<compile_context>
chip_gen: v7x
topology: tpu7x:2x2x1
jax: 0.10.0
libtpu: 0.0.40
codegen_flags: <defaults>
</compile_context>

<pallas_src>
import jax
import jax.numpy as jnp
from jax import lax
from jax.experimental import pallas as pl
from jax.experimental.pallas import tpu as pltpu

NUM_FEATURES = 1536   # efficientnet_b3 classifier.in_features
HIDDEN = 256
NUM_CLASSES = 4
OUT_PAD = 128         # lane-dense padded output width (sliced back to 4 outside)
BN_EPS = 1e-5
BATCH_TILE = 32       # upper bound on per-grid-step batch tile


def burn_head_kernel(feat_ref, w1_ref, b1_ref, w2_ref, b2_ref, out_ref):
    # feat_ref: (TB, S, C) NHWC-flattened bf16 feature tile; C=1536 is lane-dense.
    # (Padded tail rows of a partial last batch tile produce garbage rows that
    # are clipped on write — rows are independent, never read back.)
    tb, s, c = feat_ref.shape

    # backbone.global_pool: spatial mean -> (TB, C), f32 accumulation.
    # Chunk over the (sublane) spatial axis so we never materialize a full f32
    # copy of the bf16 tile.
    if s % 16 == 0 and s > 16:
        chunk = 16
    elif s % 8 == 0 and s > 8:
        chunk = 8
    else:
        chunk = s

    if chunk == s:
        pooled = jnp.sum(feat_ref[...].astype(jnp.float32), axis=-2)
    else:
        def body(i, acc):
            start = pl.multiple_of(i * chunk, chunk)
            blk = feat_ref[:, pl.ds(start, chunk), :].astype(jnp.float32)
            return acc + jnp.sum(blk, axis=-2)
        pooled = lax.fori_loop(0, s // chunk, body,
                               jnp.zeros((tb, c), jnp.float32), unroll=True)
    pooled = pooled * (1.0 / s)

    # Dropout(0.3) -> identity at inference.
    # fc1 on the MXU in native bf16 (single pass), f32 accumulation.
    h = jnp.dot(pooled.astype(jnp.bfloat16), w1_ref[...],
                preferred_element_type=jnp.float32) + b1_ref[...]
    h = jnp.maximum(h, 0.0)                                   # ReLU
    # BatchNorm1d(256) (eval mode) pre-folded into w2/b2.
    # Dropout(0.2) -> identity at inference.  Columns >= NUM_CLASSES are zero.
    out_ref[...] = (jnp.dot(h, w2_ref[...],
                            preferred_element_type=jnp.float32)
                    + b2_ref[...]).astype(out_ref.dtype)


def fold_bn_into_linear(params):
    """Fold eval-mode BatchNorm1d into the second Linear (done once, outside)."""
    w1, b1, gamma, beta, mean, var, w2, b2 = params
    scale = gamma * jax.lax.rsqrt(var + BN_EPS)              # (1, HIDDEN)
    w2f = scale.reshape(HIDDEN, 1) * w2                      # (HIDDEN, NUM_CLASSES)
    b2f = b2 + (beta - mean * scale) @ w2                    # (1, NUM_CLASSES)
    return w1, b1, w2f, b2f


def _round_up(x, m):
    return ((x + m - 1) // m) * m


def burn_classifier_forward(feat_nhwc, params, *, batch_tile=BATCH_TILE):
    """feat_nhwc: backbone final feature map in NHWC, (B, H, W, 1536).

    NHWC keeps the channel axis lane-dense (1536 = 12*128); pooling reduces
    over the sublane (spatial) axis with plain VPU adds.
    """
    b, h, w, c = feat_nhwc.shape
    assert c == NUM_FEATURES
    s = h * w
    feat = feat_nhwc.reshape(b, s, c)                        # contiguous, free

    w1, b1, w2f, b2f = fold_bn_into_linear(params)
    # fc1 weights in bf16: single-pass MXU matmul, half the DMA / VMEM.
    w1b = w1.astype(jnp.bfloat16)
    # fc2 weights / bias zero-padded to a lane-dense (128-wide) output slab.
    w2p = jnp.zeros((HIDDEN, OUT_PAD), jnp.float32).at[:, :NUM_CLASSES].set(w2f)
    b2p = jnp.zeros((1, OUT_PAD), jnp.float32).at[:, :NUM_CLASSES].set(b2f)

    # Batch tile: as large as possible (amortize per-step overhead, fill MXU
    # rows) while keeping grid >= ~4 so v7x's two TensorCores stay busy and
    # the double-buffered DMA pipeline has steps to overlap.
    if b <= 8:
        tb = b
    else:
        tb = min(batch_tile, max(8, _round_up(pl.cdiv(b, 4), 8)))
        tb = min(tb, b)
    grid = (pl.cdiv(b, tb),)

    # Explicit VMEM budget, re-derived for this tile (v7x has only 64 MiB).
    feat_block_bytes = tb * s * c * feat.dtype.itemsize
    weight_bytes = (w1b.size * w1b.dtype.itemsize + b1.size * 4
                    + w2p.size * 4 + b2p.size * 4)
    out_block_bytes = tb * OUT_PAD * 4
    need = 2 * feat_block_bytes + 2 * weight_bytes + 2 * out_block_bytes
    vmem_limit = int(min(max(need + (8 << 20), 32 << 20), 56 << 20))

    cost = pl.CostEstimate(
        flops=int(b * c * s                      # pooling adds
                  + 2 * b * c * HIDDEN           # fc1
                  + 2 * b * HIDDEN * OUT_PAD),   # fc2 (padded)
        transcendentals=0,
        bytes_accessed=int(feat.size * feat.dtype.itemsize + weight_bytes
                           + b * OUT_PAD * 4),
    )

    out_padded = pl.pallas_call(
        burn_head_kernel,
        out_shape=jax.ShapeDtypeStruct((b, OUT_PAD), jnp.float32),
        grid=grid,
        in_specs=[
            # Batch-tiled feature map: double-buffered DMA pipeline over batch.
            pl.BlockSpec((tb, s, c), lambda i: (i, 0, 0)),
            # Small weights/biases: constant block index -> VMEM-resident.
            pl.BlockSpec((NUM_FEATURES, HIDDEN), lambda i: (0, 0)),
            pl.BlockSpec((1, HIDDEN), lambda i: (0, 0)),
            pl.BlockSpec((HIDDEN, OUT_PAD), lambda i: (0, 0)),
            pl.BlockSpec((1, OUT_PAD), lambda i: (0, 0)),
        ],
        out_specs=pl.BlockSpec((tb, OUT_PAD), lambda i: (i, 0)),
        compiler_params=pltpu.CompilerParams(
            dimension_semantics=("parallel",),   # shards grid across v7x's 2 TCs
            vmem_limit_bytes=vmem_limit),
        cost_estimate=cost,
    )(feat, w1b, b1, w2p, b2p)
    return out_padded[:, :NUM_CLASSES]


def init_params(key):
    k1, k2, k3, k4, k5, k6 = jax.random.split(key, 6)
    # nn.Linear-style uniform(-1/sqrt(fan_in), 1/sqrt(fan_in)) init, weights (in, out).
    lim1 = 1.0 / jnp.sqrt(NUM_FEATURES)
    w1 = jax.random.uniform(k1, (NUM_FEATURES, HIDDEN), jnp.float32, -lim1, lim1)
    b1 = jax.random.uniform(k2, (1, HIDDEN), jnp.float32, -lim1, lim1)
    lim2 = 1.0 / jnp.sqrt(HIDDEN)
    w2 = jax.random.uniform(k3, (HIDDEN, NUM_CLASSES), jnp.float32, -lim2, lim2)
    b2 = jax.random.uniform(k4, (1, NUM_CLASSES), jnp.float32, -lim2, lim2)
    # BatchNorm1d affine params + running stats (deterministic, non-trivial).
    gamma = 1.0 + 0.1 * jax.random.normal(k5, (1, HIDDEN), jnp.float32)
    beta = 0.05 * jax.random.normal(k6, (1, HIDDEN), jnp.float32)
    mean = 0.1 * jnp.cos(jnp.arange(HIDDEN, dtype=jnp.float32)).reshape(1, HIDDEN)
    var = 1.0 + 0.05 * jnp.sin(jnp.arange(HIDDEN, dtype=jnp.float32)).reshape(1, HIDDEN)
    return (w1, b1, gamma, beta, mean, var, w2, b2)


def reference_forward(feat_nhwc, params):
    """Pure-JAX reference of the unfolded head (pool -> fc1 -> relu -> BN -> fc2)."""
    w1, b1, gamma, beta, mean, var, w2, b2 = params
    pooled = jnp.mean(feat_nhwc.astype(jnp.float32), axis=(1, 2))   # (B, C)
    h = pooled @ w1 + b1
    h = jnp.maximum(h, 0.0)
    h = (h - mean) / jnp.sqrt(var + BN_EPS) * gamma + beta
    return h @ w2 + b2


if __name__ == "__main__":
    key = jax.random.PRNGKey(0)
    k_feat, k_params = jax.random.split(key)

    # Backbone final feature map in NHWC, bf16 (halves HBM traffic), small
    # spatial size for the demo; batch 32 with TB=8 exercises a 4-step pipeline
    # that also splits across v7x's two TensorCores.
    B, H, W = 32, 8, 8
    feat_nhwc = jax.random.normal(
        k_feat, (B, H, W, NUM_FEATURES), jnp.float32).astype(jnp.bfloat16)
    params = init_params(k_params)

    out = burn_classifier_forward(feat_nhwc, params)
    out = jax.block_until_ready(out)

    ref = reference_forward(feat_nhwc, params)
    assert out.shape == (B, NUM_CLASSES)
    # Tolerance loosened slightly vs pure-f32 reference for the bf16 fc1 path.
    assert jnp.allclose(out, ref, atol=5e-3, rtol=5e-3), "mismatch vs JAX reference"

    print("KERNEL_OK")
</pallas_src>

<mosaic_0001>
module attributes {stable_mosaic.version = 11 : i64} {
  func.func @burn_head_kernel(%arg0: i32, %arg1: memref<8x64x1536xbf16, #tpu.memory_space<vmem>>, %arg2: memref<1536x256xbf16, #tpu.memory_space<vmem>>, %arg3: memref<1x256xf32, #tpu.memory_space<vmem>>, %arg4: memref<256x128xf32, #tpu.memory_space<vmem>>, %arg5: memref<1x128xf32, #tpu.memory_space<vmem>>, %arg6: memref<8x128xf32, #tpu.memory_space<vmem>>) attributes {dimension_semantics = [#tpu.dimension_semantics<parallel>], iteration_bounds = array<i64: 4>, scalar_prefetch = 0 : i64, scratch_operands = 0 : i64, tpu.core_type = #tpu.core_type<tc>, window_params = [{transform_indices = @transform_0, window_bounds = array<i64: 8, 64, 1536>}, {pipeline_mode = #tpu.pipeline_mode<synchronous>, transform_indices = @transform_1, window_bounds = array<i64: 1536, 256>}, {pipeline_mode = #tpu.pipeline_mode<synchronous>, transform_indices = @transform_2, window_bounds = array<i64: 1, 256>}, {pipeline_mode = #tpu.pipeline_mode<synchronous>, transform_indices = @transform_3, window_bounds = array<i64: 256, 128>}, {pipeline_mode = #tpu.pipeline_mode<synchronous>, transform_indices = @transform_4, window_bounds = array<i64: 1, 128>}, {transform_indices = @transform_5, window_bounds = array<i64: 8, 128>}]} {
    %cst = arith.constant 0.000000e+00 : f32
    %0 = vector.broadcast %cst : f32 to vector<8x1536xf32>
    %c0_i32 = arith.constant 0 : i32
    %c16_i32 = arith.constant 16 : i32
    %1 = arith.muli %c0_i32, %c16_i32 : i32
    %2 = tpu.assume_multiple %1, 16 : i32
    %c0 = arith.constant 0 : index
    %3 = arith.index_cast %2 : i32 to index
    %c0_0 = arith.constant 0 : index
    %4 = vector.load %arg1[%c0, %3, %c0_0] : memref<8x64x1536xbf16, #tpu.memory_space<vmem>>, vector<8x16x1536xbf16>
    %5 = arith.extf %4 : vector<8x16x1536xbf16> to vector<8x16x1536xf32>
    %cst_1 = arith.constant dense<0.000000e+00> : vector<8x1536xf32>
    %6 = vector.multi_reduction <add>, %5, %cst_1 [1] : vector<8x16x1536xf32> to vector<8x1536xf32>
    %7 = arith.addf %0, %6 : vector<8x1536xf32>
    %c1_i32 = arith.constant 1 : i32
    %c16_i32_2 = arith.constant 16 : i32
    %8 = arith.muli %c1_i32, %c16_i32_2 : i32
    %9 = tpu.assume_multiple %8, 16 : i32
    %c0_3 = arith.constant 0 : index
    %10 = arith.index_cast %9 : i32 to index
    %c0_4 = arith.constant 0 : index
    %11 = vector.load %arg1[%c0_3, %10, %c0_4] : memref<8x64x1536xbf16, #tpu.memory_space<vmem>>, vector<8x16x1536xbf16>
    %12 = arith.extf %11 : vector<8x16x1536xbf16> to vector<8x16x1536xf32>
    %cst_5 = arith.constant dense<0.000000e+00> : vector<8x1536xf32>
    %13 = vector.multi_reduction <add>, %12, %cst_5 [1] : vector<8x16x1536xf32> to vector<8x1536xf32>
    %14 = arith.addf %7, %13 : vector<8x1536xf32>
    %c2_i32 = arith.constant 2 : i32
    %c16_i32_6 = arith.constant 16 : i32
    %15 = arith.muli %c2_i32, %c16_i32_6 : i32
    %16 = tpu.assume_multiple %15, 16 : i32
    %c0_7 = arith.constant 0 : index
    %17 = arith.index_cast %16 : i32 to index
    %c0_8 = arith.constant 0 : index
    %18 = vector.load %arg1[%c0_7, %17, %c0_8] : memref<8x64x1536xbf16, #tpu.memory_space<vmem>>, vector<8x16x1536xbf16>
    %19 = arith.extf %18 : vector<8x16x1536xbf16> to vector<8x16x1536xf32>
    %cst_9 = arith.constant dense<0.000000e+00> : vector<8x1536xf32>
    %20 = vector.multi_reduction <add>, %19, %cst_9 [1] : vector<8x16x1536xf32> to vector<8x1536xf32>
    %21 = arith.addf %14, %20 : vector<8x1536xf32>
    %c3_i32 = arith.constant 3 : i32
    %c16_i32_10 = arith.constant 16 : i32
    %22 = arith.muli %c3_i32, %c16_i32_10 : i32
    %23 = tpu.assume_multiple %22, 16 : i32
    %c0_11 = arith.constant 0 : index
    %24 = arith.index_cast %23 : i32 to index
    %c0_12 = arith.constant 0 : index
    %25 = vector.load %arg1[%c0_11, %24, %c0_12] : memref<8x64x1536xbf16, #tpu.memory_space<vmem>>, vector<8x16x1536xbf16>
    %26 = arith.extf %25 : vector<8x16x1536xbf16> to vector<8x16x1536xf32>
    %cst_13 = arith.constant dense<0.000000e+00> : vector<8x1536xf32>
    %27 = vector.multi_reduction <add>, %26, %cst_13 [1] : vector<8x16x1536xf32> to vector<8x1536xf32>
    %28 = arith.addf %21, %27 : vector<8x1536xf32>
    %c4_i32 = arith.constant 4 : i32
    %cst_14 = arith.constant 1.562500e-02 : f32
    %29 = vector.broadcast %cst_14 : f32 to vector<8x1536xf32>
    %30 = arith.mulf %28, %29 : vector<8x1536xf32>
    %31 = arith.truncf %30 : vector<8x1536xf32> to vector<8x1536xbf16>
    %c0_15 = arith.constant 0 : index
    %c0_16 = arith.constant 0 : index
    %32 = vector.load %arg2[%c0_15, %c0_16] : memref<1536x256xbf16, #tpu.memory_space<vmem>>, vector<1536x256xbf16>
    %cst_17 = arith.constant dense<0.000000e+00> : vector<8x256xf32>
    %33 = tpu.matmul %31, %32, %cst_17 {dimension_numbers = #tpu.dot_dimension_numbers<[1], [0], [0], [1], [0, 0, 1, 1], [], []>} : vector<8x1536xbf16>, vector<1536x256xbf16>, vector<8x256xf32> -> vector<8x256xf32>
    %c0_18 = arith.constant 0 : index
    %c0_19 = arith.constant 0 : index
    %34 = vector.load %arg3[%c0_18, %c0_19] : memref<1x256xf32, #tpu.memory_space<vmem>>, vector<1x256xf32>
    %35 = vector.broadcast %34 : vector<1x256xf32> to vector<8x256xf32>
    %36 = arith.addf %33, %35 : vector<8x256xf32>
    %cst_20 = arith.constant 0.000000e+00 : f32
    %37 = vector.broadcast %cst_20 : f32 to vector<8x256xf32>
    %38 = arith.maximumf %36, %37 : vector<8x256xf32>
    %c0_21 = arith.constant 0 : index
    %c0_22 = arith.constant 0 : index
    %39 = vector.load %arg4[%c0_21, %c0_22] : memref<256x128xf32, #tpu.memory_space<vmem>>, vector<256x128xf32>
    %cst_23 = arith.constant dense<0.000000e+00> : vector<8x128xf32>
    %40 = tpu.matmul %38, %39, %cst_23 {dimension_numbers = #tpu.dot_dimension_numbers<[1], [0], [0], [1], [0, 0, 1, 1], [], []>} : vector<8x256xf32>, vector<256x128xf32>, vector<8x128xf32> -> vector<8x128xf32>
    %c0_24 = arith.constant 0 : index
    %c0_25 = arith.constant 0 : index
    %41 = vector.load %arg5[%c0_24, %c0_25] : memref<1x128xf32, #tpu.memory_space<vmem>>, vector<1x128xf32>
    %42 = vector.broadcast %41 : vector<1x128xf32> to vector<8x128xf32>
    %43 = arith.addf %40, %42 : vector<8x128xf32>
    %c0_26 = arith.constant 0 : index
    %c0_27 = arith.constant 0 : index
    %44 = vector.load %arg6[%c0_26, %c0_27] : memref<8x128xf32, #tpu.memory_space<vmem>>, vector<8x128xf32>
    tpu.vector_store %arg6[%c0_26, %c0_27], %43 {strides = array<i32>} : memref<8x128xf32, #tpu.memory_space<vmem>>, vector<8x128xf32>,
    return
  }
  func.func @transform_0(%arg0: i32) -> (i32, i32, i32) {
    %c0_i32 = arith.constant 0 : i32
    %c0_i32_0 = arith.constant 0 : i32
    %c0_i32_1 = arith.constant 0 : i32
    return %arg0, %c0_i32, %c0_i32_0 : i32, i32, i32
  }
  func.func @transform_1(%arg0: i32) -> (i32, i32) {
    %c0_i32 = arith.constant 0 : i32
    %c0_i32_0 = arith.constant 0 : i32
    %c0_i32_1 = arith.constant 0 : i32
    return %c0_i32, %c0_i32_0 : i32, i32
  }
  func.func @transform_2(%arg0: i32) -> (i32, i32) {
    %c0_i32 = arith.constant 0 : i32
    %c0_i32_0 = arith.constant 0 : i32
    %c0_i32_1 = arith.constant 0 : i32
    return %c0_i32, %c0_i32_0 : i32, i32
  }
  func.func @transform_3(%arg0: i32) -> (i32, i32) {
    %c0_i32 = arith.constant 0 : i32
    %c0_i32_0 = arith.constant 0 : i32
    %c0_i32_1 = arith.constant 0 : i32
    return %c0_i32, %c0_i32_0 : i32, i32
  }
  func.func @transform_4(%arg0: i32) -> (i32, i32) {
    %c0_i32 = arith.constant 0 : i32
    %c0_i32_0 = arith.constant 0 : i32
    %c0_i32_1 = arith.constant 0 : i32
    return %c0_i32, %c0_i32_0 : i32, i32
  }
  func.func @transform_5(%arg0: i32) -> (i32, i32) {
    %c0_i32 = arith.constant 0 : i32
    %c0_i32_0 = arith.constant 0 : i32
    return %arg0, %c0_i32 : i32, i32
  }
}

</mosaic_0001>

<bundles_post_ra>
// kernel: tpu_custom_call.1
= control target key start
LH: loop header
LB: loop body
LE: loop exit
PB: predicated region body
PF: predicated region fallthrough
CT: control target
= control target key end

     0   :  { %10 = vsyncpa [#allocation3], 0  ;;  %s11825_s0 = inlined_call_operand.hbm [shape: bf16[32,64,1536], index: 0, kind: input, shape index: {}]   ;;  %s11826_s1 = inlined_call_operand.hbm [shape: bf16[1536,256], index: 1, kind: input, shape index: {}]   ;;  %s11827_s2 = inlined_call_operand.hbm [shape: f32[1,256], index: 2, kind: input, shape index: {}]   ;;  %s11828_s3 = inlined_call_operand.hbm [shape: f32[256,128], index: 3, kind: input, shape index: {}]   ;;  %s11829_s4 = inlined_call_operand.hbm [shape: f32[1,128], index: 4, kind: input, shape index: {}]   ;;  %s11830_s5 = inlined_call_operand.hbm [shape: f32[32,128], index: 5, kind: output, shape index: {}]  }
   0x1   :  { %12 = vsyncpa [#allocation3 + $0x1], 0 }
   0x2   :  { %13 = vsyncpa [#allocation6], 0 }
   0x3   :  { %14 = vsyncpa [#allocation9], 0 }
   0x4   :  { %15 = vsyncpa [#allocation4], 0 }
   0x5   :  { %17 = vsyncpa [#allocation4 + $0x1], 0  ;;  %s7909_s18 = smov 0   ;;  %s7911_s19 = smov 0  }
   0x6   :  { %s7913_s20 = smov 0   ;;  %s7915_s21 = smov 0  }
   0x7 LB: > { %s7930_s22 = sadd.s32 4294967295, %s7867_s21   ;;  %s6681_s23 = sadd.s32 4294967294, %s7867_s21   ;;  %s7867_s21 = sphi %s7915_s21, %s13208_s21   ;;  %s7863_s20 = sphi %s7913_s20, %s13207_s20   ;;  %s7859_s19 = sphi %s7911_s19, %s13206_s19   ;;  %s7855_s18 = sphi %s7909_s18, %s13205_s18  }
   0x8   : > { %p43_p0 = scmp.ne.s32.totalorder %s7859_s19, %s7855_s18  ;;  %p11831_p1 = scmp.eq.s32.totalorder %s7930_s22, 0 }
   0x9   : > { %p157_p3 = scmp.eq.s32.totalorder %s6681_s23, 3  ;;  %p6682_p5 = scmp.ge.s32.totalorder %s7867_s21, 1 }
   0xa   : > { %p7939_p4 = por %p11831_p1, %p43_p0  ;;  %p164_p7 = scmp.lt.s32.totalorder %s7867_s21, 5 }
   0xb   : > { %p7944_p6 = por %p157_p3, %p43_p0  ;;  %s7869_s27 = smov [#allocation5]  }
   0xc   : > { %s12158_s24 = scalar_select %p7939_p4, 1, 0 }
   0xd   : > { %s12159_s25 = scalar_select %p7944_p6, 1, 0 }
   0xe   : > { %p7949_p8 = pnand %p6682_p5, %p164_p7  ;;  %s176_s28 = sshll.u32 %s7869_s27, 4  ;;  %s7953_s28 = int_to_ptr.vmem [resolvable:$true] %s176_s28 }
   0xf   : > { %s7870_s30 = smov [#allocation8]   ;;  %s7871_s7 = smov [#allocation7]  }
  0x10   : > { %s12160_s26 = scalar_select %p7949_p8, 1, 0 }
  0x11   : > { %p7292_p9 = pneg %p7949_p8  ;;  %s200_s6 = sshll.u32 %s7870_s30, 4  ;;  %s7963_s6 = int_to_ptr.vmem [resolvable:$true] %s200_s6 }
  0x12   : > { %s7965_s8 = sshll.u32 %s7871_s7, 4  ;;  %s7651_s11 = scalar_lea.hbm %s11826_s1, 24576  ;;  %s191_s8 = int_to_ptr.vmem [resolvable:$true] %s7965_s8 }
  0x13   : > { %p7959_p10 = pnand %p7292_p9, %p11831_p1  ;;  %p7652_p11 = scmp.ne.s32.totalorder %s11826_s1, %s7651_s11 }
  0x14   : > { %p7658_p3 = scmp.lt.u32.totalorder %s7651_s11, %s11826_s1 }
  0x15   : > { %p7975_p12 = pneg %p7959_p10 }
  0x17   : > { %p7654_p13 = pnand %p7975_p12, %p7652_p11 }
  0x19   : > { %p7655_p0 = pneg %p7654_p13 }
  0x1b   : > { %p7660_p5 = pnand %p7658_p3, %p7655_p0 }
  0x1d   : > { %7663 = shalt.err (!%p7660_p5)
}
  0x1e   : > { %s7664_s17 = scalar_lea.vmem %s7953_s28, 24576  ;;  %p7672_p2 = scmp.lt.s32.totalorder %s7953_s28, %s7953_s28 }
  0x1f   : > { %p7665_p7 = scmp.ne.s32.totalorder %s7953_s28, %s7664_s17  ;;  %p7673_p6 = scmp.lt.s32.totalorder %s7664_s17, %s7664_s17 }
  0x21   : > { %p7667_p9 = pnand %p7665_p7, %p7975_p12  ;;  %p7674_p11 = por %p7673_p6, %p7672_p2 }
  0x23   : > { %p7668_p1 = pneg %p7667_p9 }
  0x25   : > { %p7675_p13 = pnand %p7674_p11, %p7668_p1 }
  0x27   : > { %7678 = shalt.err (!%p7675_p13)
}
  0x28   : > { %s7872_s23 = smov 128   ;;  %s7873_s27 = smov 8  }
  0x29   : > { %7295 = dma.hbm_to_vmem [thread:$0]  (!%p7959_p10), %s11826_s1, 24576, %s7953_s28, [#allocation6], %s7872_s23, %s7872_s23, %s7873_s27  }
  0x2a   : > { %s7679_s11 = scalar_lea.hbm %s11828_s3, 4096 }
  0x2b   : > { %p7680_p2 = scmp.ne.s32.totalorder %s11828_s3, %s7679_s11  ;;  %p7686_p0 = scmp.lt.u32.totalorder %s7679_s11, %s11828_s3 }
  0x2d   : > { %p7682_p1 = pnand %p7680_p2, %p7975_p12 }
  0x2f   : > { %p7683_p6 = pneg %p7682_p1 }
  0x31   : > { %p7688_p3 = pnand %p7686_p0, %p7683_p6 }
  0x33   : > { %7691 = shalt.err (!%p7688_p3)
}
  0x34   : > { %s7692_s28 = scalar_lea.vmem %s7963_s6, 4096  ;;  %p7700_p11 = scmp.lt.s32.totalorder %s7963_s6, %s7963_s6 }
  0x35   : > { %p7693_p5 = scmp.ne.s32.totalorder %s7963_s6, %s7692_s28  ;;  %p7701_p13 = scmp.lt.s32.totalorder %s7692_s28, %s7692_s28 }
  0x37   : > { %p7695_p7 = pnand %p7693_p5, %p7975_p12  ;;  %p7702_p2 = por %p7701_p13, %p7700_p11 }
  0x39   : > { %p7696_p9 = pneg %p7695_p7 }
  0x3b   : > { %p7703_p1 = pnand %p7702_p2, %p7696_p9 }
  0x3d   : > { %7706 = shalt.err (!%p7703_p1)
}
  0x3e   : > { %7301 = dma.hbm_to_vmem [thread:$0]  (!%p7959_p10), %s11828_s3, 4096, %s7963_s6, [#allocation9], %s7872_s23, %s7872_s23, %s7873_s27  }
  0x3f   : > { %s7707_s10 = scalar_lea.hbm %s11827_s2, 32 }
  0x40   : > { %p7708_p6 = scmp.ne.s32.totalorder %s11827_s2, %s7707_s10  ;;  %p7714_p5 = scmp.lt.u32.totalorder %s7707_s10, %s11827_s2 }
  0x42   : > { %p7710_p0 = pnand %p7708_p6, %p7975_p12 }
  0x44   : > { %p7711_p3 = pneg %p7710_p0 }
  0x46   : > { %p7716_p7 = pnand %p7714_p5, %p7711_p3 }
  0x48   : > { %7719 = shalt.err (!%p7716_p7)
}
  0x49   : > { %s7720_s16 = scalar_lea.vmem %s191_s8, 32  ;;  %p7728_p2 = scmp.lt.s32.totalorder %s191_s8, %s191_s8 }
  0x4a   : > { %p7721_p9 = scmp.ne.s32.totalorder %s191_s8, %s7720_s16  ;;  %p7729_p1 = scmp.lt.s32.totalorder %s7720_s16, %s7720_s16 }
  0x4c   : > { %p7723_p11 = pnand %p7721_p9, %p7975_p12  ;;  %p7730_p4 = por %p7729_p1, %p7728_p2 }
  0x4e   : > { %p7724_p13 = pneg %p7723_p11 }
  0x50   : > { %p7731_p8 = pnand %p7730_p4, %p7724_p13 }
  0x52   : > { %7734 = shalt.err (!%p7731_p8)
}
  0x53   : > { %7298 = dma.hbm_to_vmem [thread:$0]  (!%p7959_p10), %s11827_s2, 32, %s191_s8, [#allocation6]  }
  0x54   : > { %s7874_s27 = smov [#allocation10]   ;;  %s7735_s7 = scalar_lea.hbm %s11829_s4, 16 }
  0x55   : > { %s214_s28 = sshll.u32 %s7874_s27, 4  ;;  %p7736_p6 = scmp.ne.s32.totalorder %s11829_s4, %s7735_s7  ;;  %s215_s28 = int_to_ptr.vmem [resolvable:$true] %s214_s28 }
  0x56   : > { %p7742_p0 = scmp.lt.u32.totalorder %s7735_s7, %s11829_s4 }
  0x57   : > { %p7738_p4 = pnand %p7736_p6, %p7975_p12 }
  0x59   : > { %p7739_p8 = pneg %p7738_p4 }
  0x5b   : > { %p7744_p3 = pnand %p7742_p0, %p7739_p8 }
  0x5d   : > { %7747 = shalt.err (!%p7744_p3)
}
  0x5e   : > { %s7748_s8 = scalar_lea.vmem %s215_s28, 16  ;;  %s7755_s13 = scalar_lea.vmem %s215_s28, 32 }
  0x5f   : > { %p7749_p5 = scmp.ne.s32.totalorder %s215_s28, %s7748_s8  ;;  %p7756_p11 = scmp.lt.s32.totalorder %s215_s28, %s215_s28 }
  0x60   : > { %p7757_p13 = scmp.lt.s32.totalorder %s7755_s13, %s7748_s8 }
  0x61   : > { %p7751_p7 = pnand %p7749_p5, %p7975_p12 }
  0x62   : > { %p7758_p2 = por %p7757_p13, %p7756_p11 }
  0x63   : > { %p7752_p9 = pneg %p7751_p7 }
  0x65   : > { %p7759_p1 = pnand %p7758_p2, %p7752_p9 }
  0x67   : > { %7762 = shalt.err (!%p7759_p1)
}
  0x68   : > { %7304 = dma.hbm_to_vmem [thread:$0]  (!%p7959_p10), %s11829_s4, 16, %s215_s28, [#allocation9]  }
  0x69   : > { %s8057_s14 = sadd.s32 1, %s7867_s21   ;;  %s30_s6 = sadd.s32 1, %s7863_s20 }
  0x6a   : > { %s27_s29 = ssub.s32 %s7867_s21, %s8057_s14  ;;  %p37_p12 = scmp.ne.s32.totalorder %s7863_s20, %s7859_s19 }
  0x6b   : > { %p28_p6 = scmp.eq.s32.totalorder %s27_s29, 0  ;;  %p38_p4 = scmp.eq.s32.totalorder %s7867_s21, 0 }
  0x6c   : > { %p12163_p8 = scmp.eq.s32.totalorder %s7930_s22, 3  ;;  %p7317_p3 = scmp.lt.s32.totalorder %s7867_s21, 4 }
  0x6d   : > { %s8073_s27 = scalar_select %p28_p6, %s7863_s20, %s30_s6  }
  0x6e   : > { %p8067_p0 = por %p12163_p8, %p37_p12  ;;  %p39_p5 = por %p38_p4, %p37_p12 }
  0x6f   : > { %s225_s17 = sand.u32 1, %s7863_s20   ;;  %s7270_s28 = smul.u32 49152, %s7867_s21 }
  0x70   : > { %s7269_s30 = smul.u32 3072, %s225_s17  ;;  %p8077_p10 = pnand %p7317_p3, %p39_p5 }
  0x71   : > { %s8084_s11 = scalar_lea.hbm %s11825_s0, %s7270_s28  ;;  %s8088_s13 = scalar_lea.sflag [#allocation3], %s225_s17 }
  0x72   : > { %s229_s12 = scalar_lea.vmem [#allocation2], %s7269_s30  ;;  %s7763_s15 = scalar_lea.hbm %s8084_s11, 49152 }
  0x73   : > { %s237_s8 = sshll.u32 %s229_s12, 4  ;;  %p7764_p7 = scmp.ne.s32.totalorder %s8084_s11, %s7763_s15  ;;  %s8086_s8 = int_to_ptr.vmem [resolvable:$true] %s237_s8 }
  0x74   : > { %p7765_p9 = pneg %p8077_p10  ;;  %s7768_s29 = scalar_lea.hbm %s11825_s0, 196608 }
  0x75   : > { %p7769_p2 = scmp.lt.u32.totalorder %s8084_s11, %s11825_s0  ;;  %p7770_p1 = scmp.lt.u32.totalorder %s7768_s29, %s7763_s15 }
  0x76   : > { %p7766_p11 = pnand %p7765_p9, %p7764_p7  ;;  %p7772_p6 = scmp.lt.u32.totalorder %s7763_s15, %s8084_s11 }
  0x77   : > { %p7771_p12 = por %p7770_p1, %p7769_p2 }
  0x78   : > { %p7767_p13 = pneg %p7766_p11 }
  0x79   : > { %p7773_p4 = por %p7772_p6, %p7771_p12 }
  0x7b   : > { %p7774_p8 = pnand %p7773_p4, %p7767_p13 }
  0x7d   : > { %7777 = shalt.err (!%p7774_p8)
}
  0x7e   : > { %s7778_s17 = scalar_lea.vmem %s8086_s8, 49152  ;;  %s7875_s30 = smov [#allocation2]  }
  0x7f   : > { %p7779_p3 = scmp.ne.s32.totalorder %s8086_s8, %s7778_s17  ;;  %s7783_s10 = sshll.u32 %s7875_s30, 4  ;;  %s7784_s10 = int_to_ptr.vmem [resolvable:$false] %s7783_s10 }
  0x80   : > { %s7785_s12 = scalar_lea.vmem %s7784_s10, 98304  ;;  %p7786_p11 = scmp.lt.s32.totalorder %s8086_s8, %s7784_s10 }
  0x81   : > { %p7781_p5 = pnand %p7779_p3, %p7765_p9  ;;  %p7787_p2 = scmp.lt.s32.totalorder %s7785_s12, %s7778_s17 }
  0x83   : > { %p7782_p7 = pneg %p7781_p5  ;;  %p7788_p1 = por %p7787_p2, %p7786_p11 }
  0x85   : > { %p7789_p12 = pnand %p7788_p1, %p7782_p7 }
  0x87   : > { %7792 = shalt.err (!%p7789_p12)
}
  0x88   : > { %s7876_s15 = smov 768   ;;  %s7877_s16 = smov 48  }
  0x89   : > { %7308 = dma.hbm_to_vmem [thread:$0]  (!%p8077_p10), %s8084_s11, 49152, %s8086_s8, %s8088_s13, %s7876_s15, %s7876_s15, %s7877_s16  }
  0x8a   : > { %p12166_p9 = scmp.ne.s32.totalorder %s12160_s26, 0 }
  0x8c   : > { %249 = sbr.rel (%p12166_p9) target bundleno = 1706 (0x6aa), region = 40 }
  0x93   : > { %s8119_s6 = sand.u32 1, %s7859_s19   ;;  %p12167_p13 = scmp.ne.s32.totalorder %s12158_s24, 0 }
  0x94   : > { %s7271_s29 = smul.u32 3072, %s8119_s6  ;;  %s252_s28 = scalar_lea.sflag [#allocation3], %s8119_s6 }
  0x96   : > { %s8123_s9 = scalar_lea.vmem [#allocation2], %s7271_s29 }
  0x97   : > { %7838 = dma.done.wait (%p12167_p13), %s252_s28, 49152  }
  0x98   : > { %7840 = vsyncadd (%p12167_p13), %s252_s28, 4294918144  ;;  %p12168_p10 = scmp.eq.s32.totalorder %s7930_s22, 0 }
  0x9a   : > { %7842 = dma.done.wait (%p12168_p10), [#allocation6], 24608   ;;  %p12169_p6 = pmov %p12168_p10 }
  0x9c   : > { %7844 = vsyncadd (%p12169_p6), [#allocation6], 4294942688  ;;  %p12170_p4 = pmov %p12169_p6 }
  0x9e   : > { %7846 = dma.done.wait (%p12170_p4), [#allocation9], 4112   ;;  %p12171_p8 = pmov %p12170_p4 }
  0x9f   : > { %v7363_v0 = vld [vmem:[#allocation5 + $0x4] ss:$8 sps:$4 sm:$0xff]   ;;  %v7367_v2 = vld [vmem:[#allocation5] ss:$8 sps:$4 sm:$0xff]   ;;  %v7369_v4 = vld [vmem:[#allocation5 + $0x14] ss:$8 sps:$4 sm:$0xff]  }
  0xa0   : > { %7848 = vsyncadd (%p12171_p8), [#allocation9], 4294963184  ;;  %v7365_v1 = vld [vmem:[#allocation5 + $0x304] ss:$8 sps:$4 sm:$0xff]   ;;  %6198 = vmatprep.subr.bf16.mxu1 %v7363_v0  ;;  %v7368_v3 = vld [vmem:[#allocation5 + $0x300] ss:$8 sps:$4 sm:$0xff]  }
  0xa1   : > { %6321 = vmatprep.subr.bf16.mxu0 %v7365_v1  ;;  %6199 = vmatpush1.bf16.msra.mxu1 %v7367_v2  ;;  %v7371_v5 = vld [vmem:[#allocation5 + $0x314] ss:$8 sps:$4 sm:$0xff]   ;;  %v7373_v6 = vld [vmem:[#allocation5 + $0x10] ss:$8 sps:$4 sm:$0xff]   ;;  %v7375_v8 = vld [vmem:[#allocation5 + $0x24] ss:$8 sps:$4 sm:$0xff]  }
  0xa2   : > { %6322 = vmatpush1.bf16.msra.mxu0 %v7368_v3  ;;  %6200 = vmatprep.subr.bf16.mxu1 %v7369_v4  ;;  %v7374_v7 = vld [vmem:[#allocation5 + $0x310] ss:$8 sps:$4 sm:$0xff]   ;;  %v7377_v9 = vld [vmem:[#allocation5 + $0x324] ss:$8 sps:$4 sm:$0xff]   ;;  %v7379_v10 = vld [vmem:[#allocation5 + $0x20] ss:$8 sps:$4 sm:$0xff]  }
  0xa3   : > { %6323 = vmatprep.subr.bf16.mxu0 %v7371_v5  ;;  %v7380_v11 = vld [vmem:[#allocation5 + $0x320] ss:$8 sps:$4 sm:$0xff]   ;;  %v7381_v12 = vld [vmem:[#allocation5 + $0x34] ss:$8 sps:$4 sm:$0xff]   ;;  %v7385_v14 = vld [vmem:[#allocation5 + $0x30] ss:$8 sps:$4 sm:$0xff]  }
  0xa4   : > { %v7383_v13 = vld [vmem:[#allocation5 + $0x334] ss:$8 sps:$4 sm:$0xff]   ;;  %v7386_v15 = vld [vmem:[#allocation5 + $0x330] ss:$8 sps:$4 sm:$0xff]   ;;  %v7387_v16 = vld [vmem:[#allocation5 + $0x44] ss:$8 sps:$4 sm:$0xff]  }
  0xa5   : > { %6201 = vmatpush1.bf16.msra.mxu1 %v7373_v6  ;;  %v7389_v17 = vld [vmem:[#allocation5 + $0x344] ss:$8 sps:$4 sm:$0xff]   ;;  %v7391_v18 = vld [vmem:[#allocation5 + $0x40] ss:$8 sps:$4 sm:$0xff]   ;;  %v7393_v20 = vld [vmem:[#allocation5 + $0x54] ss:$8 sps:$4 sm:$0xff]  }
  0xa6   : > { %6324 = vmatpush1.bf16.msra.mxu0 %v7374_v7  ;;  %6202 = vmatprep.subr.bf16.mxu1 %v7375_v8  ;;  %v7392_v19 = vld [vmem:[#allocation5 + $0x340] ss:$8 sps:$4 sm:$0xff]   ;;  %v7395_v21 = vld [vmem:[#allocation5 + $0x354] ss:$8 sps:$4 sm:$0xff]   ;;  %v7397_v22 = vld [vmem:[#allocation5 + $0x50] ss:$8 sps:$4 sm:$0xff]  }
  0xa7   : > { %6325 = vmatprep.subr.bf16.mxu0 %v7377_v9  ;;  %v7398_v23 = vld [vmem:[#allocation5 + $0x350] ss:$8 sps:$4 sm:$0xff]   ;;  %v7399_v24 = vld [vmem:[#allocation5 + $0x64] ss:$8 sps:$4 sm:$0xff]   ;;  %v7403_v26 = vld [vmem:[#allocation5 + $0x60] ss:$8 sps:$4 sm:$0xff]  }
  0xa8   : > { %v7401_v25 = vld [vmem:[#allocation5 + $0x364] ss:$8 sps:$4 sm:$0xff]   ;;  %v7404_v27 = vld [vmem:[#allocation5 + $0x360] ss:$8 sps:$4 sm:$0xff]   ;;  %v7405_v28 = vld [vmem:[#allocation5 + $0x74] ss:$8 sps:$4 sm:$0xff]  }
  0xa9   : > { %6203 = vmatpush1.bf16.msra.mxu1 %v7379_v10  ;;  %v7407_v29 = vld [vmem:[#allocation5 + $0x374] ss:$8 sps:$4 sm:$0xff]   ;;  %v7409_v30 = vld [vmem:[#allocation5 + $0x70] ss:$8 sps:$4 sm:$0xff]   ;;  %v7411_v32 = vld [vmem:[#allocation5 + $0x84] ss:$8 sps:$4 sm:$0xff]  }
  0xaa   : > { %6326 = vmatpush1.bf16.msra.mxu0 %v7380_v11  ;;  %6204 = vmatprep.subr.bf16.mxu1 %v7381_v12  ;;  %v7410_v31 = vld [vmem:[#allocation5 + $0x370] ss:$8 sps:$4 sm:$0xff]   ;;  %v7413_v33 = vld [vmem:[#allocation5 + $0x384] ss:$8 sps:$4 sm:$0xff]   ;;  %v7415_v34 = vld [vmem:[#allocation5 + $0x80] ss:$8 sps:$4 sm:$0xff]  }
  0xab   : > { %6327 = vmatprep.subr.bf16.mxu0 %v7383_v13  ;;  %v7416_v35 = vld [vmem:[#allocation5 + $0x380] ss:$8 sps:$4 sm:$0xff]   ;;  %v7417_v36 = vld [vmem:[#allocation5 + $0x94] ss:$8 sps:$4 sm:$0xff]   ;;  %v7421_v38 = vld [vmem:[#allocation5 + $0x90] ss:$8 sps:$4 sm:$0xff]  }
  0xac   : > { %v7419_v37 = vld [vmem:[#allocation5 + $0x394] ss:$8 sps:$4 sm:$0xff]   ;;  %v7422_v39 = vld [vmem:[#allocation5 + $0x390] ss:$8 sps:$4 sm:$0xff]   ;;  %v7423_v40 = vld [vmem:[#allocation5 + $0xa4] ss:$8 sps:$4 sm:$0xff]  }
  0xad   : > { %6205 = vmatpush1.bf16.msra.mxu1 %v7385_v14  ;;  %v7425_v41 = vld [vmem:[#allocation5 + $0x3a4] ss:$8 sps:$4 sm:$0xff]   ;;  %v7427_v42 = vld [vmem:[#allocation5 + $0xa0] ss:$8 sps:$4 sm:$0xff]   ;;  %v7429_v44 = vld [vmem:[#allocation5 + $0xb4] ss:$8 sps:$4 sm:$0xff]  }
  0xae   : > { %6328 = vmatpush1.bf16.msra.mxu0 %v7386_v15  ;;  %6206 = vmatprep.subr.bf16.mxu1 %v7387_v16  ;;  %v7428_v43 = vld [vmem:[#allocation5 + $0x3a0] ss:$8 sps:$4 sm:$0xff]   ;;  %v7431_v45 = vld [vmem:[#allocation5 + $0x3b4] ss:$8 sps:$4 sm:$0xff]   ;;  %v7433_v46 = vld [vmem:[#allocation5 + $0xb0] ss:$8 sps:$4 sm:$0xff]  }
  0xaf   : > { %6329 = vmatprep.subr.bf16.mxu0 %v7389_v17  ;;  %v7434_v47 = vld [vmem:[#allocation5 + $0x3b0] ss:$8 sps:$4 sm:$0xff]   ;;  %v8138_v48 = vld [vmem:[%s8123_s9] sm:$0xff]  ;;  %vm5123_vm0 = vcmask 1041409   ;;  %vm5125_vm1 = vcmask 1042434   ;;  %vm5127_vm2 = vcmask 1043459  }
  0xb0   : > { %v7435_v49 = vld [vmem:[#allocation5 + $0xc4] ss:$8 sps:$4 sm:$0xff]   ;;  %v8141_v51 = vld [vmem:[%s8123_s9 + $0x30] sm:$0xff]  ;;  %v399_v55 = vunpack.c.h.bf16 %v8138_v48  ;;  %vm5129_vm3 = vcmask 1044484   ;;  %vm5131_vm4 = vcmask 1045509   ;;  %vm5133_vm5 = vcmask 1046534  }
  0xb1   : > { %6207 = vmatpush1.bf16.msra.mxu1 %v7391_v18  ;;  %v7437_v50 = vld [vmem:[#allocation5 + $0x3c4] ss:$8 sps:$4 sm:$0xff]   ;;  %v8147_v53 = vld [vmem:[%s8123_s9 + $0x1b0] sm:$0xff]  ;;  %v411_v60 = vunpack.c.h.bf16 %v8141_v51  ;;  %vm5135_vm6 = vcmask 1047559   ;;  %s6696_s24 = sshll.u32 %s8119_s6, 3  ;;  %s7179_s26 = sshll.u32 %s7930_s22, 7 }
  0xb2   : > { %6330 = vmatpush1.bf16.msra.mxu0 %v7392_v19  ;;  %6208 = vmatprep.subr.bf16.mxu1 %v7393_v20  ;;  %v8144_v52 = vld [vmem:[%s8123_s9 + $0x180] sm:$0xff]  ;;  %v8155_v57 = vld [vmem:[%s8123_s9 + $0x330] sm:$0xff]  ;;  %v435_v3 = vunpack.c.h.bf16 %v8147_v53  ;;  %s297_s7 = scalar_lea.vmem [#allocation11], %s6696_s24  ;;  %s11782_s17 = scalar_lea.hbm %s11830_s5, %s7179_s26 }
  0xb3   : > { %6331 = vmatprep.subr.bf16.mxu0 %v7395_v21  ;;  %v8152_v56 = vld [vmem:[%s8123_s9 + $0x300] sm:$0xff]  ;;  %v423_v62 = vunpack.c.h.bf16 %v8144_v52  ;;  %v8165_v63 = vld [vmem:[%s8123_s9 + $0x4b0] sm:$0xff]  ;;  %v459_v10 = vunpack.c.h.bf16 %v8155_v57  ;;  %s6570_s11 = sshll.u32 %s297_s7, 4  ;;  %s6557_s30 = scalar_lea.sflag [#allocation4], %s8119_s6  ;;  %s11784_s11 = int_to_ptr.vmem [resolvable:$true] %s6570_s11 }
  0xb4   : > { %v8158_v58 = vld [vmem:[%s8123_s9 + $0x480] sm:$0xff]  ;;  %v8171_v1 = vld [vmem:[%s8123_s9 + $0x630] sm:$0xff]  ;;  %v447_v5 = vunpack.c.h.bf16 %v8152_v56  ;;  %v483_v16 = vunpack.c.h.bf16 %v8165_v63  ;;  %s7793_s10 = scalar_lea.vmem %s11784_s11, 128  ;;  %s7878_s22 = smov [#allocation11]  }
  0xb5   : > { %6209 = vmatpush1.bf16.msra.mxu1 %v7397_v22  ;;  %v8168_v0 = vld [vmem:[%s8123_s9 + $0x600] sm:$0xff]  ;;  %v8181_v7 = vld [vmem:[%s8123_s9 + $0x7b0] sm:$0xff]  ;;  %v471_v12 = vunpack.c.h.bf16 %v8158_v58  ;;  %p7794_p3 = scmp.ne.s32.totalorder %s11784_s11, %s7793_s10  ;;  %s7797_s12 = sshll.u32 %s7878_s22, 4  ;;  %s7798_s12 = int_to_ptr.vmem [resolvable:$false] %s7797_s12 }
  0xb6   : > { %6332 = vmatpush1.bf16.msra.mxu0 %v7398_v23  ;;  %6210 = vmatprep.subr.bf16.mxu1 %v7399_v24  ;;  %v8178_v6 = vld [vmem:[%s8123_s9 + $0x780] sm:$0xff]  ;;  %v8191_v13 = vld [vmem:[%s8123_s9 + $0x930] sm:$0xff]  ;;  %v495_v18 = vunpack.c.h.bf16 %v8168_v0  ;;  %v507_v23 = vunpack.c.h.bf16 %v8171_v1  ;;  %s7799_s15 = scalar_lea.vmem %s7798_s12, 256  ;;  %p7800_p11 = scmp.lt.s32.totalorder %s11784_s11, %s7798_s12 }
  0xb7   : > { %6333 = vmatprep.subr.bf16.mxu0 %v7401_v25  ;;  %v8184_v8 = vld [vmem:[%s8123_s9 + $0x900] sm:$0xff]  ;;  %v8201_v21 = vld [vmem:[%s8123_s9 + $0xab0] sm:$0xff]  ;;  %v519_v25 = vunpack.c.h.bf16 %v8178_v6  ;;  %p7795_p5 = pnand %p7794_p3, %p8067_p0  ;;  %p7801_p2 = scmp.lt.s32.totalorder %s7799_s15, %s7793_s10 }
  0xb8   : > { %v8194_v14 = vld [vmem:[%s8123_s9 + $0xa80] sm:$0xff] }
  0xb9   : > { %6211 = vmatpush1.bf16.msra.mxu1 %v7403_v26  ;;  %v7439_v19 = vld [vmem:[#allocation5 + $0xc0] ss:$8 sps:$4 sm:$0xff]   ;;  %v7441_v26 = vld [vmem:[#allocation5 + $0xd4] ss:$8 sps:$4 sm:$0xff]   ;;  %p7796_p7 = pneg %p7795_p5  ;;  %p7802_p1 = por %p7801_p2, %p7800_p11 }
  0xba   : > { %6334 = vmatpush1.bf16.msra.mxu0 %v7404_v27  ;;  %6212 = vmatprep.subr.bf16.mxu1 %v7405_v28  ;;  %v7440_v20 = vld [vmem:[#allocation5 + $0x3c0] ss:$8 sps:$4 sm:$0xff]   ;;  %v7443_v27 = vld [vmem:[#allocation5 + $0x3d4] ss:$8 sps:$4 sm:$0xff]  }
  0xbb   : > { %6335 = vmatprep.subr.bf16.mxu0 %v7407_v29  ;;  %v531_v29 = vunpack.c.h.bf16 %v8181_v7  ;;  %v8297_v28 = vld [vmem:[%s8123_s9 + $0xb10] sm:$0xff]  ;;  %p7803_p12 = pnand %p7802_p1, %p7796_p7 }
  0xbc   : > { %12183 = vst [vmem:[#allocation27_spill] sm:$0xff] %v8297_v28  ;;  %v1638_v2 = vunpack.c.h.bf16 %v8297_v28 }
  0xbd   : > { %6213 = vmatpush1.bf16.msra.mxu1 %v7409_v30 }
  0xbe   : > { %6336 = vmatpush1.bf16.msra.mxu0 %v7410_v31  ;;  %6214 = vmatprep.subr.bf16.mxu1 %v7411_v32  ;;  %v543_v31 = vunpack.c.h.bf16 %v8184_v8  ;;  %v8212_v32 = vld [vmem:[%s8123_s9 + $0x60] sm:$0xff] }
  0xbf   : > { %6337 = vmatprep.subr.bf16.mxu0 %v7413_v33 }
  0xc1   : > { %6215 = vmatpush1.bf16.msra.mxu1 %v7415_v34  ;;  %v555_v34 = vunpack.c.h.bf16 %v8191_v13 }
  0xc2   : > { %6338 = vmatpush1.bf16.msra.mxu0 %v7416_v35  ;;  %6216 = vmatprep.subr.bf16.mxu1 %v7417_v36  ;;  %v567_v36 = vunpack.c.h.bf16 %v8194_v14 }
  0xc3   : > { %6339 = vmatprep.subr.bf16.mxu0 %v7419_v37  ;;  %v1017_v37 = vadd.f32 %v531_v29, %v519_v25  ;;  %v1101_v33 = vadd.f32 %v555_v34, %v543_v31  ;;  %v7453_v25 = vld [vmem:[#allocation5 + $0xf4] ss:$8 sps:$4 sm:$0xff]  }
  0xc5   : > { %6217 = vmatpush1.bf16.msra.mxu1 %v7421_v38  ;;  %v579_v38 = vunpack.c.h.bf16 %v8201_v21 }
  0xc6   : > { %6340 = vmatpush1.bf16.msra.mxu0 %v7422_v39  ;;  %6218 = vmatprep.subr.bf16.mxu1 %v7423_v40  ;;  %v597_v39 = vadd.f32 %v411_v60, %v399_v55  ;;  %v681_v40 = vadd.f32 %v435_v3, %v423_v62 }
  0xc7   : > { %6341 = vmatprep.subr.bf16.mxu0 %v7425_v41  ;;  %v7445_v41 = vld [vmem:[#allocation5 + $0xd0] ss:$8 sps:$4 sm:$0xff]   ;;  %v1185_v62 = vadd.f32 %v579_v38, %v567_v36 }
  0xc8   : > { %v682_v35 = vrot.slane %v681_v40, 4 }
  0xc9   : > { %6219 = vmatpush1.bf16.msra.mxu1 %v7427_v42  ;;  %v7446_v42 = vld [vmem:[#allocation5 + $0x3d0] ss:$8 sps:$4 sm:$0xff]  }
  0xca   : > { %6342 = vmatpush1.bf16.msra.mxu0 %v7428_v43  ;;  %6220 = vmatprep.subr.bf16.mxu1 %v7429_v44  ;;  %v765_v43 = vadd.f32 %v459_v10, %v447_v5  ;;  %v849_v44 = vadd.f32 %v483_v16, %v471_v12  ;;  %v1102_v5 = vrot.slane %v1101_v33, 4  ;;  %v7451_v10 = vld [vmem:[#allocation5 + $0xe0] ss:$8 sps:$4 sm:$0xff]  }
  0xcb   : > { %6343 = vmatprep.subr.bf16.mxu0 %v7431_v45  ;;  %v933_v45 = vadd.f32 %v507_v23, %v495_v18  ;;  %v7452_v12 = vld [vmem:[#allocation5 + $0x3e0] ss:$8 sps:$4 sm:$0xff]  }
  0xcc   : > { %v766_v30 = vrot.slane %v765_v43, 4  ;;  %v850_v55 = vrot.slane %v849_v44, 4  ;;  %v1103_v36 = vadd.f32 %v1102_v5, %v1101_v33  ;;  %v8222_v5 = vld [vmem:[%s8123_s9 + $0x90] sm:$0xff] }
  0xcd   : > { %6221 = vmatpush1.bf16.msra.mxu1 %v7433_v46  ;;  %v934_v60 = vrot.slane %v933_v45, 4 }
  0xce   : > { %6344 = vmatpush1.bf16.msra.mxu0 %v7434_v47  ;;  %6222 = vmatprep.subr.bf16.mxu1 %v7435_v49  ;;  %v7447_v47 = vld [vmem:[#allocation5 + $0xe4] ss:$8 sps:$4 sm:$0xff]   ;;  %v767_v16 = vadd.f32 %v766_v30, %v765_v43  ;;  %v851_v18 = vadd.f32 %v850_v55, %v849_v44  ;;  %v1104_v46 = vrot.slane %v1103_v36, 2  ;;  %v7457_v30 = vld [vmem:[#allocation5 + $0xf0] ss:$8 sps:$4 sm:$0xff]  }
  0xcf   : > { %6345 = vmatprep.subr.bf16.mxu0 %v7437_v50  ;;  %v7449_v49 = vld [vmem:[#allocation5 + $0x3e4] ss:$8 sps:$4 sm:$0xff]   ;;  %v598_v50 = vrot.slane %v597_v39, 4  ;;  %v935_v23 = vadd.f32 %v934_v60, %v933_v45  ;;  %v7458_v43 = vld [vmem:[#allocation5 + $0x3f0] ss:$8 sps:$4 sm:$0xff]  }
  0xd0   : > { %v768_v38 = vrot.slane %v767_v16, 2  ;;  %v1105_v60 = vadd.f32 %v1104_v46, %v1103_v36 }
  0xd1   : > { %6223 = vmatpush1.bf16.msra.mxu1 %v7439_v19  ;;  %v599_v3 = vadd.f32 %v598_v50, %v597_v39  ;;  %v683_v19 = vadd.f32 %v682_v35, %v681_v40  ;;  %v852_v35 = vrot.slane %v851_v18, 2  ;;  %v936_v39 = vrot.slane %v935_v23, 2 }
  0xd2   : > { %6346 = vmatpush1.bf16.msra.mxu0 %v7440_v20  ;;  %6224 = vmatprep.subr.bf16.mxu1 %v7441_v26  ;;  %v1018_v20 = vrot.slane %v1017_v37, 4  ;;  %v1186_v26 = vrot.slane %v1185_v62, 4  ;;  %v769_v44 = vadd.f32 %v768_v38, %v767_v16  ;;  %v8248_v38 = vld [vmem:[%s8123_s9 + $0x390] sm:$0xff] }
  0xd3   : > { %6347 = vmatprep.subr.bf16.mxu0 %v7443_v27  ;;  %v7455_v27 = vld [vmem:[#allocation5 + $0x3f4] ss:$8 sps:$4 sm:$0xff]   ;;  %v600_v29 = vrot.slane %v599_v3, 2  ;;  %v684_v31 = vrot.slane %v683_v19, 2  ;;  %v853_v45 = vadd.f32 %v852_v35, %v851_v18  ;;  %v1106_v18 = vrot.slane %v1105_v60, 1  ;;  %12173 = vst [vmem:[#allocation17_spill] sm:$0xff] %v8248_v38 }
  0xd4   : > { %v1019_v34 = vadd.f32 %v1018_v20, %v1017_v37  ;;  %v1187_v40 = vadd.f32 %v1186_v26, %v1185_v62  ;;  %v770_v62 = vrot.slane %v769_v44, 1  ;;  %v8232_v26 = vld [vmem:[%s8123_s9 + $0x210] sm:$0xff]  ;;  %v8251_v35 = vld [vmem:[%s8123_s9 + $0x4e0] sm:$0xff] }
  0xd5   : > { %6225 = vmatpush1.bf16.msra.mxu1 %v7445_v41  ;;  %v601_v41 = vadd.f32 %v600_v29, %v599_v3  ;;  %v854_v3 = vrot.slane %v853_v45, 1  ;;  %v8245_v36 = vadd.f32 %v1106_v18, %v1105_v60  ;;  %12174 = vst [vmem:[#allocation18_spill] sm:$0xff] %v8251_v35  ;;  %v1530_v18 = vunpack.c.h.bf16 %v8251_v35 }
  0xd6   : > { %6348 = vmatpush1.bf16.msra.mxu0 %v7446_v42  ;;  %6226 = vmatprep.subr.bf16.mxu1 %v7447_v47  ;;  %v685_v42 = vadd.f32 %v684_v31, %v683_v19  ;;  %v1020_v50 = vrot.slane %v1019_v34, 2  ;;  %v937_v47 = vadd.f32 %v936_v39, %v935_v23  ;;  %v8229_v23 = vld [vmem:[%s8123_s9 + $0x1e0] sm:$0xff]  ;;  %v8234_v46 = vadd.f32 %v770_v62, %v769_v44  ;;  %v8277_v62 = vld [vmem:[%s8123_s9 + $0x810] sm:$0xff] }
  0xd7   : > { %6349 = vmatprep.subr.bf16.mxu0 %v7449_v49  ;;  %v1188_v49 = vrot.slane %v1187_v40, 2  ;;  %v602_v33 = vrot.slane %v601_v41, 1  ;;  %v8241_v31 = vld [vmem:[%s8123_s9 + $0x360] sm:$0xff]  ;;  %v1458_v39 = vunpack.c.h.bf16 %v8212_v32  ;;  %12179 = vst [vmem:[#allocation23_spill] sm:$0xff] %v8277_v62 }
  0xd8   : > { %v686_v37 = vrot.slane %v685_v42, 1  ;;  %v1021_v55 = vadd.f32 %v1020_v50, %v1019_v34  ;;  %v938_v19 = vrot.slane %v937_v47, 1  ;;  %12172 = vst [vmem:[#allocation16_spill] sm:$0xff] %v8241_v31  ;;  %v8258_v50 = vld [vmem:[%s8123_s9 + $0x510] sm:$0xff]  ;;  %v1506_v60 = vunpack.c.h.bf16 %v8241_v31 }
  0xd9   : > { %6227 = vmatpush1.bf16.msra.mxu1 %v7451_v10  ;;  %v1189_v20 = vadd.f32 %v1188_v49, %v1187_v40  ;;  %v8224_v10 = vadd.f32 %v602_v33, %v601_v41  ;;  %v7461_v41 = vld [vmem:[#allocation5 + $0x104] ss:$8 sps:$4 sm:$0xff]   ;;  %12175 = vst [vmem:[#allocation19_spill] sm:$0xff] %v8258_v50 }
  0xda   : > { %6350 = vmatpush1.bf16.msra.mxu0 %v7452_v12  ;;  %6228 = vmatprep.subr.bf16.mxu1 %v7453_v25  ;;  %v8226_v12 = vadd.f32 %v686_v37, %v685_v42  ;;  %v1022_v16 = vrot.slane %v1021_v55, 1  ;;  %v8236_v25 = vadd.f32 %v854_v3, %v853_v45  ;;  %v1482_v45 = vunpack.c.h.bf16 %v8229_v23  ;;  %v8270_v49 = vld [vmem:[%s8123_s9 + $0x7e0] sm:$0xff] }
  0xdb   : > { %6351 = vmatprep.subr.bf16.mxu0 %v7455_v27  ;;  %v8238_v27 = vadd.f32 %v938_v19, %v937_v47  ;;  %v1190_v29 = vrot.slane %v1189_v20, 1  ;;  %v8267_v47 = vld [vmem:[%s8123_s9 + $0x690] sm:$0xff]  ;;  %12178 = vst [vmem:[#allocation22_spill] sm:$0xff] %v8270_v49  ;;  %v1494_v37 = vunpack.c.h.bf16 %v8232_v26  ;;  %v8280_v3 = vld [vmem:[%s8123_s9 + $0x960] sm:$0xff]  ;;  %v1578_v22 = vunpack.c.h.bf16 %v8270_v49 }
  0xdc   : > { %v8243_v34 = vadd.f32 %v1022_v16, %v1021_v55  ;;  %12177 = vst [vmem:[#allocation21_spill] sm:$0xff] %v8267_v47  ;;  %12180 = vst [vmem:[#allocation24_spill] sm:$0xff] %v8280_v3  ;;  %v8290_v33 = vld [vmem:[%s8123_s9 + $0xae0] sm:$0xff]  ;;  %v1566_v16 = vunpack.c.h.bf16 %v8267_v47  ;;  %v1590_v55 = vunpack.c.h.bf16 %v8277_v62  ;;  %v1602_v44 = vunpack.c.h.bf16 %v8280_v3 }
  0xdd   : > { %6229 = vmatpush1.bf16.msra.mxu1 %v7457_v30  ;;  %v8255_v42 = vadd.f32 %v1190_v29, %v1189_v20  ;;  %v8261_v30 = vld [vmem:[%s8123_s9 + $0x660] sm:$0xff]  ;;  %v1518_v20 = vunpack.c.h.bf16 %v8248_v38  ;;  %v8287_v29 = vld [vmem:[%s8123_s9 + $0x990] sm:$0xff]  ;;  %12182 = vst [vmem:[#allocation26_spill] sm:$0xff] %v8290_v33  ;;  %v1626_v4 = vunpack.c.h.bf16 %v8290_v33  ;;  %v1740_v17 = vadd.f32 %v1494_v37, %v1482_v45 }
  0xde   : > { %6352 = vmatpush1.bf16.msra.mxu0 %v7458_v43  ;;  %12176 = vst [vmem:[#allocation20_spill] sm:$0xff] %v8261_v30  ;;  %v1470_v43 = vunpack.c.h.bf16 %v8222_v5  ;;  %6239 = vmatprep.subr.bf16.mxu1 %v7461_v41  ;;  %12181 = vst [vmem:[#allocation25_spill] sm:$0xff] %v8287_v29  ;;  %v1542_v41 = vunpack.c.h.bf16 %v8258_v50  ;;  %v1554_v40 = vunpack.c.h.bf16 %v8261_v30  ;;  %v1614_v9 = vunpack.c.h.bf16 %v8287_v29 }
  0xdf   : > { %v1824_v59 = vadd.f32 %v1518_v20, %v1506_v60  ;;  %v2076_v15 = vadd.f32 %v1590_v55, %v1578_v22  ;;  %v1741_v3 = vrot.slane %v1740_v17, 4  ;;  %v2244_v11 = vadd.f32 %v1638_v2, %v1626_v4 }
  0xe0   : > { %v1656_v61 = vadd.f32 %v1470_v43, %v1458_v39  ;;  %v1908_v54 = vadd.f32 %v1542_v41, %v1530_v18  ;;  %v1992_v62 = vadd.f32 %v1566_v16, %v1554_v40  ;;  %v2160_v47 = vadd.f32 %v1614_v9, %v1602_v44 }
  0xe1   : > { %v1825_v30 = vrot.slane %v1824_v59, 4  ;;  %v2077_v19 = vrot.slane %v2076_v15, 4  ;;  %v1742_v33 = vadd.f32 %v1741_v3, %v1740_v17  ;;  %v2245_v24 = vrot.slane %v2244_v11, 4  ;;  %v8317_v3 = vld [vmem:[%s8123_s9 + $0xf0] sm:$0xff] }
  0xe2   : > { %v1657_v49 = vrot.slane %v1656_v61, 4  ;;  %v1909_v29 = vrot.slane %v1908_v54, 4  ;;  %v1993_v50 = vrot.slane %v1992_v62, 4  ;;  %v2161_v38 = vrot.slane %v2160_v47, 4  ;;  %12185 = vst [vmem:[#allocation29_spill] sm:$0xff] %v8317_v3 }
  0xe3   : > { %v1826_v31 = vadd.f32 %v1825_v30, %v1824_v59  ;;  %v2078_v43 = vadd.f32 %v2077_v19, %v2076_v15  ;;  %v1743_v37 = vrot.slane %v1742_v33, 2  ;;  %v2246_v22 = vadd.f32 %v2245_v24, %v2244_v11 }
  0xe4   : > { %v1658_v35 = vadd.f32 %v1657_v49, %v1656_v61  ;;  %v1910_v28 = vadd.f32 %v1909_v29, %v1908_v54  ;;  %v1994_v39 = vadd.f32 %v1993_v50, %v1992_v62  ;;  %v2162_v40 = vadd.f32 %v2161_v38, %v2160_v47  ;;  %v8314_v62 = vld [vmem:[%s8123_s9 + $0xc0] sm:$0xff] }
  0xe5   : > { %v1827_v55 = vrot.slane %v1826_v31, 2  ;;  %v2079_v2 = vrot.slane %v2078_v43, 2  ;;  %v1744_v44 = vadd.f32 %v1743_v37, %v1742_v33  ;;  %v2247_v16 = vrot.slane %v2246_v22, 2  ;;  %12184 = vst [vmem:[#allocation28_spill] sm:$0xff] %v8314_v62 }
  0xe6   : > { %v1659_v45 = vrot.slane %v1658_v35, 2  ;;  %v1911_v60 = vrot.slane %v1910_v28, 2  ;;  %v1995_v9 = vrot.slane %v1994_v39, 2  ;;  %v2163_v20 = vrot.slane %v2162_v40, 2 }
  0xe7   : > { %v1828_v61 = vadd.f32 %v1827_v55, %v1826_v31  ;;  %v2080_v54 = vadd.f32 %v2079_v2, %v2078_v43  ;;  %v1745_v15 = vrot.slane %v1744_v44, 1  ;;  %v2248_v38 = vadd.f32 %v2247_v16, %v2246_v22  ;;  %v8323_v43 = vld [vmem:[%s8123_s9 + $0x270] sm:$0xff] }
  0xe8   : > { %v1660_v4 = vadd.f32 %v1659_v45, %v1658_v35  ;;  %v1912_v17 = vadd.f32 %v1911_v60, %v1910_v28  ;;  %v1996_v59 = vadd.f32 %v1995_v9, %v1994_v39  ;;  %v2164_v30 = vadd.f32 %v2163_v20, %v2162_v40  ;;  %v8320_v39 = vld [vmem:[%s8123_s9 + $0x240] sm:$0xff]  ;;  %12187 = vst [vmem:[#allocation31_spill] sm:$0xff] %v8323_v43  ;;  %v8335_v60 = vld [vmem:[%s8123_s9 + $0x3f0] sm:$0xff] }
  0xe9   : > { %v1829_v11 = vrot.slane %v1828_v61, 1  ;;  %v2081_v35 = vrot.slane %v2080_v54, 1  ;;  %v1746_v33 = vadd.f32 %v1745_v15, %v1744_v44  ;;  %v2249_v28 = vrot.slane %v2248_v38, 1  ;;  %12186 = vst [vmem:[#allocation30_spill] sm:$0xff] %v8320_v39  ;;  %v8326_v45 = vld [vmem:[%s8123_s9 + $0x3c0] sm:$0xff]  ;;  %12189 = vst [vmem:[#allocation33_spill] sm:$0xff] %v8335_v60 }
  0xea   : > { %v1661_v50 = vrot.slane %v1660_v4, 1  ;;  %v1913_v24 = vrot.slane %v1912_v17, 1  ;;  %v1997_v47 = vrot.slane %v1996_v59, 1  ;;  %v2165_v31 = vrot.slane %v2164_v30, 1  ;;  %12188 = vst [vmem:[#allocation32_spill] sm:$0xff] %v8326_v45  ;;  %v8338_v9 = vld [vmem:[%s8123_s9 + $0x540] sm:$0xff] }
  0xeb   : > { %v1830_v19 = vadd.f32 %v1829_v11, %v1828_v61  ;;  %v2082_v41 = vadd.f32 %v2081_v35, %v2080_v54  ;;  %v2250_v40 = vadd.f32 %v2249_v28, %v2248_v38  ;;  %v8332_v55 = vadd.f32 %v1746_v33, %v8226_v12  ;;  %12190 = vst [vmem:[#allocation34_spill] sm:$0xff] %v8338_v9  ;;  %v8353_v12 = vld [vmem:[%s8123_s9 + $0x570] sm:$0xff]  ;;  %v8356_v20 = vld [vmem:[%s8123_s9 + $0x6c0] sm:$0xff] }
  0xec   : > { %v1662_v49 = vadd.f32 %v1661_v50, %v1660_v4  ;;  %v1914_v18 = vadd.f32 %v1913_v24, %v1912_v17  ;;  %v1998_v29 = vadd.f32 %v1997_v47, %v1996_v59  ;;  %v2166_v37 = vadd.f32 %v2165_v31, %v2164_v30  ;;  %12191 = vst [vmem:[#allocation35_spill] sm:$0xff] %v8353_v12  ;;  %v8373_v17 = vld [vmem:[%s8123_s9 + $0x870] sm:$0xff]  ;;  %v8376_v59 = vld [vmem:[%s8123_s9 + $0x9c0] sm:$0xff] }
  0xed   : > { %v8341_v2 = vadd.f32 %v1830_v19, %v8234_v46  ;;  %12192 = vst [vmem:[#allocation36_spill] sm:$0xff] %v8356_v20  ;;  %v8362_v46 = vadd.f32 %v2250_v40, %v8255_v42  ;;  %12195 = vst [vmem:[#allocation39_spill] sm:$0xff] %v8373_v17  ;;  %v2541_v50 = vunpack.c.h.bf16 %v8320_v39  ;;  %v8383_v15 = vld [vmem:[%s8123_s9 + $0x9f0] sm:$0xff]  ;;  %v8386_v30 = vld [vmem:[%s8123_s9 + $0xb40] sm:$0xff]  ;;  %v2553_v11 = vunpack.c.h.bf16 %v8323_v43 }
  0xee   : > { %v8329_v22 = vadd.f32 %v1662_v49, %v8224_v10  ;;  %v8344_v4 = vadd.f32 %v1914_v18, %v8236_v25  ;;  %v8347_v44 = vadd.f32 %v1998_v29, %v8238_v27  ;;  %v8350_v10 = vadd.f32 %v2082_v41, %v8243_v34  ;;  %v8365_v25 = vld [vmem:[%s8123_s9 + $0x6f0] sm:$0xff]  ;;  %v8368_v27 = vld [vmem:[%s8123_s9 + $0x840] sm:$0xff]  ;;  %12196 = vst [vmem:[#allocation40_spill] sm:$0xff] %v8376_v59 }
  0xef   : > { %v8359_v16 = vadd.f32 %v2166_v37, %v8245_v36  ;;  %12193 = vst [vmem:[#allocation37_spill] sm:$0xff] %v8365_v25  ;;  %12194 = vst [vmem:[#allocation38_spill] sm:$0xff] %v8368_v27  ;;  %v2517_v34 = vunpack.c.h.bf16 %v8314_v62  ;;  %v2529_v36 = vunpack.c.h.bf16 %v8317_v3  ;;  %v2565_v47 = vunpack.c.h.bf16 %v8326_v45  ;;  %v8393_v35 = vld [vmem:[%s8123_s9 + $0xb70] sm:$0xff] }
  0xf0   : > { %12197 = vst [vmem:[#allocation41_spill] sm:$0xff] %v8383_v15  ;;  %12198 = vst [vmem:[#allocation42_spill] sm:$0xff] %v8386_v30  ;;  %v2577_v33 = vunpack.c.h.bf16 %v8335_v60  ;;  %v2589_v28 = vunpack.c.h.bf16 %v8338_v9  ;;  %v2601_v18 = vunpack.c.h.bf16 %v8353_v12  ;;  %v2613_v41 = vunpack.c.h.bf16 %v8356_v20 }
  0xf1   : > { %12199 = vst [vmem:[#allocation43_spill] sm:$0xff] %v8393_v35  ;;  %v2625_v40 = vunpack.c.h.bf16 %v8365_v25  ;;  %v2637_v24 = vunpack.c.h.bf16 %v8368_v27  ;;  %v2649_v38 = vunpack.c.h.bf16 %v8373_v17  ;;  %v2661_v42 = vunpack.c.h.bf16 %v8376_v59 }
  0xf2   : > { %v2673_v54 = vunpack.c.h.bf16 %v8383_v15  ;;  %v2685_v61 = vunpack.c.h.bf16 %v8386_v30  ;;  %v2697_v27 = vunpack.c.h.bf16 %v8393_v35  ;;  %v2715_v25 = vadd.f32 %v2529_v36, %v2517_v34 }
  0xf3   : > { %v2799_v31 = vadd.f32 %v2553_v11, %v2541_v50  ;;  %v2883_v20 = vadd.f32 %v2577_v33, %v2565_v47  ;;  %v2967_v17 = vadd.f32 %v2601_v18, %v2589_v28  ;;  %v3051_v12 = vadd.f32 %v2625_v40, %v2613_v41  ;;  %v8421_v18 = vld [vmem:[%s8123_s9 + $0x150] sm:$0xff] }
  0xf4   : > { %v3135_v19 = vadd.f32 %v2649_v38, %v2637_v24  ;;  %v2716_v9 = vrot.slane %v2715_v25, 4  ;;  %v3219_v60 = vadd.f32 %v2673_v54, %v2661_v42  ;;  %v3303_v29 = vadd.f32 %v2697_v27, %v2685_v61  ;;  %12201 = vst [vmem:[#allocation45_spill] sm:$0xff] %v8421_v18 }
  0xf5   : > { %v2800_v59 = vrot.slane %v2799_v31, 4  ;;  %v2884_v45 = vrot.slane %v2883_v20, 4  ;;  %v2968_v15 = vrot.slane %v2967_v17, 4  ;;  %v3052_v43 = vrot.slane %v3051_v12, 4 }
  0xf6   : > { %v3136_v37 = vrot.slane %v3135_v19, 4  ;;  %v2717_v39 = vadd.f32 %v2716_v9, %v2715_v25  ;;  %v3220_v3 = vrot.slane %v3219_v60, 4  ;;  %v3304_v49 = vrot.slane %v3303_v29, 4 }
  0xf7   : > { %v2801_v30 = vadd.f32 %v2800_v59, %v2799_v31  ;;  %v2885_v62 = vadd.f32 %v2884_v45, %v2883_v20  ;;  %v2969_v35 = vadd.f32 %v2968_v15, %v2967_v17  ;;  %v3053_v34 = vadd.f32 %v3052_v43, %v3051_v12  ;;  %v8418_v31 = vld [vmem:[%s8123_s9 + $0x120] sm:$0xff] }
  0xf8   : > { %v3137_v36 = vadd.f32 %v3136_v37, %v3135_v19  ;;  %v2718_v50 = vrot.slane %v2717_v39, 2  ;;  %v3221_v47 = vadd.f32 %v3220_v3, %v3219_v60  ;;  %v3305_v38 = vadd.f32 %v3304_v49, %v3303_v29  ;;  %12200 = vst [vmem:[#allocation44_spill] sm:$0xff] %v8418_v31  ;;  %v8424_v29 = vld [vmem:[%s8123_s9 + $0x2a0] sm:$0xff] }
  0xf9   : > { %v2802_v11 = vrot.slane %v2801_v30, 2  ;;  %v2886_v24 = vrot.slane %v2885_v62, 2  ;;  %v2970_v33 = vrot.slane %v2969_v35, 2  ;;  %v3054_v54 = vrot.slane %v3053_v34, 2  ;;  %12202 = vst [vmem:[#allocation46_spill] sm:$0xff] %v8424_v29 }
  0xfa   : > { %v3138_v27 = vrot.slane %v3137_v36, 2  ;;  %v2719_v61 = vadd.f32 %v2718_v50, %v2717_v39  ;;  %v3222_v28 = vrot.slane %v3221_v47, 2  ;;  %v3306_v9 = vrot.slane %v3305_v38, 2  ;;  %v8430_v50 = vld [vmem:[%s8123_s9 + $0x420] sm:$0xff] }
  0xfb   : > { %v2803_v42 = vadd.f32 %v2802_v11, %v2801_v30  ;;  %v2887_v25 = vadd.f32 %v2886_v24, %v2885_v62  ;;  %v2971_v59 = vadd.f32 %v2970_v33, %v2969_v35  ;;  %v3055_v45 = vadd.f32 %v3054_v54, %v3053_v34  ;;  %12204 = vst [vmem:[#allocation48_spill] sm:$0xff] %v8430_v50  ;;  %v8439_v33 = vld [vmem:[%s8123_s9 + $0x450] sm:$0xff]  ;;  %v8442_v54 = vld [vmem:[%s8123_s9 + $0x5a0] sm:$0xff] }
  0xfc   : > { %v3139_v43 = vadd.f32 %v3138_v27, %v3137_v36  ;;  %v2720_v12 = vrot.slane %v2719_v61, 1  ;;  %v3223_v17 = vadd.f32 %v3222_v28, %v3221_v47  ;;  %v3307_v3 = vadd.f32 %v3306_v9, %v3305_v38  ;;  %v8427_v36 = vld [vmem:[%s8123_s9 + $0x2d0] sm:$0xff]  ;;  %12205 = vst [vmem:[#allocation49_spill] sm:$0xff] %v8439_v33  ;;  %12206 = vst [vmem:[#allocation50_spill] sm:$0xff] %v8442_v54  ;;  %v8460_v28 = vld [vmem:[%s8123_s9 + $0x720] sm:$0xff] }
  0xfd   : > { %v2804_v20 = vrot.slane %v2803_v42, 1  ;;  %v2888_v60 = vrot.slane %v2887_v25, 1  ;;  %v2972_v15 = vrot.slane %v2971_v59, 1  ;;  %v3056_v49 = vrot.slane %v3055_v45, 1  ;;  %12203 = vst [vmem:[#allocation47_spill] sm:$0xff] %v8427_v36  ;;  %12208 = vst [vmem:[#allocation52_spill] sm:$0xff] %v8460_v28 }
  0xfe   : > { %v3140_v39 = vrot.slane %v3139_v43, 1  ;;  %v2721_v30 = vadd.f32 %v2720_v12, %v2719_v61  ;;  %v3224_v35 = vrot.slane %v3223_v17, 1  ;;  %v3308_v19 = vrot.slane %v3307_v3, 1 }
  0xff   : > { %v2805_v62 = vadd.f32 %v2804_v20, %v2803_v42  ;;  %v2889_v41 = vadd.f32 %v2888_v60, %v2887_v25  ;;  %v2973_v37 = vadd.f32 %v2972_v15, %v2971_v59  ;;  %v3057_v40 = vadd.f32 %v3056_v49, %v3055_v45  ;;  %v8477_v59 = vld [vmem:[%s8123_s9 + $0x8d0] sm:$0xff]  ;;  %v8480_v45 = vld [vmem:[%s8123_s9 + $0xa20] sm:$0xff] }
 0x100   : > { %v3141_v34 = vadd.f32 %v3140_v39, %v3139_v43  ;;  %v3225_v11 = vadd.f32 %v3224_v35, %v3223_v17  ;;  %v3309_v47 = vadd.f32 %v3308_v19, %v3307_v3  ;;  %v8433_v38 = vadd.f32 %v2721_v30, %v8329_v22  ;;  %12211 = vst [vmem:[#allocation55_spill] sm:$0xff] %v8477_v59  ;;  %v8487_v20 = vld [vmem:[%s8123_s9 + $0xa50] sm:$0xff]  ;;  %v8490_v17 = vld [vmem:[%s8123_s9 + $0xba0] sm:$0xff] }
 0x101   : > { %v8436_v24 = vadd.f32 %v2805_v62, %v8332_v55  ;;  %v8445_v27 = vadd.f32 %v2889_v41, %v8341_v2  ;;  %v8448_v61 = vadd.f32 %v2973_v37, %v8344_v4  ;;  %v8451_v42 = vadd.f32 %v3057_v40, %v8347_v44  ;;  %v8457_v55 = vld [vmem:[%s8123_s9 + $0x5d0] sm:$0xff]  ;;  %v8472_v44 = vld [vmem:[%s8123_s9 + $0x8a0] sm:$0xff]  ;;  %12212 = vst [vmem:[#allocation56_spill] sm:$0xff] %v8480_v45 }
 0x102   : > { %v8454_v22 = vadd.f32 %v3141_v34, %v8350_v10  ;;  %12207 = vst [vmem:[#allocation51_spill] sm:$0xff] %v8457_v55  ;;  %v8463_v9 = vadd.f32 %v3225_v11, %v8359_v16  ;;  %v8466_v2 = vadd.f32 %v3309_v47, %v8362_v46  ;;  %v8469_v4 = vld [vmem:[%s8123_s9 + $0x750] sm:$0xff]  ;;  %12210 = vst [vmem:[#allocation54_spill] sm:$0xff] %v8472_v44  ;;  %v3576_v10 = vunpack.c.h.bf16 %v8418_v31 }
 0x103   : > { %12209 = vst [vmem:[#allocation53_spill] sm:$0xff] %v8469_v4  ;;  %v3588_v16 = vunpack.c.h.bf16 %v8421_v18  ;;  %v3600_v12 = vunpack.c.h.bf16 %v8424_v29  ;;  %12213 = vst [vmem:[#allocation57_spill] sm:$0xff] %v8487_v20  ;;  %v3612_v60 = vunpack.c.h.bf16 %v8427_v36  ;;  %v3624_v49 = vunpack.c.h.bf16 %v8430_v50  ;;  %v8497_v39 = vld [vmem:[%s8123_s9 + $0xbd0] sm:$0xff]  ;;  %v7464_v29 = vld [vmem:[#allocation5 + $0x404] ss:$8 sps:$4 sm:$0xff]  }
 0x104   : > { %12214 = vst [vmem:[#allocation58_spill] sm:$0xff] %v8490_v17  ;;  %12215 = vst [vmem:[#allocation59_spill] sm:$0xff] %v8497_v39  ;;  %v3636_v62 = vunpack.c.h.bf16 %v8439_v33  ;;  %v3648_v19 = vunpack.c.h.bf16 %v8442_v54  ;;  %v3660_v37 = vunpack.c.h.bf16 %v8457_v55  ;;  %v3672_v34 = vunpack.c.h.bf16 %v8460_v28  ;;  %6362 = vmatprep.subr.bf16.mxu0 %v7464_v29 }
 0x105   : > { %v3684_v47 = vunpack.c.h.bf16 %v8469_v4  ;;  %v3696_v15 = vunpack.c.h.bf16 %v8472_v44  ;;  %v3708_v3 = vunpack.c.h.bf16 %v8477_v59  ;;  %v3720_v46 = vunpack.c.h.bf16 %v8480_v45 }
 0x106   : > { %v3732_v43 = vunpack.c.h.bf16 %v8487_v20  ;;  %v3744_v25 = vunpack.c.h.bf16 %v8490_v17  ;;  %v3756_v44 = vunpack.c.h.bf16 %v8497_v39  ;;  %v3774_v4 = vadd.f32 %v3588_v16, %v3576_v10 }
 0x107   : > { %v3858_v35 = vadd.f32 %v3612_v60, %v3600_v12  ;;  %v3942_v28 = vadd.f32 %v3636_v62, %v3624_v49  ;;  %v4026_v59 = vadd.f32 %v3660_v37, %v3648_v19  ;;  %v4110_v55 = vadd.f32 %v3684_v47, %v3672_v34 }
 0x108   : > { %v4194_v41 = vadd.f32 %v3708_v3, %v3696_v15  ;;  %v3775_v54 = vrot.slane %v3774_v4, 4  ;;  %v4278_v33 = vadd.f32 %v3732_v43, %v3720_v46  ;;  %v4362_v40 = vadd.f32 %v3756_v44, %v3744_v25 }
 0x109   : > { %v3859_v45 = vrot.slane %v3858_v35, 4  ;;  %v3943_v50 = vrot.slane %v3942_v28, 4  ;;  %v4027_v20 = vrot.slane %v4026_v59, 4  ;;  %v4111_v36 = vrot.slane %v4110_v55, 4 }
 0x10a   : > { %v4195_v11 = vrot.slane %v4194_v41, 4  ;;  %v3776_v17 = vadd.f32 %v3775_v54, %v3774_v4  ;;  %v4279_v30 = vrot.slane %v4278_v33, 4  ;;  %v4363_v31 = vrot.slane %v4362_v40, 4 }
 0x10b   : > { %v3860_v18 = vadd.f32 %v3859_v45, %v3858_v35  ;;  %v3944_v39 = vadd.f32 %v3943_v50, %v3942_v28  ;;  %v4028_v10 = vadd.f32 %v4027_v20, %v4026_v59  ;;  %v4112_v16 = vadd.f32 %v4111_v36, %v4110_v55 }
 0x10c   : > { %v4196_v12 = vadd.f32 %v4195_v11, %v4194_v41  ;;  %v3777_v60 = vrot.slane %v3776_v17, 2  ;;  %v4280_v15 = vadd.f32 %v4279_v30, %v4278_v33  ;;  %v4364_v49 = vadd.f32 %v4363_v31, %v4362_v40 }
 0x10d   : > { %v3861_v3 = vrot.slane %v3860_v18, 2  ;;  %v3945_v43 = vrot.slane %v3944_v39, 2  ;;  %v4029_v44 = vrot.slane %v4028_v10, 2  ;;  %v4113_v25 = vrot.slane %v4112_v16, 2 }
 0x10e   : > { %v4197_v46 = vrot.slane %v4196_v12, 2  ;;  %v3778_v62 = vadd.f32 %v3777_v60, %v3776_v17  ;;  %v4281_v37 = vrot.slane %v4280_v15, 2  ;;  %v4365_v54 = vrot.slane %v4364_v49, 2 }
 0x10f   : > { %v3862_v19 = vadd.f32 %v3861_v3, %v3860_v18  ;;  %v3946_v4 = vadd.f32 %v3945_v43, %v3944_v39  ;;  %v4030_v45 = vadd.f32 %v4029_v44, %v4028_v10  ;;  %v4114_v35 = vadd.f32 %v4113_v25, %v4112_v16 }
 0x110   : > { %v4198_v50 = vadd.f32 %v4197_v46, %v4196_v12  ;;  %v3779_v28 = vrot.slane %v3778_v62, 1  ;;  %v4282_v55 = vadd.f32 %v4281_v37, %v4280_v15  ;;  %v4366_v29 = vadd.f32 %v4365_v54, %v4364_v49 }
 0x111   : > { %v3863_v36 = vrot.slane %v3862_v19, 1  ;;  %v3947_v59 = vrot.slane %v3946_v4, 1  ;;  %v4031_v20 = vrot.slane %v4030_v45, 1  ;;  %v4115_v33 = vrot.slane %v4114_v35, 1 }
 0x112   : > { %v4199_v31 = vrot.slane %v4198_v50, 1  ;;  %v3780_v30 = vadd.f32 %v3779_v28, %v3778_v62  ;;  %v4283_v40 = vrot.slane %v4282_v55, 1  ;;  %v4367_v17 = vrot.slane %v4366_v29, 1 }
 0x113   : > { %v3864_v41 = vadd.f32 %v3863_v36, %v3862_v19  ;;  %v3948_v18 = vadd.f32 %v3947_v59, %v3946_v4  ;;  %v4032_v34 = vadd.f32 %v4031_v20, %v4030_v45  ;;  %v4116_v39 = vadd.f32 %v4115_v33, %v4114_v35  ;;  %v8530_v4 = vld [vmem:[%s8123_s9 + $0x18] sm:$0xff]  ;;  %v8533_v36 = vld [vmem:[%s8123_s9 + $0x48] sm:$0xff] }
 0x114   : > { %v4200_v11 = vadd.f32 %v4199_v31, %v4198_v50  ;;  %v4284_v47 = vadd.f32 %v4283_v40, %v4282_v55  ;;  %v4368_v10 = vadd.f32 %v4367_v17, %v4366_v29  ;;  %v4440_v16 = vadd.f32 %v3780_v30, %v8433_v38  ;;  %12216 = vst [vmem:[#allocation60_spill] sm:$0xff] %v8530_v4  ;;  %v8536_v33 = vld [vmem:[%s8123_s9 + $0x198] sm:$0xff]  ;;  %v8539_v31 = vld [vmem:[%s8123_s9 + $0x1c8] sm:$0xff] }
 0x115   : > { %v4452_v12 = vadd.f32 %v3864_v41, %v8436_v24  ;;  %v4464_v60 = vadd.f32 %v3948_v18, %v8445_v27  ;;  %v4476_v3 = vadd.f32 %v4032_v34, %v8448_v61  ;;  %v4488_v15 = vadd.f32 %v4116_v39, %v8451_v42  ;;  %12217 = vst [vmem:[#allocation61_spill] sm:$0xff] %v8533_v36  ;;  %v8543_v17 = vld [vmem:[%s8123_s9 + $0x318] sm:$0xff]  ;;  %v8548_v39 = vld [vmem:[%s8123_s9 + $0x348] sm:$0xff] }
 0x116   : > { %v4500_v49 = vadd.f32 %v4200_v11, %v8454_v22  ;;  %v4512_v43 = vadd.f32 %v4284_v47, %v8463_v9  ;;  %v4524_v44 = vadd.f32 %v4368_v10, %v8466_v2  ;;  %v4536_v25 = vmul.f32 0.015625, %v4440_v16  ;;  %12218 = vst [vmem:[#allocation62_spill] sm:$0xff] %v8536_v33  ;;  %12219 = vst [vmem:[#allocation63_spill] sm:$0xff] %v8539_v31  ;;  %v8551_v11 = vld [vmem:[%s8123_s9 + $0x498] sm:$0xff] }
 0x117   : > { %v4548_v46 = vmul.f32 0.015625, %v4452_v12  ;;  %v4560_v38 = vmul.f32 0.015625, %v4464_v60  ;;  %v4572_v24 = vmul.f32 0.015625, %v4476_v3  ;;  %v4584_v62 = vmul.f32 0.015625, %v4488_v15  ;;  %12220 = vst [vmem:[#allocation64_spill] sm:$0xff] %v8543_v17  ;;  %12221 = vst [vmem:[#allocation65_spill] sm:$0xff] %v8548_v39 }
 0x118   : > { %v4596_v27 = vmul.f32 0.015625, %v4500_v49  ;;  %v4608_v61 = vmul.f32 0.015625, %v4512_v43  ;;  %v4620_v19 = vmul.f32 0.015625, %v4524_v44  ;;  %v4632_v42 = vpack.c.bf16 %v4536_v25, %v4536_v25  ;;  %12222 = vst [vmem:[#allocation66_spill] sm:$0xff] %v8551_v11  ;;  %v8558_v60 = vld [vmem:[%s8123_s9 + $0x4c8] sm:$0xff]  ;;  %v8565_v44 = vld [vmem:[%s8123_s9 + $0x618] sm:$0xff] }
 0x119   : > { %v4644_v22 = vpack.c.bf16 %v4548_v46, %v4548_v46  ;;  %v4656_v37 = vpack.c.bf16 %v4560_v38, %v4560_v38  ;;  %v4668_v9 = vpack.c.bf16 %v4572_v24, %v4572_v24  ;;  %v4680_v54 = vpack.c.bf16 %v4584_v62, %v4584_v62  ;;  %12223 = vst [vmem:[#allocation67_spill] sm:$0xff] %v8558_v60  ;;  %v8568_v25 = vld [vmem:[%s8123_s9 + $0x648] sm:$0xff] }
 0x11a   : > { %v4692_v2 = vpack.c.bf16 %v4596_v27, %v4596_v27  ;;  %v4704_v45 = vpack.c.bf16 %v4608_v61, %v4608_v61  ;;  %v4716_v35 = vpack.c.bf16 %v4620_v19, %v4620_v19  ;;  %v5028_v50 = vunpack.c.l.b16 %v4632_v42  ;;  %12224 = vst [vmem:[#allocation68_spill] sm:$0xff] %v8565_v44  ;;  %12225 = vst [vmem:[#allocation69_spill] sm:$0xff] %v8568_v25  ;;  %v8575_v27 = vld [vmem:[%s8123_s9 + $0x798] sm:$0xff] }
 0x11b   : > { %v5040_v28 = vunpack.c.l.b16 %v4644_v22  ;;  %v5052_v55 = vunpack.c.l.b16 %v4656_v37  ;;  %v5064_v29 = vunpack.c.l.b16 %v4668_v9  ;;  %v5076_v59 = vunpack.c.l.b16 %v4680_v54  ;;  %12226 = vst [vmem:[#allocation70_spill] sm:$0xff] %v8575_v27  ;;  %v8582_v37 = vld [vmem:[%s8123_s9 + $0x7c8] sm:$0xff]  ;;  %v8585_v9 = vld [vmem:[%s8123_s9 + $0x918] sm:$0xff] }
 0x11c   : > { %v5088_v20 = vunpack.c.l.b16 %v4692_v2  ;;  %v5100_v30 = vunpack.c.l.b16 %v4704_v45  ;;  %v5112_v41 = vunpack.c.l.b16 %v4716_v35  ;;  %v405_v47 = vunpack.c.h.bf16 %v8530_v4  ;;  %12227 = vst [vmem:[#allocation71_spill] sm:$0xff] %v8582_v37  ;;  %12228 = vst [vmem:[#allocation72_spill] sm:$0xff] %v8585_v9 }
 0x11d   : > { %v5137_v40 = vsel %vm5123_vm0, %v5040_v28, %v5028_v50  ;;  %v417_v16 = vunpack.c.h.bf16 %v8533_v36  ;;  %v429_v15 = vunpack.c.h.bf16 %v8536_v33  ;;  %v441_v46 = vunpack.c.h.bf16 %v8539_v31  ;;  %v8592_v50 = vld [vmem:[%s8123_s9 + $0x948] sm:$0xff]  ;;  %v8595_v28 = vld [vmem:[%s8123_s9 + $0xa98] sm:$0xff] }
 0x11e   : > { %v5138_v34 = vsel %vm5125_vm1, %v5052_v55, %v5137_v40  ;;  %v453_v24 = vunpack.c.h.bf16 %v8543_v17  ;;  %v465_v19 = vunpack.c.h.bf16 %v8548_v39  ;;  %v477_v54 = vunpack.c.h.bf16 %v8551_v11  ;;  %12229 = vst [vmem:[#allocation73_spill] sm:$0xff] %v8592_v50  ;;  %12230 = vst [vmem:[#allocation74_spill] sm:$0xff] %v8595_v28 }
 0x11f   : > { %v5139_v12 = vsel %vm5127_vm2, %v5064_v29, %v5138_v34  ;;  %v489_v45 = vunpack.c.h.bf16 %v8558_v60  ;;  %v501_v29 = vunpack.c.h.bf16 %v8565_v44  ;;  %v513_v40 = vunpack.c.h.bf16 %v8568_v25 }
 0x120   : > { %v5140_v43 = vsel %vm5129_vm3, %v5076_v59, %v5139_v12  ;;  %v525_v12 = vunpack.c.h.bf16 %v8575_v27  ;;  %v573_v2 = vunpack.c.h.bf16 %v8595_v28  ;;  %v723_v61 = vadd.f32 %v441_v46, %v429_v15 }
 0x121   : > { %v5141_v62 = vsel %vm5131_vm4, %v5088_v20, %v5140_v43  ;;  %v537_v43 = vunpack.c.h.bf16 %v8582_v37  ;;  %v807_v38 = vadd.f32 %v465_v19, %v453_v24  ;;  %v891_v49 = vadd.f32 %v489_v45, %v477_v54 }
 0x122   : > { %v5142_v22 = vsel %vm5133_vm5, %v5100_v30, %v5141_v62  ;;  %v8601_v30 = vld [vmem:[%s8123_s9 + $0xac8] sm:$0xff]  ;;  %v975_v62 = vadd.f32 %v513_v40, %v501_v29 }
 0x123   : > { %v5143_v35 = vsel %vm5135_vm6, %v5112_v41, %v5142_v22  ;;  %12231 = vst [vmem:[#allocation75_spill] sm:$0xff] %v8601_v30  ;;  %v549_v22 = vunpack.c.h.bf16 %v8585_v9  ;;  %v585_v42 = vunpack.c.h.bf16 %v8601_v30  ;;  %v639_v41 = vadd.f32 %v417_v16, %v405_v47 }
 0x124   : > { %v5215_v20 = vpack.c.b16 %v5143_v35, %v5143_v35  ;;  %v561_v35 = vunpack.c.h.bf16 %v8592_v50  ;;  %v1059_v3 = vadd.f32 %v537_v43, %v525_v12  ;;  %v808_v9 = vrot.slane %v807_v38, 4  ;;  %v8624_v43 = vld [vmem:[%s8123_s9 + $0xa8] sm:$0xff] }
 0x125   : > { %v640_v10 = vrot.slane %v639_v41, 4  ;;  %v1227_v59 = vadd.f32 %v585_v42, %v573_v2  ;;  %v892_v50 = vrot.slane %v891_v49, 4  ;;  %v976_v37 = vrot.slane %v975_v62, 4  ;;  %12233 = vst [vmem:[#allocation77_spill] sm:$0xff] %v8624_v43 }
 0x126   : > { %6230 = vmatprep.mubr.bf16.mxu1 %v5215_v20  ;;  %v724_v20 = vrot.slane %v723_v61, 4  ;;  %v1143_v18 = vadd.f32 %v561_v35, %v549_v22  ;;  %v1060_v55 = vrot.slane %v1059_v3, 4  ;;  %v809_v44 = vadd.f32 %v808_v9, %v807_v38 }
 0x127   : > { %v641_v27 = vadd.f32 %v640_v10, %v639_v41  ;;  %v1228_v34 = vrot.slane %v1227_v59, 4  ;;  %v893_v30 = vadd.f32 %v892_v50, %v891_v49  ;;  %v977_v47 = vadd.f32 %v976_v37, %v975_v62  ;;  %v8627_v62 = vld [vmem:[%s8123_s9 + $0x1f8] sm:$0xff] }
 0x128   : > { %v725_v28 = vadd.f32 %v724_v20, %v723_v61  ;;  %v1144_v25 = vrot.slane %v1143_v18, 4  ;;  %v1061_v16 = vadd.f32 %v1060_v55, %v1059_v3  ;;  %v810_v54 = vrot.slane %v809_v44, 2  ;;  %12234 = vst [vmem:[#allocation78_spill] sm:$0xff] %v8627_v62 }
 0x129   : > { %v642_v15 = vrot.slane %v641_v27, 2  ;;  %v1229_v19 = vadd.f32 %v1228_v34, %v1227_v59  ;;  %v894_v45 = vrot.slane %v893_v30, 2  ;;  %v978_v29 = vrot.slane %v977_v47, 2 }
 0x12a   : > { %v726_v46 = vrot.slane %v725_v28, 2  ;;  %v1145_v24 = vadd.f32 %v1144_v25, %v1143_v18  ;;  %v1062_v42 = vrot.slane %v1061_v16, 2  ;;  %v811_v61 = vadd.f32 %v810_v54, %v809_v44  ;;  %v8651_v54 = vld [vmem:[%s8123_s9 + $0x4f8] sm:$0xff] }
 0x12b   : > { %v643_v2 = vadd.f32 %v642_v15, %v641_v27  ;;  %v1230_v10 = vrot.slane %v1229_v19, 2  ;;  %v895_v41 = vadd.f32 %v894_v45, %v893_v30  ;;  %v979_v38 = vadd.f32 %v978_v29, %v977_v47  ;;  %v8641_v15 = vld [vmem:[%s8123_s9 + $0x378] sm:$0xff]  ;;  %12238 = vst [vmem:[#allocation82_spill] sm:$0xff] %v8651_v54 }
 0x12c   : > { %v727_v40 = vadd.f32 %v726_v46, %v725_v28  ;;  %v1146_v12 = vrot.slane %v1145_v24, 2  ;;  %v1063_v49 = vadd.f32 %v1062_v42, %v1061_v16  ;;  %v812_v25 = vrot.slane %v811_v61, 1  ;;  %v8617_v28 = vld [vmem:[%s8123_s9 + $0x78] sm:$0xff]  ;;  %v8638_v16 = vld [vmem:[%s8123_s9 + $0x228] sm:$0xff]  ;;  %12236 = vst [vmem:[#allocation80_spill] sm:$0xff] %v8641_v15 }
 0x12d   : > { %v644_v3 = vrot.slane %v643_v2, 1  ;;  %v1231_v18 = vadd.f32 %v1230_v10, %v1229_v19  ;;  %v896_v50 = vrot.slane %v895_v41, 1  ;;  %v980_v55 = vrot.slane %v979_v38, 1  ;;  %12232 = vst [vmem:[#allocation76_spill] sm:$0xff] %v8617_v28  ;;  %12235 = vst [vmem:[#allocation79_spill] sm:$0xff] %v8638_v16  ;;  %v8648_v19 = vld [vmem:[%s8123_s9 + $0x3a8] sm:$0xff] }
 0x12e   : > { %v728_v37 = vrot.slane %v727_v40, 1  ;;  %v1147_v9 = vadd.f32 %v1146_v12, %v1145_v24  ;;  %v1064_v27 = vrot.slane %v1063_v49, 1  ;;  %v8629_v22 = vadd.f32 %v812_v25, %v811_v61  ;;  %12237 = vst [vmem:[#allocation81_spill] sm:$0xff] %v8648_v19  ;;  %v8656_v42 = vld [vmem:[%s8123_s9 + $0x528] sm:$0xff]  ;;  %v8679_v25 = vld [vmem:[%s8123_s9 + $0x978] sm:$0xff] }
 0x12f   : > { %v8619_v44 = vadd.f32 %v644_v3, %v643_v2  ;;  %v1232_v34 = vrot.slane %v1231_v18, 1  ;;  %v8631_v35 = vadd.f32 %v896_v50, %v895_v41  ;;  %v8633_v20 = vadd.f32 %v980_v55, %v979_v38  ;;  %12239 = vst [vmem:[#allocation83_spill] sm:$0xff] %v8656_v42  ;;  %v8659_v2 = vld [vmem:[%s8123_s9 + $0x678] sm:$0xff]  ;;  %v8666_v41 = vld [vmem:[%s8123_s9 + $0x6a8] sm:$0xff]  ;;  %12244 = vst [vmem:[#allocation88_spill] sm:$0xff] %v8679_v25 }
 0x130   : > { %v8621_v59 = vadd.f32 %v728_v37, %v727_v40  ;;  %v1148_v30 = vrot.slane %v1147_v9, 1  ;;  %v8635_v47 = vadd.f32 %v1064_v27, %v1063_v49  ;;  %v1464_v29 = vunpack.c.h.bf16 %v8617_v28  ;;  %12240 = vst [vmem:[#allocation84_spill] sm:$0xff] %v8659_v2  ;;  %12241 = vst [vmem:[#allocation85_spill] sm:$0xff] %v8666_v41  ;;  %v8669_v38 = vld [vmem:[%s8123_s9 + $0x7f8] sm:$0xff] }
 0x131   : > { %v8645_v24 = vadd.f32 %v1232_v34, %v1231_v18  ;;  %v1476_v12 = vunpack.c.h.bf16 %v8624_v43  ;;  %v1488_v61 = vunpack.c.h.bf16 %v8627_v62  ;;  %12242 = vst [vmem:[#allocation86_spill] sm:$0xff] %v8669_v38  ;;  %v1500_v3 = vunpack.c.h.bf16 %v8638_v16  ;;  %v8676_v18 = vld [vmem:[%s8123_s9 + $0x828] sm:$0xff]  ;;  %v8689_v49 = vld [vmem:[%s8123_s9 + $0xaf8] sm:$0xff] }
 0x132   : > { %v8643_v46 = vadd.f32 %v1148_v30, %v1147_v9  ;;  %v1512_v9 = vunpack.c.h.bf16 %v8641_v15  ;;  %12243 = vst [vmem:[#allocation87_spill] sm:$0xff] %v8676_v18  ;;  %v1524_v55 = vunpack.c.h.bf16 %v8648_v19  ;;  %v1536_v30 = vunpack.c.h.bf16 %v8651_v54  ;;  %v8686_v34 = vld [vmem:[%s8123_s9 + $0x9a8] sm:$0xff]  ;;  %12246 = vst [vmem:[#allocation90_spill] sm:$0xff] %v8689_v49 }
 0x133   : > { %12245 = vst [vmem:[#allocation89_spill] sm:$0xff] %v8686_v34  ;;  %v1548_v10 = vunpack.c.h.bf16 %v8656_v42  ;;  %v1560_v45 = vunpack.c.h.bf16 %v8659_v2  ;;  %v8696_v15 = vld [vmem:[%s8123_s9 + $0xb28] sm:$0xff]  ;;  %v1572_v27 = vunpack.c.h.bf16 %v8666_v41  ;;  %v1584_v19 = vunpack.c.h.bf16 %v8669_v38 }
 0x134   : > { %12247 = vst [vmem:[#allocation91_spill] sm:$0xff] %v8696_v15  ;;  %v1596_v37 = vunpack.c.h.bf16 %v8676_v18  ;;  %v1608_v40 = vunpack.c.h.bf16 %v8679_v25  ;;  %v1620_v62 = vunpack.c.h.bf16 %v8686_v34  ;;  %v1632_v41 = vunpack.c.h.bf16 %v8689_v49 }
 0x135   : > { %v1644_v38 = vunpack.c.h.bf16 %v8696_v15  ;;  %v1698_v43 = vadd.f32 %v1476_v12, %v1464_v29  ;;  %v1782_v16 = vadd.f32 %v1500_v3, %v1488_v61  ;;  %v1866_v28 = vadd.f32 %v1524_v55, %v1512_v9 }
 0x136   : > { %v1950_v18 = vadd.f32 %v1548_v10, %v1536_v30  ;;  %v2034_v60 = vadd.f32 %v1572_v27, %v1560_v45  ;;  %v2118_v42 = vadd.f32 %v1596_v37, %v1584_v19  ;;  %v2202_v39 = vadd.f32 %v1620_v62, %v1608_v40  ;;  %v8713_v30 = vld [vmem:[%s8123_s9 + $0xd8] sm:$0xff] }
 0x137   : > { %v1699_v11 = vrot.slane %v1698_v43, 4  ;;  %v1783_v25 = vrot.slane %v1782_v16, 4  ;;  %v2286_v2 = vadd.f32 %v1644_v38, %v1632_v41  ;;  %v1867_v17 = vrot.slane %v1866_v28, 4  ;;  %12248 = vst [vmem:[#allocation92_spill] sm:$0xff] %v8713_v30 }
 0x138   : > { %v1951_v34 = vrot.slane %v1950_v18, 4  ;;  %v2035_v31 = vrot.slane %v2034_v60, 4  ;;  %v2119_v50 = vrot.slane %v2118_v42, 4  ;;  %v2203_v36 = vrot.slane %v2202_v39, 4 }
 0x139   : > { %v1700_v33 = vadd.f32 %v1699_v11, %v1698_v43  ;;  %v1784_v49 = vadd.f32 %v1783_v25, %v1782_v16  ;;  %v2287_v54 = vrot.slane %v2286_v2, 4  ;;  %v1868_v4 = vadd.f32 %v1867_v17, %v1866_v28 }
 0x13a   : > { %v1952_v15 = vadd.f32 %v1951_v34, %v1950_v18  ;;  %v2036_v29 = vadd.f32 %v2035_v31, %v2034_v60  ;;  %v2120_v12 = vadd.f32 %v2119_v50, %v2118_v42  ;;  %v2204_v45 = vadd.f32 %v2203_v36, %v2202_v39 }
 0x13b   : > { %v1701_v61 = vrot.slane %v1700_v33, 2  ;;  %v1785_v10 = vrot.slane %v1784_v49, 2  ;;  %v2288_v19 = vadd.f32 %v2287_v54, %v2286_v2  ;;  %v1869_v3 = vrot.slane %v1868_v4, 2 }
 0x13c   : > { %v1953_v37 = vrot.slane %v1952_v15, 2  ;;  %v2037_v62 = vrot.slane %v2036_v29, 2  ;;  %v2121_v40 = vrot.slane %v2120_v12, 2  ;;  %v2205_v9 = vrot.slane %v2204_v45, 2 }
 0x13d   : > { %v1702_v41 = vadd.f32 %v1701_v61, %v1700_v33  ;;  %v1786_v38 = vadd.f32 %v1785_v10, %v1784_v49  ;;  %v2289_v55 = vrot.slane %v2288_v19, 2  ;;  %v1870_v11 = vadd.f32 %v1869_v3, %v1868_v4  ;;  %v8722_v10 = vld [vmem:[%s8123_s9 + $0x108] sm:$0xff] }
 0x13e   : > { %v1954_v43 = vadd.f32 %v1953_v37, %v1952_v15  ;;  %v2038_v16 = vadd.f32 %v2037_v62, %v2036_v29  ;;  %v2122_v25 = vadd.f32 %v2121_v40, %v2120_v12  ;;  %v2206_v60 = vadd.f32 %v2205_v9, %v2204_v45  ;;  %12249 = vst [vmem:[#allocation93_spill] sm:$0xff] %v8722_v10  ;;  %v8725_v45 = vld [vmem:[%s8123_s9 + $0x258] sm:$0xff] }
 0x13f   : > { %v1703_v17 = vrot.slane %v1702_v41, 1  ;;  %v1787_v31 = vrot.slane %v1786_v38, 1  ;;  %v2290_v28 = vadd.f32 %v2289_v55, %v2288_v19  ;;  %v1871_v42 = vrot.slane %v1870_v11, 1  ;;  %12250 = vst [vmem:[#allocation94_spill] sm:$0xff] %v8725_v45  ;;  %v8743_v62 = vld [vmem:[%s8123_s9 + $0x3d8] sm:$0xff] }
 0x140   : > { %v1955_v36 = vrot.slane %v1954_v43, 1  ;;  %v2039_v39 = vrot.slane %v2038_v16, 1  ;;  %v2123_v54 = vrot.slane %v2122_v25, 1  ;;  %v2207_v49 = vrot.slane %v2206_v60, 1  ;;  %12252 = vst [vmem:[#allocation96_spill] sm:$0xff] %v8743_v62  ;;  %v8763_v9 = vld [vmem:[%s8123_s9 + $0x6d8] sm:$0xff] }
 0x141   : > { %v1704_v2 = vadd.f32 %v1703_v17, %v1702_v41  ;;  %v1788_v33 = vadd.f32 %v1787_v31, %v1786_v38  ;;  %v2291_v18 = vrot.slane %v2290_v28, 1  ;;  %v1872_v4 = vadd.f32 %v1871_v42, %v1870_v11  ;;  %v8760_v38 = vld [vmem:[%s8123_s9 + $0x588] sm:$0xff]  ;;  %12256 = vst [vmem:[#allocation100_spill] sm:$0xff] %v8763_v9  ;;  %v8783_v42 = vld [vmem:[%s8123_s9 + $0x9d8] sm:$0xff] }
 0x142   : > { %v1956_v15 = vadd.f32 %v1955_v36, %v1954_v43  ;;  %v2040_v50 = vadd.f32 %v2039_v39, %v2038_v16  ;;  %v2124_v27 = vadd.f32 %v2123_v54, %v2122_v25  ;;  %v2208_v34 = vadd.f32 %v2207_v49, %v2206_v60  ;;  %12255 = vst [vmem:[#allocation99_spill] sm:$0xff] %v8760_v38  ;;  %v8770_v43 = vld [vmem:[%s8123_s9 + $0x708] sm:$0xff]  ;;  %v8773_v16 = vld [vmem:[%s8123_s9 + $0x858] sm:$0xff] }
 0x143   : > { %v2292_v29 = vadd.f32 %v2291_v18, %v2290_v28  ;;  %v8716_v12 = vadd.f32 %v1704_v2, %v8619_v44  ;;  %v8719_v61 = vadd.f32 %v1788_v33, %v8621_v59  ;;  %v8728_v19 = vadd.f32 %v1872_v4, %v8629_v22  ;;  %v8740_v59 = vld [vmem:[%s8123_s9 + $0x288] sm:$0xff]  ;;  %12257 = vst [vmem:[#allocation101_spill] sm:$0xff] %v8770_v43  ;;  %v8793_v49 = vld [vmem:[%s8123_s9 + $0xb58] sm:$0xff] }
 0x144   : > { %v8731_v3 = vadd.f32 %v1956_v15, %v8631_v35  ;;  %v8734_v37 = vadd.f32 %v2040_v50, %v8633_v20  ;;  %v8737_v44 = vadd.f32 %v2124_v27, %v8635_v47  ;;  %12251 = vst [vmem:[#allocation95_spill] sm:$0xff] %v8740_v59  ;;  %v8746_v40 = vadd.f32 %v2208_v34, %v8643_v46  ;;  %v8752_v35 = vld [vmem:[%s8123_s9 + $0x408] sm:$0xff]  ;;  %v8755_v20 = vld [vmem:[%s8123_s9 + $0x558] sm:$0xff] }
 0x145   : > { %v8749_v22 = vadd.f32 %v2292_v29, %v8645_v24  ;;  %12253 = vst [vmem:[#allocation97_spill] sm:$0xff] %v8752_v35  ;;  %12254 = vst [vmem:[#allocation98_spill] sm:$0xff] %v8755_v20  ;;  %v2523_v41 = vunpack.c.h.bf16 %v8713_v30  ;;  %v2535_v24 = vunpack.c.h.bf16 %v8722_v10  ;;  %v2547_v11 = vunpack.c.h.bf16 %v8725_v45  ;;  %v8780_v28 = vld [vmem:[%s8123_s9 + $0x888] sm:$0xff] }
 0x146   : > { %12258 = vst [vmem:[#allocation102_spill] sm:$0xff] %v8773_v16  ;;  %v2559_v17 = vunpack.c.h.bf16 %v8740_v59  ;;  %v2571_v60 = vunpack.c.h.bf16 %v8743_v62  ;;  %12259 = vst [vmem:[#allocation103_spill] sm:$0xff] %v8780_v28  ;;  %v2583_v39 = vunpack.c.h.bf16 %v8752_v35  ;;  %v2595_v2 = vunpack.c.h.bf16 %v8755_v20  ;;  %v8790_v33 = vld [vmem:[%s8123_s9 + $0xa08] sm:$0xff] }
 0x147   : > { %12260 = vst [vmem:[#allocation104_spill] sm:$0xff] %v8783_v42  ;;  %12261 = vst [vmem:[#allocation105_spill] sm:$0xff] %v8790_v33  ;;  %v2607_v4 = vunpack.c.h.bf16 %v8760_v38  ;;  %v2619_v50 = vunpack.c.h.bf16 %v8763_v9  ;;  %v8800_v27 = vld [vmem:[%s8123_s9 + $0xb88] sm:$0xff]  ;;  %v2631_v29 = vunpack.c.h.bf16 %v8770_v43  ;;  %v2643_v36 = vunpack.c.h.bf16 %v8773_v16 }
 0x148   : > { %12262 = vst [vmem:[#allocation106_spill] sm:$0xff] %v8793_v49  ;;  %12263 = vst [vmem:[#allocation107_spill] sm:$0xff] %v8800_v27  ;;  %v2655_v18 = vunpack.c.h.bf16 %v8780_v28  ;;  %v2667_v15 = vunpack.c.h.bf16 %v8783_v42  ;;  %v2679_v46 = vunpack.c.h.bf16 %v8790_v33  ;;  %v2691_v47 = vunpack.c.h.bf16 %v8793_v49 }
 0x149   : > { %v2703_v16 = vunpack.c.h.bf16 %v8800_v27  ;;  %v2757_v43 = vadd.f32 %v2535_v24, %v2523_v41  ;;  %v2841_v31 = vadd.f32 %v2559_v17, %v2547_v11  ;;  %v2925_v9 = vadd.f32 %v2583_v39, %v2571_v60 }
 0x14a   : > { %v3009_v28 = vadd.f32 %v2607_v4, %v2595_v2  ;;  %v3093_v38 = vadd.f32 %v2631_v29, %v2619_v50  ;;  %v3177_v25 = vadd.f32 %v2655_v18, %v2643_v36  ;;  %v3261_v35 = vadd.f32 %v2679_v46, %v2667_v15 }
 0x14b   : > { %v2758_v20 = vrot.slane %v2757_v43, 4  ;;  %v2842_v42 = vrot.slane %v2841_v31, 4  ;;  %v3345_v55 = vadd.f32 %v2703_v16, %v2691_v47  ;;  %v2926_v62 = vrot.slane %v2925_v9, 4 }
 0x14c   : > { %v3010_v33 = vrot.slane %v3009_v28, 4  ;;  %v3094_v59 = vrot.slane %v3093_v38, 4  ;;  %v3178_v34 = vrot.slane %v3177_v25, 4  ;;  %v3262_v10 = vrot.slane %v3261_v35, 4 }
 0x14d   : > { %v2759_v45 = vadd.f32 %v2758_v20, %v2757_v43  ;;  %v2843_v49 = vadd.f32 %v2842_v42, %v2841_v31  ;;  %v3346_v54 = vrot.slane %v3345_v55, 4  ;;  %v2927_v30 = vadd.f32 %v2926_v62, %v2925_v9 }
 0x14e   : > { %v3011_v27 = vadd.f32 %v3010_v33, %v3009_v28  ;;  %v3095_v41 = vadd.f32 %v3094_v59, %v3093_v38  ;;  %v3179_v24 = vadd.f32 %v3178_v34, %v3177_v25  ;;  %v3263_v60 = vadd.f32 %v3262_v10, %v3261_v35  ;;  %v8817_v34 = vld [vmem:[%s8123_s9 + $0x138] sm:$0xff] }
 0x14f   : > { %v2760_v11 = vrot.slane %v2759_v45, 2  ;;  %v2844_v17 = vrot.slane %v2843_v49, 2  ;;  %v3347_v36 = vadd.f32 %v3346_v54, %v3345_v55  ;;  %v2928_v39 = vrot.slane %v2927_v30, 2  ;;  %12264 = vst [vmem:[#allocation108_spill] sm:$0xff] %v8817_v34 }
 0x150   : > { %v3012_v2 = vrot.slane %v3011_v27, 2  ;;  %v3096_v46 = vrot.slane %v3095_v41, 2  ;;  %v3180_v47 = vrot.slane %v3179_v24, 2  ;;  %v3264_v4 = vrot.slane %v3263_v60, 2 }
 0x151   : > { %v2761_v16 = vadd.f32 %v2760_v11, %v2759_v45  ;;  %v2845_v18 = vadd.f32 %v2844_v17, %v2843_v49  ;;  %v3348_v15 = vrot.slane %v3347_v36, 2  ;;  %v2929_v20 = vadd.f32 %v2928_v39, %v2927_v30  ;;  %v8826_v17 = vld [vmem:[%s8123_s9 + $0x168] sm:$0xff] }
 0x152   : > { %v3013_v43 = vadd.f32 %v3012_v2, %v3011_v27  ;;  %v3097_v31 = vadd.f32 %v3096_v46, %v3095_v41  ;;  %v3181_v42 = vadd.f32 %v3180_v47, %v3179_v24  ;;  %v3265_v38 = vadd.f32 %v3264_v4, %v3263_v60  ;;  %12265 = vst [vmem:[#allocation109_spill] sm:$0xff] %v8826_v17  ;;  %v8829_v60 = vld [vmem:[%s8123_s9 + $0x2b8] sm:$0xff] }
 0x153   : > { %v2762_v62 = vrot.slane %v2761_v16, 1  ;;  %v2846_v59 = vrot.slane %v2845_v18, 1  ;;  %v3349_v9 = vadd.f32 %v3348_v15, %v3347_v36  ;;  %v2930_v25 = vrot.slane %v2929_v20, 1  ;;  %12266 = vst [vmem:[#allocation110_spill] sm:$0xff] %v8829_v60  ;;  %v8847_v46 = vld [vmem:[%s8123_s9 + $0x438] sm:$0xff] }
 0x154   : > { %v3014_v10 = vrot.slane %v3013_v43, 1  ;;  %v3098_v35 = vrot.slane %v3097_v31, 1  ;;  %v3182_v55 = vrot.slane %v3181_v42, 1  ;;  %v3266_v54 = vrot.slane %v3265_v38, 1  ;;  %12268 = vst [vmem:[#allocation112_spill] sm:$0xff] %v8847_v46  ;;  %v8867_v4 = vld [vmem:[%s8123_s9 + $0x738] sm:$0xff] }
 0x155   : > { %v2763_v28 = vadd.f32 %v2762_v62, %v2761_v16  ;;  %v2847_v45 = vadd.f32 %v2846_v59, %v2845_v18  ;;  %v3350_v33 = vrot.slane %v3349_v9, 1  ;;  %v2931_v30 = vadd.f32 %v2930_v25, %v2929_v20  ;;  %v8864_v18 = vld [vmem:[%s8123_s9 + $0x5e8] sm:$0xff]  ;;  %12272 = vst [vmem:[#allocation116_spill] sm:$0xff] %v8867_v4  ;;  %v8887_v25 = vld [vmem:[%s8123_s9 + $0xa38] sm:$0xff] }
 0x156   : > { %v3015_v49 = vadd.f32 %v3014_v10, %v3013_v43  ;;  %v3099_v50 = vadd.f32 %v3098_v35, %v3097_v31  ;;  %v3183_v27 = vadd.f32 %v3182_v55, %v3181_v42  ;;  %v3267_v29 = vadd.f32 %v3266_v54, %v3265_v38  ;;  %12271 = vst [vmem:[#allocation115_spill] sm:$0xff] %v8864_v18  ;;  %v8874_v43 = vld [vmem:[%s8123_s9 + $0x768] sm:$0xff]  ;;  %v8877_v31 = vld [vmem:[%s8123_s9 + $0x8b8] sm:$0xff] }
 0x157   : > { %v3351_v41 = vadd.f32 %v3350_v33, %v3349_v9  ;;  %v8820_v24 = vadd.f32 %v2763_v28, %v8716_v12  ;;  %v8823_v11 = vadd.f32 %v2847_v45, %v8719_v61  ;;  %v8832_v36 = vadd.f32 %v2931_v30, %v8728_v19  ;;  %v8844_v61 = vld [vmem:[%s8123_s9 + $0x2e8] sm:$0xff]  ;;  %12273 = vst [vmem:[#allocation117_spill] sm:$0xff] %v8874_v43  ;;  %v8897_v54 = vld [vmem:[%s8123_s9 + $0xbb8] sm:$0xff] }
 0x158   : > { %v8835_v39 = vadd.f32 %v3015_v49, %v8731_v3  ;;  %v8838_v2 = vadd.f32 %v3099_v50, %v8734_v37  ;;  %v8841_v12 = vadd.f32 %v3183_v27, %v8737_v44  ;;  %12267 = vst [vmem:[#allocation111_spill] sm:$0xff] %v8844_v61  ;;  %v8850_v47 = vadd.f32 %v3267_v29, %v8746_v40  ;;  %v8856_v3 = vld [vmem:[%s8123_s9 + $0x468] sm:$0xff]  ;;  %v8859_v37 = vld [vmem:[%s8123_s9 + $0x5b8] sm:$0xff] }
 0x159   : > { %v8853_v19 = vadd.f32 %v3351_v41, %v8749_v22  ;;  %12269 = vst [vmem:[#allocation113_spill] sm:$0xff] %v8856_v3  ;;  %12270 = vst [vmem:[#allocation114_spill] sm:$0xff] %v8859_v37  ;;  %v3582_v16 = vunpack.c.h.bf16 %v8817_v34  ;;  %v3594_v22 = vunpack.c.h.bf16 %v8826_v17  ;;  %v3606_v20 = vunpack.c.h.bf16 %v8829_v60  ;;  %v8884_v9 = vld [vmem:[%s8123_s9 + $0x8e8] sm:$0xff] }
 0x15a   : > { %12274 = vst [vmem:[#allocation118_spill] sm:$0xff] %v8877_v31  ;;  %v3618_v62 = vunpack.c.h.bf16 %v8844_v61  ;;  %v3630_v38 = vunpack.c.h.bf16 %v8847_v46  ;;  %12275 = vst [vmem:[#allocation119_spill] sm:$0xff] %v8884_v9  ;;  %v3642_v35 = vunpack.c.h.bf16 %v8856_v3  ;;  %v3654_v28 = vunpack.c.h.bf16 %v8859_v37  ;;  %v8894_v45 = vld [vmem:[%s8123_s9 + $0xa68] sm:$0xff] }
 0x15b   : > { %12276 = vst [vmem:[#allocation120_spill] sm:$0xff] %v8887_v25  ;;  %12277 = vst [vmem:[#allocation121_spill] sm:$0xff] %v8894_v45  ;;  %v3666_v30 = vunpack.c.h.bf16 %v8864_v18  ;;  %v3678_v50 = vunpack.c.h.bf16 %v8867_v4  ;;  %v8904_v27 = vld [vmem:[%s8123_s9 + $0xbe8] sm:$0xff]  ;;  %v3690_v41 = vunpack.c.h.bf16 %v8874_v43  ;;  %v3702_v10 = vunpack.c.h.bf16 %v8877_v31 }
 0x15c   : > { %12278 = vst [vmem:[#allocation122_spill] sm:$0xff] %v8897_v54  ;;  %12279 = vst [vmem:[#allocation123_spill] sm:$0xff] %v8904_v27  ;;  %v3714_v33 = vunpack.c.h.bf16 %v8884_v9  ;;  %v3726_v49 = vunpack.c.h.bf16 %v8887_v25  ;;  %v3738_v40 = vunpack.c.h.bf16 %v8894_v45  ;;  %v3750_v44 = vunpack.c.h.bf16 %v8897_v54 }
 0x15d   : > { %v3762_v31 = vunpack.c.h.bf16 %v8904_v27  ;;  %v3816_v43 = vadd.f32 %v3594_v22, %v3582_v16  ;;  %v3900_v59 = vadd.f32 %v3618_v62, %v3606_v20  ;;  %v3984_v4 = vadd.f32 %v3642_v35, %v3630_v38 }
 0x15e   : > { %v4068_v9 = vadd.f32 %v3666_v30, %v3654_v28  ;;  %v4152_v18 = vadd.f32 %v3690_v41, %v3678_v50  ;;  %v4236_v42 = vadd.f32 %v3714_v33, %v3702_v10  ;;  %v4320_v3 = vadd.f32 %v3738_v40, %v3726_v49 }
 0x15f   : > { %v3817_v37 = vrot.slane %v3816_v43, 4  ;;  %v3901_v25 = vrot.slane %v3900_v59, 4  ;;  %v4404_v15 = vadd.f32 %v3762_v31, %v3750_v44  ;;  %v3985_v46 = vrot.slane %v3984_v4, 4 }
 0x160   : > { %v4069_v45 = vrot.slane %v4068_v9, 4  ;;  %v4153_v61 = vrot.slane %v4152_v18, 4  ;;  %v4237_v29 = vrot.slane %v4236_v42, 4  ;;  %v4321_v17 = vrot.slane %v4320_v3, 4 }
 0x161   : > { %v3818_v60 = vadd.f32 %v3817_v37, %v3816_v43  ;;  %v3902_v54 = vadd.f32 %v3901_v25, %v3900_v59  ;;  %v4405_v55 = vrot.slane %v4404_v15, 4  ;;  %v3986_v34 = vadd.f32 %v3985_v46, %v3984_v4 }
 0x162   : > { %v4070_v27 = vadd.f32 %v4069_v45, %v4068_v9  ;;  %v4154_v16 = vadd.f32 %v4153_v61, %v4152_v18  ;;  %v4238_v22 = vadd.f32 %v4237_v29, %v4236_v42  ;;  %v4322_v38 = vadd.f32 %v4321_v17, %v4320_v3 }
 0x163   : > { %v3819_v20 = vrot.slane %v3818_v60, 2  ;;  %v3903_v62 = vrot.slane %v3902_v54, 2  ;;  %v4406_v10 = vadd.f32 %v4405_v55, %v4404_v15  ;;  %v3987_v35 = vrot.slane %v3986_v34, 2 }
 0x164   : > { %v4071_v28 = vrot.slane %v4070_v27, 2  ;;  %v4155_v40 = vrot.slane %v4154_v16, 2  ;;  %v4239_v44 = vrot.slane %v4238_v22, 2  ;;  %v4323_v30 = vrot.slane %v4322_v38, 2 }
 0x165   : > { %v3820_v31 = vadd.f32 %v3819_v20, %v3818_v60  ;;  %v3904_v33 = vadd.f32 %v3903_v62, %v3902_v54  ;;  %v4407_v49 = vrot.slane %v4406_v10, 2  ;;  %v3988_v37 = vadd.f32 %v3987_v35, %v3986_v34 }
 0x166   : > { %v4072_v43 = vadd.f32 %v4071_v28, %v4070_v27  ;;  %v4156_v59 = vadd.f32 %v4155_v40, %v4154_v16  ;;  %v4240_v25 = vadd.f32 %v4239_v44, %v4238_v22  ;;  %v4324_v61 = vadd.f32 %v4323_v30, %v4322_v38 }
 0x167   : > { %v3821_v46 = vrot.slane %v3820_v31, 1  ;;  %v3905_v4 = vrot.slane %v3904_v33, 1  ;;  %v4408_v18 = vadd.f32 %v4407_v49, %v4406_v10  ;;  %v3989_v42 = vrot.slane %v3988_v37, 1 }
 0x168   : > { %v4073_v9 = vrot.slane %v4072_v43, 1  ;;  %v4157_v17 = vrot.slane %v4156_v59, 1  ;;  %v4241_v3 = vrot.slane %v4240_v25, 1  ;;  %v4325_v45 = vrot.slane %v4324_v61, 1 }
 0x169   : > { %v3822_v15 = vadd.f32 %v3821_v46, %v3820_v31  ;;  %v3906_v55 = vadd.f32 %v3905_v4, %v3904_v33  ;;  %v4409_v50 = vrot.slane %v4408_v18, 1  ;;  %v3990_v60 = vadd.f32 %v3989_v42, %v3988_v37 }
 0x16a   : > { %v4074_v54 = vadd.f32 %v4073_v9, %v4072_v43  ;;  %v4158_v29 = vadd.f32 %v4157_v17, %v4156_v59  ;;  %v4242_v41 = vadd.f32 %v4241_v3, %v4240_v25  ;;  %v4326_v34 = vadd.f32 %v4325_v45, %v4324_v61 }
 0x16b   : > { %v4410_v27 = vadd.f32 %v4409_v50, %v4408_v18  ;;  %v4446_v16 = vadd.f32 %v3822_v15, %v8820_v24  ;;  %v4458_v22 = vadd.f32 %v3906_v55, %v8823_v11  ;;  %v4470_v20 = vadd.f32 %v3990_v60, %v8832_v36 }
 0x16c   : > { %v4482_v62 = vadd.f32 %v4074_v54, %v8835_v39  ;;  %v4494_v38 = vadd.f32 %v4158_v29, %v8838_v2  ;;  %v4506_v10 = vadd.f32 %v4242_v41, %v8841_v12  ;;  %v4518_v35 = vadd.f32 %v4326_v34, %v8850_v47 }
 0x16d   : > { %v4530_v28 = vadd.f32 %v4410_v27, %v8853_v19  ;;  %v4542_v40 = vmul.f32 0.015625, %v4446_v16  ;;  %v4554_v44 = vmul.f32 0.015625, %v4458_v22  ;;  %v4566_v31 = vmul.f32 0.015625, %v4470_v20 }
 0x16e   : > { %v4578_v33 = vmul.f32 0.015625, %v4482_v62  ;;  %v4590_v30 = vmul.f32 0.015625, %v4494_v38  ;;  %v4602_v24 = vmul.f32 0.015625, %v4506_v10  ;;  %v4614_v49 = vmul.f32 0.015625, %v4518_v35 }
 0x16f   : > { %v4626_v11 = vmul.f32 0.015625, %v4530_v28  ;;  %v4638_v37 = vpack.c.bf16 %v4542_v40, %v4542_v40  ;;  %v4650_v36 = vpack.c.bf16 %v4554_v44, %v4554_v44  ;;  %v4662_v43 = vpack.c.bf16 %v4566_v31, %v4566_v31 }
 0x170   : > { %v4674_v39 = vpack.c.bf16 %v4578_v33, %v4578_v33  ;;  %v4686_v59 = vpack.c.bf16 %v4590_v30, %v4590_v30  ;;  %v4698_v2 = vpack.c.bf16 %v4602_v24, %v4602_v24  ;;  %v4710_v25 = vpack.c.bf16 %v4614_v49, %v4614_v49 }
 0x171   : > { %v4722_v12 = vpack.c.bf16 %v4626_v11, %v4626_v11  ;;  %v5034_v46 = vunpack.c.l.b16 %v4638_v37  ;;  %v5046_v47 = vunpack.c.l.b16 %v4650_v36  ;;  %v5058_v4 = vunpack.c.l.b16 %v4662_v43 }
 0x172   : > { %v5070_v19 = vunpack.c.l.b16 %v4674_v39  ;;  %v5082_v61 = vunpack.c.l.b16 %v4686_v59  ;;  %v5094_v18 = vunpack.c.l.b16 %v4698_v2  ;;  %v5106_v42 = vunpack.c.l.b16 %v4710_v25 }
 0x173   : > { %v5118_v9 = vunpack.c.l.b16 %v4722_v12  ;;  %v5179_v17 = vsel %vm5123_vm0, %v5046_v47, %v5034_v46  ;;  %v12280_v3 = vunpack.c.l.bf16 %v8138_v48  ;;  %v12281_v15 = vunpack.c.l.bf16 %v8141_v51 }
 0x174   : > { %v5180_v45 = vsel %vm5125_vm1, %v5058_v4, %v5179_v17  ;;  %v12282_v50 = vunpack.c.l.bf16 %v8144_v52  ;;  %v12283_v60 = vunpack.c.l.bf16 %v8147_v53  ;;  %v12284_v29 = vunpack.c.l.bf16 %v8152_v56 }
 0x175   : > { %v590_v55 = vadd.f32 %v12281_v15, %v12280_v3  ;;  %v12285_v41 = vunpack.c.l.bf16 %v8155_v57  ;;  %v12286_v27 = vunpack.c.l.bf16 %v8158_v58  ;;  %v12287_v16 = vunpack.c.l.bf16 %v8165_v63 }
 0x176   : > { %v674_v54 = vadd.f32 %v12283_v60, %v12282_v50  ;;  %v5181_v51 = vsel %vm5127_vm2, %v5070_v19, %v5180_v45  ;;  %v12288_v20 = vunpack.c.l.bf16 %v8168_v0  ;;  %v12289_v52 = vunpack.c.l.bf16 %v8171_v1 }
 0x177   : > { %v758_v34 = vadd.f32 %v12285_v41, %v12284_v29  ;;  %v842_v48 = vadd.f32 %v12287_v16, %v12286_v27  ;;  %v591_v22 = vrot.slane %v590_v55, 4  ;;  %v12290_v53 = vunpack.c.l.bf16 %v8178_v6 }
 0x178   : > { %v926_v62 = vadd.f32 %v12289_v52, %v12288_v20  ;;  %v12291_v56 = vunpack.c.l.bf16 %v8181_v7  ;;  %v5182_v57 = vsel %vm5129_vm3, %v5082_v61, %v5181_v51  ;;  %v675_v10 = vrot.slane %v674_v54, 4 }
 0x179   : > { %v759_v58 = vrot.slane %v758_v34, 4  ;;  %v843_v35 = vrot.slane %v842_v48, 4  ;;  %v5183_v63 = vsel %vm5131_vm4, %v5094_v18, %v5182_v57  ;;  %v592_v28 = vadd.f32 %v591_v22, %v590_v55  ;;  %v12302_v57 = vld [vmem:[#allocation17_spill] sm:$0xff] }
 0x17a   : > { %v1010_v38 = vadd.f32 %v12291_v56, %v12290_v53  ;;  %v927_v40 = vrot.slane %v926_v62, 4  ;;  %v5184_v0 = vsel %vm5133_vm5, %v5106_v42, %v5183_v63  ;;  %v676_v31 = vadd.f32 %v675_v10, %v674_v54  ;;  %v12300_v56 = vld [vmem:[#allocation16_spill] sm:$0xff] }
 0x17b   : > { %v760_v1 = vadd.f32 %v759_v58, %v758_v34  ;;  %v844_v33 = vadd.f32 %v843_v35, %v842_v48  ;;  %v5185_v6 = vsel %vm5135_vm6, %v5118_v9, %v5184_v0  ;;  %v593_v30 = vrot.slane %v592_v28, 2  ;;  %v12304_v35 = vld [vmem:[#allocation18_spill] sm:$0xff] }
 0x17c   : > { %v1011_v44 = vrot.slane %v1010_v38, 4  ;;  %v928_v7 = vadd.f32 %v927_v40, %v926_v62  ;;  %v5221_v49 = vpack.c.b16 %v5185_v6, %v5185_v6  ;;  %v677_v11 = vrot.slane %v676_v31, 2  ;;  %v12312_v6 = vld [vmem:[#allocation22_spill] sm:$0xff] }
 0x17d   : > { %v761_v37 = vrot.slane %v760_v1, 2  ;;  %v845_v36 = vrot.slane %v844_v33, 2  ;;  %v594_v43 = vadd.f32 %v593_v30, %v592_v28  ;;  %v12292_v2 = vunpack.c.l.bf16 %v8184_v8  ;;  %v12306_v28 = vld [vmem:[#allocation19_spill] sm:$0xff] }
 0x17e   : > { %v1012_v24 = vadd.f32 %v1011_v44, %v1010_v38  ;;  %v929_v39 = vrot.slane %v928_v7, 2  ;;  %v12293_v25 = vunpack.c.l.bf16 %v8191_v13  ;;  %6353 = vmatprep.mubr.bf16.mxu0 %v5221_v49  ;;  %v678_v46 = vadd.f32 %v677_v11, %v676_v31  ;;  %v12314_v30 = vld [vmem:[#allocation23_spill] sm:$0xff] }
 0x17f   : > { %v762_v47 = vadd.f32 %v761_v37, %v760_v1  ;;  %v846_v4 = vadd.f32 %v845_v36, %v844_v33  ;;  %v12294_v19 = vunpack.c.l.bf16 %v8194_v14  ;;  %v12295_v61 = vunpack.c.l.bf16 %v8201_v21  ;;  %v12310_v1 = vld [vmem:[#allocation21_spill] sm:$0xff] }
 0x180   : > { %v1013_v59 = vrot.slane %v1012_v24, 2  ;;  %v1094_v12 = vadd.f32 %v12293_v25, %v12292_v2  ;;  %v595_v42 = vrot.slane %v594_v43, 1  ;;  %v930_v9 = vadd.f32 %v929_v39, %v928_v7 }
 0x181   : > { %v1178_v18 = vadd.f32 %v12295_v61, %v12294_v19  ;;  %v679_v15 = vrot.slane %v678_v46, 1  ;;  %v763_v55 = vrot.slane %v762_v47, 1  ;;  %v847_v45 = vrot.slane %v846_v4, 1 }
 0x182   : > { %v1014_v17 = vadd.f32 %v1013_v59, %v1012_v24  ;;  %v1095_v3 = vrot.slane %v1094_v12, 4  ;;  %v8967_v50 = vadd.f32 %v595_v42, %v594_v43  ;;  %v931_v13 = vrot.slane %v930_v9, 1 }
 0x183   : > { %v1179_v8 = vrot.slane %v1178_v18, 4  ;;  %v8969_v29 = vadd.f32 %v679_v15, %v678_v46  ;;  %v8971_v41 = vadd.f32 %v763_v55, %v762_v47  ;;  %v8973_v14 = vadd.f32 %v847_v45, %v846_v4 }
 0x184   : > { %v1015_v60 = vrot.slane %v1014_v17, 1  ;;  %v1096_v54 = vadd.f32 %v1095_v3, %v1094_v12  ;;  %v8975_v34 = vadd.f32 %v931_v13, %v930_v9  ;;  %v12296_v48 = vunpack.c.l.bf16 %v8212_v32 }
 0x185   : > { %v1180_v21 = vadd.f32 %v1179_v8, %v1178_v18  ;;  %v12297_v51 = vunpack.c.l.bf16 %v8222_v5  ;;  %v12298_v52 = vunpack.c.l.bf16 %v8229_v23  ;;  %v12299_v62 = vunpack.c.l.bf16 %v8232_v26  ;;  %v12308_v5 = vld [vmem:[#allocation20_spill] sm:$0xff] }
 0x186   : > { %v8977_v27 = vadd.f32 %v1015_v60, %v1014_v17  ;;  %v1097_v16 = vrot.slane %v1096_v54, 2  ;;  %v12301_v38 = vunpack.c.l.bf16 %v12300_v56  ;;  %v12303_v10 = vunpack.c.l.bf16 %v12302_v57  ;;  %v12316_v8 = vld [vmem:[#allocation24_spill] sm:$0xff]  ;;  %v12318_v60 = vld [vmem:[#allocation25_spill] sm:$0xff] }
 0x187   : > { %v1649_v22 = vadd.f32 %v12297_v51, %v12296_v48  ;;  %v1181_v20 = vrot.slane %v1180_v21, 2  ;;  %v1733_v53 = vadd.f32 %v12299_v62, %v12298_v52  ;;  %v12305_v63 = vunpack.c.l.bf16 %v12304_v35  ;;  %v12322_v52 = vld [vmem:[#allocation27_spill] sm:$0xff] }
 0x188   : > { %v1817_v58 = vadd.f32 %v12303_v10, %v12301_v38  ;;  %v12307_v40 = vunpack.c.l.bf16 %v12306_v28  ;;  %v1098_v32 = vadd.f32 %v1097_v16, %v1096_v54  ;;  %v12309_v31 = vunpack.c.l.bf16 %v12308_v5 }
 0x189   : > { %v1650_v0 = vrot.slane %v1649_v22, 4  ;;  %v12311_v33 = vunpack.c.l.bf16 %v12310_v1  ;;  %v12313_v26 = vunpack.c.l.bf16 %v12312_v6  ;;  %v12315_v7 = vunpack.c.l.bf16 %v12314_v30 }
 0x18a   : > { %v1901_v44 = vadd.f32 %v12307_v40, %v12305_v63  ;;  %v1182_v49 = vadd.f32 %v1181_v20, %v1180_v21  ;;  %v1734_v11 = vrot.slane %v1733_v53, 4  ;;  %v1818_v37 = vrot.slane %v1817_v58, 4 }
 0x18b   : > { %v1985_v23 = vadd.f32 %v12311_v33, %v12309_v31  ;;  %v2069_v24 = vadd.f32 %v12315_v7, %v12313_v26  ;;  %v1099_v43 = vrot.slane %v1098_v32, 1  ;;  %v1651_v39 = vadd.f32 %v1650_v0, %v1649_v22  ;;  %v12320_v22 = vld [vmem:[#allocation26_spill] sm:$0xff] }
 0x18c   : > { %v1902_v36 = vrot.slane %v1901_v44, 4  ;;  %v1183_v25 = vrot.slane %v1182_v49, 1  ;;  %v1735_v12 = vadd.f32 %v1734_v11, %v1733_v53  ;;  %v1819_v46 = vadd.f32 %v1818_v37, %v1817_v58 }
 0x18d   : > { %v1986_v59 = vrot.slane %v1985_v23, 4  ;;  %v2070_v2 = vrot.slane %v2069_v24, 4  ;;  %v9003_v4 = vadd.f32 %v1099_v43, %v1098_v32  ;;  %v1652_v19 = vrot.slane %v1651_v39, 2 }
 0x18e   : > { %v1903_v47 = vadd.f32 %v1902_v36, %v1901_v44  ;;  %v9005_v42 = vadd.f32 %v1183_v25, %v1182_v49  ;;  %v1736_v9 = vrot.slane %v1735_v12, 2  ;;  %v1820_v17 = vrot.slane %v1819_v46, 2 }
 0x18f   : > { %v1987_v61 = vadd.f32 %v1986_v59, %v1985_v23  ;;  %v2071_v18 = vadd.f32 %v2070_v2, %v2069_v24  ;;  %v1653_v15 = vadd.f32 %v1652_v19, %v1651_v39  ;;  %v12317_v13 = vunpack.c.l.bf16 %v12316_v8  ;;  %v12324_v39 = vld [vmem:[#allocation28_spill] sm:$0xff]  ;;  %v12326_v59 = vld [vmem:[#allocation29_spill] sm:$0xff] }
 0x190   : > { %v1904_v3 = vrot.slane %v1903_v47, 2  ;;  %v12319_v54 = vunpack.c.l.bf16 %v12318_v60  ;;  %v1737_v16 = vadd.f32 %v1736_v9, %v1735_v12  ;;  %v1821_v48 = vadd.f32 %v1820_v17, %v1819_v46  ;;  %v12328_v12 = vld [vmem:[#allocation30_spill] sm:$0xff] }
 0x191   : > { %v1988_v55 = vrot.slane %v1987_v61, 2  ;;  %v2072_v45 = vrot.slane %v2071_v18, 2  ;;  %v12321_v20 = vunpack.c.l.bf16 %v12320_v22  ;;  %v12323_v62 = vunpack.c.l.bf16 %v12322_v52  ;;  %v12336_v17 = vld [vmem:[#allocation34_spill] sm:$0xff]  ;;  %v12346_v22 = vld [vmem:[#allocation39_spill] sm:$0xff] }
 0x192   : > { %v2153_v21 = vadd.f32 %v12319_v54, %v12317_v13  ;;  %v1905_v51 = vadd.f32 %v1904_v3, %v1903_v47  ;;  %v1654_v56 = vrot.slane %v1653_v15, 1  ;;  %v1738_v58 = vrot.slane %v1737_v16, 1  ;;  %v12340_v13 = vld [vmem:[#allocation36_spill] sm:$0xff]  ;;  %v12342_v54 = vld [vmem:[#allocation37_spill] sm:$0xff] }
 0x193   : > { %v2237_v53 = vadd.f32 %v12323_v62, %v12321_v20  ;;  %v1989_v38 = vadd.f32 %v1988_v55, %v1987_v61  ;;  %v2073_v57 = vadd.f32 %v2072_v45, %v2071_v18  ;;  %v1822_v35 = vrot.slane %v1821_v48, 1  ;;  %v12334_v18 = vld [vmem:[#allocation33_spill] sm:$0xff] }
 0x194   : > { %v2154_v10 = vrot.slane %v2153_v21, 4  ;;  %v1906_v63 = vrot.slane %v1905_v51, 1  ;;  %v1655_v40 = vadd.f32 %v1654_v56, %v1653_v15  ;;  %v1739_v5 = vadd.f32 %v1738_v58, %v1737_v16 }
 0x195   : > { %v2238_v28 = vrot.slane %v2237_v53, 4  ;;  %v1990_v44 = vrot.slane %v1989_v38, 1  ;;  %v2074_v32 = vrot.slane %v2073_v57, 1  ;;  %v1823_v31 = vadd.f32 %v1822_v35, %v1821_v48  ;;  %v12344_v48 = vld [vmem:[#allocation38_spill] sm:$0xff] }
 0x196   : > { %v2155_v0 = vadd.f32 %v2154_v10, %v2153_v21  ;;  %v1907_v1 = vadd.f32 %v1906_v63, %v1905_v51  ;;  %v9016_v30 = vadd.f32 %v1655_v40, %v8967_v50  ;;  %v9019_v24 = vadd.f32 %v1739_v5, %v8969_v29 }
 0x197   : > { %v2239_v33 = vadd.f32 %v2238_v28, %v2237_v53  ;;  %v1991_v23 = vadd.f32 %v1990_v44, %v1989_v38  ;;  %v2075_v6 = vadd.f32 %v2074_v32, %v2073_v57  ;;  %v9022_v49 = vadd.f32 %v1823_v31, %v8971_v41  ;;  %v12330_v41 = vld [vmem:[#allocation31_spill] sm:$0xff] }
 0x198   : > { %v2156_v26 = vrot.slane %v2155_v0, 2  ;;  %v9025_v11 = vadd.f32 %v1907_v1, %v8973_v14  ;;  %v12325_v50 = vunpack.c.l.bf16 %v12324_v39  ;;  %v12327_v2 = vunpack.c.l.bf16 %v12326_v59  ;;  %v12332_v14 = vld [vmem:[#allocation32_spill] sm:$0xff]  ;;  %v12350_v59 = vld [vmem:[#allocation41_spill] sm:$0xff] }
 0x199   : > { %v2240_v7 = vrot.slane %v2239_v33, 2  ;;  %v9028_v36 = vadd.f32 %v1991_v23, %v8975_v34  ;;  %v9031_v43 = vadd.f32 %v2075_v6, %v8977_v27  ;;  %v12329_v46 = vunpack.c.l.bf16 %v12328_v12  ;;  %v12338_v27 = vld [vmem:[#allocation35_spill] sm:$0xff]  ;;  %v12348_v39 = vld [vmem:[#allocation40_spill] sm:$0xff] }
 0x19a   : > { %v2157_v37 = vadd.f32 %v2156_v26, %v2155_v0  ;;  %v2708_v25 = vadd.f32 %v12327_v2, %v12325_v50  ;;  %v12331_v47 = vunpack.c.l.bf16 %v12330_v41  ;;  %v12333_v61 = vunpack.c.l.bf16 %v12332_v14 }
 0x19b   : > { %v2241_v29 = vadd.f32 %v2240_v7, %v2239_v33  ;;  %v12335_v9 = vunpack.c.l.bf16 %v12334_v18  ;;  %v12337_v3 = vunpack.c.l.bf16 %v12336_v17  ;;  %v12339_v15 = vunpack.c.l.bf16 %v12338_v27 }
 0x19c   : > { %v2792_v19 = vadd.f32 %v12331_v47, %v12329_v46  ;;  %v2158_v45 = vrot.slane %v2157_v37, 1  ;;  %v2709_v8 = vrot.slane %v2708_v25, 4  ;;  %v12341_v60 = vunpack.c.l.bf16 %v12340_v13  ;;  %v12352_v46 = vld [vmem:[#allocation42_spill] sm:$0xff]  ;;  %v12354_v47 = vld [vmem:[#allocation43_spill] sm:$0xff] }
 0x19d   : > { %v2876_v34 = vadd.f32 %v12335_v9, %v12333_v61  ;;  %v2960_v55 = vadd.f32 %v12339_v15, %v12337_v3  ;;  %v12343_v21 = vunpack.c.l.bf16 %v12342_v54  ;;  %v12345_v51 = vunpack.c.l.bf16 %v12344_v48 }
 0x19e   : > { %v12347_v20 = vunpack.c.l.bf16 %v12346_v22  ;;  %v2242_v62 = vrot.slane %v2241_v29, 1  ;;  %v2793_v53 = vrot.slane %v2792_v19, 4  ;;  %v2159_v57 = vadd.f32 %v2158_v45, %v2157_v37 }
 0x19f   : > { %v3044_v16 = vadd.f32 %v12343_v21, %v12341_v60  ;;  %v2877_v56 = vrot.slane %v2876_v34, 4  ;;  %v2961_v38 = vrot.slane %v2960_v55, 4  ;;  %v2710_v10 = vadd.f32 %v2709_v8, %v2708_v25 }
 0x1a0   : > { %v3128_v52 = vadd.f32 %v12347_v20, %v12345_v51  ;;  %v2243_v63 = vadd.f32 %v2242_v62, %v2241_v29  ;;  %v2794_v28 = vadd.f32 %v2793_v53, %v2792_v19  ;;  %v9058_v32 = vadd.f32 %v2159_v57, %v9003_v4 }
 0x1a1   : > { %v3045_v58 = vrot.slane %v3044_v16, 4  ;;  %v2878_v40 = vadd.f32 %v2877_v56, %v2876_v34  ;;  %v2962_v44 = vadd.f32 %v2961_v38, %v2960_v55  ;;  %v2711_v0 = vrot.slane %v2710_v10, 2 }
 0x1a2   : > { %v3129_v35 = vrot.slane %v3128_v52, 4  ;;  %v9061_v1 = vadd.f32 %v2243_v63, %v9005_v42  ;;  %v2795_v33 = vrot.slane %v2794_v28, 2  ;;  %v12349_v50 = vunpack.c.l.bf16 %v12348_v39 }
 0x1a3   : > { %v3046_v5 = vadd.f32 %v3045_v58, %v3044_v16  ;;  %v2879_v23 = vrot.slane %v2878_v40, 2  ;;  %v2963_v6 = vrot.slane %v2962_v44, 2  ;;  %v2712_v26 = vadd.f32 %v2711_v0, %v2710_v10  ;;  %v12356_v10 = vld [vmem:[#allocation44_spill] sm:$0xff]  ;;  %v12358_v58 = vld [vmem:[#allocation45_spill] sm:$0xff] }
 0x1a4   : > { %v3130_v31 = vadd.f32 %v3129_v35, %v3128_v52  ;;  %v12351_v2 = vunpack.c.l.bf16 %v12350_v59  ;;  %v2796_v29 = vadd.f32 %v2795_v33, %v2794_v28  ;;  %v12353_v41 = vunpack.c.l.bf16 %v12352_v46  ;;  %v12360_v28 = vld [vmem:[#allocation46_spill] sm:$0xff]  ;;  %v12378_v46 = vld [vmem:[#allocation55_spill] sm:$0xff] }
 0x1a5   : > { %v3047_v7 = vrot.slane %v3046_v5, 2  ;;  %v2880_v4 = vadd.f32 %v2879_v23, %v2878_v40  ;;  %v2964_v12 = vadd.f32 %v2963_v6, %v2962_v44  ;;  %v12355_v19 = vunpack.c.l.bf16 %v12354_v47  ;;  %v12368_v23 = vld [vmem:[#allocation50_spill] sm:$0xff] }
 0x1a6   : > { %v3131_v37 = vrot.slane %v3130_v31, 2  ;;  %v3212_v25 = vadd.f32 %v12351_v2, %v12349_v50  ;;  %v2713_v14 = vrot.slane %v2712_v26, 1  ;;  %v2797_v34 = vrot.slane %v2796_v29, 1  ;;  %v12372_v50 = vld [vmem:[#allocation52_spill] sm:$0xff]  ;;  %v12374_v2 = vld [vmem:[#allocation53_spill] sm:$0xff] }
 0x1a7   : > { %v3296_v42 = vadd.f32 %v12355_v19, %v12353_v41  ;;  %v3048_v61 = vadd.f32 %v3047_v7, %v3046_v5  ;;  %v2881_v17 = vrot.slane %v2880_v4, 1  ;;  %v2965_v3 = vrot.slane %v2964_v12, 1 }
 0x1a8   : > { %v3132_v18 = vadd.f32 %v3131_v37, %v3130_v31  ;;  %v3213_v9 = vrot.slane %v3212_v25, 4  ;;  %v2714_v15 = vadd.f32 %v2713_v14, %v2712_v26  ;;  %v2798_v13 = vadd.f32 %v2797_v34, %v2796_v29  ;;  %v12366_v31 = vld [vmem:[#allocation49_spill] sm:$0xff] }
 0x1a9   : > { %v3297_v27 = vrot.slane %v3296_v42, 4  ;;  %v3049_v55 = vrot.slane %v3048_v61, 1  ;;  %v2882_v60 = vadd.f32 %v2881_v17, %v2880_v4  ;;  %v2966_v54 = vadd.f32 %v2965_v3, %v2964_v12  ;;  %v12376_v4 = vld [vmem:[#allocation54_spill] sm:$0xff] }
 0x1aa   : > { %v3133_v45 = vrot.slane %v3132_v18, 1  ;;  %v3214_v8 = vadd.f32 %v3213_v9, %v3212_v25  ;;  %v9072_v22 = vadd.f32 %v2714_v15, %v9016_v30  ;;  %v9075_v52 = vadd.f32 %v2798_v13, %v9019_v24 }
 0x1ab   : > { %v3298_v21 = vadd.f32 %v3297_v27, %v3296_v42  ;;  %v3050_v16 = vadd.f32 %v3049_v55, %v3048_v61  ;;  %v9078_v62 = vadd.f32 %v2882_v60, %v9022_v49  ;;  %v9081_v53 = vadd.f32 %v2966_v54, %v9025_v11  ;;  %v12362_v49 = vld [vmem:[#allocation47_spill] sm:$0xff]  ;;  %v12364_v11 = vld [vmem:[#allocation48_spill] sm:$0xff] }
 0x1ac   : > { %v3134_v48 = vadd.f32 %v3133_v45, %v3132_v18  ;;  %v3215_v51 = vrot.slane %v3214_v8, 2  ;;  %v12357_v30 = vunpack.c.l.bf16 %v12356_v10  ;;  %v12359_v35 = vunpack.c.l.bf16 %v12358_v58  ;;  %v12380_v10 = vld [vmem:[#allocation56_spill] sm:$0xff]  ;;  %v12382_v58 = vld [vmem:[#allocation57_spill] sm:$0xff] }
 0x1ad   : > { %v3299_v20 = vrot.slane %v3298_v21, 2  ;;  %v9084_v38 = vadd.f32 %v3050_v16, %v9028_v36  ;;  %v12361_v40 = vunpack.c.l.bf16 %v12360_v28  ;;  %v12363_v44 = vunpack.c.l.bf16 %v12362_v49 }
 0x1ae   : > { %v3216_v56 = vadd.f32 %v3215_v51, %v3214_v8  ;;  %v9087_v57 = vadd.f32 %v3134_v48, %v9031_v43  ;;  %v3767_v63 = vadd.f32 %v12359_v35, %v12357_v30  ;;  %v12365_v5 = vunpack.c.l.bf16 %v12364_v11  ;;  %v12370_v43 = vld [vmem:[#allocation51_spill] sm:$0xff] }
 0x1af   : > { %v3300_v24 = vadd.f32 %v3299_v20, %v3298_v21  ;;  %v3851_v0 = vadd.f32 %v12363_v44, %v12361_v40  ;;  %v12367_v33 = vunpack.c.l.bf16 %v12366_v31  ;;  %v12369_v6 = vunpack.c.l.bf16 %v12368_v23  ;;  %v12384_v40 = vld [vmem:[#allocation58_spill] sm:$0xff]  ;;  %v12386_v44 = vld [vmem:[#allocation59_spill] sm:$0xff] }
 0x1b0   : > { %v12371_v26 = vunpack.c.l.bf16 %v12370_v43  ;;  %v3217_v37 = vrot.slane %v3216_v56, 1  ;;  %v3768_v39 = vrot.slane %v3767_v63, 4  ;;  %v12373_v59 = vunpack.c.l.bf16 %v12372_v50 }
 0x1b1   : > { %v3935_v36 = vadd.f32 %v12367_v33, %v12365_v5  ;;  %v12375_v25 = vunpack.c.l.bf16 %v12374_v2  ;;  %v12377_v12 = vunpack.c.l.bf16 %v12376_v4  ;;  %v12379_v41 = vunpack.c.l.bf16 %v12378_v46 }
 0x1b2   : > { %v4019_v7 = vadd.f32 %v12371_v26, %v12369_v6  ;;  %v3301_v19 = vrot.slane %v3300_v24, 1  ;;  %v3852_v42 = vrot.slane %v3851_v0, 4  ;;  %v3218_v18 = vadd.f32 %v3217_v37, %v3216_v56 }
 0x1b3   : > { %v4103_v29 = vadd.f32 %v12375_v25, %v12373_v59  ;;  %v4187_v47 = vadd.f32 %v12379_v41, %v12377_v12  ;;  %v3936_v14 = vrot.slane %v3935_v36, 4  ;;  %v3769_v9 = vadd.f32 %v3768_v39, %v3767_v63 }
 0x1b4   : > { %v4020_v61 = vrot.slane %v4019_v7, 4  ;;  %v3302_v3 = vadd.f32 %v3301_v19, %v3300_v24  ;;  %v3853_v27 = vadd.f32 %v3852_v42, %v3851_v0  ;;  %v9114_v45 = vadd.f32 %v3218_v18, %v9058_v32 }
 0x1b5   : > { %v4104_v34 = vrot.slane %v4103_v29, 4  ;;  %v4188_v17 = vrot.slane %v4187_v47, 4  ;;  %v3937_v15 = vadd.f32 %v3936_v14, %v3935_v36  ;;  %v3770_v8 = vrot.slane %v3769_v9, 2 }
 0x1b6   : > { %v4021_v55 = vadd.f32 %v4020_v61, %v4019_v7  ;;  %v9117_v54 = vadd.f32 %v3302_v3, %v9061_v1  ;;  %v3854_v21 = vrot.slane %v3853_v27, 2  ;;  %v12381_v30 = vunpack.c.l.bf16 %v12380_v10 }
 0x1b7   : > { %v4105_v13 = vadd.f32 %v4104_v34, %v4103_v29  ;;  %v4189_v60 = vadd.f32 %v4188_v17, %v4187_v47  ;;  %v3938_v16 = vrot.slane %v3937_v15, 2  ;;  %v3771_v51 = vadd.f32 %v3770_v8, %v3769_v9 }
 0x1b8   : > { %v4022_v48 = vrot.slane %v4021_v55, 2  ;;  %v12383_v35 = vunpack.c.l.bf16 %v12382_v58  ;;  %v3855_v24 = vadd.f32 %v3854_v21, %v3853_v27  ;;  %v12385_v49 = vunpack.c.l.bf16 %v12384_v40  ;;  %v12388_v58 = vld [vmem:[#allocation60_spill] sm:$0xff] }
 0x1b9   : > { %v4106_v20 = vrot.slane %v4105_v13, 2  ;;  %v4190_v56 = vrot.slane %v4189_v60, 2  ;;  %v3939_v32 = vadd.f32 %v3938_v16, %v3937_v15  ;;  %v12387_v0 = vunpack.c.l.bf16 %v12386_v44 }
 0x1ba   : > { %v4271_v63 = vadd.f32 %v12383_v35, %v12381_v30  ;;  %v4023_v28 = vadd.f32 %v4022_v48, %v4021_v55  ;;  %v3772_v11 = vrot.slane %v3771_v51, 1  ;;  %v3856_v36 = vrot.slane %v3855_v24, 1 }
 0x1bb   : > { %v4355_v1 = vadd.f32 %v12387_v0, %v12385_v49  ;;  %v4107_v5 = vadd.f32 %v4106_v20, %v4105_v13  ;;  %v4191_v31 = vadd.f32 %v4190_v56, %v4189_v60  ;;  %v3940_v23 = vrot.slane %v3939_v32, 1  ;;  %v12392_v49 = vld [vmem:[#allocation62_spill] sm:$0xff]  ;;  %v12394_v0 = vld [vmem:[#allocation63_spill] sm:$0xff] }
 0x1bc   : > { %v4272_v33 = vrot.slane %v4271_v63, 4  ;;  %v4024_v6 = vrot.slane %v4023_v28, 1  ;;  %v3773_v26 = vadd.f32 %v3772_v11, %v3771_v51  ;;  %v3857_v50 = vadd.f32 %v3856_v36, %v3855_v24 }
 0x1bd   : > { %v4356_v43 = vrot.slane %v4355_v1, 4  ;;  %v4108_v7 = vrot.slane %v4107_v5, 1  ;;  %v4192_v37 = vrot.slane %v4191_v31, 1  ;;  %v3941_v59 = vadd.f32 %v3940_v23, %v3939_v32 }
 0x1be   : > { %v4273_v39 = vadd.f32 %v4272_v33, %v4271_v63  ;;  %v4025_v2 = vadd.f32 %v4024_v6, %v4023_v28  ;;  %v4439_v46 = vadd.f32 %v3773_v26, %v9072_v22  ;;  %v4451_v47 = vadd.f32 %v3857_v50, %v9075_v52  ;;  %v12390_v63 = vld [vmem:[#allocation61_spill] sm:$0xff]  ;;  %v12400_v26 = vld [vmem:[#allocation66_spill] sm:$0xff] }
 0x1bf   : > { %v4357_v25 = vadd.f32 %v4356_v43, %v4355_v1  ;;  %v4109_v29 = vadd.f32 %v4108_v7, %v4107_v5  ;;  %v4193_v4 = vadd.f32 %v4192_v37, %v4191_v31  ;;  %v4463_v19 = vadd.f32 %v3941_v59, %v9078_v62  ;;  %v12396_v5 = vld [vmem:[#allocation64_spill] sm:$0xff]  ;;  %v12398_v33 = vld [vmem:[#allocation65_spill] sm:$0xff]  ;;  %v12402_v37 = vld [vmem:[#allocation67_spill] sm:$0xff] }
 0x1c0   : > { %v4274_v12 = vrot.slane %v4273_v39, 2  ;;  %v4475_v42 = vadd.f32 %v4025_v2, %v9081_v53  ;;  %v4535_v9 = vmul.f32 0.015625, %v4439_v46  ;;  %v4547_v17 = vmul.f32 0.015625, %v4451_v47 }
 0x1c1   : > { %v4358_v41 = vrot.slane %v4357_v25, 2  ;;  %v4487_v61 = vadd.f32 %v4109_v29, %v9084_v38  ;;  %v4499_v18 = vadd.f32 %v4193_v4, %v9087_v57  ;;  %v4559_v3 = vmul.f32 0.015625, %v4463_v19 }
 0x1c2   : > { %v4275_v14 = vadd.f32 %v4274_v12, %v4273_v39  ;;  %v4571_v27 = vmul.f32 0.015625, %v4475_v42  ;;  %v4631_v8 = vpack.c.bf16 %v4535_v9, %v4535_v9  ;;  %v4643_v52 = vpack.c.bf16 %v4547_v17, %v4547_v17  ;;  %v12404_v9 = vld [vmem:[#allocation68_spill] sm:$0xff]  ;;  %v12406_v17 = vld [vmem:[#allocation69_spill] sm:$0xff] }
 0x1c3   : > { %v4359_v34 = vadd.f32 %v4358_v41, %v4357_v25  ;;  %v4583_v55 = vmul.f32 0.015625, %v4487_v61  ;;  %v4595_v22 = vmul.f32 0.015625, %v4499_v18  ;;  %v4655_v60 = vpack.c.bf16 %v4559_v3, %v4559_v3 }
 0x1c4   : > { %v4276_v15 = vrot.slane %v4275_v14, 1  ;;  %v4667_v62 = vpack.c.bf16 %v4571_v27, %v4571_v27  ;;  %v5027_v48 = vunpack.c.l.b16 %v4631_v8  ;;  %v5039_v51 = vunpack.c.l.b16 %v4643_v52  ;;  %v12408_v8 = vld [vmem:[#allocation70_spill] sm:$0xff]  ;;  %v12410_v52 = vld [vmem:[#allocation71_spill] sm:$0xff] }
 0x1c5   : > { %v4360_v13 = vrot.slane %v4359_v34, 1  ;;  %v4679_v53 = vpack.c.bf16 %v4583_v55, %v4583_v55  ;;  %v4691_v16 = vpack.c.bf16 %v4595_v22, %v4595_v22  ;;  %v5051_v57 = vunpack.c.l.b16 %v4655_v60 }
 0x1c6   : > { %v4277_v21 = vadd.f32 %v4276_v15, %v4275_v14  ;;  %v5063_v20 = vunpack.c.l.b16 %v4667_v62  ;;  %v12389_v35 = vunpack.c.l.bf16 %v12388_v58  ;;  %v12391_v24 = vunpack.c.l.bf16 %v12390_v63  ;;  %v7467_v63 = vld [vmem:[#allocation5 + $0x114] ss:$8 sps:$4 sm:$0xff]  }
 0x1c7   : > { %v4361_v38 = vadd.f32 %v4360_v13, %v4359_v34  ;;  %v5075_v10 = vunpack.c.l.b16 %v4679_v53  ;;  %v5087_v30 = vunpack.c.l.b16 %v4691_v16  ;;  %v5124_v40 = vsel %vm5123_vm0, %v5039_v51, %v5027_v48 }
 0x1c8   : > { %v4511_v56 = vadd.f32 %v4277_v21, %v9114_v45  ;;  %v632_v32 = vadd.f32 %v12391_v24, %v12389_v35  ;;  %v12393_v44 = vunpack.c.l.bf16 %v12392_v49  ;;  %v12395_v1 = vunpack.c.l.bf16 %v12394_v0 }
 0x1c9   : > { %v4523_v28 = vadd.f32 %v4361_v38, %v9117_v54  ;;  %v12397_v31 = vunpack.c.l.bf16 %v12396_v5  ;;  %v12399_v45 = vunpack.c.l.bf16 %v12398_v33  ;;  %v5126_v6 = vsel %vm5125_vm1, %v5051_v57, %v5124_v40  ;;  %v7459_v38 = vld [vmem:[#allocation5 + $0x100] ss:$8 sps:$4 sm:$0xff]   ;;  %v12412_v40 = vld [vmem:[#allocation72_spill] sm:$0xff] }
 0x1ca   : > { %v716_v11 = vadd.f32 %v12395_v1, %v12393_v44  ;;  %v4607_v23 = vmul.f32 0.015625, %v4511_v56  ;;  %v633_v43 = vrot.slane %v632_v32, 4  ;;  %v12401_v7 = vunpack.c.l.bf16 %v12400_v26  ;;  %v12414_v44 = vld [vmem:[#allocation73_spill] sm:$0xff]  ;;  %v12416_v33 = vld [vmem:[#allocation74_spill] sm:$0xff] }
 0x1cb   : > { %v800_v36 = vadd.f32 %v12399_v45, %v12397_v31  ;;  %v12403_v54 = vunpack.c.l.bf16 %v12402_v37  ;;  %v4619_v50 = vmul.f32 0.015625, %v4523_v28  ;;  %v5128_v59 = vsel %vm5127_vm2, %v5063_v20, %v5126_v6 }
 0x1cc   : > { %v717_v2 = vrot.slane %v716_v11, 4  ;;  %v4703_v29 = vpack.c.bf16 %v4607_v23, %v4607_v23  ;;  %v5130_v4 = vsel %vm5129_vm3, %v5075_v10, %v5128_v59  ;;  %v634_v12 = vadd.f32 %v633_v43, %v632_v32 }
 0x1cd   : > { %v884_v39 = vadd.f32 %v12403_v54, %v12401_v7  ;;  %v801_v25 = vrot.slane %v800_v36, 4  ;;  %v4715_v41 = vpack.c.bf16 %v4619_v50, %v4619_v50  ;;  %v5132_v47 = vsel %vm5131_vm4, %v5087_v30, %v5130_v4  ;;  %v7465_v54 = vld [vmem:[#allocation5 + $0x110] ss:$8 sps:$4 sm:$0xff]  }
 0x1ce   : > { %v718_v19 = vadd.f32 %v717_v2, %v716_v11  ;;  %v5099_v14 = vunpack.c.l.b16 %v4703_v29  ;;  %v635_v61 = vrot.slane %v634_v12, 2  ;;  %v12405_v34 = vunpack.c.l.bf16 %v12404_v9  ;;  %v12420_v2 = vld [vmem:[#allocation76_spill] sm:$0xff]  ;;  %v12422_v29 = vld [vmem:[#allocation77_spill] sm:$0xff] }
 0x1cf   : > { %v885_v46 = vrot.slane %v884_v39, 4  ;;  %v802_v42 = vadd.f32 %v801_v25, %v800_v36  ;;  %v12407_v3 = vunpack.c.l.bf16 %v12406_v17  ;;  %v5111_v15 = vunpack.c.l.b16 %v4715_v41  ;;  %v12418_v36 = vld [vmem:[#allocation75_spill] sm:$0xff]  ;;  %v12428_v9 = vld [vmem:[#allocation80_spill] sm:$0xff]  ;;  %v12430_v17 = vld [vmem:[#allocation81_spill] sm:$0xff] }
 0x1d0   : > { %v719_v55 = vrot.slane %v718_v19, 2  ;;  %v12409_v13 = vunpack.c.l.bf16 %v12408_v8  ;;  %v12411_v60 = vunpack.c.l.bf16 %v12410_v52  ;;  %v5134_v21 = vsel %vm5133_vm5, %v5099_v14, %v5132_v47  ;;  %v12426_v14 = vld [vmem:[#allocation79_spill] sm:$0xff]  ;;  %v12432_v8 = vld [vmem:[#allocation82_spill] sm:$0xff] }
 0x1d1   : > { %v886_v18 = vadd.f32 %v885_v46, %v884_v39  ;;  %v968_v27 = vadd.f32 %v12407_v3, %v12405_v34  ;;  %v803_v22 = vrot.slane %v802_v42, 2  ;;  %v636_v53 = vadd.f32 %v635_v61, %v634_v12  ;;  %v7473_v46 = vld [vmem:[#allocation5 + $0x124] ss:$8 sps:$4 sm:$0xff]  }
 0x1d2   : > { %v1052_v62 = vadd.f32 %v12411_v60, %v12409_v13  ;;  %v5136_v51 = vsel %vm5135_vm6, %v5111_v15, %v5134_v21  ;;  %v720_v57 = vadd.f32 %v719_v55, %v718_v19  ;;  %v12413_v49 = vunpack.c.l.bf16 %v12412_v40  ;;  %v12424_v19 = vld [vmem:[#allocation78_spill] sm:$0xff]  ;;  %v12434_v52 = vld [vmem:[#allocation83_spill] sm:$0xff]  ;;  %v12436_v40 = vld [vmem:[#allocation84_spill] sm:$0xff] }
 0x1d3   : > { %v887_v16 = vrot.slane %v886_v18, 2  ;;  %v969_v48 = vrot.slane %v968_v27, 4  ;;  %v804_v20 = vadd.f32 %v803_v22, %v802_v42  ;;  %v5214_v10 = vpack.c.b16 %v5136_v51, %v5136_v51 }
 0x1d4   : > { %v1053_v56 = vrot.slane %v1052_v62, 4  ;;  %v637_v30 = vrot.slane %v636_v53, 1  ;;  %v721_v24 = vrot.slane %v720_v57, 1  ;;  %v12415_v0 = vunpack.c.l.bf16 %v12414_v44  ;;  %v12438_v44 = vld [vmem:[#allocation85_spill] sm:$0xff] }
 0x1d5   : > { %v888_v58 = vadd.f32 %v887_v16, %v886_v18  ;;  %v970_v35 = vadd.f32 %v969_v48, %v968_v27  ;;  %v805_v32 = vrot.slane %v804_v20, 1  ;;  %6231 = vmatmul.mubr.bf16.vlgmr.msra.gmra.mrb[0].mxu1 %v5214_v10  ;;  %v12417_v45 = vunpack.c.l.bf16 %v12416_v33  ;;  %v7479_v10 = vld [vmem:[#allocation5 + $0x134] ss:$8 sps:$4 sm:$0xff]  }
 0x1d6   : > { %v1054_v28 = vadd.f32 %v1053_v56, %v1052_v62  ;;  %v1136_v1 = vadd.f32 %v12415_v0, %v12413_v49  ;;  %v9170_v11 = vadd.f32 %v637_v30, %v636_v53  ;;  %v12419_v23 = vunpack.c.l.bf16 %v12418_v36  ;;  %6240 = vmatpush1.bf16.msra.mxu1 %v7459_v38  ;;  %v7471_v38 = vld [vmem:[#allocation5 + $0x120] ss:$8 sps:$4 sm:$0xff]  }
 0x1d7   : > { %v889_v5 = vrot.slane %v888_v58, 1  ;;  %v971_v31 = vrot.slane %v970_v35, 2  ;;  %v9176_v43 = vadd.f32 %v721_v24, %v720_v57  ;;  %v9178_v26 = vadd.f32 %v805_v32, %v804_v20  ;;  %6241 = vmatprep.subr.bf16.mxu1 %v7467_v63 }
 0x1d8   : > { %v1220_v6 = vadd.f32 %v12419_v23, %v12417_v45  ;;  %v1055_v7 = vrot.slane %v1054_v28, 2  ;;  %v1137_v37 = vrot.slane %v1136_v1, 4  ;;  %v12421_v25 = vunpack.c.l.bf16 %v12420_v2  ;;  %v12440_v45 = vld [vmem:[#allocation86_spill] sm:$0xff]  ;;  %v12442_v23 = vld [vmem:[#allocation87_spill] sm:$0xff] }
 0x1d9   : > { %v9180_v39 = vadd.f32 %v889_v5, %v888_v58  ;;  %v972_v50 = vadd.f32 %v971_v31, %v970_v35  ;;  %v12423_v4 = vunpack.c.l.bf16 %v12422_v29  ;;  %v12425_v42 = vunpack.c.l.bf16 %v12424_v19 }
 0x1da   : > { %v1221_v59 = vrot.slane %v1220_v6, 4  ;;  %v1056_v41 = vadd.f32 %v1055_v7, %v1054_v28  ;;  %v1138_v47 = vadd.f32 %v1137_v37, %v1136_v1  ;;  %v12427_v61 = vunpack.c.l.bf16 %v12426_v14  ;;  %6242 = vmatpush1.bf16.msra.mxu1 %v7465_v54  ;;  %v7477_v37 = vld [vmem:[#allocation5 + $0x130] ss:$8 sps:$4 sm:$0xff]  }
 0x1db   : > { %v1691_v12 = vadd.f32 %v12423_v4, %v12421_v25  ;;  %v12429_v34 = vunpack.c.l.bf16 %v12428_v9  ;;  %v12431_v3 = vunpack.c.l.bf16 %v12430_v17  ;;  %v973_v15 = vrot.slane %v972_v50, 1  ;;  %6243 = vmatprep.subr.bf16.mxu1 %v7473_v46  ;;  %v7485_v25 = vld [vmem:[#allocation5 + $0x144] ss:$8 sps:$4 sm:$0xff]   ;;  %v12444_v9 = vld [vmem:[#allocation88_spill] sm:$0xff]  ;;  %v12446_v17 = vld [vmem:[#allocation89_spill] sm:$0xff] }
 0x1dc   : > { %v1775_v18 = vadd.f32 %v12427_v61, %v12425_v42  ;;  %v1222_v55 = vadd.f32 %v1221_v59, %v1220_v6  ;;  %v12433_v13 = vunpack.c.l.bf16 %v12432_v8  ;;  %v12435_v60 = vunpack.c.l.bf16 %v12434_v52 }
 0x1dd   : > { %v1859_v27 = vadd.f32 %v12431_v3, %v12429_v34  ;;  %v1692_v22 = vrot.slane %v1691_v12, 4  ;;  %v1057_v21 = vrot.slane %v1056_v41, 1  ;;  %v1139_v53 = vrot.slane %v1138_v47, 2 }
 0x1de   : > { %v1943_v62 = vadd.f32 %v12435_v60, %v12433_v13  ;;  %v1776_v16 = vrot.slane %v1775_v18, 4  ;;  %v9198_v51 = vadd.f32 %v973_v15, %v972_v50  ;;  %v1223_v57 = vrot.slane %v1222_v55, 2  ;;  %6244 = vmatpush1.bf16.msra.mxu1 %v7471_v38  ;;  %v7483_v15 = vld [vmem:[#allocation5 + $0x140] ss:$8 sps:$4 sm:$0xff]   ;;  %v12450_v60 = vld [vmem:[#allocation91_spill] sm:$0xff] }
 0x1df   : > { %v1860_v48 = vrot.slane %v1859_v27, 4  ;;  %v1693_v20 = vadd.f32 %v1692_v22, %v1691_v12  ;;  %v9200_v30 = vadd.f32 %v1057_v21, %v1056_v41  ;;  %v1140_v58 = vadd.f32 %v1139_v53, %v1138_v47  ;;  %6245 = vmatprep.subr.bf16.mxu1 %v7479_v10  ;;  %v12448_v13 = vld [vmem:[#allocation90_spill] sm:$0xff]  ;;  %v7491_v53 = vld [vmem:[#allocation5 + $0x154] ss:$8 sps:$4 sm:$0xff]  }
 0x1e0   : > { %v1944_v56 = vrot.slane %v1943_v62, 4  ;;  %v1777_v35 = vadd.f32 %v1776_v16, %v1775_v18  ;;  %v1224_v24 = vadd.f32 %v1223_v57, %v1222_v55  ;;  %v12437_v49 = vunpack.c.l.bf16 %v12436_v40 }
 0x1e1   : > { %v1861_v63 = vadd.f32 %v1860_v48, %v1859_v27  ;;  %v1694_v32 = vrot.slane %v1693_v20, 2  ;;  %v12439_v0 = vunpack.c.l.bf16 %v12438_v44  ;;  %v1141_v5 = vrot.slane %v1140_v58, 1 }
 0x1e2   : > { %v1945_v28 = vadd.f32 %v1944_v56, %v1943_v62  ;;  %v1778_v31 = vrot.slane %v1777_v35, 2  ;;  %v12441_v36 = vunpack.c.l.bf16 %v12440_v45  ;;  %v12443_v6 = vunpack.c.l.bf16 %v12442_v23  ;;  %6246 = vmatpush1.bf16.msra.mxu1 %v7477_v37  ;;  %v12460_v37 = vld [vmem:[#allocation96_spill] sm:$0xff] }
 0x1e3   : > { %v2027_v1 = vadd.f32 %v12439_v0, %v12437_v49  ;;  %v1862_v33 = vrot.slane %v1861_v63, 2  ;;  %v1225_v54 = vrot.slane %v1224_v24, 1  ;;  %v1695_v50 = vadd.f32 %v1694_v32, %v1693_v20  ;;  %6247 = vmatprep.subr.bf16.mxu1 %v7485_v25  ;;  %v12452_v0 = vld [vmem:[#allocation92_spill] sm:$0xff] }
 0x1e4   : > { %v2111_v7 = vadd.f32 %v12443_v6, %v12441_v36  ;;  %v1946_v59 = vrot.slane %v1945_v28, 2  ;;  %v9210_v29 = vadd.f32 %v1141_v5, %v1140_v58  ;;  %v1779_v4 = vadd.f32 %v1778_v31, %v1777_v35  ;;  %v12454_v5 = vld [vmem:[#allocation93_spill] sm:$0xff]  ;;  %v12456_v36 = vld [vmem:[#allocation94_spill] sm:$0xff] }
 0x1e5   : > { %v2028_v2 = vrot.slane %v2027_v1, 4  ;;  %v1863_v12 = vadd.f32 %v1862_v33, %v1861_v63  ;;  %v9212_v41 = vadd.f32 %v1225_v54, %v1224_v24  ;;  %v1696_v47 = vrot.slane %v1695_v50, 1  ;;  %v7497_v33 = vld [vmem:[#allocation5 + $0x164] ss:$8 sps:$4 sm:$0xff]  }
 0x1e6   : > { %v2112_v46 = vrot.slane %v2111_v7, 4  ;;  %v1947_v19 = vadd.f32 %v1946_v59, %v1945_v28  ;;  %v1780_v14 = vrot.slane %v1779_v4, 1  ;;  %v12445_v34 = vunpack.c.l.bf16 %v12444_v9  ;;  %6248 = vmatpush1.bf16.msra.mxu1 %v7483_v15  ;;  %v7489_v28 = vld [vmem:[#allocation5 + $0x150] ss:$8 sps:$4 sm:$0xff]  }
 0x1e7   : > { %v2029_v42 = vadd.f32 %v2028_v2, %v2027_v1  ;;  %v1864_v61 = vrot.slane %v1863_v12, 1  ;;  %v12447_v3 = vunpack.c.l.bf16 %v12446_v17  ;;  %v1697_v55 = vadd.f32 %v1696_v47, %v1695_v50  ;;  %6249 = vmatprep.subr.bf16.mxu1 %v7491_v53  ;;  %v12462_v50 = vld [vmem:[#allocation97_spill] sm:$0xff]  ;;  %v12466_v47 = vld [vmem:[#allocation99_spill] sm:$0xff]  ;;  %v12468_v53 = vld [vmem:[#allocation100_spill] sm:$0xff] }
 0x1e8   : > { %v2113_v18 = vadd.f32 %v2112_v46, %v2111_v7  ;;  %v1948_v22 = vrot.slane %v1947_v19, 1  ;;  %v12449_v52 = vunpack.c.l.bf16 %v12448_v13  ;;  %v12451_v62 = vunpack.c.l.bf16 %v12450_v60 }
 0x1e9   : > { %v2195_v27 = vadd.f32 %v12447_v3, %v12445_v34  ;;  %v2030_v8 = vrot.slane %v2029_v42, 2  ;;  %v1781_v16 = vadd.f32 %v1780_v14, %v1779_v4  ;;  %v1865_v48 = vadd.f32 %v1864_v61, %v1863_v12  ;;  %v12464_v12 = vld [vmem:[#allocation98_spill] sm:$0xff] }
 0x1ea   : > { %v2279_v21 = vadd.f32 %v12451_v62, %v12449_v52  ;;  %v2114_v38 = vrot.slane %v2113_v18, 2  ;;  %v1949_v20 = vadd.f32 %v1948_v22, %v1947_v19  ;;  %v9223_v58 = vadd.f32 %v1697_v55, %v9170_v11  ;;  %6250 = vmatpush1.bf16.msra.mxu1 %v7489_v28  ;;  %v7495_v34 = vld [vmem:[#allocation5 + $0x160] ss:$8 sps:$4 sm:$0xff]   ;;  %v7503_v55 = vld [vmem:[#allocation5 + $0x174] ss:$8 sps:$4 sm:$0xff]  }
 0x1eb   : > { %v2196_v57 = vrot.slane %v2195_v27, 4  ;;  %v2031_v56 = vadd.f32 %v2030_v8, %v2029_v42  ;;  %v9226_v24 = vadd.f32 %v1781_v16, %v9176_v43  ;;  %v9229_v32 = vadd.f32 %v1865_v48, %v9178_v26  ;;  %v12458_v26 = vld [vmem:[#allocation95_spill] sm:$0xff]  ;;  %6251 = vmatprep.subr.bf16.mxu1 %v7497_v33  ;;  %v12470_v48 = vld [vmem:[#allocation101_spill] sm:$0xff] }
 0x1ec   : > { %v2280_v10 = vrot.slane %v2279_v21, 4  ;;  %v2115_v35 = vadd.f32 %v2114_v38, %v2113_v18  ;;  %v9232_v44 = vadd.f32 %v1949_v20, %v9180_v39  ;;  %v12453_v1 = vunpack.c.l.bf16 %v12452_v0 }
 0x1ed   : > { %v2197_v63 = vadd.f32 %v2196_v57, %v2195_v27  ;;  %v2032_v40 = vrot.slane %v2031_v56, 1  ;;  %v12455_v11 = vunpack.c.l.bf16 %v12454_v5  ;;  %v12457_v23 = vunpack.c.l.bf16 %v12456_v36 }
 0x1ee   : > { %v2281_v49 = vadd.f32 %v2280_v10, %v2279_v21  ;;  %v2116_v45 = vrot.slane %v2115_v35, 1  ;;  %v12459_v6 = vunpack.c.l.bf16 %v12458_v26  ;;  %v12461_v54 = vunpack.c.l.bf16 %v12460_v37  ;;  %v12472_v10 = vld [vmem:[#allocation102_spill] sm:$0xff]  ;;  %6252 = vmatpush1.bf16.msra.mxu1 %v7495_v34 }
 0x1ef   : > { %v2750_v31 = vadd.f32 %v12455_v11, %v12453_v1  ;;  %v2198_v43 = vrot.slane %v2197_v63, 2  ;;  %v12463_v59 = vunpack.c.l.bf16 %v12462_v50  ;;  %v2033_v2 = vadd.f32 %v2032_v40, %v2031_v56  ;;  %6253 = vmatprep.subr.bf16.mxu1 %v7503_v55  ;;  %v7509_v11 = vld [vmem:[#allocation5 + $0x184] ss:$8 sps:$4 sm:$0xff]   ;;  %v12476_v50 = vld [vmem:[#allocation104_spill] sm:$0xff] }
 0x1f0   : > { %v2834_v7 = vadd.f32 %v12459_v6, %v12457_v23  ;;  %v2282_v25 = vrot.slane %v2281_v49, 2  ;;  %v12465_v46 = vunpack.c.l.bf16 %v12464_v12  ;;  %v12467_v19 = vunpack.c.l.bf16 %v12466_v47  ;;  %v12480_v47 = vld [vmem:[#allocation106_spill] sm:$0xff] }
 0x1f1   : > { %v2918_v39 = vadd.f32 %v12463_v59, %v12461_v54  ;;  %v2751_v4 = vrot.slane %v2750_v31, 4  ;;  %v2117_v14 = vadd.f32 %v2116_v45, %v2115_v35  ;;  %v2199_v61 = vadd.f32 %v2198_v43, %v2197_v63  ;;  %v12474_v63 = vld [vmem:[#allocation103_spill] sm:$0xff] }
 0x1f2   : > { %v3002_v42 = vadd.f32 %v12467_v19, %v12465_v46  ;;  %v2835_v18 = vrot.slane %v2834_v7, 4  ;;  %v2283_v17 = vadd.f32 %v2282_v25, %v2281_v49  ;;  %v9251_v3 = vadd.f32 %v2033_v2, %v9198_v51 }
 0x1f3   : > { %v2919_v9 = vrot.slane %v2918_v39, 4  ;;  %v2752_v27 = vadd.f32 %v2751_v4, %v2750_v31  ;;  %v2200_v22 = vrot.slane %v2199_v61, 1  ;;  %v9254_v8 = vadd.f32 %v2117_v14, %v9200_v30  ;;  %v7501_v30 = vld [vmem:[#allocation5 + $0x170] ss:$8 sps:$4 sm:$0xff]  }
 0x1f4   : > { %v3003_v15 = vrot.slane %v3002_v42, 4  ;;  %v2836_v13 = vadd.f32 %v2835_v18, %v2834_v7  ;;  %v2284_v60 = vrot.slane %v2283_v17, 1  ;;  %v12469_v16 = vunpack.c.l.bf16 %v12468_v53  ;;  %6254 = vmatpush1.bf16.msra.mxu1 %v7501_v30  ;;  %v12492_v30 = vld [vmem:[#allocation112_spill] sm:$0xff] }
 0x1f5   : > { %v2920_v52 = vadd.f32 %v2919_v9, %v2918_v39  ;;  %v2753_v62 = vrot.slane %v2752_v27, 2  ;;  %v12471_v38 = vunpack.c.l.bf16 %v12470_v48  ;;  %v2201_v51 = vadd.f32 %v2200_v22, %v2199_v61  ;;  %v12478_v39 = vld [vmem:[#allocation105_spill] sm:$0xff]  ;;  %6255 = vmatprep.subr.bf16.mxu1 %v7509_v11 }
 0x1f6   : > { %v3004_v21 = vadd.f32 %v3003_v15, %v3002_v42  ;;  %v2837_v20 = vrot.slane %v2836_v13, 2  ;;  %v12473_v35 = vunpack.c.l.bf16 %v12472_v10  ;;  %v12475_v28 = vunpack.c.l.bf16 %v12474_v63  ;;  %v7515_v61 = vld [vmem:[#allocation5 + $0x194] ss:$8 sps:$4 sm:$0xff]  }
 0x1f7   : > { %v3086_v57 = vadd.f32 %v12471_v38, %v12469_v16  ;;  %v2921_v56 = vrot.slane %v2920_v52, 2  ;;  %v2285_v49 = vadd.f32 %v2284_v60, %v2283_v17  ;;  %v2754_v0 = vadd.f32 %v2753_v62, %v2752_v27  ;;  %v12484_v38 = vld [vmem:[#allocation108_spill] sm:$0xff] }
 0x1f8   : > { %v3170_v40 = vadd.f32 %v12475_v28, %v12473_v35  ;;  %v3005_v1 = vrot.slane %v3004_v21, 2  ;;  %v9265_v31 = vadd.f32 %v2201_v51, %v9210_v29  ;;  %v2838_v33 = vadd.f32 %v2837_v20, %v2836_v13  ;;  %v7507_v29 = vld [vmem:[#allocation5 + $0x180] ss:$8 sps:$4 sm:$0xff]  }
 0x1f9   : > { %v3087_v5 = vrot.slane %v3086_v57, 4  ;;  %v2922_v45 = vadd.f32 %v2921_v56, %v2920_v52  ;;  %v9268_v36 = vadd.f32 %v2285_v49, %v9212_v41  ;;  %v2755_v23 = vrot.slane %v2754_v0, 1  ;;  %v12482_v41 = vld [vmem:[#allocation107_spill] sm:$0xff]  ;;  %6256 = vmatpush1.bf16.msra.mxu1 %v7507_v29  ;;  %v12486_v51 = vld [vmem:[#allocation109_spill] sm:$0xff]  ;;  %v12488_v35 = vld [vmem:[#allocation110_spill] sm:$0xff] }
 0x1fa   : > { %v3171_v43 = vrot.slane %v3170_v40, 4  ;;  %v3006_v26 = vadd.f32 %v3005_v1, %v3004_v21  ;;  %v2839_v7 = vrot.slane %v2838_v33, 1  ;;  %v12477_v59 = vunpack.c.l.bf16 %v12476_v50  ;;  %v7513_v21 = vld [vmem:[#allocation5 + $0x190] ss:$8 sps:$4 sm:$0xff]   ;;  %6257 = vmatprep.subr.bf16.mxu1 %v7515_v61  ;;  %v7521_v56 = vld [vmem:[#allocation5 + $0x1a4] ss:$8 sps:$4 sm:$0xff]  }
 0x1fb   : > { %v3088_v6 = vadd.f32 %v3087_v5, %v3086_v57  ;;  %v2923_v37 = vrot.slane %v2922_v45, 1  ;;  %v12479_v2 = vunpack.c.l.bf16 %v12478_v39  ;;  %v2756_v4 = vadd.f32 %v2755_v23, %v2754_v0  ;;  %v12494_v0 = vld [vmem:[#allocation113_spill] sm:$0xff]  ;;  %v12498_v23 = vld [vmem:[#allocation115_spill] sm:$0xff]  ;;  %v12500_v61 = vld [vmem:[#allocation116_spill] sm:$0xff] }
 0x1fc   : > { %v3172_v54 = vadd.f32 %v3171_v43, %v3170_v40  ;;  %v3007_v12 = vrot.slane %v3006_v26, 1  ;;  %v12481_v19 = vunpack.c.l.bf16 %v12480_v47  ;;  %v12483_v42 = vunpack.c.l.bf16 %v12482_v41 }
 0x1fd   : > { %v3254_v25 = vadd.f32 %v12479_v2, %v12477_v59  ;;  %v3089_v46 = vrot.slane %v3088_v6, 2  ;;  %v2840_v18 = vadd.f32 %v2839_v7, %v2838_v33  ;;  %v2924_v9 = vadd.f32 %v2923_v37, %v2922_v45  ;;  %v12496_v45 = vld [vmem:[#allocation114_spill] sm:$0xff]  ;;  %6258 = vmatpush1.bf16.msra.mxu1 %v7513_v21 }
 0x1fe   : > { %v3338_v14 = vadd.f32 %v12483_v42, %v12481_v19  ;;  %v3173_v34 = vrot.slane %v3172_v54, 2  ;;  %v3008_v27 = vadd.f32 %v3007_v12, %v3006_v26  ;;  %v9279_v22 = vadd.f32 %v2756_v4, %v9223_v58  ;;  %v7519_v59 = vld [vmem:[#allocation5 + $0x1a0] ss:$8 sps:$4 sm:$0xff]   ;;  %6259 = vmatprep.subr.bf16.mxu1 %v7521_v56  ;;  %v7527_v4 = vld [vmem:[#allocation5 + $0x1b4] ss:$8 sps:$4 sm:$0xff]  }
 0x1ff   : > { %v3255_v17 = vrot.slane %v3254_v25, 4  ;;  %v3090_v15 = vadd.f32 %v3089_v46, %v3088_v6  ;;  %v9282_v60 = vadd.f32 %v2840_v18, %v9226_v24  ;;  %v9285_v62 = vadd.f32 %v2924_v9, %v9229_v32  ;;  %v12490_v32 = vld [vmem:[#allocation111_spill] sm:$0xff]  ;;  %v12502_v9 = vld [vmem:[#allocation117_spill] sm:$0xff] }
 0x200   : > { %v3339_v55 = vrot.slane %v3338_v14, 4  ;;  %v3174_v13 = vadd.f32 %v3173_v34, %v3172_v54  ;;  %v9288_v48 = vadd.f32 %v3008_v27, %v9232_v44  ;;  %v12485_v57 = vunpack.c.l.bf16 %v12484_v38 }
 0x201   : > { %v3256_v52 = vadd.f32 %v3255_v17, %v3254_v25  ;;  %v3091_v53 = vrot.slane %v3090_v15, 1  ;;  %v12487_v58 = vunpack.c.l.bf16 %v12486_v51  ;;  %v12489_v63 = vunpack.c.l.bf16 %v12488_v35  ;;  %6260 = vmatpush1.bf16.msra.mxu1 %v7519_v59 }
 0x202   : > { %v3340_v16 = vadd.f32 %v3339_v55, %v3338_v14  ;;  %v3175_v10 = vrot.slane %v3174_v13, 1  ;;  %v12491_v28 = vunpack.c.l.bf16 %v12490_v32  ;;  %v12493_v49 = vunpack.c.l.bf16 %v12492_v30  ;;  %v12504_v55 = vld [vmem:[#allocation118_spill] sm:$0xff]  ;;  %6261 = vmatprep.subr.bf16.mxu1 %v7527_v4 }
 0x203   : > { %v3809_v20 = vadd.f32 %v12487_v58, %v12485_v57  ;;  %v3257_v24 = vrot.slane %v3256_v52, 2  ;;  %v12495_v1 = vunpack.c.l.bf16 %v12494_v0  ;;  %v3092_v5 = vadd.f32 %v3091_v53, %v3090_v15  ;;  %v7533_v58 = vld [vmem:[#allocation5 + $0x1c4] ss:$8 sps:$4 sm:$0xff]   ;;  %v12508_v0 = vld [vmem:[#allocation120_spill] sm:$0xff] }
 0x204   : > { %v3893_v40 = vadd.f32 %v12491_v28, %v12489_v63  ;;  %v3341_v11 = vrot.slane %v3340_v16, 2  ;;  %v12497_v43 = vunpack.c.l.bf16 %v12496_v45  ;;  %v12499_v26 = vunpack.c.l.bf16 %v12498_v23  ;;  %v12512_v23 = vld [vmem:[#allocation122_spill] sm:$0xff] }
 0x205   : > { %v3977_v44 = vadd.f32 %v12495_v1, %v12493_v49  ;;  %v3810_v33 = vrot.slane %v3809_v20, 4  ;;  %v3176_v7 = vadd.f32 %v3175_v10, %v3174_v13  ;;  %v3258_v37 = vadd.f32 %v3257_v24, %v3256_v52  ;;  %v12506_v52 = vld [vmem:[#allocation119_spill] sm:$0xff] }
 0x206   : > { %v4061_v6 = vadd.f32 %v12499_v26, %v12497_v43  ;;  %v3894_v54 = vrot.slane %v3893_v40, 4  ;;  %v3342_v39 = vadd.f32 %v3341_v11, %v3340_v16  ;;  %v9307_v2 = vadd.f32 %v3092_v5, %v9251_v3 }
 0x207   : > { %v3978_v50 = vrot.slane %v3977_v44, 4  ;;  %v3811_v25 = vadd.f32 %v3810_v33, %v3809_v20  ;;  %v3259_v12 = vrot.slane %v3258_v37, 1  ;;  %v9310_v46 = vadd.f32 %v3176_v7, %v9254_v8  ;;  %v7525_v8 = vld [vmem:[#allocation5 + $0x1b0] ss:$8 sps:$4 sm:$0xff]  }
 0x208   : > { %v4062_v29 = vrot.slane %v4061_v6, 4  ;;  %v3895_v47 = vadd.f32 %v3894_v54, %v3893_v40  ;;  %v3343_v41 = vrot.slane %v3342_v39, 1  ;;  %v12501_v18 = vunpack.c.l.bf16 %v12500_v61  ;;  %6262 = vmatpush1.bf16.msra.mxu1 %v7525_v8 }
 0x209   : > { %v3979_v19 = vadd.f32 %v3978_v50, %v3977_v44  ;;  %v3812_v42 = vrot.slane %v3811_v25, 2  ;;  %v12503_v34 = vunpack.c.l.bf16 %v12502_v9  ;;  %v3260_v3 = vadd.f32 %v3259_v12, %v3258_v37  ;;  %v12510_v44 = vld [vmem:[#allocation121_spill] sm:$0xff]  ;;  %6263 = vmatprep.subr.bf16.mxu1 %v7533_v58 }
 0x20a   : > { %v4063_v14 = vadd.f32 %v4062_v29, %v4061_v6  ;;  %v3896_v27 = vrot.slane %v3895_v47, 2  ;;  %v12505_v13 = vunpack.c.l.bf16 %v12504_v55  ;;  %v12507_v21 = vunpack.c.l.bf16 %v12506_v52  ;;  %v7539_v37 = vld [vmem:[#allocation5 + $0x1d4] ss:$8 sps:$4 sm:$0xff]  }
 0x20b   : > { %v4145_v17 = vadd.f32 %v12503_v34, %v12501_v18  ;;  %v3980_v15 = vrot.slane %v3979_v19, 2  ;;  %v3344_v16 = vadd.f32 %v3343_v41, %v3342_v39  ;;  %v3813_v38 = vadd.f32 %v3812_v42, %v3811_v25 }
 0x20c   : > { %v4229_v53 = vadd.f32 %v12507_v21, %v12505_v13  ;;  %v4064_v57 = vrot.slane %v4063_v14, 2  ;;  %v9321_v20 = vadd.f32 %v3260_v3, %v9265_v31  ;;  %v3897_v56 = vadd.f32 %v3896_v27, %v3895_v47  ;;  %v7531_v31 = vld [vmem:[#allocation5 + $0x1c0] ss:$8 sps:$4 sm:$0xff]  }
 0x20d   : > { %v4146_v51 = vrot.slane %v4145_v17, 4  ;;  %v3981_v10 = vadd.f32 %v3980_v15, %v3979_v19  ;;  %v9324_v35 = vadd.f32 %v3344_v16, %v9268_v36  ;;  %v3814_v63 = vrot.slane %v3813_v38, 1  ;;  %v12514_v36 = vld [vmem:[#allocation123_spill] sm:$0xff]  ;;  %6264 = vmatpush1.bf16.msra.mxu1 %v7531_v31  ;;  %v7543_v16 = vld [vmem:[#allocation5 + $0x1e0] ss:$8 sps:$4 sm:$0xff]  }
 0x20e   : > { %v4230_v24 = vrot.slane %v4229_v53, 4  ;;  %v4065_v32 = vadd.f32 %v4064_v57, %v4063_v14  ;;  %v3898_v40 = vrot.slane %v3897_v56, 1  ;;  %v12509_v1 = vunpack.c.l.bf16 %v12508_v0  ;;  %v7537_v14 = vld [vmem:[#allocation5 + $0x1d0] ss:$8 sps:$4 sm:$0xff]   ;;  %6265 = vmatprep.subr.bf16.mxu1 %v7539_v37  ;;  %v9360_v37 = vld [vmem:[%s8123_s9 + $0x308] sm:$0xff] }
 0x20f   : > { %v4147_v28 = vadd.f32 %v4146_v51, %v4145_v17  ;;  %v3982_v30 = vrot.slane %v3981_v10, 1  ;;  %v12511_v5 = vunpack.c.l.bf16 %v12510_v44  ;;  %v3815_v33 = vadd.f32 %v3814_v63, %v3813_v38  ;;  %v7545_v17 = vld [vmem:[#allocation5 + $0x1e4] ss:$8 sps:$4 sm:$0xff]  }
 0x210   : > { %v4231_v49 = vadd.f32 %v4230_v24, %v4229_v53  ;;  %v4066_v45 = vrot.slane %v4065_v32, 1  ;;  %v12513_v26 = vunpack.c.l.bf16 %v12512_v23  ;;  %v12515_v6 = vunpack.c.l.bf16 %v12514_v36  ;;  %v7504_v23 = vld [vmem:[#allocation5 + $0x470] ss:$8 sps:$4 sm:$0xff]  }
 0x211   : > { %v4313_v11 = vadd.f32 %v12511_v5, %v12509_v1  ;;  %v4148_v43 = vrot.slane %v4147_v28, 2  ;;  %v3899_v54 = vadd.f32 %v3898_v40, %v3897_v56  ;;  %v3983_v50 = vadd.f32 %v3982_v30, %v3981_v10  ;;  %6266 = vmatpush1.bf16.msra.mxu1 %v7537_v14  ;;  %v7551_v56 = vld [vmem:[#allocation5 + $0x1f4] ss:$8 sps:$4 sm:$0xff]   ;;  %v7549_v5 = vld [vmem:[#allocation5 + $0x1f0] ss:$8 sps:$4 sm:$0xff]   ;;  %v9379_v14 = vld [vmem:[%s8123_s9 + $0x608] sm:$0xff] }
 0x212   : > { %v4397_v7 = vadd.f32 %v12515_v6, %v12513_v26  ;;  %v4232_v59 = vrot.slane %v4231_v49, 2  ;;  %v4067_v25 = vadd.f32 %v4066_v45, %v4065_v32  ;;  %v4445_v12 = vadd.f32 %v3815_v33, %v9279_v22  ;;  %6267 = vmatprep.subr.bf16.mxu1 %v7545_v17  ;;  %v7557_v26 = vld [vmem:[#allocation5 + $0x204] ss:$8 sps:$4 sm:$0xff]   ;;  %v9385_v17 = vld [vmem:[%s8123_s9 + $0x638] sm:$0xff] }
 0x213   : > { %v4314_v39 = vrot.slane %v4313_v11, 4  ;;  %v4149_v29 = vadd.f32 %v4148_v43, %v4147_v28  ;;  %v4457_v41 = vadd.f32 %v3899_v54, %v9282_v60  ;;  %v4469_v42 = vadd.f32 %v3983_v50, %v9285_v62  ;;  %v9344_v28 = vld [vmem:[%s8123_s9 + $0x38] sm:$0xff] }
 0x214   : > { %v4398_v4 = vrot.slane %v4397_v7, 4  ;;  %v4233_v47 = vadd.f32 %v4232_v59, %v4231_v49  ;;  %v4481_v9 = vadd.f32 %v4067_v25, %v9288_v48  ;;  %v4541_v34 = vmul.f32 0.015625, %v4445_v12  ;;  %v9339_v48 = vld [vmem:[%s8123_s9 + $0x8] sm:$0xff]  ;;  %v9354_v43 = vld [vmem:[%s8123_s9 + $0x1b8] sm:$0xff] }
 0x215   : > { %v4315_v19 = vadd.f32 %v4314_v39, %v4313_v11  ;;  %v4150_v61 = vrot.slane %v4149_v29, 1  ;;  %v4553_v15 = vmul.f32 0.015625, %v4457_v41  ;;  %v4565_v22 = vmul.f32 0.015625, %v4469_v42  ;;  %6268 = vmatpush1.bf16.msra.mxu1 %v7543_v16  ;;  %v9349_v11 = vld [vmem:[%s8123_s9 + $0x188] sm:$0xff]  ;;  %v9365_v39 = vld [vmem:[%s8123_s9 + $0x338] sm:$0xff] }
 0x216   : > { %v4399_v18 = vadd.f32 %v4398_v4, %v4397_v7  ;;  %v4234_v3 = vrot.slane %v4233_v47, 1  ;;  %v4577_v52 = vmul.f32 0.015625, %v4481_v9  ;;  %v4637_v60 = vpack.c.bf16 %v4541_v34, %v4541_v34  ;;  %6269 = vmatprep.subr.bf16.mxu1 %v7551_v56  ;;  %v9370_v12 = vld [vmem:[%s8123_s9 + $0x488] sm:$0xff]  ;;  %v9511_v16 = vld [vmem:[%s8123_s9 + $0xb18] sm:$0xff] }
 0x217   : > { %v4316_v27 = vrot.slane %v4315_v19, 2  ;;  %v4151_v55 = vadd.f32 %v4150_v61, %v4149_v29  ;;  %v4649_v53 = vpack.c.bf16 %v4553_v15, %v4553_v15  ;;  %v4661_v8 = vpack.c.bf16 %v4565_v22, %v4565_v22  ;;  %12527 = vst [vmem:[#allocation27_spill] sm:$0xff] %v9511_v16 }
 0x218   : > { %v4400_v13 = vrot.slane %v4399_v18, 2  ;;  %v4235_v21 = vadd.f32 %v4234_v3, %v4233_v47  ;;  %v4673_v51 = vpack.c.bf16 %v4577_v52, %v4577_v52  ;;  %v5033_v58 = vunpack.c.l.b16 %v4637_v60  ;;  %v9373_v47 = vld [vmem:[%s8123_s9 + $0x4b8] sm:$0xff]  ;;  %v9388_v3 = vld [vmem:[%s8123_s9 + $0x788] sm:$0xff] }
 0x219   : > { %v4317_v62 = vadd.f32 %v4316_v27, %v4315_v19  ;;  %v4493_v57 = vadd.f32 %v4151_v55, %v9307_v2  ;;  %v5045_v63 = vunpack.c.l.b16 %v4649_v53  ;;  %v5057_v32 = vunpack.c.l.b16 %v4661_v8  ;;  %6270 = vmatpush1.bf16.msra.mxu1 %v7549_v5  ;;  %v9393_v55 = vld [vmem:[%s8123_s9 + $0x7b8] sm:$0xff]  ;;  %v7498_v60 = vld [vmem:[#allocation5 + $0x460] ss:$8 sps:$4 sm:$0xff]  }
 0x21a   : > { %v4401_v38 = vadd.f32 %v4400_v13, %v4399_v18  ;;  %v4505_v24 = vadd.f32 %v4235_v21, %v9310_v46  ;;  %v5069_v49 = vunpack.c.l.b16 %v4673_v51  ;;  %v401_v46 = vunpack.c.h.bf16 %v9339_v48  ;;  %6280 = vmatprep.subr.bf16.mxu1 %v7557_v26  ;;  %v9402_v53 = vld [vmem:[%s8123_s9 + $0x938] sm:$0xff]  ;;  %v9408_v51 = vld [vmem:[%s8123_s9 + $0xa88] sm:$0xff] }
 0x21b   : > { %v4318_v10 = vrot.slane %v4317_v62, 1  ;;  %v4589_v30 = vmul.f32 0.015625, %v4493_v57  ;;  %v5172_v44 = vsel %vm5123_vm0, %v5045_v63, %v5033_v58  ;;  %v413_v54 = vunpack.c.h.bf16 %v9344_v28  ;;  %v9415_v63 = vld [vmem:[%s8123_s9 + $0xab8] sm:$0xff]  ;;  %v7500_v58 = vld [vmem:[#allocation5 + $0x464] ss:$8 sps:$4 sm:$0xff]  }
 0x21c   : > { %v4402_v40 = vrot.slane %v4401_v38, 1  ;;  %v4601_v2 = vmul.f32 0.015625, %v4505_v24  ;;  %v5173_v45 = vsel %vm5125_vm1, %v5057_v32, %v5172_v44  ;;  %v425_v29 = vunpack.c.h.bf16 %v9349_v11 }
 0x21d   : > { %v4319_v1 = vadd.f32 %v4318_v10, %v4317_v62  ;;  %v4685_v33 = vpack.c.bf16 %v4589_v30, %v4589_v30  ;;  %v5174_v7 = vsel %vm5127_vm2, %v5069_v49, %v5173_v45  ;;  %v449_v18 = vunpack.c.h.bf16 %v9360_v37  ;;  %v9399_v62 = vld [vmem:[%s8123_s9 + $0x908] sm:$0xff]  ;;  %v7506_v10 = vld [vmem:[#allocation5 + $0x474] ss:$8 sps:$4 sm:$0xff]  }
 0x21e   : > { %v4403_v31 = vadd.f32 %v4402_v40, %v4401_v38  ;;  %v4697_v6 = vpack.c.bf16 %v4601_v2, %v4601_v2  ;;  %v461_v15 = vunpack.c.h.bf16 %v9365_v39  ;;  %v473_v52 = vunpack.c.h.bf16 %v9370_v12  ;;  %v7462_v49 = vld [vmem:[#allocation5 + $0x400] ss:$8 sps:$4 sm:$0xff]  }
 0x21f   : > { %v4517_v36 = vadd.f32 %v4319_v1, %v9321_v20  ;;  %v5081_v59 = vunpack.c.l.b16 %v4685_v33  ;;  %v485_v8 = vunpack.c.h.bf16 %v9373_v47  ;;  %v497_v38 = vunpack.c.h.bf16 %v9379_v14  ;;  %v7470_v33 = vld [vmem:[#allocation5 + $0x414] ss:$8 sps:$4 sm:$0xff]  }
 0x220   : > { %v4529_v50 = vadd.f32 %v4403_v31, %v9324_v35  ;;  %v5093_v20 = vunpack.c.l.b16 %v4697_v6  ;;  %v437_v35 = vunpack.c.h.bf16 %v9354_v43  ;;  %v509_v56 = vunpack.c.h.bf16 %v9385_v17 }
 0x221   : > { %v4613_v4 = vmul.f32 0.015625, %v4517_v36  ;;  %v5175_v42 = vsel %vm5129_vm3, %v5081_v59, %v5174_v7  ;;  %v521_v32 = vunpack.c.h.bf16 %v9388_v3  ;;  %v533_v30 = vunpack.c.h.bf16 %v9393_v55 }
 0x222   : > { %v4625_v41 = vmul.f32 0.015625, %v4529_v50  ;;  %v5176_v34 = vsel %vm5131_vm4, %v5093_v20, %v5175_v42  ;;  %v545_v44 = vunpack.c.h.bf16 %v9399_v62  ;;  %v557_v45 = vunpack.c.h.bf16 %v9402_v53 }
 0x223   : > { %v4709_v9 = vpack.c.bf16 %v4613_v4, %v4613_v4  ;;  %v569_v36 = vunpack.c.h.bf16 %v9408_v51  ;;  %v581_v7 = vunpack.c.h.bf16 %v9415_v63  ;;  %v611_v50 = vadd.f32 %v413_v54, %v401_v46 }
 0x224   : > { %v4721_v22 = vpack.c.bf16 %v4625_v41, %v4625_v41  ;;  %v695_v59 = vadd.f32 %v437_v35, %v425_v29  ;;  %v779_v4 = vadd.f32 %v461_v15, %v449_v18  ;;  %v863_v20 = vadd.f32 %v485_v8, %v473_v52  ;;  %v7474_v8 = vld [vmem:[#allocation5 + $0x420] ss:$8 sps:$4 sm:$0xff]  }
 0x225   : > { %v5105_v21 = vunpack.c.l.b16 %v4709_v9  ;;  %v947_v41 = vadd.f32 %v509_v56, %v497_v38  ;;  %v1031_v42 = vadd.f32 %v533_v30, %v521_v32  ;;  %v7468_v9 = vld [vmem:[#allocation5 + $0x410] ss:$8 sps:$4 sm:$0xff]  }
 0x226   : > { %v5117_v57 = vunpack.c.l.b16 %v4721_v22  ;;  %v696_v22 = vrot.slane %v695_v59, 4  ;;  %v864_v6 = vrot.slane %v863_v20, 4 }
 0x227   : > { %v5177_v24 = vsel %vm5133_vm5, %v5105_v21, %v5176_v34  ;;  %v612_v34 = vrot.slane %v611_v50, 4  ;;  %v1115_v21 = vadd.f32 %v557_v45, %v545_v44  ;;  %v948_v26 = vrot.slane %v947_v41, 4 }
 0x228   : > { %v5178_v1 = vsel %vm5135_vm6, %v5117_v57, %v5177_v24  ;;  %v1199_v57 = vadd.f32 %v581_v7, %v569_v36  ;;  %v7476_v24 = vld [vmem:[#allocation5 + $0x424] ss:$8 sps:$4 sm:$0xff]   ;;  %v1032_v5 = vrot.slane %v1031_v42, 4  ;;  %v697_v46 = vadd.f32 %v696_v22, %v695_v59 }
 0x229   : > { %v5220_v31 = vpack.c.b16 %v5178_v1, %v5178_v1  ;;  %v780_v1 = vrot.slane %v779_v4, 4  ;;  %v613_v2 = vadd.f32 %v612_v34, %v611_v50  ;;  %v1116_v54 = vrot.slane %v1115_v21, 4 }
 0x22a   : > { %v1200_v29 = vrot.slane %v1199_v57, 4  ;;  %v865_v18 = vadd.f32 %v864_v6, %v863_v20  ;;  %v949_v15 = vadd.f32 %v948_v26, %v947_v41  ;;  %v1033_v52 = vadd.f32 %v1032_v5, %v1031_v42  ;;  %v7480_v20 = vld [vmem:[#allocation5 + $0x430] ss:$8 sps:$4 sm:$0xff]   ;;  %v7488_v41 = vld [vmem:[#allocation5 + $0x444] ss:$8 sps:$4 sm:$0xff]  }
 0x22b   : > { %6354 = vmatmul.mubr.bf16.vlgmr.msra.gmra.mrb[0].mxu0 %v5220_v31  ;;  %v781_v35 = vadd.f32 %v780_v1, %v779_v4  ;;  %v614_v38 = vrot.slane %v613_v2, 2  ;;  %v698_v56 = vrot.slane %v697_v46, 2  ;;  %v1117_v32 = vadd.f32 %v1116_v54, %v1115_v21  ;;  %v9432_v1 = vld [vmem:[%s8123_s9 + $0x68] sm:$0xff] }
 0x22c   : > { %6363 = vmatpush1.bf16.msra.mxu0 %v7462_v49  ;;  %v1201_v30 = vadd.f32 %v1200_v29, %v1199_v57  ;;  %v7482_v49 = vld [vmem:[#allocation5 + $0x434] ss:$8 sps:$4 sm:$0xff]   ;;  %v866_v31 = vrot.slane %v865_v18, 2  ;;  %v1034_v45 = vrot.slane %v1033_v52, 2 }
 0x22d   : > { %6364 = vmatprep.subr.bf16.mxu0 %v7470_v33  ;;  %v782_v44 = vrot.slane %v781_v35, 2  ;;  %v950_v33 = vrot.slane %v949_v15, 2  ;;  %v615_v36 = vadd.f32 %v614_v38, %v613_v2  ;;  %v699_v7 = vadd.f32 %v698_v56, %v697_v46 }
 0x22e   : > { %v1118_v50 = vrot.slane %v1117_v32, 2  ;;  %v1202_v59 = vrot.slane %v1201_v30, 2  ;;  %v867_v26 = vadd.f32 %v866_v31, %v865_v18  ;;  %v1035_v6 = vadd.f32 %v1034_v45, %v1033_v52  ;;  %v9439_v18 = vld [vmem:[%s8123_s9 + $0x98] sm:$0xff]  ;;  %v9466_v45 = vld [vmem:[%s8123_s9 + $0x4e8] sm:$0xff] }
 0x22f   : > { %v783_v4 = vadd.f32 %v782_v44, %v781_v35  ;;  %v951_v5 = vadd.f32 %v950_v33, %v949_v15  ;;  %v616_v42 = vrot.slane %v615_v36, 1  ;;  %v9442_v15 = vld [vmem:[%s8123_s9 + $0x1e8] sm:$0xff]  ;;  %v9463_v33 = vld [vmem:[%s8123_s9 + $0x398] sm:$0xff]  ;;  %12518 = vst [vmem:[#allocation18_spill] sm:$0xff] %v9466_v45 }
 0x230   : > { %6365 = vmatpush1.bf16.msra.mxu0 %v7468_v9  ;;  %v700_v9 = vrot.slane %v699_v7, 1  ;;  %v1119_v34 = vadd.f32 %v1118_v50, %v1117_v32  ;;  %v1203_v22 = vadd.f32 %v1202_v59, %v1201_v30  ;;  %v868_v21 = vrot.slane %v867_v26, 1  ;;  %v9453_v32 = vld [vmem:[%s8123_s9 + $0x218] sm:$0xff]  ;;  %v9456_v30 = vld [vmem:[%s8123_s9 + $0x368] sm:$0xff]  ;;  %12517 = vst [vmem:[#allocation17_spill] sm:$0xff] %v9463_v33 }
 0x231   : > { %6366 = vmatprep.subr.bf16.mxu0 %v7476_v24  ;;  %v784_v2 = vrot.slane %v783_v4, 1  ;;  %v952_v57 = vrot.slane %v951_v5, 1  ;;  %v1036_v24 = vrot.slane %v1035_v6, 1  ;;  %v9434_v46 = vadd.f32 %v616_v42, %v615_v36  ;;  %12516 = vst [vmem:[#allocation16_spill] sm:$0xff] %v9456_v30  ;;  %v7494_v50 = vld [vmem:[#allocation5 + $0x454] ss:$8 sps:$4 sm:$0xff]  }
 0x232   : > { %v9436_v54 = vadd.f32 %v700_v9, %v699_v7  ;;  %v1120_v29 = vrot.slane %v1119_v34, 1  ;;  %v1204_v35 = vrot.slane %v1203_v22, 1  ;;  %v1460_v7 = vunpack.c.h.bf16 %v9432_v1  ;;  %v9471_v59 = vld [vmem:[%s8123_s9 + $0x518] sm:$0xff]  ;;  %v9484_v9 = vld [vmem:[%s8123_s9 + $0x7e8] sm:$0xff] }
 0x233   : > { %v9444_v52 = vadd.f32 %v784_v2, %v783_v4  ;;  %v9448_v38 = vadd.f32 %v952_v57, %v951_v5  ;;  %v9450_v56 = vadd.f32 %v1036_v24, %v1035_v6  ;;  %12519 = vst [vmem:[#allocation19_spill] sm:$0xff] %v9471_v59  ;;  %v9474_v4 = vld [vmem:[%s8123_s9 + $0x668] sm:$0xff]  ;;  %v1472_v5 = vunpack.c.h.bf16 %v9439_v18  ;;  %v9481_v42 = vld [vmem:[%s8123_s9 + $0x698] sm:$0xff]  ;;  %12522 = vst [vmem:[#allocation22_spill] sm:$0xff] %v9484_v9 }
 0x234   : > { %6367 = vmatpush1.bf16.msra.mxu0 %v7474_v8  ;;  %v9446_v8 = vadd.f32 %v868_v21, %v867_v26  ;;  %v9458_v44 = vadd.f32 %v1120_v29, %v1119_v34  ;;  %v9460_v31 = vadd.f32 %v1204_v35, %v1203_v22  ;;  %12520 = vst [vmem:[#allocation20_spill] sm:$0xff] %v9474_v4  ;;  %12521 = vst [vmem:[#allocation21_spill] sm:$0xff] %v9481_v42  ;;  %v9491_v21 = vld [vmem:[%s8123_s9 + $0x818] sm:$0xff]  ;;  %v9494_v57 = vld [vmem:[%s8123_s9 + $0x968] sm:$0xff] }
 0x235   : > { %6368 = vmatprep.subr.bf16.mxu0 %v7482_v49  ;;  %v7486_v49 = vld [vmem:[#allocation5 + $0x440] ss:$8 sps:$4 sm:$0xff]   ;;  %v1496_v34 = vunpack.c.h.bf16 %v9453_v32  ;;  %v1508_v2 = vunpack.c.h.bf16 %v9456_v30  ;;  %12523 = vst [vmem:[#allocation23_spill] sm:$0xff] %v9491_v21  ;;  %12524 = vst [vmem:[#allocation24_spill] sm:$0xff] %v9494_v57  ;;  %v1520_v29 = vunpack.c.h.bf16 %v9463_v33  ;;  %v1532_v6 = vunpack.c.h.bf16 %v9466_v45  ;;  %v9501_v26 = vld [vmem:[%s8123_s9 + $0x998] sm:$0xff] }
 0x236   : > { %12525 = vst [vmem:[#allocation25_spill] sm:$0xff] %v9501_v26  ;;  %v9504_v22 = vld [vmem:[%s8123_s9 + $0xae8] sm:$0xff]  ;;  %v1544_v40 = vunpack.c.h.bf16 %v9471_v59  ;;  %v1556_v24 = vunpack.c.h.bf16 %v9474_v4  ;;  %v1580_v13 = vunpack.c.h.bf16 %v9484_v9  ;;  %v1592_v27 = vunpack.c.h.bf16 %v9491_v21 }
 0x237   : > { %12526 = vst [vmem:[#allocation26_spill] sm:$0xff] %v9504_v22  ;;  %v1604_v61 = vunpack.c.h.bf16 %v9494_v57  ;;  %v1616_v19 = vunpack.c.h.bf16 %v9501_v26  ;;  %v1628_v25 = vunpack.c.h.bf16 %v9504_v22  ;;  %v1640_v36 = vunpack.c.h.bf16 %v9511_v16 }
 0x238   : > { %6369 = vmatpush1.bf16.msra.mxu0 %v7480_v20  ;;  %v1484_v20 = vunpack.c.h.bf16 %v9442_v15  ;;  %v1670_v0 = vadd.f32 %v1472_v5, %v1460_v7  ;;  %v1838_v9 = vadd.f32 %v1520_v29, %v1508_v2  ;;  %v1922_v57 = vadd.f32 %v1544_v40, %v1532_v6 }
 0x239   : > { %6370 = vmatprep.subr.bf16.mxu0 %v7488_v41  ;;  %v7492_v41 = vld [vmem:[#allocation5 + $0x450] ss:$8 sps:$4 sm:$0xff]   ;;  %v2174_v59 = vadd.f32 %v1616_v19, %v1604_v61  ;;  %v2258_v35 = vadd.f32 %v1640_v36, %v1628_v25 }
 0x23a   : > { %v1754_v21 = vadd.f32 %v1496_v34, %v1484_v20  ;;  %v1671_v4 = vrot.slane %v1670_v0, 4  ;;  %v1839_v45 = vrot.slane %v1838_v9, 4  ;;  %v1923_v22 = vrot.slane %v1922_v57, 4 }
 0x23b   : > { %v2175_v7 = vrot.slane %v2174_v59, 4  ;;  %v2259_v5 = vrot.slane %v2258_v35, 4 }
 0x23c   : > { %6371 = vmatpush1.bf16.msra.mxu0 %v7486_v49  ;;  %v1568_v49 = vunpack.c.h.bf16 %v9481_v42  ;;  %v1755_v26 = vrot.slane %v1754_v21, 4  ;;  %v1672_v30 = vadd.f32 %v1671_v4, %v1670_v0  ;;  %v1840_v20 = vadd.f32 %v1839_v45, %v1838_v9 }
 0x23d   : > { %6372 = vmatprep.subr.bf16.mxu0 %v7494_v50  ;;  %v2090_v50 = vadd.f32 %v1592_v27, %v1580_v13  ;;  %v1924_v40 = vadd.f32 %v1923_v22, %v1922_v57  ;;  %v2176_v19 = vadd.f32 %v2175_v7, %v2174_v59  ;;  %v2260_v25 = vadd.f32 %v2259_v5, %v2258_v35 }
 0x23e   : > { %v2006_v42 = vadd.f32 %v1568_v49, %v1556_v24  ;;  %v1756_v16 = vadd.f32 %v1755_v26, %v1754_v21  ;;  %v1673_v13 = vrot.slane %v1672_v30, 2  ;;  %v1841_v61 = vrot.slane %v1840_v20, 2 }
 0x23f   : > { %v2091_v33 = vrot.slane %v2090_v50, 4  ;;  %v1925_v36 = vrot.slane %v1924_v40, 2  ;;  %v2177_v26 = vrot.slane %v2176_v19, 2  ;;  %v2261_v21 = vrot.slane %v2260_v25, 2 }
 0x240   : > { %6373 = vmatpush1.bf16.msra.mxu0 %v7492_v41  ;;  %v2007_v41 = vrot.slane %v2006_v42, 4  ;;  %v1757_v34 = vrot.slane %v1756_v16, 2  ;;  %v1674_v0 = vadd.f32 %v1673_v13, %v1672_v30  ;;  %v1842_v45 = vadd.f32 %v1841_v61, %v1840_v20  ;;  %v7516_v30 = vld [vmem:[#allocation5 + $0x490] ss:$8 sps:$4 sm:$0xff]   ;;  %v9528_v13 = vld [vmem:[%s8123_s9 + $0xc8] sm:$0xff] }
 0x241   : > { %6374 = vmatprep.subr.bf16.mxu0 %v7500_v58  ;;  %v7512_v58 = vld [vmem:[#allocation5 + $0x484] ss:$8 sps:$4 sm:$0xff]   ;;  %v2092_v27 = vadd.f32 %v2091_v33, %v2090_v50  ;;  %v1926_v9 = vadd.f32 %v1925_v36, %v1924_v40  ;;  %v2178_v59 = vadd.f32 %v2177_v26, %v2176_v19  ;;  %v2262_v29 = vadd.f32 %v2261_v21, %v2260_v25  ;;  %v9537_v36 = vld [vmem:[%s8123_s9 + $0xf8] sm:$0xff]  ;;  %v7522_v26 = vld [vmem:[#allocation5 + $0x4a0] ss:$8 sps:$4 sm:$0xff]  }
 0x242   : > { %v2008_v6 = vadd.f32 %v2007_v41, %v2006_v42  ;;  %v1758_v4 = vadd.f32 %v1757_v34, %v1756_v16  ;;  %v1675_v22 = vrot.slane %v1674_v0, 1  ;;  %v1843_v35 = vrot.slane %v1842_v45, 1  ;;  %12528 = vst [vmem:[#allocation28_spill] sm:$0xff] %v9528_v13  ;;  %12529 = vst [vmem:[#allocation29_spill] sm:$0xff] %v9537_v36  ;;  %v9567_v21 = vld [vmem:[%s8123_s9 + $0x3f8] sm:$0xff] }
 0x243   : > { %v2093_v24 = vrot.slane %v2092_v27, 2  ;;  %v1927_v49 = vrot.slane %v1926_v9, 1  ;;  %v2179_v7 = vrot.slane %v2178_v59, 1  ;;  %v2263_v5 = vrot.slane %v2262_v29, 1  ;;  %12533 = vst [vmem:[#allocation33_spill] sm:$0xff] %v9567_v21 }
 0x244   : > { %6375 = vmatpush1.bf16.msra.mxu0 %v7498_v60  ;;  %v2009_v2 = vrot.slane %v2008_v6, 2  ;;  %v7510_v60 = vld [vmem:[#allocation5 + $0x480] ss:$8 sps:$4 sm:$0xff]   ;;  %v1759_v57 = vrot.slane %v1758_v4, 1  ;;  %v1676_v16 = vadd.f32 %v1675_v22, %v1674_v0  ;;  %v1844_v20 = vadd.f32 %v1843_v35, %v1842_v45  ;;  %v7530_v45 = vld [vmem:[#allocation5 + $0x4b4] ss:$8 sps:$4 sm:$0xff]  }
 0x245   : > { %6376 = vmatprep.subr.bf16.mxu0 %v7506_v10  ;;  %v7518_v10 = vld [vmem:[#allocation5 + $0x494] ss:$8 sps:$4 sm:$0xff]   ;;  %v2094_v33 = vadd.f32 %v2093_v24, %v2092_v27  ;;  %v1928_v40 = vadd.f32 %v1927_v49, %v1926_v9  ;;  %v2180_v34 = vadd.f32 %v2179_v7, %v2178_v59  ;;  %v2264_v19 = vadd.f32 %v2263_v5, %v2262_v29  ;;  %v9588_v59 = vld [vmem:[%s8123_s9 + $0x848] sm:$0xff] }
 0x246   : > { %v2010_v42 = vadd.f32 %v2009_v2, %v2008_v6  ;;  %v1760_v41 = vadd.f32 %v1759_v57, %v1758_v4  ;;  %v9531_v25 = vadd.f32 %v1676_v16, %v9434_v46  ;;  %v9540_v2 = vld [vmem:[%s8123_s9 + $0x248] sm:$0xff]  ;;  %v9543_v24 = vadd.f32 %v1844_v20, %v9444_v52  ;;  %v9575_v9 = vld [vmem:[%s8123_s9 + $0x578] sm:$0xff]  ;;  %12538 = vst [vmem:[#allocation38_spill] sm:$0xff] %v9588_v59 }
 0x247   : > { %12530 = vst [vmem:[#allocation30_spill] sm:$0xff] %v9540_v2  ;;  %v9558_v4 = vld [vmem:[%s8123_s9 + $0x3c8] sm:$0xff]  ;;  %v9561_v52 = vadd.f32 %v2180_v34, %v9458_v44  ;;  %12535 = vst [vmem:[#allocation35_spill] sm:$0xff] %v9575_v9  ;;  %v2543_v22 = vunpack.c.h.bf16 %v9540_v2  ;;  %v9585_v57 = vld [vmem:[%s8123_s9 + $0x6f8] sm:$0xff] }
 0x248   : > { %6377 = vmatpush1.bf16.msra.mxu0 %v7504_v23  ;;  %v2011_v50 = vrot.slane %v2010_v42, 1  ;;  %v2095_v23 = vrot.slane %v2094_v33, 1  ;;  %v9534_v61 = vadd.f32 %v1760_v41, %v9436_v54  ;;  %v9555_v54 = vld [vmem:[%s8123_s9 + $0x278] sm:$0xff]  ;;  %12532 = vst [vmem:[#allocation32_spill] sm:$0xff] %v9558_v4  ;;  %12537 = vst [vmem:[#allocation37_spill] sm:$0xff] %v9585_v57  ;;  %v2579_v41 = vunpack.c.h.bf16 %v9567_v21 }
 0x249   : > { %6378 = vmatprep.subr.bf16.mxu0 %v7512_v58  ;;  %v7524_v58 = vld [vmem:[#allocation5 + $0x4a4] ss:$8 sps:$4 sm:$0xff]   ;;  %12531 = vst [vmem:[#allocation31_spill] sm:$0xff] %v9555_v54  ;;  %v2555_v35 = vunpack.c.h.bf16 %v9555_v54  ;;  %v9605_v20 = vld [vmem:[%s8123_s9 + $0x9f8] sm:$0xff]  ;;  %v7534_v29 = vld [vmem:[#allocation5 + $0x4c0] ss:$8 sps:$4 sm:$0xff]  }
 0x24a   : > { %v2012_v6 = vadd.f32 %v2011_v50, %v2010_v42  ;;  %v2096_v27 = vadd.f32 %v2095_v23, %v2094_v33  ;;  %v9578_v42 = vld [vmem:[%s8123_s9 + $0x6c8] sm:$0xff]  ;;  %v2567_v50 = vunpack.c.h.bf16 %v9558_v4  ;;  %v9595_v23 = vld [vmem:[%s8123_s9 + $0x878] sm:$0xff]  ;;  %12541 = vst [vmem:[#allocation41_spill] sm:$0xff] %v9605_v20  ;;  %v2639_v33 = vunpack.c.h.bf16 %v9588_v59 }
 0x24b   : > { %12536 = vst [vmem:[#allocation36_spill] sm:$0xff] %v9578_v42  ;;  %12539 = vst [vmem:[#allocation39_spill] sm:$0xff] %v9595_v23  ;;  %v7536_v16 = vld [vmem:[#allocation5 + $0x4c4] ss:$8 sps:$4 sm:$0xff]   ;;  %v9615_v49 = vld [vmem:[%s8123_s9 + $0xb78] sm:$0xff]  ;;  %v2651_v44 = vunpack.c.h.bf16 %v9595_v23  ;;  %v2813_v23 = vadd.f32 %v2555_v35, %v2543_v22 }
 0x24c   : > { %6379 = vmatpush1.bf16.msra.mxu0 %v7510_v60  ;;  %v9546_v60 = vadd.f32 %v1928_v40, %v9446_v8  ;;  %v9549_v0 = vadd.f32 %v2012_v6, %v9448_v38  ;;  %v9552_v46 = vadd.f32 %v2096_v27, %v9450_v56  ;;  %v9564_v8 = vadd.f32 %v2264_v19, %v9460_v31  ;;  %v9570_v38 = vld [vmem:[%s8123_s9 + $0x548] sm:$0xff]  ;;  %v7542_v34 = vld [vmem:[#allocation5 + $0x4d4] ss:$8 sps:$4 sm:$0xff]   ;;  %v7540_v59 = vld [vmem:[#allocation5 + $0x4d0] ss:$8 sps:$4 sm:$0xff]  }
 0x24d   : > { %6380 = vmatprep.subr.bf16.mxu0 %v7518_v10  ;;  %12534 = vst [vmem:[#allocation34_spill] sm:$0xff] %v9570_v38  ;;  %v2519_v10 = vunpack.c.h.bf16 %v9528_v13  ;;  %v2531_v31 = vunpack.c.h.bf16 %v9537_v36  ;;  %v2591_v5 = vunpack.c.h.bf16 %v9570_v38  ;;  %v9608_v40 = vld [vmem:[%s8123_s9 + $0xb48] sm:$0xff]  ;;  %v2603_v27 = vunpack.c.h.bf16 %v9575_v9  ;;  %12543 = vst [vmem:[#allocation43_spill] sm:$0xff] %v9615_v49 }
 0x24e   : > { %12542 = vst [vmem:[#allocation42_spill] sm:$0xff] %v9608_v40  ;;  %v2615_v19 = vunpack.c.h.bf16 %v9578_v42  ;;  %v2675_v42 = vunpack.c.h.bf16 %v9605_v20  ;;  %v2699_v6 = vunpack.c.h.bf16 %v9615_v49  ;;  %v2897_v38 = vadd.f32 %v2579_v41, %v2567_v50  ;;  %v7548_v22 = vld [vmem:[#allocation5 + $0x4e4] ss:$8 sps:$4 sm:$0xff]  }
 0x24f   : > { %v2729_v9 = vadd.f32 %v2531_v31, %v2519_v10  ;;  %v2814_v20 = vrot.slane %v2813_v23, 4 }
 0x250   : > { %6381 = vmatpush1.bf16.msra.mxu0 %v7516_v30  ;;  %v9598_v30 = vld [vmem:[%s8123_s9 + $0x9c8] sm:$0xff]  ;;  %v2898_v2 = vrot.slane %v2897_v38, 4 }
 0x251   : > { %6382 = vmatprep.subr.bf16.mxu0 %v7524_v58  ;;  %12540 = vst [vmem:[#allocation40_spill] sm:$0xff] %v9598_v30  ;;  %v7528_v58 = vld [vmem:[#allocation5 + $0x4b0] ss:$8 sps:$4 sm:$0xff]   ;;  %v2663_v56 = vunpack.c.h.bf16 %v9598_v30  ;;  %v2981_v30 = vadd.f32 %v2603_v27, %v2591_v5  ;;  %v2730_v4 = vrot.slane %v2729_v9, 4  ;;  %v2815_v49 = vadd.f32 %v2814_v20, %v2813_v23 }
 0x252   : > { %v2899_v35 = vadd.f32 %v2898_v2, %v2897_v38 }
 0x253   : > { %v3233_v54 = vadd.f32 %v2675_v42, %v2663_v56  ;;  %v2731_v13 = vadd.f32 %v2730_v4, %v2729_v9  ;;  %v2816_v41 = vrot.slane %v2815_v49, 2 }
 0x254   : > { %6383 = vmatpush1.bf16.msra.mxu0 %v7522_v26  ;;  %v2627_v26 = vunpack.c.h.bf16 %v9585_v57  ;;  %v2687_v57 = vunpack.c.h.bf16 %v9608_v40  ;;  %v2982_v40 = vrot.slane %v2981_v30, 4 }
 0x255   : > { %6384 = vmatprep.subr.bf16.mxu0 %v7530_v45  ;;  %v3149_v45 = vadd.f32 %v2651_v44, %v2639_v33  ;;  %v3234_v10 = vrot.slane %v3233_v54, 4  ;;  %v2732_v33 = vrot.slane %v2731_v13, 2  ;;  %v2817_v9 = vadd.f32 %v2816_v41, %v2815_v49 }
 0x256   : > { %v3065_v21 = vadd.f32 %v2627_v26, %v2615_v19  ;;  %v3317_v7 = vadd.f32 %v2699_v6, %v2687_v57  ;;  %v2983_v50 = vadd.f32 %v2982_v40, %v2981_v30  ;;  %v2900_v57 = vrot.slane %v2899_v35, 2 }
 0x257   : > { %v3150_v36 = vrot.slane %v3149_v45, 4  ;;  %v3235_v56 = vadd.f32 %v3234_v10, %v3233_v54  ;;  %v2733_v4 = vadd.f32 %v2732_v33, %v2731_v13  ;;  %v2818_v40 = vrot.slane %v2817_v9, 1  ;;  %v7552_v13 = vld [vmem:[#allocation5 + $0x4f0] ss:$8 sps:$4 sm:$0xff]  }
 0x258   : > { %6385 = vmatpush1.bf16.msra.mxu0 %v7528_v58  ;;  %v3066_v58 = vrot.slane %v3065_v21, 4  ;;  %v3318_v31 = vrot.slane %v3317_v7, 4  ;;  %v2984_v5 = vrot.slane %v2983_v50, 2  ;;  %v2901_v2 = vadd.f32 %v2900_v57, %v2899_v35  ;;  %v9641_v57 = vld [vmem:[%s8123_s9 + $0x158] sm:$0xff] }
 0x259   : > { %6386 = vmatprep.subr.bf16.mxu0 %v7536_v16  ;;  %v3151_v44 = vadd.f32 %v3150_v36, %v3149_v45  ;;  %v3236_v23 = vrot.slane %v3235_v56, 2  ;;  %v2734_v30 = vrot.slane %v2733_v4, 1  ;;  %12545 = vst [vmem:[#allocation45_spill] sm:$0xff] %v9641_v57 }
 0x25a   : > { %v3067_v16 = vadd.f32 %v3066_v58, %v3065_v21  ;;  %v3319_v42 = vadd.f32 %v3318_v31, %v3317_v7  ;;  %v2985_v38 = vadd.f32 %v2984_v5, %v2983_v50  ;;  %v2902_v19 = vrot.slane %v2901_v2, 1  ;;  %v9644_v5 = vld [vmem:[%s8123_s9 + $0x2a8] sm:$0xff] }
 0x25b   : > { %v3152_v27 = vrot.slane %v3151_v44, 2  ;;  %v3237_v54 = vadd.f32 %v3236_v23, %v3235_v56  ;;  %v2735_v49 = vadd.f32 %v2734_v30, %v2733_v4  ;;  %v2819_v58 = vadd.f32 %v2818_v40, %v2817_v9  ;;  %12546 = vst [vmem:[#allocation46_spill] sm:$0xff] %v9644_v5  ;;  %v9662_v4 = vld [vmem:[%s8123_s9 + $0x428] sm:$0xff] }
 0x25c   : > { %6387 = vmatpush1.bf16.msra.mxu0 %v7534_v29  ;;  %v3068_v6 = vrot.slane %v3067_v16, 2  ;;  %v7546_v29 = vld [vmem:[#allocation5 + $0x4e0] ss:$8 sps:$4 sm:$0xff]   ;;  %v3320_v20 = vrot.slane %v3319_v42, 2  ;;  %v2986_v26 = vrot.slane %v2985_v38, 1  ;;  %12548 = vst [vmem:[#allocation48_spill] sm:$0xff] %v9662_v4 }
 0x25d   : > { %6388 = vmatprep.subr.bf16.mxu0 %v7542_v34  ;;  %v7554_v34 = vld [vmem:[#allocation5 + $0x4f4] ss:$8 sps:$4 sm:$0xff]   ;;  %v3153_v36 = vadd.f32 %v3152_v27, %v3151_v44  ;;  %v3238_v10 = vrot.slane %v3237_v54, 1  ;;  %v9632_v44 = vld [vmem:[%s8123_s9 + $0x128] sm:$0xff]  ;;  %v9635_v56 = vadd.f32 %v2735_v49, %v9531_v25 }
 0x25e   : > { %v3069_v21 = vadd.f32 %v3068_v6, %v3067_v16  ;;  %v3321_v7 = vadd.f32 %v3320_v20, %v3319_v42  ;;  %v2987_v35 = vadd.f32 %v2986_v26, %v2985_v38  ;;  %12544 = vst [vmem:[#allocation44_spill] sm:$0xff] %v9632_v44  ;;  %v9638_v42 = vadd.f32 %v2819_v58, %v9534_v61  ;;  %v9659_v61 = vld [vmem:[%s8123_s9 + $0x2d8] sm:$0xff]  ;;  %v9702_v26 = vld [vmem:[%s8123_s9 + $0xa28] sm:$0xff] }
 0x25f   : > { %v3239_v33 = vadd.f32 %v3238_v10, %v3237_v54  ;;  %12547 = vst [vmem:[#allocation47_spill] sm:$0xff] %v9659_v61  ;;  %v3578_v23 = vunpack.c.h.bf16 %v9632_v44  ;;  %v9679_v20 = vld [vmem:[%s8123_s9 + $0x5d8] sm:$0xff]  ;;  %v3602_v38 = vunpack.c.h.bf16 %v9644_v5  ;;  %v3614_v40 = vunpack.c.h.bf16 %v9659_v61  ;;  %12556 = vst [vmem:[#allocation56_spill] sm:$0xff] %v9702_v26  ;;  %v9712_v10 = vld [vmem:[%s8123_s9 + $0xba8] sm:$0xff] }
 0x260   : > { %6389 = vmatpush1.bf16.msra.mxu0 %v7540_v59  ;;  %v3070_v45 = vrot.slane %v3069_v21, 1  ;;  %v3154_v59 = vrot.slane %v3153_v36, 1  ;;  %v3322_v31 = vrot.slane %v3321_v7, 1  ;;  %v9650_v27 = vadd.f32 %v2987_v35, %v9546_v60  ;;  %v9671_v60 = vld [vmem:[%s8123_s9 + $0x458] sm:$0xff]  ;;  %12551 = vst [vmem:[#allocation51_spill] sm:$0xff] %v9679_v20  ;;  %12558 = vst [vmem:[#allocation58_spill] sm:$0xff] %v9712_v10 }
 0x261   : > { %6390 = vmatprep.subr.bf16.mxu0 %v7548_v22  ;;  %v2903_v22 = vadd.f32 %v2902_v19, %v2901_v2  ;;  %v9665_v9 = vadd.f32 %v3239_v33, %v9561_v52  ;;  %12549 = vst [vmem:[#allocation49_spill] sm:$0xff] %v9671_v60  ;;  %v9699_v19 = vld [vmem:[%s8123_s9 + $0x8d8] sm:$0xff]  ;;  %v3722_v35 = vunpack.c.h.bf16 %v9702_v26  ;;  %v3872_v54 = vadd.f32 %v3614_v40, %v3602_v38  ;;  %v7560_v5 = vld [vmem:[#allocation5 + $0x504] ss:$8 sps:$4 sm:$0xff]  }
 0x262   : > { %v3071_v50 = vadd.f32 %v3070_v45, %v3069_v21  ;;  %v3155_v16 = vadd.f32 %v3154_v59, %v3153_v36  ;;  %v3323_v41 = vadd.f32 %v3322_v31, %v3321_v7  ;;  %v9689_v21 = vld [vmem:[%s8123_s9 + $0x758] sm:$0xff]  ;;  %v9692_v36 = vld [vmem:[%s8123_s9 + $0x8a8] sm:$0xff]  ;;  %v3626_v7 = vunpack.c.h.bf16 %v9662_v4  ;;  %12555 = vst [vmem:[#allocation55_spill] sm:$0xff] %v9699_v19 }
 0x263   : > { %v9647_v6 = vadd.f32 %v2903_v22, %v9543_v24  ;;  %12553 = vst [vmem:[#allocation53_spill] sm:$0xff] %v9689_v21  ;;  %12554 = vst [vmem:[#allocation54_spill] sm:$0xff] %v9692_v36  ;;  %v3638_v59 = vunpack.c.h.bf16 %v9671_v60  ;;  %v9709_v58 = vld [vmem:[%s8123_s9 + $0xa58] sm:$0xff]  ;;  %v3662_v22 = vunpack.c.h.bf16 %v9679_v20  ;;  %v3698_v45 = vunpack.c.h.bf16 %v9692_v36 }
 0x264   : > { %6391 = vmatpush1.bf16.msra.mxu0 %v7546_v29  ;;  %v9653_v29 = vadd.f32 %v3071_v50, %v9549_v0  ;;  %v9656_v25 = vadd.f32 %v3155_v16, %v9552_v46  ;;  %v9668_v24 = vadd.f32 %v3323_v41, %v9564_v8  ;;  %v9674_v0 = vld [vmem:[%s8123_s9 + $0x5a8] sm:$0xff]  ;;  %v3590_v8 = vunpack.c.h.bf16 %v9641_v57  ;;  %12557 = vst [vmem:[#allocation57_spill] sm:$0xff] %v9709_v58  ;;  %v9719_v16 = vld [vmem:[%s8123_s9 + $0xbd8] sm:$0xff] }
 0x265   : > { %6392 = vmatprep.subr.bf16.mxu0 %v7554_v34  ;;  %12550 = vst [vmem:[#allocation50_spill] sm:$0xff] %v9674_v0  ;;  %v9682_v34 = vld [vmem:[%s8123_s9 + $0x728] sm:$0xff]  ;;  %v3650_v49 = vunpack.c.h.bf16 %v9674_v0  ;;  %12559 = vst [vmem:[#allocation59_spill] sm:$0xff] %v9719_v16  ;;  %v3686_v41 = vunpack.c.h.bf16 %v9689_v21  ;;  %v3710_v31 = vunpack.c.h.bf16 %v9699_v19  ;;  %v3734_v52 = vunpack.c.h.bf16 %v9709_v58 }
 0x266   : > { %12552 = vst [vmem:[#allocation52_spill] sm:$0xff] %v9682_v34  ;;  %v3674_v50 = vunpack.c.h.bf16 %v9682_v34  ;;  %v3746_v46 = vunpack.c.h.bf16 %v9712_v10  ;;  %v3758_v36 = vunpack.c.h.bf16 %v9719_v16  ;;  %v3788_v21 = vadd.f32 %v3590_v8, %v3578_v23 }
 0x267   : > { %v3956_v34 = vadd.f32 %v3638_v59, %v3626_v7  ;;  %v4040_v19 = vadd.f32 %v3662_v22, %v3650_v49  ;;  %v4208_v30 = vadd.f32 %v3710_v31, %v3698_v45  ;;  %v3873_v26 = vrot.slane %v3872_v54, 4 }
 0x268   : > { %6393 = vmatpush1.bf16.msra.mxu0 %v7552_v13  ;;  %v4124_v20 = vadd.f32 %v3686_v41, %v3674_v50  ;;  %v3789_v0 = vrot.slane %v3788_v21, 4  ;;  %v4292_v60 = vadd.f32 %v3734_v52, %v3722_v35  ;;  %v4376_v2 = vadd.f32 %v3758_v36, %v3746_v46 }
 0x269   : > { %v3957_v4 = vrot.slane %v3956_v34, 4  ;;  %v4041_v58 = vrot.slane %v4040_v19, 4  ;;  %v4209_v33 = vrot.slane %v4208_v30, 4  ;;  %v3874_v57 = vadd.f32 %v3873_v26, %v3872_v54  ;;  %6403 = vmatprep.subr.bf16.mxu0 %v7560_v5 }
 0x26a   : > { %v4125_v61 = vrot.slane %v4124_v20, 4  ;;  %v3790_v10 = vadd.f32 %v3789_v0, %v3788_v21  ;;  %v4293_v13 = vrot.slane %v4292_v60, 4  ;;  %v4377_v44 = vrot.slane %v4376_v2, 4 }
 0x26b   : > { %v3958_v16 = vadd.f32 %v3957_v4, %v3956_v34  ;;  %v4042_v23 = vadd.f32 %v4041_v58, %v4040_v19  ;;  %v4210_v38 = vadd.f32 %v4209_v33, %v4208_v30  ;;  %v3875_v7 = vrot.slane %v3874_v57, 2 }
 0x26c   : > { %v4126_v8 = vadd.f32 %v4125_v61, %v4124_v20  ;;  %v3791_v40 = vrot.slane %v3790_v10, 2  ;;  %v4294_v45 = vadd.f32 %v4293_v13, %v4292_v60  ;;  %v4378_v59 = vadd.f32 %v4377_v44, %v4376_v2 }
 0x26d   : > { %v3959_v52 = vrot.slane %v3958_v16, 2  ;;  %v4043_v46 = vrot.slane %v4042_v23, 2  ;;  %v4211_v49 = vrot.slane %v4210_v38, 2  ;;  %v3876_v22 = vadd.f32 %v3875_v7, %v3874_v57 }
 0x26e   : > { %v4127_v36 = vrot.slane %v4126_v8, 2  ;;  %v3792_v31 = vadd.f32 %v3791_v40, %v3790_v10  ;;  %v4295_v35 = vrot.slane %v4294_v45, 2  ;;  %v4379_v0 = vrot.slane %v4378_v59, 2 }
 0x26f   : > { %v3960_v21 = vadd.f32 %v3959_v52, %v3958_v16  ;;  %v4044_v54 = vadd.f32 %v4043_v46, %v4042_v23  ;;  %v4212_v4 = vadd.f32 %v4211_v49, %v4210_v38  ;;  %v3877_v61 = vrot.slane %v3876_v22, 1 }
 0x270   : > { %v4128_v26 = vadd.f32 %v4127_v36, %v4126_v8  ;;  %v3793_v34 = vrot.slane %v3792_v31, 1  ;;  %v4296_v20 = vadd.f32 %v4295_v35, %v4294_v45  ;;  %v4380_v5 = vadd.f32 %v4379_v0, %v4378_v59 }
 0x271   : > { %v3961_v30 = vrot.slane %v3960_v21, 1  ;;  %v4045_v19 = vrot.slane %v4044_v54, 1  ;;  %v4213_v44 = vrot.slane %v4212_v4, 1  ;;  %v3878_v13 = vadd.f32 %v3877_v61, %v3876_v22  ;;  %v9747_v61 = vld [vmem:[%s8123_s9 + $0x50] sm:$0xff] }
 0x272   : > { %v4129_v60 = vrot.slane %v4128_v26, 1  ;;  %v3794_v2 = vadd.f32 %v3793_v34, %v3792_v31  ;;  %v4297_v58 = vrot.slane %v4296_v20, 1  ;;  %v4381_v50 = vrot.slane %v4380_v5, 1  ;;  %12561 = vst [vmem:[#allocation61_spill] sm:$0xff] %v9747_v61 }
 0x273   : > { %v3962_v10 = vadd.f32 %v3961_v30, %v3960_v21  ;;  %v4046_v57 = vadd.f32 %v4045_v19, %v4044_v54  ;;  %v4214_v41 = vadd.f32 %v4213_v44, %v4212_v4  ;;  %v4454_v38 = vadd.f32 %v3878_v13, %v9638_v42  ;;  %v9744_v54 = vld [vmem:[%s8123_s9 + $0x20] sm:$0xff]  ;;  %v9753_v44 = vld [vmem:[%s8123_s9 + $0x1d0] sm:$0xff] }
 0x274   : > { %v4130_v33 = vadd.f32 %v4129_v60, %v4128_v26  ;;  %v4298_v16 = vadd.f32 %v4297_v58, %v4296_v20  ;;  %v4382_v23 = vadd.f32 %v4381_v50, %v4380_v5  ;;  %v4442_v8 = vadd.f32 %v3794_v2, %v9635_v56  ;;  %12560 = vst [vmem:[#allocation60_spill] sm:$0xff] %v9744_v54  ;;  %v9750_v60 = vld [vmem:[%s8123_s9 + $0x1a0] sm:$0xff] }
 0x275   : > { %v4466_v40 = vadd.f32 %v3962_v10, %v9647_v6  ;;  %v4478_v7 = vadd.f32 %v4046_v57, %v9650_v27  ;;  %v4502_v59 = vadd.f32 %v4214_v41, %v9656_v25  ;;  %v4550_v49 = vmul.f32 0.015625, %v4454_v38  ;;  %12562 = vst [vmem:[#allocation62_spill] sm:$0xff] %v9750_v60  ;;  %12563 = vst [vmem:[#allocation63_spill] sm:$0xff] %v9753_v44  ;;  %v9757_v50 = vld [vmem:[%s8123_s9 + $0x320] sm:$0xff] }
 0x276   : > { %v4490_v45 = vadd.f32 %v4130_v33, %v9653_v29  ;;  %v4514_v52 = vadd.f32 %v4298_v16, %v9665_v9  ;;  %v4526_v46 = vadd.f32 %v4382_v23, %v9668_v24  ;;  %v4538_v36 = vmul.f32 0.015625, %v4442_v8  ;;  %12564 = vst [vmem:[#allocation64_spill] sm:$0xff] %v9757_v50  ;;  %v9762_v33 = vld [vmem:[%s8123_s9 + $0x350] sm:$0xff]  ;;  %v9765_v41 = vld [vmem:[%s8123_s9 + $0x4a0] sm:$0xff] }
 0x277   : > { %v4562_v31 = vmul.f32 0.015625, %v4466_v40  ;;  %v4574_v22 = vmul.f32 0.015625, %v4478_v7  ;;  %v4598_v42 = vmul.f32 0.015625, %v4502_v59  ;;  %v4646_v27 = vpack.c.bf16 %v4550_v49, %v4550_v49  ;;  %12565 = vst [vmem:[#allocation65_spill] sm:$0xff] %v9762_v33  ;;  %12566 = vst [vmem:[#allocation66_spill] sm:$0xff] %v9765_v41  ;;  %v9772_v40 = vld [vmem:[%s8123_s9 + $0x4d0] sm:$0xff] }
 0x278   : > { %v4586_v56 = vmul.f32 0.015625, %v4490_v45  ;;  %v4610_v35 = vmul.f32 0.015625, %v4514_v52  ;;  %v4622_v6 = vmul.f32 0.015625, %v4526_v46  ;;  %v4634_v0 = vpack.c.bf16 %v4538_v36, %v4538_v36  ;;  %12567 = vst [vmem:[#allocation67_spill] sm:$0xff] %v9772_v40  ;;  %v9779_v46 = vld [vmem:[%s8123_s9 + $0x620] sm:$0xff]  ;;  %v9782_v36 = vld [vmem:[%s8123_s9 + $0x650] sm:$0xff] }
 0x279   : > { %v4658_v29 = vpack.c.bf16 %v4562_v31, %v4562_v31  ;;  %v4670_v25 = vpack.c.bf16 %v4574_v22, %v4574_v22  ;;  %v4694_v9 = vpack.c.bf16 %v4598_v42, %v4598_v42  ;;  %v5042_v34 = vunpack.c.l.b16 %v4646_v27  ;;  %12568 = vst [vmem:[#allocation68_spill] sm:$0xff] %v9779_v46  ;;  %12569 = vst [vmem:[#allocation69_spill] sm:$0xff] %v9782_v36  ;;  %v9789_v42 = vld [vmem:[%s8123_s9 + $0x7a0] sm:$0xff] }
 0x27a   : > { %v4682_v21 = vpack.c.bf16 %v4586_v56, %v4586_v56  ;;  %v4706_v24 = vpack.c.bf16 %v4610_v35, %v4610_v35  ;;  %v4718_v26 = vpack.c.bf16 %v4622_v6, %v4622_v6  ;;  %v5030_v4 = vunpack.c.l.b16 %v4634_v0  ;;  %12570 = vst [vmem:[#allocation70_spill] sm:$0xff] %v9789_v42 }
 0x27b   : > { %v5054_v20 = vunpack.c.l.b16 %v4658_v29  ;;  %v5066_v5 = vunpack.c.l.b16 %v4670_v25  ;;  %v5090_v19 = vunpack.c.l.b16 %v4694_v9  ;;  %v407_v16 = vunpack.c.h.bf16 %v9744_v54  ;;  %v9796_v29 = vld [vmem:[%s8123_s9 + $0x7d0] sm:$0xff]  ;;  %v9799_v25 = vld [vmem:[%s8123_s9 + $0x920] sm:$0xff] }
 0x27c   : > { %v5078_v30 = vunpack.c.l.b16 %v4682_v21  ;;  %v5102_v2 = vunpack.c.l.b16 %v4706_v24  ;;  %v5114_v13 = vunpack.c.l.b16 %v4718_v26  ;;  %v5151_v58 = vsel %vm5123_vm0, %v5042_v34, %v5030_v4  ;;  %12571 = vst [vmem:[#allocation71_spill] sm:$0xff] %v9796_v29  ;;  %12572 = vst [vmem:[#allocation72_spill] sm:$0xff] %v9799_v25  ;;  %v9806_v4 = vld [vmem:[%s8123_s9 + $0x950] sm:$0xff]  ;;  %v9809_v34 = vld [vmem:[%s8123_s9 + $0xaa0] sm:$0xff] }
 0x27d   : > { %v5152_v57 = vsel %vm5125_vm1, %v5054_v20, %v5151_v58  ;;  %v419_v8 = vunpack.c.h.bf16 %v9747_v61  ;;  %v431_v45 = vunpack.c.h.bf16 %v9750_v60  ;;  %v443_v49 = vunpack.c.h.bf16 %v9753_v44  ;;  %12573 = vst [vmem:[#allocation73_spill] sm:$0xff] %v9806_v4  ;;  %12574 = vst [vmem:[#allocation74_spill] sm:$0xff] %v9809_v34 }
 0x27e   : > { %v5153_v38 = vsel %vm5127_vm2, %v5066_v5, %v5152_v57  ;;  %v455_v22 = vunpack.c.h.bf16 %v9757_v50  ;;  %v467_v6 = vunpack.c.h.bf16 %v9762_v33  ;;  %v479_v21 = vunpack.c.h.bf16 %v9765_v41 }
 0x27f   : > { %v5154_v52 = vsel %vm5129_vm3, %v5078_v30, %v5153_v38  ;;  %v491_v24 = vunpack.c.h.bf16 %v9772_v40  ;;  %v503_v5 = vunpack.c.h.bf16 %v9779_v46  ;;  %v515_v58 = vunpack.c.h.bf16 %v9782_v36 }
 0x280   : > { %v5155_v56 = vsel %vm5131_vm4, %v5090_v19, %v5154_v52  ;;  %v527_v38 = vunpack.c.h.bf16 %v9789_v42  ;;  %v539_v52 = vunpack.c.h.bf16 %v9796_v29  ;;  %v575_v9 = vunpack.c.h.bf16 %v9809_v34 }
 0x281   : > { %v5156_v27 = vsel %vm5133_vm5, %v5102_v2, %v5155_v56  ;;  %v9815_v2 = vld [vmem:[%s8123_s9 + $0xad0] sm:$0xff]  ;;  %v737_v35 = vadd.f32 %v443_v49, %v431_v45  ;;  %v821_v31 = vadd.f32 %v467_v6, %v455_v22  ;;  %v905_v59 = vadd.f32 %v491_v24, %v479_v21 }
 0x282   : > { %v5157_v26 = vsel %vm5135_vm6, %v5114_v13, %v5156_v27  ;;  %12575 = vst [vmem:[#allocation75_spill] sm:$0xff] %v9815_v2  ;;  %v551_v27 = vunpack.c.h.bf16 %v9799_v25  ;;  %v587_v0 = vunpack.c.h.bf16 %v9815_v2  ;;  %v653_v13 = vadd.f32 %v419_v8, %v407_v16 }
 0x283   : > { %v5217_v19 = vpack.c.b16 %v5157_v26, %v5157_v26  ;;  %v563_v26 = vunpack.c.h.bf16 %v9806_v4  ;;  %v989_v56 = vadd.f32 %v515_v58, %v503_v5  ;;  %v1073_v7 = vadd.f32 %v539_v52, %v527_v38  ;;  %v9838_v52 = vld [vmem:[%s8123_s9 + $0xb0] sm:$0xff] }
 0x284   : > { %v654_v23 = vrot.slane %v653_v13, 4  ;;  %v1241_v30 = vadd.f32 %v587_v0, %v575_v9  ;;  %v822_v25 = vrot.slane %v821_v31, 4  ;;  %v906_v4 = vrot.slane %v905_v59, 4  ;;  %12577 = vst [vmem:[#allocation77_spill] sm:$0xff] %v9838_v52 }
 0x285   : > { %6271 = vmatprep.mubr.bf16.mxu1 %v5217_v19  ;;  %v738_v19 = vrot.slane %v737_v35, 4  ;;  %v1157_v10 = vadd.f32 %v563_v26, %v551_v27  ;;  %v990_v29 = vrot.slane %v989_v56, 4  ;;  %v1074_v20 = vrot.slane %v1073_v7, 4 }
 0x286   : > { %v655_v42 = vadd.f32 %v654_v23, %v653_v13  ;;  %v1242_v57 = vrot.slane %v1241_v30, 4  ;;  %v823_v46 = vadd.f32 %v822_v25, %v821_v31  ;;  %v907_v2 = vadd.f32 %v906_v4, %v905_v59 }
 0x287   : > { %v739_v34 = vadd.f32 %v738_v19, %v737_v35  ;;  %v1158_v36 = vrot.slane %v1157_v10, 4  ;;  %v991_v16 = vadd.f32 %v990_v29, %v989_v56  ;;  %v1075_v8 = vadd.f32 %v1074_v20, %v1073_v7  ;;  %v9841_v56 = vld [vmem:[%s8123_s9 + $0x200] sm:$0xff] }
 0x288   : > { %v656_v45 = vrot.slane %v655_v42, 2  ;;  %v1243_v6 = vadd.f32 %v1242_v57, %v1241_v30  ;;  %v824_v21 = vrot.slane %v823_v46, 2  ;;  %v908_v24 = vrot.slane %v907_v2, 2  ;;  %12578 = vst [vmem:[#allocation78_spill] sm:$0xff] %v9841_v56 }
 0x289   : > { %v740_v49 = vrot.slane %v739_v34, 2  ;;  %v1159_v22 = vadd.f32 %v1158_v36, %v1157_v10  ;;  %v992_v5 = vrot.slane %v991_v16, 2  ;;  %v1076_v0 = vrot.slane %v1075_v8, 2 }
 0x28a   : > { %v657_v9 = vadd.f32 %v656_v45, %v655_v42  ;;  %v1244_v23 = vrot.slane %v1243_v6, 2  ;;  %v825_v35 = vadd.f32 %v824_v21, %v823_v46  ;;  %v909_v13 = vadd.f32 %v908_v24, %v907_v2  ;;  %v9855_v45 = vld [vmem:[%s8123_s9 + $0x380] sm:$0xff] }
 0x28b   : > { %v741_v58 = vadd.f32 %v740_v49, %v739_v34  ;;  %v1160_v38 = vrot.slane %v1159_v22, 2  ;;  %v993_v31 = vadd.f32 %v992_v5, %v991_v16  ;;  %v1077_v59 = vadd.f32 %v1076_v0, %v1075_v8  ;;  %v9831_v34 = vld [vmem:[%s8123_s9 + $0x80] sm:$0xff]  ;;  %v9852_v8 = vld [vmem:[%s8123_s9 + $0x230] sm:$0xff]  ;;  %12580 = vst [vmem:[#allocation80_spill] sm:$0xff] %v9855_v45 }
 0x28c   : > { %v658_v7 = vrot.slane %v657_v9, 1  ;;  %v1245_v10 = vadd.f32 %v1244_v23, %v1243_v6  ;;  %v826_v36 = vrot.slane %v825_v35, 1  ;;  %v910_v4 = vrot.slane %v909_v13, 1  ;;  %12576 = vst [vmem:[#allocation76_spill] sm:$0xff] %v9831_v34  ;;  %12579 = vst [vmem:[#allocation79_spill] sm:$0xff] %v9852_v8  ;;  %v9862_v6 = vld [vmem:[%s8123_s9 + $0x3b0] sm:$0xff] }
 0x28d   : > { %v742_v29 = vrot.slane %v741_v58, 1  ;;  %v1161_v25 = vadd.f32 %v1160_v38, %v1159_v22  ;;  %v994_v20 = vrot.slane %v993_v31, 1  ;;  %v1078_v42 = vrot.slane %v1077_v59, 1  ;;  %12581 = vst [vmem:[#allocation81_spill] sm:$0xff] %v9862_v6  ;;  %v9865_v21 = vld [vmem:[%s8123_s9 + $0x500] sm:$0xff]  ;;  %v9870_v0 = vld [vmem:[%s8123_s9 + $0x530] sm:$0xff] }
 0x28e   : > { %v9833_v46 = vadd.f32 %v658_v7, %v657_v9  ;;  %v1246_v57 = vrot.slane %v1245_v10, 1  ;;  %v9843_v27 = vadd.f32 %v826_v36, %v825_v35  ;;  %v9845_v26 = vadd.f32 %v910_v4, %v909_v13  ;;  %12582 = vst [vmem:[#allocation82_spill] sm:$0xff] %v9865_v21  ;;  %12583 = vst [vmem:[#allocation83_spill] sm:$0xff] %v9870_v0  ;;  %v9873_v9 = vld [vmem:[%s8123_s9 + $0x680] sm:$0xff]  ;;  %v9880_v13 = vld [vmem:[%s8123_s9 + $0x6b0] sm:$0xff] }
 0x28f   : > { %v9835_v30 = vadd.f32 %v742_v29, %v741_v58  ;;  %v1162_v2 = vrot.slane %v1161_v25, 1  ;;  %v9847_v19 = vadd.f32 %v994_v20, %v993_v31  ;;  %v9849_v16 = vadd.f32 %v1078_v42, %v1077_v59  ;;  %12584 = vst [vmem:[#allocation84_spill] sm:$0xff] %v9873_v9  ;;  %12585 = vst [vmem:[#allocation85_spill] sm:$0xff] %v9880_v13  ;;  %v9883_v31 = vld [vmem:[%s8123_s9 + $0x800] sm:$0xff] }
 0x290   : > { %v9859_v22 = vadd.f32 %v1246_v57, %v1245_v10  ;;  %v1466_v5 = vunpack.c.h.bf16 %v9831_v34  ;;  %v1478_v38 = vunpack.c.h.bf16 %v9838_v52  ;;  %v1490_v35 = vunpack.c.h.bf16 %v9841_v56  ;;  %12586 = vst [vmem:[#allocation86_spill] sm:$0xff] %v9883_v31  ;;  %v9890_v10 = vld [vmem:[%s8123_s9 + $0x830] sm:$0xff]  ;;  %v9893_v36 = vld [vmem:[%s8123_s9 + $0x980] sm:$0xff] }
 0x291   : > { %v9857_v49 = vadd.f32 %v1162_v2, %v1161_v25  ;;  %v1502_v7 = vunpack.c.h.bf16 %v9852_v8  ;;  %v1514_v25 = vunpack.c.h.bf16 %v9855_v45  ;;  %12587 = vst [vmem:[#allocation87_spill] sm:$0xff] %v9890_v10  ;;  %12588 = vst [vmem:[#allocation88_spill] sm:$0xff] %v9893_v36  ;;  %v1526_v20 = vunpack.c.h.bf16 %v9862_v6  ;;  %v9900_v57 = vld [vmem:[%s8123_s9 + $0x9b0] sm:$0xff]  ;;  %v9903_v59 = vld [vmem:[%s8123_s9 + $0xb00] sm:$0xff] }
 0x292   : > { %v1538_v2 = vunpack.c.h.bf16 %v9865_v21  ;;  %12589 = vst [vmem:[#allocation89_spill] sm:$0xff] %v9900_v57  ;;  %12590 = vst [vmem:[#allocation90_spill] sm:$0xff] %v9903_v59  ;;  %v1550_v23 = vunpack.c.h.bf16 %v9870_v0  ;;  %v1562_v24 = vunpack.c.h.bf16 %v9873_v9  ;;  %v9910_v45 = vld [vmem:[%s8123_s9 + $0xb30] sm:$0xff]  ;;  %v1574_v42 = vunpack.c.h.bf16 %v9880_v13 }
 0x293   : > { %12591 = vst [vmem:[#allocation91_spill] sm:$0xff] %v9910_v45  ;;  %v1586_v6 = vunpack.c.h.bf16 %v9883_v31  ;;  %v1598_v29 = vunpack.c.h.bf16 %v9890_v10  ;;  %v1610_v58 = vunpack.c.h.bf16 %v9893_v36  ;;  %v1622_v56 = vunpack.c.h.bf16 %v9900_v57 }
 0x294   : > { %v1634_v13 = vunpack.c.h.bf16 %v9903_v59  ;;  %v1646_v31 = vunpack.c.h.bf16 %v9910_v45  ;;  %v1712_v52 = vadd.f32 %v1478_v38, %v1466_v5  ;;  %v1796_v8 = vadd.f32 %v1502_v7, %v1490_v35 }
 0x295   : > { %v1880_v34 = vadd.f32 %v1526_v20, %v1514_v25  ;;  %v1964_v10 = vadd.f32 %v1550_v23, %v1538_v2  ;;  %v2048_v40 = vadd.f32 %v1574_v42, %v1562_v24  ;;  %v2132_v0 = vadd.f32 %v1598_v29, %v1586_v6  ;;  %v9927_v2 = vld [vmem:[%s8123_s9 + $0xe0] sm:$0xff] }
 0x296   : > { %v1713_v41 = vrot.slane %v1712_v52, 4  ;;  %v1797_v36 = vrot.slane %v1796_v8, 4  ;;  %v2216_v33 = vadd.f32 %v1622_v56, %v1610_v58  ;;  %v2300_v9 = vadd.f32 %v1646_v31, %v1634_v13  ;;  %12592 = vst [vmem:[#allocation92_spill] sm:$0xff] %v9927_v2 }
 0x297   : > { %v1881_v50 = vrot.slane %v1880_v34, 4  ;;  %v1965_v57 = vrot.slane %v1964_v10, 4  ;;  %v2049_v44 = vrot.slane %v2048_v40, 4  ;;  %v2133_v4 = vrot.slane %v2132_v0, 4 }
 0x298   : > { %v1714_v60 = vadd.f32 %v1713_v41, %v1712_v52  ;;  %v1798_v59 = vadd.f32 %v1797_v36, %v1796_v8  ;;  %v2217_v61 = vrot.slane %v2216_v33, 4  ;;  %v2301_v21 = vrot.slane %v2300_v9, 4 }
 0x299   : > { %v1882_v54 = vadd.f32 %v1881_v50, %v1880_v34  ;;  %v1966_v45 = vadd.f32 %v1965_v57, %v1964_v10  ;;  %v2050_v5 = vadd.f32 %v2049_v44, %v2048_v40  ;;  %v2134_v38 = vadd.f32 %v2133_v4, %v2132_v0 }
 0x29a   : > { %v1715_v35 = vrot.slane %v1714_v60, 2  ;;  %v1799_v23 = vrot.slane %v1798_v59, 2  ;;  %v2218_v24 = vadd.f32 %v2217_v61, %v2216_v33  ;;  %v2302_v6 = vadd.f32 %v2301_v21, %v2300_v9 }
 0x29b   : > { %v1883_v7 = vrot.slane %v1882_v54, 2  ;;  %v1967_v29 = vrot.slane %v1966_v45, 2  ;;  %v2051_v56 = vrot.slane %v2050_v5, 2  ;;  %v2135_v58 = vrot.slane %v2134_v38, 2 }
 0x29c   : > { %v1716_v13 = vadd.f32 %v1715_v35, %v1714_v60  ;;  %v1800_v31 = vadd.f32 %v1799_v23, %v1798_v59  ;;  %v2219_v25 = vrot.slane %v2218_v24, 2  ;;  %v2303_v20 = vrot.slane %v2302_v6, 2  ;;  %v9936_v23 = vld [vmem:[%s8123_s9 + $0x110] sm:$0xff] }
 0x29d   : > { %v1884_v41 = vadd.f32 %v1883_v7, %v1882_v54  ;;  %v1968_v52 = vadd.f32 %v1967_v29, %v1966_v45  ;;  %v2052_v8 = vadd.f32 %v2051_v56, %v2050_v5  ;;  %v2136_v36 = vadd.f32 %v2135_v58, %v2134_v38  ;;  %12593 = vst [vmem:[#allocation93_spill] sm:$0xff] %v9936_v23  ;;  %v9957_v56 = vld [vmem:[%s8123_s9 + $0x3e0] sm:$0xff] }
 0x29e   : > { %v1717_v50 = vrot.slane %v1716_v13, 1  ;;  %v1801_v44 = vrot.slane %v1800_v31, 1  ;;  %v2220_v40 = vadd.f32 %v2219_v25, %v2218_v24  ;;  %v2304_v34 = vadd.f32 %v2303_v20, %v2302_v6  ;;  %v9939_v24 = vld [vmem:[%s8123_s9 + $0x260] sm:$0xff]  ;;  %12596 = vst [vmem:[#allocation96_spill] sm:$0xff] %v9957_v56 }
 0x29f   : > { %v1885_v0 = vrot.slane %v1884_v41, 1  ;;  %v1969_v61 = vrot.slane %v1968_v52, 1  ;;  %v2053_v33 = vrot.slane %v2052_v8, 1  ;;  %v2137_v21 = vrot.slane %v2136_v36, 1  ;;  %12594 = vst [vmem:[#allocation94_spill] sm:$0xff] %v9939_v24  ;;  %v9977_v25 = vld [vmem:[%s8123_s9 + $0x6e0] sm:$0xff] }
 0x2a0   : > { %v1718_v9 = vadd.f32 %v1717_v50, %v1716_v13  ;;  %v1802_v60 = vadd.f32 %v1801_v44, %v1800_v31  ;;  %v2221_v59 = vrot.slane %v2220_v40, 1  ;;  %v2305_v10 = vrot.slane %v2304_v34, 1  ;;  %v9974_v31 = vld [vmem:[%s8123_s9 + $0x590] sm:$0xff]  ;;  %12600 = vst [vmem:[#allocation100_spill] sm:$0xff] %v9977_v25 }
 0x2a1   : > { %v1886_v54 = vadd.f32 %v1885_v0, %v1884_v41  ;;  %v1970_v45 = vadd.f32 %v1969_v61, %v1968_v52  ;;  %v2054_v4 = vadd.f32 %v2053_v33, %v2052_v8  ;;  %v2138_v42 = vadd.f32 %v2137_v21, %v2136_v36  ;;  %12599 = vst [vmem:[#allocation99_spill] sm:$0xff] %v9974_v31  ;;  %v9984_v52 = vld [vmem:[%s8123_s9 + $0x710] sm:$0xff]  ;;  %v9987_v8 = vld [vmem:[%s8123_s9 + $0x860] sm:$0xff] }
 0x2a2   : > { %v2222_v57 = vadd.f32 %v2221_v59, %v2220_v40  ;;  %v2306_v5 = vadd.f32 %v2305_v10, %v2304_v34  ;;  %v9930_v38 = vadd.f32 %v1718_v9, %v9833_v46  ;;  %v9933_v35 = vadd.f32 %v1802_v60, %v9835_v30  ;;  %v9954_v30 = vld [vmem:[%s8123_s9 + $0x290] sm:$0xff]  ;;  %12601 = vst [vmem:[#allocation101_spill] sm:$0xff] %v9984_v52  ;;  %v9997_v0 = vld [vmem:[%s8123_s9 + $0x9e0] sm:$0xff] }
 0x2a3   : > { %v9942_v6 = vadd.f32 %v1886_v54, %v9843_v27  ;;  %v9945_v7 = vadd.f32 %v1970_v45, %v9845_v26  ;;  %v9948_v29 = vadd.f32 %v2054_v4, %v9847_v19  ;;  %v9951_v46 = vadd.f32 %v2138_v42, %v9849_v16  ;;  %12595 = vst [vmem:[#allocation95_spill] sm:$0xff] %v9954_v30  ;;  %v9966_v26 = vld [vmem:[%s8123_s9 + $0x410] sm:$0xff]  ;;  %v9969_v19 = vld [vmem:[%s8123_s9 + $0x560] sm:$0xff] }
 0x2a4   : > { %v9960_v58 = vadd.f32 %v2222_v57, %v9857_v49  ;;  %v9963_v27 = vadd.f32 %v2306_v5, %v9859_v22  ;;  %12597 = vst [vmem:[#allocation97_spill] sm:$0xff] %v9966_v26  ;;  %12598 = vst [vmem:[#allocation98_spill] sm:$0xff] %v9969_v19  ;;  %v2525_v13 = vunpack.c.h.bf16 %v9927_v2  ;;  %v2537_v22 = vunpack.c.h.bf16 %v9936_v23  ;;  %v9994_v34 = vld [vmem:[%s8123_s9 + $0x890] sm:$0xff]  ;;  %v10007_v59 = vld [vmem:[%s8123_s9 + $0xb60] sm:$0xff] }
 0x2a5   : > { %v2549_v41 = vunpack.c.h.bf16 %v9939_v24  ;;  %12602 = vst [vmem:[#allocation102_spill] sm:$0xff] %v9987_v8  ;;  %v2561_v50 = vunpack.c.h.bf16 %v9954_v30  ;;  %v2573_v40 = vunpack.c.h.bf16 %v9957_v56  ;;  %12603 = vst [vmem:[#allocation103_spill] sm:$0xff] %v9994_v34  ;;  %v2585_v33 = vunpack.c.h.bf16 %v9966_v26  ;;  %v10004_v60 = vld [vmem:[%s8123_s9 + $0xa10] sm:$0xff] }
 0x2a6   : > { %12604 = vst [vmem:[#allocation104_spill] sm:$0xff] %v9997_v0  ;;  %v2597_v9 = vunpack.c.h.bf16 %v9969_v19  ;;  %12605 = vst [vmem:[#allocation105_spill] sm:$0xff] %v10004_v60  ;;  %v2609_v54 = vunpack.c.h.bf16 %v9974_v31  ;;  %v2621_v4 = vunpack.c.h.bf16 %v9977_v25  ;;  %v10014_v42 = vld [vmem:[%s8123_s9 + $0xb90] sm:$0xff]  ;;  %v2633_v5 = vunpack.c.h.bf16 %v9984_v52 }
 0x2a7   : > { %12606 = vst [vmem:[#allocation106_spill] sm:$0xff] %v10007_v59  ;;  %12607 = vst [vmem:[#allocation107_spill] sm:$0xff] %v10014_v42  ;;  %v2645_v61 = vunpack.c.h.bf16 %v9987_v8  ;;  %v2657_v10 = vunpack.c.h.bf16 %v9994_v34  ;;  %v2669_v45 = vunpack.c.h.bf16 %v9997_v0  ;;  %v2681_v49 = vunpack.c.h.bf16 %v10004_v60 }
 0x2a8   : > { %v2693_v16 = vunpack.c.h.bf16 %v10007_v59  ;;  %v2705_v8 = vunpack.c.h.bf16 %v10014_v42  ;;  %v2771_v52 = vadd.f32 %v2537_v22, %v2525_v13  ;;  %v2855_v44 = vadd.f32 %v2561_v50, %v2549_v41 }
 0x2a9   : > { %v2939_v25 = vadd.f32 %v2585_v33, %v2573_v40  ;;  %v3023_v34 = vadd.f32 %v2609_v54, %v2597_v9  ;;  %v3107_v31 = vadd.f32 %v2633_v5, %v2621_v4  ;;  %v3191_v36 = vadd.f32 %v2657_v10, %v2645_v61 }
 0x2aa   : > { %v2772_v19 = vrot.slane %v2771_v52, 4  ;;  %v2856_v0 = vrot.slane %v2855_v44, 4  ;;  %v3275_v26 = vadd.f32 %v2681_v49, %v2669_v45  ;;  %v3359_v20 = vadd.f32 %v2705_v8, %v2693_v16 }
 0x2ab   : > { %v2940_v56 = vrot.slane %v2939_v25, 4  ;;  %v3024_v60 = vrot.slane %v3023_v34, 4  ;;  %v3108_v30 = vrot.slane %v3107_v31, 4  ;;  %v3192_v57 = vrot.slane %v3191_v36, 4 }
 0x2ac   : > { %v2773_v24 = vadd.f32 %v2772_v19, %v2771_v52  ;;  %v2857_v59 = vadd.f32 %v2856_v0, %v2855_v44  ;;  %v3276_v23 = vrot.slane %v3275_v26, 4  ;;  %v3360_v21 = vrot.slane %v3359_v20, 4 }
 0x2ad   : > { %v2941_v2 = vadd.f32 %v2940_v56, %v2939_v25  ;;  %v3025_v42 = vadd.f32 %v3024_v60, %v3023_v34  ;;  %v3109_v13 = vadd.f32 %v3108_v30, %v3107_v31  ;;  %v3193_v22 = vadd.f32 %v3192_v57, %v3191_v36  ;;  %v10031_v57 = vld [vmem:[%s8123_s9 + $0x140] sm:$0xff] }
 0x2ae   : > { %v2774_v41 = vrot.slane %v2773_v24, 2  ;;  %v2858_v50 = vrot.slane %v2857_v59, 2  ;;  %v3277_v40 = vadd.f32 %v3276_v23, %v3275_v26  ;;  %v3361_v61 = vadd.f32 %v3360_v21, %v3359_v20  ;;  %12608 = vst [vmem:[#allocation108_spill] sm:$0xff] %v10031_v57 }
 0x2af   : > { %v2942_v33 = vrot.slane %v2941_v2, 2  ;;  %v3026_v9 = vrot.slane %v3025_v42, 2  ;;  %v3110_v49 = vrot.slane %v3109_v13, 2  ;;  %v3194_v16 = vrot.slane %v3193_v22, 2 }
 0x2b0   : > { %v2775_v8 = vadd.f32 %v2774_v41, %v2773_v24  ;;  %v2859_v10 = vadd.f32 %v2858_v50, %v2857_v59  ;;  %v3278_v54 = vrot.slane %v3277_v40, 2  ;;  %v3362_v45 = vrot.slane %v3361_v61, 2  ;;  %v10040_v50 = vld [vmem:[%s8123_s9 + $0x170] sm:$0xff] }
 0x2b1   : > { %v2943_v19 = vadd.f32 %v2942_v33, %v2941_v2  ;;  %v3027_v52 = vadd.f32 %v3026_v9, %v3025_v42  ;;  %v3111_v44 = vadd.f32 %v3110_v49, %v3109_v13  ;;  %v3195_v0 = vadd.f32 %v3194_v16, %v3193_v22  ;;  %12609 = vst [vmem:[#allocation109_spill] sm:$0xff] %v10040_v50  ;;  %v10061_v49 = vld [vmem:[%s8123_s9 + $0x440] sm:$0xff] }
 0x2b2   : > { %v2776_v56 = vrot.slane %v2775_v8, 1  ;;  %v2860_v30 = vrot.slane %v2859_v10, 1  ;;  %v3279_v31 = vadd.f32 %v3278_v54, %v3277_v40  ;;  %v3363_v25 = vadd.f32 %v3362_v45, %v3361_v61  ;;  %v10043_v40 = vld [vmem:[%s8123_s9 + $0x2c0] sm:$0xff]  ;;  %12612 = vst [vmem:[#allocation112_spill] sm:$0xff] %v10061_v49 }
 0x2b3   : > { %v2944_v36 = vrot.slane %v2943_v19, 1  ;;  %v3028_v23 = vrot.slane %v3027_v52, 1  ;;  %v3112_v26 = vrot.slane %v3111_v44, 1  ;;  %v3196_v20 = vrot.slane %v3195_v0, 1  ;;  %12610 = vst [vmem:[#allocation110_spill] sm:$0xff] %v10043_v40  ;;  %v10081_v54 = vld [vmem:[%s8123_s9 + $0x740] sm:$0xff] }
 0x2b4   : > { %v2777_v34 = vadd.f32 %v2776_v56, %v2775_v8  ;;  %v2861_v24 = vadd.f32 %v2860_v30, %v2859_v10  ;;  %v3280_v21 = vrot.slane %v3279_v31, 1  ;;  %v3364_v60 = vrot.slane %v3363_v25, 1  ;;  %v10078_v10 = vld [vmem:[%s8123_s9 + $0x5f0] sm:$0xff]  ;;  %12616 = vst [vmem:[#allocation116_spill] sm:$0xff] %v10081_v54 }
 0x2b5   : > { %v2945_v2 = vadd.f32 %v2944_v36, %v2943_v19  ;;  %v3029_v59 = vadd.f32 %v3028_v23, %v3027_v52  ;;  %v3113_v4 = vadd.f32 %v3112_v26, %v3111_v44  ;;  %v3197_v42 = vadd.f32 %v3196_v20, %v3195_v0  ;;  %12615 = vst [vmem:[#allocation115_spill] sm:$0xff] %v10078_v10  ;;  %v10088_v52 = vld [vmem:[%s8123_s9 + $0x770] sm:$0xff]  ;;  %v10091_v44 = vld [vmem:[%s8123_s9 + $0x8c0] sm:$0xff] }
 0x2b6   : > { %v3281_v5 = vadd.f32 %v3280_v21, %v3279_v31  ;;  %v3365_v13 = vadd.f32 %v3364_v60, %v3363_v25  ;;  %v10034_v22 = vadd.f32 %v2777_v34, %v9930_v38  ;;  %v10037_v41 = vadd.f32 %v2861_v24, %v9933_v35  ;;  %v10058_v35 = vld [vmem:[%s8123_s9 + $0x2f0] sm:$0xff]  ;;  %12617 = vst [vmem:[#allocation117_spill] sm:$0xff] %v10088_v52  ;;  %v10101_v36 = vld [vmem:[%s8123_s9 + $0xa40] sm:$0xff] }
 0x2b7   : > { %v10046_v61 = vadd.f32 %v2945_v2, %v9942_v6  ;;  %v10049_v33 = vadd.f32 %v3029_v59, %v9945_v7  ;;  %v10052_v9 = vadd.f32 %v3113_v4, %v9948_v29  ;;  %v10055_v38 = vadd.f32 %v3197_v42, %v9951_v46  ;;  %12611 = vst [vmem:[#allocation111_spill] sm:$0xff] %v10058_v35  ;;  %v10070_v7 = vld [vmem:[%s8123_s9 + $0x470] sm:$0xff]  ;;  %v10073_v29 = vld [vmem:[%s8123_s9 + $0x5c0] sm:$0xff] }
 0x2b8   : > { %v10064_v16 = vadd.f32 %v3281_v5, %v9960_v58  ;;  %v10067_v6 = vadd.f32 %v3365_v13, %v9963_v27  ;;  %12613 = vst [vmem:[#allocation113_spill] sm:$0xff] %v10070_v7  ;;  %12614 = vst [vmem:[#allocation114_spill] sm:$0xff] %v10073_v29  ;;  %v3584_v8 = vunpack.c.h.bf16 %v10031_v57  ;;  %v3596_v27 = vunpack.c.h.bf16 %v10040_v50  ;;  %v10098_v25 = vld [vmem:[%s8123_s9 + $0x8f0] sm:$0xff]  ;;  %v10111_v21 = vld [vmem:[%s8123_s9 + $0xbc0] sm:$0xff] }
 0x2b9   : > { %v3608_v19 = vunpack.c.h.bf16 %v10043_v40  ;;  %12618 = vst [vmem:[#allocation118_spill] sm:$0xff] %v10091_v44  ;;  %v3620_v56 = vunpack.c.h.bf16 %v10058_v35  ;;  %v3632_v31 = vunpack.c.h.bf16 %v10061_v49  ;;  %12619 = vst [vmem:[#allocation119_spill] sm:$0xff] %v10098_v25  ;;  %v3644_v26 = vunpack.c.h.bf16 %v10070_v7  ;;  %v10108_v24 = vld [vmem:[%s8123_s9 + $0xa70] sm:$0xff] }
 0x2ba   : > { %12620 = vst [vmem:[#allocation120_spill] sm:$0xff] %v10101_v36  ;;  %v3656_v34 = vunpack.c.h.bf16 %v10073_v29  ;;  %12621 = vst [vmem:[#allocation121_spill] sm:$0xff] %v10108_v24  ;;  %v3668_v2 = vunpack.c.h.bf16 %v10078_v10  ;;  %v3680_v4 = vunpack.c.h.bf16 %v10081_v54  ;;  %v10118_v42 = vld [vmem:[%s8123_s9 + $0xbf0] sm:$0xff]  ;;  %v3692_v13 = vunpack.c.h.bf16 %v10088_v52 }
 0x2bb   : > { %12622 = vst [vmem:[#allocation122_spill] sm:$0xff] %v10111_v21  ;;  %12623 = vst [vmem:[#allocation123_spill] sm:$0xff] %v10118_v42  ;;  %v3704_v23 = vunpack.c.h.bf16 %v10091_v44  ;;  %v3716_v60 = vunpack.c.h.bf16 %v10098_v25  ;;  %v3728_v59 = vunpack.c.h.bf16 %v10101_v36  ;;  %v3740_v58 = vunpack.c.h.bf16 %v10108_v24 }
 0x2bc   : > { %v3752_v46 = vunpack.c.h.bf16 %v10111_v21  ;;  %v3764_v44 = vunpack.c.h.bf16 %v10118_v42  ;;  %v3830_v52 = vadd.f32 %v3596_v27, %v3584_v8  ;;  %v3914_v30 = vadd.f32 %v3620_v56, %v3608_v19 }
 0x2bd   : > { %v3998_v54 = vadd.f32 %v3644_v26, %v3632_v31  ;;  %v4082_v25 = vadd.f32 %v3668_v2, %v3656_v34  ;;  %v4166_v10 = vadd.f32 %v3692_v13, %v3680_v4  ;;  %v4250_v0 = vadd.f32 %v3716_v60, %v3704_v23 }
 0x2be   : > { %v3831_v29 = vrot.slane %v3830_v52, 4  ;;  %v3915_v36 = vrot.slane %v3914_v30, 4  ;;  %v4334_v7 = vadd.f32 %v3740_v58, %v3728_v59  ;;  %v4418_v45 = vadd.f32 %v3764_v44, %v3752_v46 }
 0x2bf   : > { %v3999_v49 = vrot.slane %v3998_v54, 4  ;;  %v4083_v24 = vrot.slane %v4082_v25, 4  ;;  %v4167_v35 = vrot.slane %v4166_v10, 4  ;;  %v4251_v5 = vrot.slane %v4250_v0, 4 }
 0x2c0   : > { %v3832_v40 = vadd.f32 %v3831_v29, %v3830_v52  ;;  %v3916_v21 = vadd.f32 %v3915_v36, %v3914_v30  ;;  %v4335_v50 = vrot.slane %v4334_v7, 4  ;;  %v4419_v20 = vrot.slane %v4418_v45, 4 }
 0x2c1   : > { %v4000_v57 = vadd.f32 %v3999_v49, %v3998_v54  ;;  %v4084_v42 = vadd.f32 %v4083_v24, %v4082_v25  ;;  %v4168_v8 = vadd.f32 %v4167_v35, %v4166_v10  ;;  %v4252_v27 = vadd.f32 %v4251_v5, %v4250_v0 }
 0x2c2   : > { %v3833_v19 = vrot.slane %v3832_v40, 2  ;;  %v3917_v56 = vrot.slane %v3916_v21, 2  ;;  %v4336_v31 = vadd.f32 %v4335_v50, %v4334_v7  ;;  %v4420_v23 = vadd.f32 %v4419_v20, %v4418_v45 }
 0x2c3   : > { %v4001_v26 = vrot.slane %v4000_v57, 2  ;;  %v4085_v34 = vrot.slane %v4084_v42, 2  ;;  %v4169_v58 = vrot.slane %v4168_v8, 2  ;;  %v4253_v46 = vrot.slane %v4252_v27, 2 }
 0x2c4   : > { %v3834_v44 = vadd.f32 %v3833_v19, %v3832_v40  ;;  %v3918_v60 = vadd.f32 %v3917_v56, %v3916_v21  ;;  %v4337_v2 = vrot.slane %v4336_v31, 2  ;;  %v4421_v59 = vrot.slane %v4420_v23, 2 }
 0x2c5   : > { %v4002_v29 = vadd.f32 %v4001_v26, %v4000_v57  ;;  %v4086_v52 = vadd.f32 %v4085_v34, %v4084_v42  ;;  %v4170_v30 = vadd.f32 %v4169_v58, %v4168_v8  ;;  %v4254_v36 = vadd.f32 %v4253_v46, %v4252_v27 }
 0x2c6   : > { %v3835_v49 = vrot.slane %v3834_v44, 1  ;;  %v3919_v54 = vrot.slane %v3918_v60, 1  ;;  %v4338_v35 = vadd.f32 %v4337_v2, %v4336_v31  ;;  %v4422_v10 = vadd.f32 %v4421_v59, %v4420_v23 }
 0x2c7   : > { %v4003_v0 = vrot.slane %v4002_v29, 1  ;;  %v4087_v25 = vrot.slane %v4086_v52, 1  ;;  %v4171_v50 = vrot.slane %v4170_v30, 1  ;;  %v4255_v7 = vrot.slane %v4254_v36, 1 }
 0x2c8   : > { %v3836_v45 = vadd.f32 %v3835_v49, %v3834_v44  ;;  %v3920_v20 = vadd.f32 %v3919_v54, %v3918_v60  ;;  %v4339_v24 = vrot.slane %v4338_v35, 1  ;;  %v4423_v4 = vrot.slane %v4422_v10, 1 }
 0x2c9   : > { %v4004_v40 = vadd.f32 %v4003_v0, %v4002_v29  ;;  %v4088_v21 = vadd.f32 %v4087_v25, %v4086_v52  ;;  %v4172_v5 = vadd.f32 %v4171_v50, %v4170_v30  ;;  %v4256_v13 = vadd.f32 %v4255_v7, %v4254_v36 }
 0x2ca   : > { %v4340_v57 = vadd.f32 %v4339_v24, %v4338_v35  ;;  %v4424_v42 = vadd.f32 %v4423_v4, %v4422_v10  ;;  %v4448_v8 = vadd.f32 %v3836_v45, %v10034_v22  ;;  %v4460_v27 = vadd.f32 %v3920_v20, %v10037_v41 }
 0x2cb   : > { %v4472_v19 = vadd.f32 %v4004_v40, %v10046_v61  ;;  %v4484_v56 = vadd.f32 %v4088_v21, %v10049_v33  ;;  %v4496_v31 = vadd.f32 %v4172_v5, %v10052_v9  ;;  %v4508_v23 = vadd.f32 %v4256_v13, %v10055_v38 }
 0x2cc   : > { %v4520_v26 = vadd.f32 %v4340_v57, %v10064_v16  ;;  %v4532_v34 = vadd.f32 %v4424_v42, %v10067_v6  ;;  %v4544_v58 = vmul.f32 0.015625, %v4448_v8  ;;  %v4556_v46 = vmul.f32 0.015625, %v4460_v27 }
 0x2cd   : > { %v4568_v44 = vmul.f32 0.015625, %v4472_v19  ;;  %v4580_v60 = vmul.f32 0.015625, %v4484_v56  ;;  %v4592_v2 = vmul.f32 0.015625, %v4496_v31  ;;  %v4604_v22 = vmul.f32 0.015625, %v4508_v23 }
 0x2ce   : > { %v4616_v59 = vmul.f32 0.015625, %v4520_v26  ;;  %v4628_v41 = vmul.f32 0.015625, %v4532_v34  ;;  %v4640_v29 = vpack.c.bf16 %v4544_v58, %v4544_v58  ;;  %v4652_v61 = vpack.c.bf16 %v4556_v46, %v4556_v46 }
 0x2cf   : > { %v4664_v52 = vpack.c.bf16 %v4568_v44, %v4568_v44  ;;  %v4676_v33 = vpack.c.bf16 %v4580_v60, %v4580_v60  ;;  %v4688_v30 = vpack.c.bf16 %v4592_v2, %v4592_v2  ;;  %v4700_v9 = vpack.c.bf16 %v4604_v22, %v4604_v22 }
 0x2d0   : > { %v4712_v36 = vpack.c.bf16 %v4616_v59, %v4616_v59  ;;  %v4724_v38 = vpack.c.bf16 %v4628_v41, %v4628_v41  ;;  %v5036_v49 = vunpack.c.l.b16 %v4640_v29  ;;  %v5048_v16 = vunpack.c.l.b16 %v4652_v61 }
 0x2d1   : > { %v5060_v54 = vunpack.c.l.b16 %v4664_v52  ;;  %v5072_v6 = vunpack.c.l.b16 %v4676_v33  ;;  %v5084_v35 = vunpack.c.l.b16 %v4688_v30  ;;  %v5096_v10 = vunpack.c.l.b16 %v4700_v9 }
 0x2d2   : > { %v5108_v0 = vunpack.c.l.b16 %v4712_v36  ;;  %v5120_v25 = vunpack.c.l.b16 %v4724_v38  ;;  %v5193_v50 = vsel %vm5123_vm0, %v5048_v16, %v5036_v49  ;;  %v12624_v7 = vunpack.c.l.bf16 %v9339_v48 }
 0x2d3   : > { %v12625_v45 = vunpack.c.l.bf16 %v9344_v28  ;;  %v5194_v24 = vsel %vm5125_vm1, %v5060_v54, %v5193_v50  ;;  %v12626_v4 = vunpack.c.l.bf16 %v9349_v11  ;;  %v12627_v40 = vunpack.c.l.bf16 %v9354_v43 }
 0x2d4   : > { %v12628_v5 = vunpack.c.l.bf16 %v9360_v37  ;;  %v12629_v13 = vunpack.c.l.bf16 %v9365_v39  ;;  %v12630_v42 = vunpack.c.l.bf16 %v9370_v12  ;;  %v12631_v8 = vunpack.c.l.bf16 %v9373_v47 }
 0x2d5   : > { %v604_v20 = vadd.f32 %v12625_v45, %v12624_v7  ;;  %v688_v21 = vadd.f32 %v12627_v40, %v12626_v4  ;;  %v5195_v28 = vsel %vm5127_vm2, %v5072_v6, %v5194_v24  ;;  %v12632_v19 = vunpack.c.l.bf16 %v9379_v14 }
 0x2d6   : > { %v772_v57 = vadd.f32 %v12629_v13, %v12628_v5  ;;  %v856_v48 = vadd.f32 %v12631_v8, %v12630_v42  ;;  %v12633_v11 = vunpack.c.l.bf16 %v9385_v17  ;;  %v12634_v43 = vunpack.c.l.bf16 %v9388_v3 }
 0x2d7   : > { %v605_v27 = vrot.slane %v604_v20, 4  ;;  %v12635_v37 = vunpack.c.l.bf16 %v9393_v55  ;;  %v5196_v39 = vsel %vm5129_vm3, %v5084_v35, %v5195_v28  ;;  %v689_v23 = vrot.slane %v688_v21, 4 }
 0x2d8   : > { %v940_v56 = vadd.f32 %v12633_v11, %v12632_v19  ;;  %v773_v12 = vrot.slane %v772_v57, 4  ;;  %v857_v26 = vrot.slane %v856_v48, 4  ;;  %v5197_v47 = vsel %vm5131_vm4, %v5096_v10, %v5196_v39  ;;  %v12646_v39 = vld [vmem:[#allocation17_spill] sm:$0xff] }
 0x2d9   : > { %v1024_v31 = vadd.f32 %v12635_v37, %v12634_v43  ;;  %v606_v34 = vadd.f32 %v605_v27, %v604_v20  ;;  %v5198_v14 = vsel %vm5133_vm5, %v5108_v0, %v5197_v47  ;;  %v690_v44 = vadd.f32 %v689_v23, %v688_v21  ;;  %v12644_v37 = vld [vmem:[#allocation16_spill] sm:$0xff] }
 0x2da   : > { %v941_v58 = vrot.slane %v940_v56, 4  ;;  %v774_v17 = vadd.f32 %v773_v12, %v772_v57  ;;  %v858_v60 = vadd.f32 %v857_v26, %v856_v48  ;;  %v5199_v3 = vsel %vm5135_vm6, %v5120_v25, %v5198_v14  ;;  %v12648_v26 = vld [vmem:[#allocation18_spill] sm:$0xff] }
 0x2db   : > { %v1025_v46 = vrot.slane %v1024_v31, 4  ;;  %v607_v2 = vrot.slane %v606_v34, 2  ;;  %v5223_v59 = vpack.c.b16 %v5199_v3, %v5199_v3  ;;  %v691_v41 = vrot.slane %v690_v44, 2  ;;  %v12656_v3 = vld [vmem:[#allocation22_spill] sm:$0xff] }
 0x2dc   : > { %v942_v55 = vadd.f32 %v941_v58, %v940_v56  ;;  %v775_v29 = vrot.slane %v774_v17, 2  ;;  %v859_v61 = vrot.slane %v858_v60, 2  ;;  %v12636_v9 = vunpack.c.l.bf16 %v9399_v62 }
 0x2dd   : > { %v1026_v22 = vadd.f32 %v1025_v46, %v1024_v31  ;;  %v608_v52 = vadd.f32 %v607_v2, %v606_v34  ;;  %v12637_v36 = vunpack.c.l.bf16 %v9402_v53  ;;  %6394 = vmatprep.mubr.bf16.mxu0 %v5223_v59  ;;  %v692_v49 = vadd.f32 %v691_v41, %v690_v44  ;;  %v12650_v34 = vld [vmem:[#allocation19_spill] sm:$0xff] }
 0x2de   : > { %v943_v33 = vrot.slane %v942_v55, 2  ;;  %v776_v16 = vadd.f32 %v775_v29, %v774_v17  ;;  %v860_v54 = vadd.f32 %v859_v61, %v858_v60  ;;  %v12638_v6 = vunpack.c.l.bf16 %v9408_v51  ;;  %v12654_v17 = vld [vmem:[#allocation21_spill] sm:$0xff]  ;;  %v12658_v2 = vld [vmem:[#allocation23_spill] sm:$0xff] }
 0x2df   : > { %v1027_v30 = vrot.slane %v1026_v22, 2  ;;  %v1108_v38 = vadd.f32 %v12637_v36, %v12636_v9  ;;  %v12639_v35 = vunpack.c.l.bf16 %v9415_v63  ;;  %v609_v0 = vrot.slane %v608_v52, 1 }
 0x2e0   : > { %v944_v25 = vadd.f32 %v943_v33, %v942_v55  ;;  %v693_v45 = vrot.slane %v692_v49, 1  ;;  %v777_v20 = vrot.slane %v776_v16, 1  ;;  %v861_v24 = vrot.slane %v860_v54, 1 }
 0x2e1   : > { %v1192_v10 = vadd.f32 %v12639_v35, %v12638_v6  ;;  %v1028_v50 = vadd.f32 %v1027_v30, %v1026_v22  ;;  %v1109_v7 = vrot.slane %v1108_v38, 4  ;;  %v10181_v4 = vadd.f32 %v609_v0, %v608_v52 }
 0x2e2   : > { %v945_v53 = vrot.slane %v944_v25, 1  ;;  %v10183_v5 = vadd.f32 %v693_v45, %v692_v49  ;;  %v10185_v13 = vadd.f32 %v777_v20, %v776_v16  ;;  %v10187_v51 = vadd.f32 %v861_v24, %v860_v54 }
 0x2e3   : > { %v1193_v62 = vrot.slane %v1192_v10, 4  ;;  %v1029_v40 = vrot.slane %v1028_v50, 1  ;;  %v1110_v21 = vadd.f32 %v1109_v7, %v1108_v38  ;;  %v12640_v48 = vunpack.c.l.bf16 %v9432_v1 }
 0x2e4   : > { %v10189_v57 = vadd.f32 %v945_v53, %v944_v25  ;;  %v12641_v28 = vunpack.c.l.bf16 %v9439_v18  ;;  %v12642_v11 = vunpack.c.l.bf16 %v9442_v15  ;;  %v12643_v56 = vunpack.c.l.bf16 %v9453_v32  ;;  %v12652_v18 = vld [vmem:[#allocation20_spill] sm:$0xff] }
 0x2e5   : > { %v1194_v63 = vadd.f32 %v1193_v62, %v1192_v10  ;;  %v10191_v42 = vadd.f32 %v1029_v40, %v1028_v50  ;;  %v1111_v8 = vrot.slane %v1110_v21, 2  ;;  %v12645_v31 = vunpack.c.l.bf16 %v12644_v37  ;;  %v12660_v62 = vld [vmem:[#allocation24_spill] sm:$0xff]  ;;  %v12662_v40 = vld [vmem:[#allocation25_spill] sm:$0xff] }
 0x2e6   : > { %v1663_v27 = vadd.f32 %v12641_v28, %v12640_v48  ;;  %v1747_v43 = vadd.f32 %v12643_v56, %v12642_v11  ;;  %v12647_v23 = vunpack.c.l.bf16 %v12646_v39  ;;  %v12649_v47 = vunpack.c.l.bf16 %v12648_v26  ;;  %v12666_v11 = vld [vmem:[#allocation27_spill] sm:$0xff] }
 0x2e7   : > { %v1195_v19 = vrot.slane %v1194_v63, 2  ;;  %v12651_v58 = vunpack.c.l.bf16 %v12650_v34  ;;  %v1112_v1 = vadd.f32 %v1111_v8, %v1110_v21  ;;  %v12653_v44 = vunpack.c.l.bf16 %v12652_v18 }
 0x2e8   : > { %v1831_v12 = vadd.f32 %v12647_v23, %v12645_v31  ;;  %v1664_v14 = vrot.slane %v1663_v27, 4  ;;  %v12655_v60 = vunpack.c.l.bf16 %v12654_v17  ;;  %v12657_v32 = vunpack.c.l.bf16 %v12656_v3 }
 0x2e9   : > { %v1915_v46 = vadd.f32 %v12651_v58, %v12649_v47  ;;  %v12659_v55 = vunpack.c.l.bf16 %v12658_v2  ;;  %v1196_v59 = vadd.f32 %v1195_v19, %v1194_v63  ;;  %v1748_v41 = vrot.slane %v1747_v43, 4 }
 0x2ea   : > { %v1999_v15 = vadd.f32 %v12655_v60, %v12653_v44  ;;  %v1832_v29 = vrot.slane %v1831_v12, 4  ;;  %v1113_v52 = vrot.slane %v1112_v1, 1  ;;  %v1665_v33 = vadd.f32 %v1664_v14, %v1663_v27  ;;  %v12664_v27 = vld [vmem:[#allocation26_spill] sm:$0xff] }
 0x2eb   : > { %v2083_v22 = vadd.f32 %v12659_v55, %v12657_v32  ;;  %v1916_v61 = vrot.slane %v1915_v46, 4  ;;  %v1197_v36 = vrot.slane %v1196_v59, 1  ;;  %v1749_v38 = vadd.f32 %v1748_v41, %v1747_v43 }
 0x2ec   : > { %v2000_v30 = vrot.slane %v1999_v15, 4  ;;  %v1833_v49 = vadd.f32 %v1832_v29, %v1831_v12  ;;  %v10217_v54 = vadd.f32 %v1113_v52, %v1112_v1  ;;  %v1666_v6 = vrot.slane %v1665_v33, 2 }
 0x2ed   : > { %v2084_v9 = vrot.slane %v2083_v22, 4  ;;  %v1917_v16 = vadd.f32 %v1916_v61, %v1915_v46  ;;  %v10219_v0 = vadd.f32 %v1197_v36, %v1196_v59  ;;  %v1750_v25 = vrot.slane %v1749_v38, 2 }
 0x2ee   : > { %v2001_v35 = vadd.f32 %v2000_v30, %v1999_v15  ;;  %v1834_v50 = vrot.slane %v1833_v49, 2  ;;  %v1667_v45 = vadd.f32 %v1666_v6, %v1665_v33  ;;  %v12661_v53 = vunpack.c.l.bf16 %v12660_v62  ;;  %v12668_v33 = vld [vmem:[#allocation28_spill] sm:$0xff]  ;;  %v12670_v30 = vld [vmem:[#allocation29_spill] sm:$0xff] }
 0x2ef   : > { %v2085_v10 = vadd.f32 %v2084_v9, %v2083_v22  ;;  %v1918_v7 = vrot.slane %v1917_v16, 2  ;;  %v12663_v21 = vunpack.c.l.bf16 %v12662_v40  ;;  %v1751_v8 = vadd.f32 %v1750_v25, %v1749_v38  ;;  %v12672_v38 = vld [vmem:[#allocation30_spill] sm:$0xff] }
 0x2f0   : > { %v2002_v20 = vrot.slane %v2001_v35, 2  ;;  %v1835_v48 = vadd.f32 %v1834_v50, %v1833_v49  ;;  %v12665_v19 = vunpack.c.l.bf16 %v12664_v27  ;;  %v12667_v56 = vunpack.c.l.bf16 %v12666_v11  ;;  %v12680_v50 = vld [vmem:[#allocation34_spill] sm:$0xff]  ;;  %v12690_v27 = vld [vmem:[#allocation39_spill] sm:$0xff] }
 0x2f1   : > { %v2086_v24 = vrot.slane %v2085_v10, 2  ;;  %v2167_v63 = vadd.f32 %v12663_v21, %v12661_v53  ;;  %v1919_v28 = vadd.f32 %v1918_v7, %v1917_v16  ;;  %v1668_v37 = vrot.slane %v1667_v45, 1  ;;  %v12684_v53 = vld [vmem:[#allocation36_spill] sm:$0xff]  ;;  %v12686_v21 = vld [vmem:[#allocation37_spill] sm:$0xff] }
 0x2f2   : > { %v2251_v43 = vadd.f32 %v12667_v56, %v12665_v19  ;;  %v2003_v31 = vadd.f32 %v2002_v20, %v2001_v35  ;;  %v1752_v12 = vrot.slane %v1751_v8, 1  ;;  %v1836_v26 = vrot.slane %v1835_v48, 1 }
 0x2f3   : > { %v2087_v39 = vadd.f32 %v2086_v24, %v2085_v10  ;;  %v2168_v23 = vrot.slane %v2167_v63, 4  ;;  %v1920_v47 = vrot.slane %v1919_v28, 1  ;;  %v1669_v58 = vadd.f32 %v1668_v37, %v1667_v45  ;;  %v12678_v10 = vld [vmem:[#allocation33_spill] sm:$0xff] }
 0x2f4   : > { %v2252_v34 = vrot.slane %v2251_v43, 4  ;;  %v2004_v46 = vrot.slane %v2003_v31, 1  ;;  %v1753_v18 = vadd.f32 %v1752_v12, %v1751_v8  ;;  %v1837_v44 = vadd.f32 %v1836_v26, %v1835_v48  ;;  %v12688_v48 = vld [vmem:[#allocation38_spill] sm:$0xff] }
 0x2f5   : > { %v2088_v1 = vrot.slane %v2087_v39, 1  ;;  %v2169_v14 = vadd.f32 %v2168_v23, %v2167_v63  ;;  %v1921_v17 = vadd.f32 %v1920_v47, %v1919_v28  ;;  %v10230_v2 = vadd.f32 %v1669_v58, %v10181_v4 }
 0x2f6   : > { %v2253_v60 = vadd.f32 %v2252_v34, %v2251_v43  ;;  %v2005_v15 = vadd.f32 %v2004_v46, %v2003_v31  ;;  %v10233_v22 = vadd.f32 %v1753_v18, %v10183_v5  ;;  %v10236_v59 = vadd.f32 %v1837_v44, %v10185_v13  ;;  %v12674_v13 = vld [vmem:[#allocation31_spill] sm:$0xff] }
 0x2f7   : > { %v2089_v3 = vadd.f32 %v2088_v1, %v2087_v39  ;;  %v2170_v32 = vrot.slane %v2169_v14, 2  ;;  %v10239_v41 = vadd.f32 %v1921_v17, %v10187_v51  ;;  %v12669_v4 = vunpack.c.l.bf16 %v12668_v33  ;;  %v12676_v51 = vld [vmem:[#allocation32_spill] sm:$0xff] }
 0x2f8   : > { %v2254_v55 = vrot.slane %v2253_v60, 2  ;;  %v10242_v61 = vadd.f32 %v2005_v15, %v10189_v57  ;;  %v12671_v9 = vunpack.c.l.bf16 %v12670_v30  ;;  %v12673_v49 = vunpack.c.l.bf16 %v12672_v38  ;;  %v12692_v33 = vld [vmem:[#allocation40_spill] sm:$0xff]  ;;  %v12694_v30 = vld [vmem:[#allocation41_spill] sm:$0xff] }
 0x2f9   : > { %v2171_v29 = vadd.f32 %v2170_v32, %v2169_v14  ;;  %v10245_v52 = vadd.f32 %v2089_v3, %v10191_v42  ;;  %v12675_v16 = vunpack.c.l.bf16 %v12674_v13  ;;  %v12677_v35 = vunpack.c.l.bf16 %v12676_v51  ;;  %v12682_v42 = vld [vmem:[#allocation35_spill] sm:$0xff] }
 0x2fa   : > { %v2722_v36 = vadd.f32 %v12671_v9, %v12669_v4  ;;  %v2255_v5 = vadd.f32 %v2254_v55, %v2253_v60  ;;  %v12679_v25 = vunpack.c.l.bf16 %v12678_v10  ;;  %v12681_v7 = vunpack.c.l.bf16 %v12680_v50 }
 0x2fb   : > { %v2806_v6 = vadd.f32 %v12675_v16, %v12673_v49  ;;  %v12683_v45 = vunpack.c.l.bf16 %v12682_v42  ;;  %v2172_v24 = vrot.slane %v2171_v29, 1  ;;  %v12685_v40 = vunpack.c.l.bf16 %v12684_v53  ;;  %v12696_v49 = vld [vmem:[#allocation42_spill] sm:$0xff]  ;;  %v12698_v16 = vld [vmem:[#allocation43_spill] sm:$0xff] }
 0x2fc   : > { %v2890_v57 = vadd.f32 %v12679_v25, %v12677_v35  ;;  %v2723_v62 = vrot.slane %v2722_v36, 4  ;;  %v12687_v63 = vunpack.c.l.bf16 %v12686_v21  ;;  %v12689_v28 = vunpack.c.l.bf16 %v12688_v48 }
 0x2fd   : > { %v2974_v20 = vadd.f32 %v12683_v45, %v12681_v7  ;;  %v12691_v19 = vunpack.c.l.bf16 %v12690_v27  ;;  %v2256_v56 = vrot.slane %v2255_v5, 1  ;;  %v2807_v43 = vrot.slane %v2806_v6, 4 }
 0x2fe   : > { %v3058_v8 = vadd.f32 %v12687_v63, %v12685_v40  ;;  %v2891_v37 = vrot.slane %v2890_v57, 4  ;;  %v2173_v39 = vadd.f32 %v2172_v24, %v2171_v29  ;;  %v2724_v23 = vadd.f32 %v2723_v62, %v2722_v36 }
 0x2ff   : > { %v3142_v11 = vadd.f32 %v12691_v19, %v12689_v28  ;;  %v2975_v31 = vrot.slane %v2974_v20, 4  ;;  %v2257_v47 = vadd.f32 %v2256_v56, %v2255_v5  ;;  %v2808_v34 = vadd.f32 %v2807_v43, %v2806_v6 }
 0x300   : > { %v3059_v12 = vrot.slane %v3058_v8, 4  ;;  %v2892_v58 = vadd.f32 %v2891_v37, %v2890_v57  ;;  %v10272_v1 = vadd.f32 %v2173_v39, %v10217_v54  ;;  %v2725_v14 = vrot.slane %v2724_v23, 2 }
 0x301   : > { %v3143_v26 = vrot.slane %v3142_v11, 4  ;;  %v2976_v46 = vadd.f32 %v2975_v31, %v2974_v20  ;;  %v10275_v17 = vadd.f32 %v2257_v47, %v10219_v0  ;;  %v2809_v60 = vrot.slane %v2808_v34, 2 }
 0x302   : > { %v3060_v18 = vadd.f32 %v3059_v12, %v3058_v8  ;;  %v2893_v15 = vrot.slane %v2892_v58, 2  ;;  %v2726_v32 = vadd.f32 %v2725_v14, %v2724_v23  ;;  %v12693_v4 = vunpack.c.l.bf16 %v12692_v33  ;;  %v12700_v23 = vld [vmem:[#allocation44_spill] sm:$0xff]  ;;  %v12702_v12 = vld [vmem:[#allocation45_spill] sm:$0xff] }
 0x303   : > { %v3144_v44 = vadd.f32 %v3143_v26, %v3142_v11  ;;  %v2977_v3 = vrot.slane %v2976_v46, 2  ;;  %v12695_v9 = vunpack.c.l.bf16 %v12694_v30  ;;  %v2810_v5 = vadd.f32 %v2809_v60, %v2808_v34  ;;  %v12704_v34 = vld [vmem:[#allocation46_spill] sm:$0xff] }
 0x304   : > { %v3061_v55 = vrot.slane %v3060_v18, 2  ;;  %v2894_v54 = vadd.f32 %v2893_v15, %v2892_v58  ;;  %v12697_v13 = vunpack.c.l.bf16 %v12696_v49  ;;  %v12699_v6 = vunpack.c.l.bf16 %v12698_v16  ;;  %v12712_v15 = vld [vmem:[#allocation50_spill] sm:$0xff]  ;;  %v12722_v49 = vld [vmem:[#allocation55_spill] sm:$0xff] }
 0x305   : > { %v3145_v29 = vrot.slane %v3144_v44, 2  ;;  %v3226_v36 = vadd.f32 %v12695_v9, %v12693_v4  ;;  %v2978_v38 = vadd.f32 %v2977_v3, %v2976_v46  ;;  %v2727_v51 = vrot.slane %v2726_v32, 1  ;;  %v12716_v4 = vld [vmem:[#allocation52_spill] sm:$0xff]  ;;  %v12718_v9 = vld [vmem:[#allocation53_spill] sm:$0xff] }
 0x306   : > { %v3310_v0 = vadd.f32 %v12699_v6, %v12697_v13  ;;  %v3062_v35 = vadd.f32 %v3061_v55, %v3060_v18  ;;  %v2811_v57 = vrot.slane %v2810_v5, 1  ;;  %v2895_v50 = vrot.slane %v2894_v54, 1 }
 0x307   : > { %v3146_v10 = vadd.f32 %v3145_v29, %v3144_v44  ;;  %v3227_v25 = vrot.slane %v3226_v36, 4  ;;  %v2979_v7 = vrot.slane %v2978_v38, 1  ;;  %v2728_v45 = vadd.f32 %v2727_v51, %v2726_v32  ;;  %v12710_v44 = vld [vmem:[#allocation49_spill] sm:$0xff] }
 0x308   : > { %v3311_v42 = vrot.slane %v3310_v0, 4  ;;  %v3063_v20 = vrot.slane %v3062_v35, 1  ;;  %v2812_v53 = vadd.f32 %v2811_v57, %v2810_v5  ;;  %v2896_v40 = vadd.f32 %v2895_v50, %v2894_v54  ;;  %v12720_v54 = vld [vmem:[#allocation54_spill] sm:$0xff] }
 0x309   : > { %v3147_v24 = vrot.slane %v3146_v10, 1  ;;  %v3228_v62 = vadd.f32 %v3227_v25, %v3226_v36  ;;  %v2980_v21 = vadd.f32 %v2979_v7, %v2978_v38  ;;  %v10286_v27 = vadd.f32 %v2728_v45, %v10230_v2 }
 0x30a   : > { %v3312_v63 = vadd.f32 %v3311_v42, %v3310_v0  ;;  %v3064_v8 = vadd.f32 %v3063_v20, %v3062_v35  ;;  %v10289_v11 = vadd.f32 %v2812_v53, %v10233_v22  ;;  %v10292_v56 = vadd.f32 %v2896_v40, %v10236_v59  ;;  %v12706_v59 = vld [vmem:[#allocation47_spill] sm:$0xff] }
 0x30b   : > { %v3148_v48 = vadd.f32 %v3147_v24, %v3146_v10  ;;  %v3229_v28 = vrot.slane %v3228_v62, 2  ;;  %v10295_v43 = vadd.f32 %v2980_v21, %v10239_v41  ;;  %v12701_v2 = vunpack.c.l.bf16 %v12700_v23  ;;  %v12708_v41 = vld [vmem:[#allocation48_spill] sm:$0xff] }
 0x30c   : > { %v3313_v19 = vrot.slane %v3312_v63, 2  ;;  %v10298_v31 = vadd.f32 %v3064_v8, %v10242_v61  ;;  %v12703_v26 = vunpack.c.l.bf16 %v12702_v12  ;;  %v12705_v58 = vunpack.c.l.bf16 %v12704_v34  ;;  %v12724_v23 = vld [vmem:[#allocation56_spill] sm:$0xff]  ;;  %v12726_v12 = vld [vmem:[#allocation57_spill] sm:$0xff] }
 0x30d   : > { %v3230_v37 = vadd.f32 %v3229_v28, %v3228_v62  ;;  %v10301_v39 = vadd.f32 %v3148_v48, %v10245_v52  ;;  %v12707_v46 = vunpack.c.l.bf16 %v12706_v59  ;;  %v12709_v18 = vunpack.c.l.bf16 %v12708_v41  ;;  %v12714_v52 = vld [vmem:[#allocation51_spill] sm:$0xff] }
 0x30e   : > { %v3781_v47 = vadd.f32 %v12703_v26, %v12701_v2  ;;  %v3314_v22 = vadd.f32 %v3313_v19, %v3312_v63  ;;  %v12711_v60 = vunpack.c.l.bf16 %v12710_v44  ;;  %v12713_v3 = vunpack.c.l.bf16 %v12712_v15 }
 0x30f   : > { %v3865_v14 = vadd.f32 %v12707_v46, %v12705_v58  ;;  %v12715_v32 = vunpack.c.l.bf16 %v12714_v52  ;;  %v3231_v29 = vrot.slane %v3230_v37, 1  ;;  %v12717_v30 = vunpack.c.l.bf16 %v12716_v4  ;;  %v12728_v58 = vld [vmem:[#allocation58_spill] sm:$0xff]  ;;  %v12730_v46 = vld [vmem:[#allocation59_spill] sm:$0xff] }
 0x310   : > { %v3949_v61 = vadd.f32 %v12711_v60, %v12709_v18  ;;  %v3782_v33 = vrot.slane %v3781_v47, 4  ;;  %v12719_v36 = vunpack.c.l.bf16 %v12718_v9  ;;  %v12721_v38 = vunpack.c.l.bf16 %v12720_v54 }
 0x311   : > { %v4033_v55 = vadd.f32 %v12715_v32, %v12713_v3  ;;  %v12723_v13 = vunpack.c.l.bf16 %v12722_v49  ;;  %v3315_v6 = vrot.slane %v3314_v22, 1  ;;  %v3866_v0 = vrot.slane %v3865_v14, 4 }
 0x312   : > { %v4117_v5 = vadd.f32 %v12719_v36, %v12717_v30  ;;  %v3950_v51 = vrot.slane %v3949_v61, 4  ;;  %v3232_v10 = vadd.f32 %v3231_v29, %v3230_v37  ;;  %v3783_v25 = vadd.f32 %v3782_v33, %v3781_v47 }
 0x313   : > { %v4201_v16 = vadd.f32 %v12723_v13, %v12721_v38  ;;  %v4034_v35 = vrot.slane %v4033_v55, 4  ;;  %v3316_v7 = vadd.f32 %v3315_v6, %v3314_v22  ;;  %v3867_v42 = vadd.f32 %v3866_v0, %v3865_v14 }
 0x314   : > { %v4118_v57 = vrot.slane %v4117_v5, 4  ;;  %v3951_v45 = vadd.f32 %v3950_v51, %v3949_v61  ;;  %v10328_v24 = vadd.f32 %v3232_v10, %v10272_v1  ;;  %v3784_v62 = vrot.slane %v3783_v25, 2 }
 0x315   : > { %v4202_v50 = vrot.slane %v4201_v16, 4  ;;  %v4035_v20 = vadd.f32 %v4034_v35, %v4033_v55  ;;  %v10331_v21 = vadd.f32 %v3316_v7, %v10275_v17  ;;  %v3868_v63 = vrot.slane %v3867_v42, 2 }
 0x316   : > { %v4119_v53 = vadd.f32 %v4118_v57, %v4117_v5  ;;  %v3952_v8 = vrot.slane %v3951_v45, 2  ;;  %v3785_v28 = vadd.f32 %v3784_v62, %v3783_v25  ;;  %v12725_v2 = vunpack.c.l.bf16 %v12724_v23 }
 0x317   : > { %v4203_v40 = vadd.f32 %v4202_v50, %v4201_v16  ;;  %v4036_v48 = vrot.slane %v4035_v20, 2  ;;  %v12727_v26 = vunpack.c.l.bf16 %v12726_v12  ;;  %v3869_v22 = vadd.f32 %v3868_v63, %v3867_v42  ;;  %v12732_v12 = vld [vmem:[#allocation60_spill] sm:$0xff] }
 0x318   : > { %v4120_v19 = vrot.slane %v4119_v53, 2  ;;  %v3953_v1 = vadd.f32 %v3952_v8, %v3951_v45  ;;  %v12729_v59 = vunpack.c.l.bf16 %v12728_v58  ;;  %v12731_v14 = vunpack.c.l.bf16 %v12730_v46 }
 0x319   : > { %v4204_v37 = vrot.slane %v4203_v40, 2  ;;  %v4285_v47 = vadd.f32 %v12727_v26, %v12725_v2  ;;  %v4037_v34 = vadd.f32 %v4036_v48, %v4035_v20  ;;  %v3786_v41 = vrot.slane %v3785_v28, 1 }
 0x31a   : > { %v4369_v17 = vadd.f32 %v12731_v14, %v12729_v59  ;;  %v4121_v18 = vadd.f32 %v4120_v19, %v4119_v53  ;;  %v3870_v61 = vrot.slane %v3869_v22, 1  ;;  %v3954_v15 = vrot.slane %v3953_v1, 1  ;;  %v12736_v59 = vld [vmem:[#allocation62_spill] sm:$0xff]  ;;  %v12738_v14 = vld [vmem:[#allocation63_spill] sm:$0xff] }
 0x31b   : > { %v4205_v44 = vadd.f32 %v4204_v37, %v4203_v40  ;;  %v4286_v60 = vrot.slane %v4285_v47, 4  ;;  %v4038_v3 = vrot.slane %v4037_v34, 1  ;;  %v3787_v32 = vadd.f32 %v3786_v41, %v3785_v28 }
 0x31c   : > { %v4370_v52 = vrot.slane %v4369_v17, 4  ;;  %v4122_v55 = vrot.slane %v4121_v18, 1  ;;  %v3871_v4 = vadd.f32 %v3870_v61, %v3869_v22  ;;  %v3955_v30 = vadd.f32 %v3954_v15, %v3953_v1 }
 0x31d   : > { %v4206_v29 = vrot.slane %v4205_v44, 1  ;;  %v4287_v33 = vadd.f32 %v4286_v60, %v4285_v47  ;;  %v4039_v9 = vadd.f32 %v4038_v3, %v4037_v34  ;;  %v4441_v49 = vadd.f32 %v3787_v32, %v10286_v27  ;;  %v12734_v47 = vld [vmem:[#allocation61_spill] sm:$0xff]  ;;  %v12744_v32 = vld [vmem:[#allocation66_spill] sm:$0xff] }
 0x31e   : > { %v4371_v36 = vadd.f32 %v4370_v52, %v4369_v17  ;;  %v4123_v5 = vadd.f32 %v4122_v55, %v4121_v18  ;;  %v4453_v16 = vadd.f32 %v3871_v4, %v10289_v11  ;;  %v4465_v6 = vadd.f32 %v3955_v30, %v10292_v56  ;;  %v12740_v18 = vld [vmem:[#allocation64_spill] sm:$0xff]  ;;  %v12742_v60 = vld [vmem:[#allocation65_spill] sm:$0xff] }
 0x31f   : > { %v4207_v54 = vadd.f32 %v4206_v29, %v4205_v44  ;;  %v4288_v38 = vrot.slane %v4287_v33, 2  ;;  %v4477_v0 = vadd.f32 %v4039_v9, %v10295_v43  ;;  %v4537_v25 = vmul.f32 0.015625, %v4441_v49  ;;  %v12746_v29 = vld [vmem:[#allocation67_spill] sm:$0xff] }
 0x320   : > { %v4372_v13 = vrot.slane %v4371_v36, 2  ;;  %v4489_v35 = vadd.f32 %v4123_v5, %v10298_v31  ;;  %v4549_v50 = vmul.f32 0.015625, %v4453_v16  ;;  %v4561_v7 = vmul.f32 0.015625, %v4465_v6 }
 0x321   : > { %v4289_v51 = vadd.f32 %v4288_v38, %v4287_v33  ;;  %v4501_v10 = vadd.f32 %v4207_v54, %v10301_v39  ;;  %v4573_v42 = vmul.f32 0.015625, %v4477_v0  ;;  %v4633_v62 = vpack.c.bf16 %v4537_v25, %v4537_v25  ;;  %v12748_v25 = vld [vmem:[#allocation68_spill] sm:$0xff] }
 0x322   : > { %v4373_v57 = vadd.f32 %v4372_v13, %v4371_v36  ;;  %v4585_v20 = vmul.f32 0.015625, %v4489_v35  ;;  %v4645_v11 = vpack.c.bf16 %v4549_v50, %v4549_v50  ;;  %v4657_v40 = vpack.c.bf16 %v4561_v7, %v4561_v7  ;;  %v12750_v50 = vld [vmem:[#allocation69_spill] sm:$0xff] }
 0x323   : > { %v4290_v45 = vrot.slane %v4289_v51, 1  ;;  %v4597_v27 = vmul.f32 0.015625, %v4501_v10  ;;  %v4669_v56 = vpack.c.bf16 %v4573_v42, %v4573_v42  ;;  %v5029_v48 = vunpack.c.l.b16 %v4633_v62  ;;  %v12752_v62 = vld [vmem:[#allocation70_spill] sm:$0xff] }
 0x324   : > { %v4374_v53 = vrot.slane %v4373_v57, 1  ;;  %v4681_v43 = vpack.c.bf16 %v4585_v20, %v4585_v20  ;;  %v5041_v28 = vunpack.c.l.b16 %v4645_v11  ;;  %v5053_v39 = vunpack.c.l.b16 %v4657_v40  ;;  %v12754_v11 = vld [vmem:[#allocation71_spill] sm:$0xff] }
 0x325   : > { %v4291_v63 = vadd.f32 %v4290_v45, %v4289_v51  ;;  %v4693_v8 = vpack.c.bf16 %v4597_v27, %v4597_v27  ;;  %v5065_v19 = vunpack.c.l.b16 %v4669_v56  ;;  %v12733_v26 = vunpack.c.l.bf16 %v12732_v12 }
 0x326   : > { %v4375_v31 = vadd.f32 %v4374_v53, %v4373_v57  ;;  %v5077_v23 = vunpack.c.l.b16 %v4681_v43  ;;  %v12735_v22 = vunpack.c.l.bf16 %v12734_v47  ;;  %v5144_v58 = vsel %vm5123_vm0, %v5041_v28, %v5029_v48  ;;  %v7563_v47 = vld [vmem:[#allocation5 + $0x214] ss:$8 sps:$4 sm:$0xff]  }
 0x327   : > { %v4513_v37 = vadd.f32 %v4291_v63, %v10328_v24  ;;  %v5089_v2 = vunpack.c.l.b16 %v4693_v8  ;;  %v12737_v46 = vunpack.c.l.bf16 %v12736_v59  ;;  %v12739_v17 = vunpack.c.l.bf16 %v12738_v14 }
 0x328   : > { %v646_v1 = vadd.f32 %v12735_v22, %v12733_v26  ;;  %v4525_v34 = vadd.f32 %v4375_v31, %v10331_v21  ;;  %v12741_v44 = vunpack.c.l.bf16 %v12740_v18  ;;  %v12743_v24 = vunpack.c.l.bf16 %v12742_v60  ;;  %v7555_v31 = vld [vmem:[#allocation5 + $0x200] ss:$8 sps:$4 sm:$0xff]  }
 0x329   : > { %v730_v41 = vadd.f32 %v12739_v17, %v12737_v46  ;;  %v4609_v15 = vmul.f32 0.015625, %v4513_v37  ;;  %v5145_v3 = vsel %vm5125_vm1, %v5053_v39, %v5144_v58  ;;  %v12745_v55 = vunpack.c.l.bf16 %v12744_v32  ;;  %v12756_v58 = vld [vmem:[#allocation72_spill] sm:$0xff]  ;;  %v12758_v46 = vld [vmem:[#allocation73_spill] sm:$0xff]  ;;  %v12760_v60 = vld [vmem:[#allocation74_spill] sm:$0xff] }
 0x32a   : > { %v814_v61 = vadd.f32 %v12743_v24, %v12741_v44  ;;  %v647_v52 = vrot.slane %v646_v1, 4  ;;  %v12747_v21 = vunpack.c.l.bf16 %v12746_v29  ;;  %v4621_v4 = vmul.f32 0.015625, %v4525_v34 }
 0x32b   : > { %v5146_v30 = vsel %vm5127_vm2, %v5065_v19, %v5145_v3  ;;  %v731_v9 = vrot.slane %v730_v41, 4  ;;  %v4705_v5 = vpack.c.bf16 %v4609_v15, %v4609_v15  ;;  %v12749_v57 = vunpack.c.l.bf16 %v12748_v25  ;;  %v12772_v25 = vld [vmem:[#allocation80_spill] sm:$0xff] }
 0x32c   : > { %v898_v33 = vadd.f32 %v12747_v21, %v12745_v55  ;;  %v815_v36 = vrot.slane %v814_v61, 4  ;;  %v5147_v54 = vsel %vm5129_vm3, %v5077_v23, %v5146_v30  ;;  %v648_v38 = vadd.f32 %v647_v52, %v646_v1  ;;  %v7561_v21 = vld [vmem:[#allocation5 + $0x210] ss:$8 sps:$4 sm:$0xff]  }
 0x32d   : > { %v4717_v13 = vpack.c.bf16 %v4621_v4, %v4621_v4  ;;  %v5148_v16 = vsel %vm5131_vm4, %v5089_v2, %v5147_v54  ;;  %v732_v6 = vadd.f32 %v731_v9, %v730_v41  ;;  %v5101_v51 = vunpack.c.l.b16 %v4705_v5  ;;  %v12764_v9 = vld [vmem:[#allocation76_spill] sm:$0xff]  ;;  %v12766_v5 = vld [vmem:[#allocation77_spill] sm:$0xff] }
 0x32e   : > { %v899_v49 = vrot.slane %v898_v33, 4  ;;  %v816_v0 = vadd.f32 %v815_v36, %v814_v61  ;;  %v649_v35 = vrot.slane %v648_v38, 2  ;;  %v12751_v7 = vunpack.c.l.bf16 %v12750_v50  ;;  %v12762_v61 = vld [vmem:[#allocation75_spill] sm:$0xff]  ;;  %v12774_v50 = vld [vmem:[#allocation81_spill] sm:$0xff] }
 0x32f   : > { %v5113_v45 = vunpack.c.l.b16 %v4717_v13  ;;  %v733_v20 = vrot.slane %v732_v6, 2  ;;  %v12753_v53 = vunpack.c.l.bf16 %v12752_v62  ;;  %v12755_v40 = vunpack.c.l.bf16 %v12754_v11  ;;  %v12776_v62 = vld [vmem:[#allocation82_spill] sm:$0xff]  ;;  %v12778_v11 = vld [vmem:[#allocation83_spill] sm:$0xff] }
 0x330   : > { %v900_v10 = vadd.f32 %v899_v49, %v898_v33  ;;  %v982_v42 = vadd.f32 %v12751_v7, %v12749_v57  ;;  %v817_v27 = vrot.slane %v816_v0, 2  ;;  %v5149_v63 = vsel %vm5133_vm5, %v5101_v51, %v5148_v16  ;;  %v7569_v49 = vld [vmem:[#allocation5 + $0x224] ss:$8 sps:$4 sm:$0xff]  }
 0x331   : > { %v1066_v56 = vadd.f32 %v12755_v40, %v12753_v53  ;;  %v650_v43 = vadd.f32 %v649_v35, %v648_v38  ;;  %v5150_v28 = vsel %vm5135_vm6, %v5113_v45, %v5149_v63  ;;  %v734_v39 = vadd.f32 %v733_v20, %v732_v6  ;;  %v12768_v6 = vld [vmem:[#allocation78_spill] sm:$0xff]  ;;  %v12770_v51 = vld [vmem:[#allocation79_spill] sm:$0xff] }
 0x332   : > { %v901_v8 = vrot.slane %v900_v10, 2  ;;  %v983_v48 = vrot.slane %v982_v42, 4  ;;  %v818_v19 = vadd.f32 %v817_v27, %v816_v0  ;;  %v5216_v23 = vpack.c.b16 %v5150_v28, %v5150_v28 }
 0x333   : > { %v1067_v37 = vrot.slane %v1066_v56, 4  ;;  %v651_v2 = vrot.slane %v650_v43, 1  ;;  %v735_v22 = vrot.slane %v734_v39, 1  ;;  %v12757_v59 = vunpack.c.l.bf16 %v12756_v58  ;;  %v12780_v58 = vld [vmem:[#allocation84_spill] sm:$0xff] }
 0x334   : > { %v902_v12 = vadd.f32 %v901_v8, %v900_v10  ;;  %v984_v26 = vadd.f32 %v983_v48, %v982_v42  ;;  %v819_v1 = vrot.slane %v818_v19, 1  ;;  %v12759_v14 = vunpack.c.l.bf16 %v12758_v46  ;;  %6272 = vmatmul.mubr.bf16.vlgmr.msra.gmra.mrb[0].mxu1 %v5216_v23  ;;  %v7575_v23 = vld [vmem:[#allocation5 + $0x234] ss:$8 sps:$4 sm:$0xff]  }
 0x335   : > { %v1068_v34 = vadd.f32 %v1067_v37, %v1066_v56  ;;  %v10384_v41 = vadd.f32 %v651_v2, %v650_v43  ;;  %v12761_v24 = vunpack.c.l.bf16 %v12760_v60  ;;  %v12763_v15 = vunpack.c.l.bf16 %v12762_v61  ;;  %6281 = vmatpush1.bf16.msra.mxu1 %v7555_v31  ;;  %v7567_v31 = vld [vmem:[#allocation5 + $0x220] ss:$8 sps:$4 sm:$0xff]  }
 0x336   : > { %v1150_v17 = vadd.f32 %v12759_v14, %v12757_v59  ;;  %v903_v18 = vrot.slane %v902_v12, 1  ;;  %v985_v44 = vrot.slane %v984_v26, 2  ;;  %v10390_v52 = vadd.f32 %v735_v22, %v734_v39  ;;  %6282 = vmatprep.subr.bf16.mxu1 %v7563_v47  ;;  %v12782_v46 = vld [vmem:[#allocation85_spill] sm:$0xff] }
 0x337   : > { %v1234_v3 = vadd.f32 %v12763_v15, %v12761_v24  ;;  %v10392_v32 = vadd.f32 %v819_v1, %v818_v19  ;;  %v1069_v55 = vrot.slane %v1068_v34, 2  ;;  %v12765_v36 = vunpack.c.l.bf16 %v12764_v9  ;;  %v12784_v24 = vld [vmem:[#allocation86_spill] sm:$0xff]  ;;  %v12786_v15 = vld [vmem:[#allocation87_spill] sm:$0xff] }
 0x338   : > { %v1151_v29 = vrot.slane %v1150_v17, 4  ;;  %v10394_v33 = vadd.f32 %v903_v18, %v902_v12  ;;  %v986_v4 = vadd.f32 %v985_v44, %v984_v26  ;;  %v12767_v54 = vunpack.c.l.bf16 %v12766_v5 }
 0x339   : > { %v1235_v30 = vrot.slane %v1234_v3, 4  ;;  %v1070_v13 = vadd.f32 %v1069_v55, %v1068_v34  ;;  %v12769_v0 = vunpack.c.l.bf16 %v12768_v6  ;;  %v12771_v35 = vunpack.c.l.bf16 %v12770_v51  ;;  %6283 = vmatpush1.bf16.msra.mxu1 %v7561_v21 }
 0x33a   : > { %v1705_v38 = vadd.f32 %v12767_v54, %v12765_v36  ;;  %v1152_v16 = vadd.f32 %v1151_v29, %v1150_v17  ;;  %v12773_v57 = vunpack.c.l.bf16 %v12772_v25  ;;  %v12775_v7 = vunpack.c.l.bf16 %v12774_v50  ;;  %6284 = vmatprep.subr.bf16.mxu1 %v7569_v49  ;;  %v7573_v29 = vld [vmem:[#allocation5 + $0x230] ss:$8 sps:$4 sm:$0xff]   ;;  %v7581_v36 = vld [vmem:[#allocation5 + $0x244] ss:$8 sps:$4 sm:$0xff]   ;;  %v12790_v50 = vld [vmem:[#allocation89_spill] sm:$0xff] }
 0x33b   : > { %v1789_v10 = vadd.f32 %v12771_v35, %v12769_v0  ;;  %v987_v45 = vrot.slane %v986_v4, 1  ;;  %v1236_v20 = vadd.f32 %v1235_v30, %v1234_v3  ;;  %v12777_v53 = vunpack.c.l.bf16 %v12776_v62  ;;  %v12788_v25 = vld [vmem:[#allocation88_spill] sm:$0xff] }
 0x33c   : > { %v1873_v42 = vadd.f32 %v12775_v7, %v12773_v57  ;;  %v1706_v27 = vrot.slane %v1705_v38, 4  ;;  %v12779_v40 = vunpack.c.l.bf16 %v12778_v11  ;;  %v1071_v63 = vrot.slane %v1070_v13, 1 }
 0x33d   : > { %v1153_v43 = vrot.slane %v1152_v16, 2  ;;  %v1790_v8 = vrot.slane %v1789_v10, 4  ;;  %v10412_v28 = vadd.f32 %v987_v45, %v986_v4  ;;  %v1237_v39 = vrot.slane %v1236_v20, 2  ;;  %6285 = vmatpush1.bf16.msra.mxu1 %v7567_v31  ;;  %v7579_v45 = vld [vmem:[#allocation5 + $0x240] ss:$8 sps:$4 sm:$0xff]  }
 0x33e   : > { %v1957_v56 = vadd.f32 %v12779_v40, %v12777_v53  ;;  %v1874_v48 = vrot.slane %v1873_v42, 4  ;;  %v1707_v19 = vadd.f32 %v1706_v27, %v1705_v38  ;;  %v10414_v2 = vadd.f32 %v1071_v63, %v1070_v13  ;;  %6286 = vmatprep.subr.bf16.mxu1 %v7575_v23  ;;  %v12792_v53 = vld [vmem:[#allocation90_spill] sm:$0xff]  ;;  %v12794_v40 = vld [vmem:[#allocation91_spill] sm:$0xff] }
 0x33f   : > { %v1154_v12 = vadd.f32 %v1153_v43, %v1152_v16  ;;  %v1791_v26 = vadd.f32 %v1790_v8, %v1789_v10  ;;  %v1238_v22 = vadd.f32 %v1237_v39, %v1236_v20  ;;  %v12781_v59 = vunpack.c.l.bf16 %v12780_v58  ;;  %v7587_v43 = vld [vmem:[#allocation5 + $0x254] ss:$8 sps:$4 sm:$0xff]  }
 0x340   : > { %v1958_v37 = vrot.slane %v1957_v56, 4  ;;  %v1875_v47 = vadd.f32 %v1874_v48, %v1873_v42  ;;  %v1708_v1 = vrot.slane %v1707_v19, 2  ;;  %v12783_v14 = vunpack.c.l.bf16 %v12782_v46 }
 0x341   : > { %v1155_v18 = vrot.slane %v1154_v12, 1  ;;  %v1792_v44 = vrot.slane %v1791_v26, 2  ;;  %v12785_v61 = vunpack.c.l.bf16 %v12784_v24  ;;  %v12787_v3 = vunpack.c.l.bf16 %v12786_v15  ;;  %6287 = vmatpush1.bf16.msra.mxu1 %v7573_v29  ;;  %v12804_v29 = vld [vmem:[#allocation96_spill] sm:$0xff] }
 0x342   : > { %v1959_v34 = vadd.f32 %v1958_v37, %v1957_v56  ;;  %v2041_v17 = vadd.f32 %v12783_v14, %v12781_v59  ;;  %v1876_v60 = vrot.slane %v1875_v47, 2  ;;  %v1239_v21 = vrot.slane %v1238_v22, 1  ;;  %6288 = vmatprep.subr.bf16.mxu1 %v7581_v36  ;;  %v12796_v14 = vld [vmem:[#allocation92_spill] sm:$0xff] }
 0x343   : > { %v2125_v55 = vadd.f32 %v12787_v3, %v12785_v61  ;;  %v1709_v4 = vadd.f32 %v1708_v1, %v1707_v19  ;;  %v10424_v5 = vadd.f32 %v1155_v18, %v1154_v12  ;;  %v1793_v54 = vadd.f32 %v1792_v44, %v1791_v26  ;;  %v12798_v18 = vld [vmem:[#allocation93_spill] sm:$0xff]  ;;  %v12800_v61 = vld [vmem:[#allocation94_spill] sm:$0xff] }
 0x344   : > { %v1960_v30 = vrot.slane %v1959_v34, 2  ;;  %v2042_v9 = vrot.slane %v2041_v17, 4  ;;  %v1877_v38 = vadd.f32 %v1876_v60, %v1875_v47  ;;  %v10426_v13 = vadd.f32 %v1239_v21, %v1238_v22  ;;  %v7593_v60 = vld [vmem:[#allocation5 + $0x264] ss:$8 sps:$4 sm:$0xff]  }
 0x345   : > { %v2126_v49 = vrot.slane %v2125_v55, 4  ;;  %v1710_v16 = vrot.slane %v1709_v4, 1  ;;  %v1794_v51 = vrot.slane %v1793_v54, 1  ;;  %v12789_v57 = vunpack.c.l.bf16 %v12788_v25  ;;  %6289 = vmatpush1.bf16.msra.mxu1 %v7579_v45 }
 0x346   : > { %v1961_v6 = vadd.f32 %v1960_v30, %v1959_v34  ;;  %v2043_v0 = vadd.f32 %v2042_v9, %v2041_v17  ;;  %v1878_v35 = vrot.slane %v1877_v38, 1  ;;  %v12791_v7 = vunpack.c.l.bf16 %v12790_v50  ;;  %v7585_v34 = vld [vmem:[#allocation5 + $0x250] ss:$8 sps:$4 sm:$0xff]   ;;  %6290 = vmatprep.subr.bf16.mxu1 %v7587_v43 }
 0x347   : > { %v2127_v10 = vadd.f32 %v2126_v49, %v2125_v55  ;;  %v1711_v20 = vadd.f32 %v1710_v16, %v1709_v4  ;;  %v12793_v11 = vunpack.c.l.bf16 %v12792_v53  ;;  %v12795_v56 = vunpack.c.l.bf16 %v12794_v40  ;;  %v12806_v4 = vld [vmem:[#allocation97_spill] sm:$0xff]  ;;  %v12810_v16 = vld [vmem:[#allocation99_spill] sm:$0xff]  ;;  %v12812_v43 = vld [vmem:[#allocation100_spill] sm:$0xff] }
 0x348   : > { %v2209_v42 = vadd.f32 %v12791_v7, %v12789_v57  ;;  %v1962_v27 = vrot.slane %v1961_v6, 1  ;;  %v2044_v62 = vrot.slane %v2043_v0, 2  ;;  %v1795_v8 = vadd.f32 %v1794_v51, %v1793_v54  ;;  %v7591_v57 = vld [vmem:[#allocation5 + $0x260] ss:$8 sps:$4 sm:$0xff]  }
 0x349   : > { %v2293_v63 = vadd.f32 %v12795_v56, %v12793_v11  ;;  %v1879_v48 = vadd.f32 %v1878_v35, %v1877_v38  ;;  %v2128_v31 = vrot.slane %v2127_v10, 2  ;;  %v10437_v12 = vadd.f32 %v1711_v20, %v10384_v41  ;;  %v12808_v38 = vld [vmem:[#allocation98_spill] sm:$0xff]  ;;  %6291 = vmatpush1.bf16.msra.mxu1 %v7585_v34  ;;  %v7599_v20 = vld [vmem:[#allocation5 + $0x274] ss:$8 sps:$4 sm:$0xff]  }
 0x34a   : > { %v2210_v39 = vrot.slane %v2209_v42, 4  ;;  %v1963_v19 = vadd.f32 %v1962_v27, %v1961_v6  ;;  %v2045_v37 = vadd.f32 %v2044_v62, %v2043_v0  ;;  %v10440_v22 = vadd.f32 %v1795_v8, %v10390_v52  ;;  %6292 = vmatprep.subr.bf16.mxu1 %v7593_v60 }
 0x34b   : > { %v2294_v23 = vrot.slane %v2293_v63, 4  ;;  %v2129_v26 = vadd.f32 %v2128_v31, %v2127_v10  ;;  %v10443_v1 = vadd.f32 %v1879_v48, %v10392_v32  ;;  %v12797_v17 = vunpack.c.l.bf16 %v12796_v14  ;;  %v12802_v32 = vld [vmem:[#allocation95_spill] sm:$0xff]  ;;  %v12814_v48 = vld [vmem:[#allocation101_spill] sm:$0xff] }
 0x34c   : > { %v2211_v47 = vadd.f32 %v2210_v39, %v2209_v42  ;;  %v2046_v58 = vrot.slane %v2045_v37, 1  ;;  %v10446_v46 = vadd.f32 %v1963_v19, %v10394_v33  ;;  %v12799_v41 = vunpack.c.l.bf16 %v12798_v18 }
 0x34d   : > { %v2295_v59 = vadd.f32 %v2294_v23, %v2293_v63  ;;  %v2130_v24 = vrot.slane %v2129_v26, 1  ;;  %v12801_v15 = vunpack.c.l.bf16 %v12800_v61  ;;  %v12803_v3 = vunpack.c.l.bf16 %v12802_v32  ;;  %v12816_v23 = vld [vmem:[#allocation102_spill] sm:$0xff]  ;;  %6293 = vmatpush1.bf16.msra.mxu1 %v7591_v57 }
 0x34e   : > { %v2764_v44 = vadd.f32 %v12799_v41, %v12797_v17  ;;  %v2212_v52 = vrot.slane %v2211_v47, 2  ;;  %v12805_v21 = vunpack.c.l.bf16 %v12804_v29  ;;  %v12807_v30 = vunpack.c.l.bf16 %v12806_v4  ;;  %6294 = vmatprep.subr.bf16.mxu1 %v7599_v20  ;;  %v7605_v41 = vld [vmem:[#allocation5 + $0x284] ss:$8 sps:$4 sm:$0xff]   ;;  %v12820_v4 = vld [vmem:[#allocation104_spill] sm:$0xff] }
 0x34f   : > { %v2848_v55 = vadd.f32 %v12803_v3, %v12801_v15  ;;  %v2047_v9 = vadd.f32 %v2046_v58, %v2045_v37  ;;  %v2296_v36 = vrot.slane %v2295_v59, 2  ;;  %v12809_v49 = vunpack.c.l.bf16 %v12808_v38 }
 0x350   : > { %v2932_v33 = vadd.f32 %v12807_v30, %v12805_v21  ;;  %v2765_v54 = vrot.slane %v2764_v44, 4  ;;  %v12811_v6 = vunpack.c.l.bf16 %v12810_v16  ;;  %v2131_v51 = vadd.f32 %v2130_v24, %v2129_v26  ;;  %v12824_v16 = vld [vmem:[#allocation106_spill] sm:$0xff] }
 0x351   : > { %v2213_v35 = vadd.f32 %v2212_v52, %v2211_v47  ;;  %v2849_v10 = vrot.slane %v2848_v55, 4  ;;  %v2297_v50 = vadd.f32 %v2296_v36, %v2295_v59  ;;  %v10465_v7 = vadd.f32 %v2047_v9, %v10412_v28  ;;  %v12818_v47 = vld [vmem:[#allocation103_spill] sm:$0xff] }
 0x352   : > { %v3016_v0 = vadd.f32 %v12811_v6, %v12809_v49  ;;  %v2933_v25 = vrot.slane %v2932_v33, 4  ;;  %v2766_v42 = vadd.f32 %v2765_v54, %v2764_v44  ;;  %v10468_v62 = vadd.f32 %v2131_v51, %v10414_v2  ;;  %v7597_v2 = vld [vmem:[#allocation5 + $0x270] ss:$8 sps:$4 sm:$0xff]  }
 0x353   : > { %v2214_v27 = vrot.slane %v2213_v35, 1  ;;  %v2850_v53 = vadd.f32 %v2849_v10, %v2848_v55  ;;  %v2298_v40 = vrot.slane %v2297_v50, 1  ;;  %v12813_v8 = vunpack.c.l.bf16 %v12812_v43  ;;  %6295 = vmatpush1.bf16.msra.mxu1 %v7597_v2  ;;  %v12836_v2 = vld [vmem:[#allocation112_spill] sm:$0xff] }
 0x354   : > { %v3017_v45 = vrot.slane %v3016_v0, 4  ;;  %v2934_v11 = vadd.f32 %v2933_v25, %v2932_v33  ;;  %v2767_v56 = vrot.slane %v2766_v42, 2  ;;  %v12815_v31 = vunpack.c.l.bf16 %v12814_v48  ;;  %v12822_v33 = vld [vmem:[#allocation105_spill] sm:$0xff]  ;;  %6296 = vmatprep.subr.bf16.mxu1 %v7605_v41 }
 0x355   : > { %v2215_v28 = vadd.f32 %v2214_v27, %v2213_v35  ;;  %v2851_v19 = vrot.slane %v2850_v53, 2  ;;  %v12817_v26 = vunpack.c.l.bf16 %v12816_v23  ;;  %v12819_v34 = vunpack.c.l.bf16 %v12818_v47  ;;  %v7611_v35 = vld [vmem:[#allocation5 + $0x294] ss:$8 sps:$4 sm:$0xff]  }
 0x356   : > { %v3018_v63 = vadd.f32 %v3017_v45, %v3016_v0  ;;  %v3100_v39 = vadd.f32 %v12815_v31, %v12813_v8  ;;  %v2935_v37 = vrot.slane %v2934_v11, 2  ;;  %v2299_v59 = vadd.f32 %v2298_v40, %v2297_v50  ;;  %v12828_v31 = vld [vmem:[#allocation108_spill] sm:$0xff] }
 0x357   : > { %v3184_v58 = vadd.f32 %v12819_v34, %v12817_v26  ;;  %v2768_v14 = vadd.f32 %v2767_v56, %v2766_v42  ;;  %v10479_v44 = vadd.f32 %v2215_v28, %v10424_v5  ;;  %v2852_v60 = vadd.f32 %v2851_v19, %v2850_v53  ;;  %v7603_v5 = vld [vmem:[#allocation5 + $0x280] ss:$8 sps:$4 sm:$0xff]  }
 0x358   : > { %v3019_v17 = vrot.slane %v3018_v63, 2  ;;  %v3101_v18 = vrot.slane %v3100_v39, 4  ;;  %v2936_v24 = vadd.f32 %v2935_v37, %v2934_v11  ;;  %v10482_v61 = vadd.f32 %v2299_v59, %v10426_v13  ;;  %v12826_v13 = vld [vmem:[#allocation107_spill] sm:$0xff]  ;;  %6297 = vmatpush1.bf16.msra.mxu1 %v7603_v5  ;;  %v12830_v28 = vld [vmem:[#allocation109_spill] sm:$0xff]  ;;  %v12832_v26 = vld [vmem:[#allocation110_spill] sm:$0xff] }
 0x359   : > { %v3185_v52 = vrot.slane %v3184_v58, 4  ;;  %v2769_v15 = vrot.slane %v2768_v14, 1  ;;  %v2853_v55 = vrot.slane %v2852_v60, 1  ;;  %v12821_v30 = vunpack.c.l.bf16 %v12820_v4  ;;  %6298 = vmatprep.subr.bf16.mxu1 %v7611_v35  ;;  %v7617_v37 = vld [vmem:[#allocation5 + $0x2a4] ss:$8 sps:$4 sm:$0xff]   ;;  %v12844_v35 = vld [vmem:[#allocation116_spill] sm:$0xff] }
 0x35a   : > { %v3020_v32 = vadd.f32 %v3019_v17, %v3018_v63  ;;  %v3102_v3 = vadd.f32 %v3101_v18, %v3100_v39  ;;  %v2937_v29 = vrot.slane %v2936_v24, 1  ;;  %v12823_v9 = vunpack.c.l.bf16 %v12822_v33  ;;  %v7609_v63 = vld [vmem:[#allocation5 + $0x290] ss:$8 sps:$4 sm:$0xff]  }
 0x35b   : > { %v3186_v21 = vadd.f32 %v3185_v52, %v3184_v58  ;;  %v2770_v54 = vadd.f32 %v2769_v15, %v2768_v14  ;;  %v12825_v6 = vunpack.c.l.bf16 %v12824_v16  ;;  %v12827_v0 = vunpack.c.l.bf16 %v12826_v13  ;;  %v12838_v14 = vld [vmem:[#allocation113_spill] sm:$0xff]  ;;  %v12842_v15 = vld [vmem:[#allocation115_spill] sm:$0xff] }
 0x35c   : > { %v3268_v36 = vadd.f32 %v12823_v9, %v12821_v30  ;;  %v3021_v38 = vrot.slane %v3020_v32, 1  ;;  %v3103_v49 = vrot.slane %v3102_v3, 2  ;;  %v2854_v10 = vadd.f32 %v2853_v55, %v2852_v60  ;;  %6299 = vmatpush1.bf16.msra.mxu1 %v7609_v63  ;;  %v7615_v30 = vld [vmem:[#allocation5 + $0x2a0] ss:$8 sps:$4 sm:$0xff]  }
 0x35d   : > { %v3352_v51 = vadd.f32 %v12827_v0, %v12825_v6  ;;  %v2938_v25 = vadd.f32 %v2937_v29, %v2936_v24  ;;  %v3187_v57 = vrot.slane %v3186_v21, 2  ;;  %v10493_v27 = vadd.f32 %v2770_v54, %v10437_v12  ;;  %v12840_v24 = vld [vmem:[#allocation114_spill] sm:$0xff]  ;;  %6300 = vmatprep.subr.bf16.mxu1 %v7617_v37  ;;  %v7623_v54 = vld [vmem:[#allocation5 + $0x2b4] ss:$8 sps:$4 sm:$0xff]  }
 0x35e   : > { %v3269_v50 = vrot.slane %v3268_v36, 4  ;;  %v3022_v42 = vadd.f32 %v3021_v38, %v3020_v32  ;;  %v3104_v45 = vadd.f32 %v3103_v49, %v3102_v3  ;;  %v10496_v40 = vadd.f32 %v2854_v10, %v10440_v22 }
 0x35f   : > { %v3353_v20 = vrot.slane %v3352_v51, 4  ;;  %v3188_v53 = vadd.f32 %v3187_v57, %v3186_v21  ;;  %v10499_v56 = vadd.f32 %v2938_v25, %v10443_v1  ;;  %v12829_v39 = vunpack.c.l.bf16 %v12828_v31  ;;  %v12834_v1 = vld [vmem:[#allocation111_spill] sm:$0xff]  ;;  %v12846_v25 = vld [vmem:[#allocation117_spill] sm:$0xff] }
 0x360   : > { %v3270_v11 = vadd.f32 %v3269_v50, %v3268_v36  ;;  %v3105_v43 = vrot.slane %v3104_v45, 1  ;;  %v10502_v48 = vadd.f32 %v3022_v42, %v10446_v46  ;;  %v12831_v12 = vunpack.c.l.bf16 %v12830_v28  ;;  %6301 = vmatpush1.bf16.msra.mxu1 %v7615_v30 }
 0x361   : > { %v3354_v8 = vadd.f32 %v3353_v20, %v3352_v51  ;;  %v3189_v23 = vrot.slane %v3188_v53, 1  ;;  %v12833_v47 = vunpack.c.l.bf16 %v12832_v26  ;;  %v12835_v34 = vunpack.c.l.bf16 %v12834_v1  ;;  %v12848_v20 = vld [vmem:[#allocation118_spill] sm:$0xff]  ;;  %6302 = vmatprep.subr.bf16.mxu1 %v7623_v54 }
 0x362   : > { %v3823_v19 = vadd.f32 %v12831_v12, %v12829_v39  ;;  %v3271_v22 = vrot.slane %v3270_v11, 2  ;;  %v12837_v59 = vunpack.c.l.bf16 %v12836_v2  ;;  %v12839_v17 = vunpack.c.l.bf16 %v12838_v14  ;;  %v7629_v12 = vld [vmem:[#allocation5 + $0x2c4] ss:$8 sps:$4 sm:$0xff]   ;;  %v12852_v14 = vld [vmem:[#allocation120_spill] sm:$0xff] }
 0x363   : > { %v3907_v58 = vadd.f32 %v12835_v34, %v12833_v47  ;;  %v3106_v18 = vadd.f32 %v3105_v43, %v3104_v45  ;;  %v3355_v41 = vrot.slane %v3354_v8, 2  ;;  %v12841_v52 = vunpack.c.l.bf16 %v12840_v24 }
 0x364   : > { %v3991_v46 = vadd.f32 %v12839_v17, %v12837_v59  ;;  %v3824_v60 = vrot.slane %v3823_v19, 4  ;;  %v12843_v32 = vunpack.c.l.bf16 %v12842_v15  ;;  %v3190_v55 = vadd.f32 %v3189_v23, %v3188_v53  ;;  %v12856_v15 = vld [vmem:[#allocation122_spill] sm:$0xff] }
 0x365   : > { %v3272_v29 = vadd.f32 %v3271_v22, %v3270_v11  ;;  %v3908_v21 = vrot.slane %v3907_v58, 4  ;;  %v3356_v33 = vadd.f32 %v3355_v41, %v3354_v8  ;;  %v10521_v9 = vadd.f32 %v3106_v18, %v10465_v7  ;;  %v12850_v11 = vld [vmem:[#allocation119_spill] sm:$0xff] }
 0x366   : > { %v4075_v3 = vadd.f32 %v12843_v32, %v12841_v52  ;;  %v3992_v4 = vrot.slane %v3991_v46, 4  ;;  %v3825_v36 = vadd.f32 %v3824_v60, %v3823_v19  ;;  %v10524_v49 = vadd.f32 %v3190_v55, %v10468_v62  ;;  %v7621_v62 = vld [vmem:[#allocation5 + $0x2b0] ss:$8 sps:$4 sm:$0xff]  }
 0x367   : > { %v3273_v38 = vrot.slane %v3272_v29, 1  ;;  %v3909_v16 = vadd.f32 %v3908_v21, %v3907_v58  ;;  %v3357_v13 = vrot.slane %v3356_v33, 1  ;;  %v12845_v10 = vunpack.c.l.bf16 %v12844_v35  ;;  %6303 = vmatpush1.bf16.msra.mxu1 %v7621_v62 }
 0x368   : > { %v4076_v5 = vrot.slane %v4075_v3, 4  ;;  %v3993_v6 = vadd.f32 %v3992_v4, %v3991_v46  ;;  %v3826_v0 = vrot.slane %v3825_v36, 2  ;;  %v12847_v57 = vunpack.c.l.bf16 %v12846_v25  ;;  %v12854_v46 = vld [vmem:[#allocation121_spill] sm:$0xff]  ;;  %6304 = vmatprep.subr.bf16.mxu1 %v7629_v12 }
 0x369   : > { %v3274_v7 = vadd.f32 %v3273_v38, %v3272_v29  ;;  %v3910_v42 = vrot.slane %v3909_v16, 2  ;;  %v12849_v53 = vunpack.c.l.bf16 %v12848_v20  ;;  %v12851_v63 = vunpack.c.l.bf16 %v12850_v11  ;;  %v7635_v29 = vld [vmem:[#allocation5 + $0x2d4] ss:$8 sps:$4 sm:$0xff]  }
 0x36a   : > { %v4077_v51 = vadd.f32 %v4076_v5, %v4075_v3  ;;  %v4159_v50 = vadd.f32 %v12847_v57, %v12845_v10  ;;  %v3994_v45 = vrot.slane %v3993_v6, 2  ;;  %v3358_v8 = vadd.f32 %v3357_v13, %v3356_v33 }
 0x36b   : > { %v4243_v43 = vadd.f32 %v12851_v63, %v12849_v53  ;;  %v3827_v31 = vadd.f32 %v3826_v0, %v3825_v36  ;;  %v10535_v19 = vadd.f32 %v3274_v7, %v10479_v44  ;;  %v3911_v37 = vadd.f32 %v3910_v42, %v3909_v16  ;;  %v7627_v44 = vld [vmem:[#allocation5 + $0x2c0] ss:$8 sps:$4 sm:$0xff]  }
 0x36c   : > { %v4078_v39 = vrot.slane %v4077_v51, 2  ;;  %v4160_v28 = vrot.slane %v4159_v50, 4  ;;  %v3995_v23 = vadd.f32 %v3994_v45, %v3993_v6  ;;  %v10538_v26 = vadd.f32 %v3358_v8, %v10482_v61  ;;  %v12858_v61 = vld [vmem:[#allocation123_spill] sm:$0xff]  ;;  %6305 = vmatpush1.bf16.msra.mxu1 %v7627_v44  ;;  %v7639_v8 = vld [vmem:[#allocation5 + $0x2e0] ss:$8 sps:$4 sm:$0xff]  }
 0x36d   : > { %v4244_v22 = vrot.slane %v4243_v43, 4  ;;  %v3828_v47 = vrot.slane %v3827_v31, 1  ;;  %v3912_v58 = vrot.slane %v3911_v37, 1  ;;  %v12853_v17 = vunpack.c.l.bf16 %v12852_v14  ;;  %6306 = vmatprep.subr.bf16.mxu1 %v7635_v29 }
 0x36e   : > { %v4079_v1 = vadd.f32 %v4078_v39, %v4077_v51  ;;  %v4161_v34 = vadd.f32 %v4160_v28, %v4159_v50  ;;  %v3996_v2 = vrot.slane %v3995_v23, 1  ;;  %v12855_v18 = vunpack.c.l.bf16 %v12854_v46  ;;  %v7633_v51 = vld [vmem:[#allocation5 + $0x2d0] ss:$8 sps:$4 sm:$0xff]   ;;  %v7641_v50 = vld [vmem:[#allocation5 + $0x2e4] ss:$8 sps:$4 sm:$0xff]  }
 0x36f   : > { %v4245_v59 = vadd.f32 %v4244_v22, %v4243_v43  ;;  %v3829_v60 = vadd.f32 %v3828_v47, %v3827_v31  ;;  %v12857_v32 = vunpack.c.l.bf16 %v12856_v15  ;;  %v12859_v3 = vunpack.c.l.bf16 %v12858_v61  ;;  %v7600_v15 = vld [vmem:[#allocation5 + $0x570] ss:$8 sps:$4 sm:$0xff]  }
 0x370   : > { %v4327_v41 = vadd.f32 %v12855_v18, %v12853_v17  ;;  %v4080_v24 = vrot.slane %v4079_v1, 1  ;;  %v4162_v52 = vrot.slane %v4161_v34, 2  ;;  %v3913_v21 = vadd.f32 %v3912_v58, %v3911_v37  ;;  %6307 = vmatpush1.bf16.msra.mxu1 %v7633_v51  ;;  %v7647_v37 = vld [vmem:[#allocation5 + $0x2f4] ss:$8 sps:$4 sm:$0xff]   ;;  %v7645_v18 = vld [vmem:[#allocation5 + $0x2f0] ss:$8 sps:$4 sm:$0xff]  }
 0x371   : > { %v4411_v55 = vadd.f32 %v12859_v3, %v12857_v32  ;;  %v3997_v4 = vadd.f32 %v3996_v2, %v3995_v23  ;;  %v4246_v30 = vrot.slane %v4245_v59, 2  ;;  %v4447_v38 = vadd.f32 %v3829_v60, %v10493_v27  ;;  %6308 = vmatprep.subr.bf16.mxu1 %v7641_v50  ;;  %v10602_v50 = vld [vmem:[%s8123_s9 + $0x790] sm:$0xff] }
 0x372   : > { %v4328_v33 = vrot.slane %v4327_v41, 4  ;;  %v4081_v36 = vadd.f32 %v4080_v24, %v4079_v1  ;;  %v4163_v5 = vadd.f32 %v4162_v52, %v4161_v34  ;;  %v4459_v13 = vadd.f32 %v3913_v21, %v10496_v40  ;;  %v10558_v34 = vld [vmem:[%s8123_s9 + $0x40] sm:$0xff] }
 0x373   : > { %v4412_v54 = vrot.slane %v4411_v55, 4  ;;  %v4247_v16 = vadd.f32 %v4246_v30, %v4245_v59  ;;  %v4471_v0 = vadd.f32 %v3997_v4, %v10499_v56  ;;  %v4543_v57 = vmul.f32 0.015625, %v4447_v38  ;;  %v10568_v52 = vld [vmem:[%s8123_s9 + $0x1c0] sm:$0xff] }
 0x374   : > { %v4329_v6 = vadd.f32 %v4328_v33, %v4327_v41  ;;  %v4164_v35 = vrot.slane %v4163_v5, 1  ;;  %v4483_v25 = vadd.f32 %v4081_v36, %v10502_v48  ;;  %v4555_v45 = vmul.f32 0.015625, %v4459_v13  ;;  %v10553_v48 = vld [vmem:[%s8123_s9 + $0x10] sm:$0xff]  ;;  %6309 = vmatpush1.bf16.msra.mxu1 %v7639_v8  ;;  %v10579_v30 = vld [vmem:[%s8123_s9 + $0x340] sm:$0xff] }
 0x375   : > { %v4413_v10 = vadd.f32 %v4412_v54, %v4411_v55  ;;  %v4248_v7 = vrot.slane %v4247_v16, 1  ;;  %v4567_v27 = vmul.f32 0.015625, %v4471_v0  ;;  %v4639_v40 = vpack.c.bf16 %v4543_v57, %v4543_v57  ;;  %v10563_v41 = vld [vmem:[%s8123_s9 + $0x190] sm:$0xff]  ;;  %6310 = vmatprep.subr.bf16.mxu1 %v7647_v37  ;;  %v10587_v38 = vld [vmem:[%s8123_s9 + $0x4c0] sm:$0xff] }
 0x376   : > { %v4330_v42 = vrot.slane %v4329_v6, 2  ;;  %v4165_v20 = vadd.f32 %v4164_v35, %v4163_v5  ;;  %v4579_v11 = vmul.f32 0.015625, %v4483_v25  ;;  %v4651_v43 = vpack.c.bf16 %v4555_v45, %v4555_v45  ;;  %v10574_v55 = vld [vmem:[%s8123_s9 + $0x310] sm:$0xff]  ;;  %v10599_v57 = vld [vmem:[%s8123_s9 + $0x640] sm:$0xff] }
 0x377   : > { %v4414_v53 = vrot.slane %v4413_v10, 2  ;;  %v4249_v63 = vadd.f32 %v4248_v7, %v4247_v16  ;;  %v4663_v62 = vpack.c.bf16 %v4567_v27, %v4567_v27  ;;  %v5035_v12 = vunpack.c.l.b16 %v4639_v40  ;;  %v10584_v54 = vld [vmem:[%s8123_s9 + $0x490] sm:$0xff]  ;;  %v10607_v27 = vld [vmem:[%s8123_s9 + $0x7c0] sm:$0xff] }
 0x378   : > { %v4331_v56 = vadd.f32 %v4330_v42, %v4329_v6  ;;  %v4495_v39 = vadd.f32 %v4165_v20, %v10521_v9  ;;  %v4675_v28 = vpack.c.bf16 %v4579_v11, %v4579_v11  ;;  %v5047_v47 = vunpack.c.l.b16 %v4651_v43  ;;  %6311 = vmatpush1.bf16.msra.mxu1 %v7645_v18  ;;  %v10593_v0 = vld [vmem:[%s8123_s9 + $0x610] sm:$0xff]  ;;  %v7594_v11 = vld [vmem:[#allocation5 + $0x560] ss:$8 sps:$4 sm:$0xff]  }
 0x379   : > { %v4415_v31 = vadd.f32 %v4414_v53, %v4413_v10  ;;  %v4507_v22 = vadd.f32 %v4249_v63, %v10524_v49  ;;  %v5059_v1 = vunpack.c.l.b16 %v4663_v62  ;;  %v403_v49 = vunpack.c.h.bf16 %v10553_v48  ;;  %v10613_v63 = vld [vmem:[%s8123_s9 + $0x910] sm:$0xff]  ;;  %v10725_v62 = vld [vmem:[%s8123_s9 + $0xb20] sm:$0xff] }
 0x37a   : > { %v4332_v23 = vrot.slane %v4331_v56, 1  ;;  %v4591_v2 = vmul.f32 0.015625, %v4495_v39  ;;  %v5071_v59 = vunpack.c.l.b16 %v4675_v28  ;;  %v5186_v46 = vsel %vm5123_vm0, %v5047_v47, %v5035_v12  ;;  %v10622_v39 = vld [vmem:[%s8123_s9 + $0xa90] sm:$0xff]  ;;  %v7596_v28 = vld [vmem:[#allocation5 + $0x564] ss:$8 sps:$4 sm:$0xff]   ;;  %12871 = vst [vmem:[#allocation27_spill] sm:$0xff] %v10725_v62 }
 0x37b   : > { %v4416_v58 = vrot.slane %v4415_v31, 1  ;;  %v4603_v9 = vmul.f32 0.015625, %v4507_v22  ;;  %v5187_v24 = vsel %vm5125_vm1, %v5059_v1, %v5186_v46  ;;  %v415_v29 = vunpack.c.h.bf16 %v10558_v34  ;;  %v10629_v22 = vld [vmem:[%s8123_s9 + $0xac0] sm:$0xff]  ;;  %v7602_v37 = vld [vmem:[#allocation5 + $0x574] ss:$8 sps:$4 sm:$0xff]  }
 0x37c   : > { %v4333_v17 = vadd.f32 %v4332_v23, %v4331_v56  ;;  %v4687_v60 = vpack.c.bf16 %v4591_v2, %v4591_v2  ;;  %v5188_v3 = vsel %vm5127_vm2, %v5071_v59, %v5187_v24  ;;  %v427_v36 = vunpack.c.h.bf16 %v10563_v41  ;;  %v10616_v56 = vld [vmem:[%s8123_s9 + $0x940] sm:$0xff] }
 0x37d   : > { %v4417_v44 = vadd.f32 %v4416_v58, %v4415_v31  ;;  %v4699_v61 = vpack.c.bf16 %v4603_v9, %v4603_v9  ;;  %v451_v35 = vunpack.c.h.bf16 %v10574_v55  ;;  %v463_v42 = vunpack.c.h.bf16 %v10579_v30  ;;  %v7558_v2 = vld [vmem:[#allocation5 + $0x500] ss:$8 sps:$4 sm:$0xff]  }
 0x37e   : > { %v4519_v32 = vadd.f32 %v4333_v17, %v10535_v19  ;;  %v5083_v4 = vunpack.c.l.b16 %v4687_v60  ;;  %v475_v53 = vunpack.c.h.bf16 %v10584_v54  ;;  %v487_v43 = vunpack.c.h.bf16 %v10587_v38 }
 0x37f   : > { %v4531_v21 = vadd.f32 %v4417_v44, %v10538_v26  ;;  %v5095_v5 = vunpack.c.l.b16 %v4699_v61  ;;  %v439_v26 = vunpack.c.h.bf16 %v10568_v52  ;;  %v499_v8 = vunpack.c.h.bf16 %v10593_v0  ;;  %v7566_v44 = vld [vmem:[#allocation5 + $0x514] ss:$8 sps:$4 sm:$0xff]  }
 0x380   : > { %v4615_v19 = vmul.f32 0.015625, %v4519_v32  ;;  %v5189_v13 = vsel %vm5129_vm3, %v5083_v4, %v5188_v3  ;;  %v511_v12 = vunpack.c.h.bf16 %v10599_v57  ;;  %v523_v47 = vunpack.c.h.bf16 %v10602_v50 }
 0x381   : > { %v4627_v6 = vmul.f32 0.015625, %v4531_v21  ;;  %v5190_v25 = vsel %vm5131_vm4, %v5095_v5, %v5189_v13  ;;  %v535_v58 = vunpack.c.h.bf16 %v10607_v27  ;;  %v547_v9 = vunpack.c.h.bf16 %v10613_v63 }
 0x382   : > { %v4711_v10 = vpack.c.bf16 %v4615_v19, %v4615_v19  ;;  %v559_v60 = vunpack.c.h.bf16 %v10616_v56  ;;  %v571_v32 = vunpack.c.h.bf16 %v10622_v39  ;;  %v583_v3 = vunpack.c.h.bf16 %v10629_v22 }
 0x383   : > { %v4723_v45 = vpack.c.bf16 %v4627_v6, %v4627_v6  ;;  %v625_v21 = vadd.f32 %v415_v29, %v403_v49  ;;  %v709_v4 = vadd.f32 %v439_v26, %v427_v36  ;;  %v793_v19 = vadd.f32 %v463_v42, %v451_v35 }
 0x384   : > { %v5107_v40 = vunpack.c.l.b16 %v4711_v10  ;;  %v877_v5 = vadd.f32 %v487_v43, %v475_v53  ;;  %v961_v6 = vadd.f32 %v511_v12, %v499_v8  ;;  %v1045_v13 = vadd.f32 %v535_v58, %v523_v47  ;;  %v7564_v10 = vld [vmem:[#allocation5 + $0x510] ss:$8 sps:$4 sm:$0xff]   ;;  %v7570_v43 = vld [vmem:[#allocation5 + $0x520] ss:$8 sps:$4 sm:$0xff]  }
 0x385   : > { %v5119_v31 = vunpack.c.l.b16 %v4723_v45  ;;  %v710_v45 = vrot.slane %v709_v4, 4 }
 0x386   : > { %v5191_v23 = vsel %vm5133_vm5, %v5107_v40, %v5190_v25  ;;  %v626_v25 = vrot.slane %v625_v21, 4  ;;  %v1129_v40 = vadd.f32 %v559_v60, %v547_v9  ;;  %v878_v61 = vrot.slane %v877_v5, 4 }
 0x387   : > { %v5192_v59 = vsel %vm5135_vm6, %v5119_v31, %v5191_v23  ;;  %v1213_v31 = vadd.f32 %v583_v3, %v571_v32  ;;  %v7572_v23 = vld [vmem:[#allocation5 + $0x524] ss:$8 sps:$4 sm:$0xff]   ;;  %v962_v24 = vrot.slane %v961_v6, 4  ;;  %v1046_v46 = vrot.slane %v1045_v13, 4 }
 0x388   : > { %v5222_v18 = vpack.c.b16 %v5192_v59, %v5192_v59  ;;  %v794_v59 = vrot.slane %v793_v19, 4  ;;  %v627_v17 = vadd.f32 %v626_v25, %v625_v21  ;;  %v711_v49 = vadd.f32 %v710_v45, %v709_v4 }
 0x389   : > { %v1130_v29 = vrot.slane %v1129_v40, 4  ;;  %v1214_v36 = vrot.slane %v1213_v31, 4  ;;  %v879_v35 = vadd.f32 %v878_v61, %v877_v5  ;;  %v963_v42 = vadd.f32 %v962_v24, %v961_v6  ;;  %v7576_v5 = vld [vmem:[#allocation5 + $0x530] ss:$8 sps:$4 sm:$0xff]   ;;  %v7584_v6 = vld [vmem:[#allocation5 + $0x544] ss:$8 sps:$4 sm:$0xff]  }
 0x38a   : > { %6395 = vmatmul.mubr.bf16.vlgmr.msra.gmra.mrb[0].mxu0 %v5222_v18  ;;  %v795_v26 = vadd.f32 %v794_v59, %v793_v19  ;;  %v1047_v53 = vadd.f32 %v1046_v46, %v1045_v13  ;;  %v628_v8 = vrot.slane %v627_v17, 2  ;;  %v712_v12 = vrot.slane %v711_v49, 2  ;;  %v10646_v59 = vld [vmem:[%s8123_s9 + $0x70] sm:$0xff] }
 0x38b   : > { %6404 = vmatpush1.bf16.msra.mxu0 %v7558_v2  ;;  %v1131_v47 = vadd.f32 %v1130_v29, %v1129_v40  ;;  %v1215_v58 = vadd.f32 %v1214_v36, %v1213_v31  ;;  %v7578_v2 = vld [vmem:[#allocation5 + $0x534] ss:$8 sps:$4 sm:$0xff]   ;;  %v880_v18 = vrot.slane %v879_v35, 2 }
 0x38c   : > { %6405 = vmatprep.subr.bf16.mxu0 %v7566_v44  ;;  %v796_v9 = vrot.slane %v795_v26, 2  ;;  %v964_v44 = vrot.slane %v963_v42, 2  ;;  %v1048_v60 = vrot.slane %v1047_v53, 2  ;;  %v629_v32 = vadd.f32 %v628_v8, %v627_v17 }
 0x38d   : > { %v713_v3 = vadd.f32 %v712_v12, %v711_v49  ;;  %v1132_v21 = vrot.slane %v1131_v47, 2  ;;  %v1216_v4 = vrot.slane %v1215_v58, 2  ;;  %v881_v24 = vadd.f32 %v880_v18, %v879_v35  ;;  %v10653_v35 = vld [vmem:[%s8123_s9 + $0xa0] sm:$0xff] }
 0x38e   : > { %v797_v19 = vadd.f32 %v796_v9, %v795_v26  ;;  %v965_v46 = vadd.f32 %v964_v44, %v963_v42  ;;  %v1049_v61 = vadd.f32 %v1048_v60, %v1047_v53  ;;  %v630_v13 = vrot.slane %v629_v32, 1  ;;  %v10656_v42 = vld [vmem:[%s8123_s9 + $0x1f0] sm:$0xff]  ;;  %v10677_v44 = vld [vmem:[%s8123_s9 + $0x3a0] sm:$0xff] }
 0x38f   : > { %6406 = vmatpush1.bf16.msra.mxu0 %v7564_v10  ;;  %v714_v10 = vrot.slane %v713_v3, 1  ;;  %v1133_v25 = vadd.f32 %v1132_v21, %v1131_v47  ;;  %v1217_v45 = vadd.f32 %v1216_v4, %v1215_v58  ;;  %v882_v40 = vrot.slane %v881_v24, 1  ;;  %v10667_v47 = vld [vmem:[%s8123_s9 + $0x220] sm:$0xff]  ;;  %v10670_v58 = vld [vmem:[%s8123_s9 + $0x370] sm:$0xff]  ;;  %12861 = vst [vmem:[#allocation17_spill] sm:$0xff] %v10677_v44 }
 0x390   : > { %6407 = vmatprep.subr.bf16.mxu0 %v7572_v23  ;;  %v798_v17 = vrot.slane %v797_v19, 1  ;;  %v966_v31 = vrot.slane %v965_v46, 1  ;;  %v1050_v23 = vrot.slane %v1049_v61, 1  ;;  %v10648_v49 = vadd.f32 %v630_v13, %v629_v32  ;;  %12860 = vst [vmem:[#allocation16_spill] sm:$0xff] %v10670_v58  ;;  %v10680_v60 = vld [vmem:[%s8123_s9 + $0x4f0] sm:$0xff]  ;;  %v10685_v4 = vld [vmem:[%s8123_s9 + $0x520] sm:$0xff] }
 0x391   : > { %v10650_v29 = vadd.f32 %v714_v10, %v713_v3  ;;  %v1134_v36 = vrot.slane %v1133_v25, 1  ;;  %v1218_v26 = vrot.slane %v1217_v45, 1  ;;  %12862 = vst [vmem:[#allocation18_spill] sm:$0xff] %v10680_v60  ;;  %v1462_v3 = vunpack.c.h.bf16 %v10646_v59  ;;  %v7590_v21 = vld [vmem:[#allocation5 + $0x554] ss:$8 sps:$4 sm:$0xff]   ;;  %12863 = vst [vmem:[#allocation19_spill] sm:$0xff] %v10685_v4 }
 0x392   : > { %v10658_v53 = vadd.f32 %v798_v17, %v797_v19  ;;  %v10662_v8 = vadd.f32 %v966_v31, %v965_v46  ;;  %v10664_v12 = vadd.f32 %v1050_v23, %v1049_v61  ;;  %v10688_v19 = vld [vmem:[%s8123_s9 + $0x670] sm:$0xff]  ;;  %v1474_v46 = vunpack.c.h.bf16 %v10653_v35  ;;  %v10695_v13 = vld [vmem:[%s8123_s9 + $0x6a0] sm:$0xff] }
 0x393   : > { %6408 = vmatpush1.bf16.msra.mxu0 %v7570_v43  ;;  %v10660_v43 = vadd.f32 %v882_v40, %v881_v24  ;;  %v10672_v9 = vadd.f32 %v1134_v36, %v1133_v25  ;;  %v10674_v18 = vadd.f32 %v1218_v26, %v1217_v45  ;;  %12864 = vst [vmem:[#allocation20_spill] sm:$0xff] %v10688_v19  ;;  %12865 = vst [vmem:[#allocation21_spill] sm:$0xff] %v10695_v13  ;;  %v10698_v10 = vld [vmem:[%s8123_s9 + $0x7f0] sm:$0xff]  ;;  %v10705_v40 = vld [vmem:[%s8123_s9 + $0x820] sm:$0xff] }
 0x394   : > { %6409 = vmatprep.subr.bf16.mxu0 %v7578_v2  ;;  %v7582_v2 = vld [vmem:[#allocation5 + $0x540] ss:$8 sps:$4 sm:$0xff]   ;;  %12866 = vst [vmem:[#allocation22_spill] sm:$0xff] %v10698_v10  ;;  %v1498_v25 = vunpack.c.h.bf16 %v10667_v47  ;;  %v1510_v17 = vunpack.c.h.bf16 %v10670_v58  ;;  %12867 = vst [vmem:[#allocation23_spill] sm:$0xff] %v10705_v40  ;;  %v10708_v31 = vld [vmem:[%s8123_s9 + $0x970] sm:$0xff]  ;;  %v1522_v36 = vunpack.c.h.bf16 %v10677_v44  ;;  %v1534_v61 = vunpack.c.h.bf16 %v10680_v60 }
 0x395   : > { %12868 = vst [vmem:[#allocation24_spill] sm:$0xff] %v10708_v31  ;;  %v10715_v24 = vld [vmem:[%s8123_s9 + $0x9a0] sm:$0xff]  ;;  %v10718_v45 = vld [vmem:[%s8123_s9 + $0xaf0] sm:$0xff]  ;;  %v1546_v1 = vunpack.c.h.bf16 %v10685_v4  ;;  %v1558_v23 = vunpack.c.h.bf16 %v10688_v19  ;;  %v1582_v20 = vunpack.c.h.bf16 %v10698_v10  ;;  %v1594_v7 = vunpack.c.h.bf16 %v10705_v40 }
 0x396   : > { %12869 = vst [vmem:[#allocation25_spill] sm:$0xff] %v10715_v24  ;;  %12870 = vst [vmem:[#allocation26_spill] sm:$0xff] %v10718_v45  ;;  %v1606_v51 = vunpack.c.h.bf16 %v10708_v31  ;;  %v1618_v16 = vunpack.c.h.bf16 %v10715_v24  ;;  %v1630_v33 = vunpack.c.h.bf16 %v10718_v45  ;;  %v1642_v32 = vunpack.c.h.bf16 %v10725_v62 }
 0x397   : > { %6410 = vmatpush1.bf16.msra.mxu0 %v7576_v5  ;;  %v1486_v5 = vunpack.c.h.bf16 %v10656_v42  ;;  %v1684_v14 = vadd.f32 %v1474_v46, %v1462_v3  ;;  %v1852_v10 = vadd.f32 %v1522_v36, %v1510_v17  ;;  %v1936_v31 = vadd.f32 %v1546_v1, %v1534_v61 }
 0x398   : > { %6411 = vmatprep.subr.bf16.mxu0 %v7584_v6  ;;  %v7588_v6 = vld [vmem:[#allocation5 + $0x550] ss:$8 sps:$4 sm:$0xff]   ;;  %v2188_v4 = vadd.f32 %v1618_v16, %v1606_v51  ;;  %v2272_v26 = vadd.f32 %v1642_v32, %v1630_v33 }
 0x399   : > { %v1768_v40 = vadd.f32 %v1498_v25, %v1486_v5  ;;  %v1685_v19 = vrot.slane %v1684_v14, 4  ;;  %v1853_v60 = vrot.slane %v1852_v10, 4  ;;  %v1937_v45 = vrot.slane %v1936_v31, 4 }
 0x39a   : > { %v2189_v3 = vrot.slane %v2188_v4, 4  ;;  %v2273_v46 = vrot.slane %v2272_v26, 4 }
 0x39b   : > { %6412 = vmatpush1.bf16.msra.mxu0 %v7582_v2  ;;  %v1570_v2 = vunpack.c.h.bf16 %v10695_v13  ;;  %v1769_v24 = vrot.slane %v1768_v40, 4  ;;  %v1686_v58 = vadd.f32 %v1685_v19, %v1684_v14  ;;  %v1854_v5 = vadd.f32 %v1853_v60, %v1852_v10 }
 0x39c   : > { %6413 = vmatprep.subr.bf16.mxu0 %v7590_v21  ;;  %v2104_v21 = vadd.f32 %v1594_v7, %v1582_v20  ;;  %v1938_v1 = vadd.f32 %v1937_v45, %v1936_v31  ;;  %v2190_v16 = vadd.f32 %v2189_v3, %v2188_v4  ;;  %v2274_v33 = vadd.f32 %v2273_v46, %v2272_v26 }
 0x39d   : > { %v2020_v13 = vadd.f32 %v1570_v2, %v1558_v23  ;;  %v1770_v62 = vadd.f32 %v1769_v24, %v1768_v40  ;;  %v1687_v20 = vrot.slane %v1686_v58, 2  ;;  %v1855_v51 = vrot.slane %v1854_v5, 2 }
 0x39e   : > { %v2105_v44 = vrot.slane %v2104_v21, 4  ;;  %v1939_v32 = vrot.slane %v1938_v1, 2  ;;  %v2191_v24 = vrot.slane %v2190_v16, 2  ;;  %v2275_v40 = vrot.slane %v2274_v33, 2 }
 0x39f   : > { %6414 = vmatpush1.bf16.msra.mxu0 %v7588_v6  ;;  %v2021_v6 = vrot.slane %v2020_v13, 4  ;;  %v1771_v25 = vrot.slane %v1770_v62, 2  ;;  %v1688_v14 = vadd.f32 %v1687_v20, %v1686_v58  ;;  %v1856_v60 = vadd.f32 %v1855_v51, %v1854_v5  ;;  %v7612_v58 = vld [vmem:[#allocation5 + $0x590] ss:$8 sps:$4 sm:$0xff]  }
 0x3a0   : > { %6415 = vmatprep.subr.bf16.mxu0 %v7596_v28  ;;  %v7608_v28 = vld [vmem:[#allocation5 + $0x584] ss:$8 sps:$4 sm:$0xff]   ;;  %v2106_v7 = vadd.f32 %v2105_v44, %v2104_v21  ;;  %v1940_v10 = vadd.f32 %v1939_v32, %v1938_v1  ;;  %v2192_v4 = vadd.f32 %v2191_v24, %v2190_v16  ;;  %v2276_v36 = vadd.f32 %v2275_v40, %v2274_v33  ;;  %v10742_v20 = vld [vmem:[%s8123_s9 + $0xd0] sm:$0xff]  ;;  %v7618_v24 = vld [vmem:[#allocation5 + $0x5a0] ss:$8 sps:$4 sm:$0xff]  }
 0x3a1   : > { %v2022_v61 = vadd.f32 %v2021_v6, %v2020_v13  ;;  %v1772_v19 = vadd.f32 %v1771_v25, %v1770_v62  ;;  %v1689_v45 = vrot.slane %v1688_v14, 1  ;;  %v1857_v26 = vrot.slane %v1856_v60, 1  ;;  %12872 = vst [vmem:[#allocation28_spill] sm:$0xff] %v10742_v20  ;;  %v10751_v32 = vld [vmem:[%s8123_s9 + $0x100] sm:$0xff] }
 0x3a2   : > { %v2107_v23 = vrot.slane %v2106_v7, 2  ;;  %v1941_v2 = vrot.slane %v1940_v10, 1  ;;  %v2193_v3 = vrot.slane %v2192_v4, 1  ;;  %v2277_v46 = vrot.slane %v2276_v36, 1  ;;  %12873 = vst [vmem:[#allocation29_spill] sm:$0xff] %v10751_v32  ;;  %v10781_v40 = vld [vmem:[%s8123_s9 + $0x400] sm:$0xff] }
 0x3a3   : > { %6416 = vmatpush1.bf16.msra.mxu0 %v7594_v11  ;;  %v2023_v17 = vrot.slane %v2022_v61, 2  ;;  %v7606_v11 = vld [vmem:[#allocation5 + $0x580] ss:$8 sps:$4 sm:$0xff]   ;;  %v1773_v31 = vrot.slane %v1772_v19, 1  ;;  %v1690_v62 = vadd.f32 %v1689_v45, %v1688_v14  ;;  %v1858_v5 = vadd.f32 %v1857_v26, %v1856_v60  ;;  %12877 = vst [vmem:[#allocation33_spill] sm:$0xff] %v10781_v40 }
 0x3a4   : > { %6417 = vmatprep.subr.bf16.mxu0 %v7602_v37  ;;  %v7614_v37 = vld [vmem:[#allocation5 + $0x594] ss:$8 sps:$4 sm:$0xff]   ;;  %v2108_v44 = vadd.f32 %v2107_v23, %v2106_v7  ;;  %v1942_v1 = vadd.f32 %v1941_v2, %v1940_v10  ;;  %v2194_v25 = vadd.f32 %v2193_v3, %v2192_v4  ;;  %v2278_v16 = vadd.f32 %v2277_v46, %v2276_v36  ;;  %v10789_v10 = vld [vmem:[%s8123_s9 + $0x580] sm:$0xff] }
 0x3a5   : > { %v2024_v13 = vadd.f32 %v2023_v17, %v2022_v61  ;;  %v1774_v6 = vadd.f32 %v1773_v31, %v1772_v19  ;;  %v10745_v33 = vadd.f32 %v1690_v62, %v10648_v49  ;;  %v10754_v17 = vld [vmem:[%s8123_s9 + $0x250] sm:$0xff]  ;;  %v10757_v23 = vadd.f32 %v1858_v5, %v10658_v53  ;;  %12879 = vst [vmem:[#allocation35_spill] sm:$0xff] %v10789_v10  ;;  %v10799_v31 = vld [vmem:[%s8123_s9 + $0x700] sm:$0xff] }
 0x3a6   : > { %12874 = vst [vmem:[#allocation30_spill] sm:$0xff] %v10754_v17  ;;  %v10772_v19 = vld [vmem:[%s8123_s9 + $0x3d0] sm:$0xff]  ;;  %v10775_v53 = vadd.f32 %v2194_v25, %v10672_v9  ;;  %v2545_v45 = vunpack.c.h.bf16 %v10754_v17  ;;  %12881 = vst [vmem:[#allocation37_spill] sm:$0xff] %v10799_v31  ;;  %v10819_v5 = vld [vmem:[%s8123_s9 + $0xa00] sm:$0xff] }
 0x3a7   : > { %6418 = vmatpush1.bf16.msra.mxu0 %v7600_v15  ;;  %v2025_v21 = vrot.slane %v2024_v13, 1  ;;  %v2109_v15 = vrot.slane %v2108_v44, 1  ;;  %v10748_v51 = vadd.f32 %v1774_v6, %v10650_v29  ;;  %v10769_v29 = vld [vmem:[%s8123_s9 + $0x280] sm:$0xff]  ;;  %12876 = vst [vmem:[#allocation32_spill] sm:$0xff] %v10772_v19  ;;  %v7626_v60 = vld [vmem:[#allocation5 + $0x5b4] ss:$8 sps:$4 sm:$0xff]   ;;  %v2581_v6 = vunpack.c.h.bf16 %v10781_v40 }
 0x3a8   : > { %6419 = vmatprep.subr.bf16.mxu0 %v7608_v28  ;;  %v7620_v28 = vld [vmem:[#allocation5 + $0x5a4] ss:$8 sps:$4 sm:$0xff]   ;;  %12875 = vst [vmem:[#allocation31_spill] sm:$0xff] %v10769_v29  ;;  %v10802_v4 = vld [vmem:[%s8123_s9 + $0x850] sm:$0xff]  ;;  %v2557_v26 = vunpack.c.h.bf16 %v10769_v29  ;;  %12885 = vst [vmem:[#allocation41_spill] sm:$0xff] %v10819_v5 }
 0x3a9   : > { %v2026_v61 = vadd.f32 %v2025_v21, %v2024_v13  ;;  %v2110_v7 = vadd.f32 %v2109_v15, %v2108_v44  ;;  %v10792_v13 = vld [vmem:[%s8123_s9 + $0x6d0] sm:$0xff]  ;;  %12882 = vst [vmem:[#allocation38_spill] sm:$0xff] %v10802_v4  ;;  %v2569_v21 = vunpack.c.h.bf16 %v10772_v19  ;;  %v10809_v15 = vld [vmem:[%s8123_s9 + $0x880] sm:$0xff]  ;;  %v2641_v44 = vunpack.c.h.bf16 %v10802_v4 }
 0x3aa   : > { %12880 = vst [vmem:[#allocation36_spill] sm:$0xff] %v10792_v13  ;;  %12883 = vst [vmem:[#allocation39_spill] sm:$0xff] %v10809_v15  ;;  %v7632_v62 = vld [vmem:[#allocation5 + $0x5c4] ss:$8 sps:$4 sm:$0xff]   ;;  %v2653_v9 = vunpack.c.h.bf16 %v10809_v15  ;;  %v7630_v36 = vld [vmem:[#allocation5 + $0x5c0] ss:$8 sps:$4 sm:$0xff]   ;;  %v2827_v15 = vadd.f32 %v2557_v26, %v2545_v45 }
 0x3ab   : > { %6420 = vmatpush1.bf16.msra.mxu0 %v7606_v11  ;;  %v10760_v11 = vadd.f32 %v1942_v1, %v10660_v43  ;;  %v10763_v14 = vadd.f32 %v2026_v61, %v10662_v8  ;;  %v10766_v49 = vadd.f32 %v2110_v7, %v10664_v12  ;;  %v10778_v43 = vadd.f32 %v2278_v16, %v10674_v18  ;;  %v10784_v8 = vld [vmem:[%s8123_s9 + $0x550] sm:$0xff]  ;;  %v10829_v2 = vld [vmem:[%s8123_s9 + $0xb80] sm:$0xff] }
 0x3ac   : > { %6421 = vmatprep.subr.bf16.mxu0 %v7614_v37  ;;  %12878 = vst [vmem:[#allocation34_spill] sm:$0xff] %v10784_v8  ;;  %v2521_v37 = vunpack.c.h.bf16 %v10742_v20  ;;  %v2533_v18 = vunpack.c.h.bf16 %v10751_v32  ;;  %v2593_v46 = vunpack.c.h.bf16 %v10784_v8  ;;  %v10822_v1 = vld [vmem:[%s8123_s9 + $0xb50] sm:$0xff]  ;;  %v2605_v7 = vunpack.c.h.bf16 %v10789_v10  ;;  %12887 = vst [vmem:[#allocation43_spill] sm:$0xff] %v10829_v2  ;;  %v7644_v45 = vld [vmem:[#allocation5 + $0x5e4] ss:$8 sps:$4 sm:$0xff]  }
 0x3ad   : > { %12886 = vst [vmem:[#allocation42_spill] sm:$0xff] %v10822_v1  ;;  %v2617_v16 = vunpack.c.h.bf16 %v10792_v13  ;;  %v2677_v13 = vunpack.c.h.bf16 %v10819_v5  ;;  %v2701_v61 = vunpack.c.h.bf16 %v10829_v2  ;;  %v7638_v25 = vld [vmem:[#allocation5 + $0x5d4] ss:$8 sps:$4 sm:$0xff]   ;;  %v2911_v8 = vadd.f32 %v2581_v6, %v2569_v21  ;;  %v7636_v4 = vld [vmem:[#allocation5 + $0x5d0] ss:$8 sps:$4 sm:$0xff]  }
 0x3ae   : > { %v2743_v10 = vadd.f32 %v2533_v18, %v2521_v37  ;;  %v2828_v5 = vrot.slane %v2827_v15, 4 }
 0x3af   : > { %6422 = vmatpush1.bf16.msra.mxu0 %v7612_v58  ;;  %v10812_v58 = vld [vmem:[%s8123_s9 + $0x9d0] sm:$0xff]  ;;  %v2912_v17 = vrot.slane %v2911_v8, 4 }
 0x3b0   : > { %6423 = vmatprep.subr.bf16.mxu0 %v7620_v28  ;;  %12884 = vst [vmem:[#allocation40_spill] sm:$0xff] %v10812_v58  ;;  %v7624_v28 = vld [vmem:[#allocation5 + $0x5b0] ss:$8 sps:$4 sm:$0xff]   ;;  %v2665_v12 = vunpack.c.h.bf16 %v10812_v58  ;;  %v2995_v58 = vadd.f32 %v2605_v7, %v2593_v46  ;;  %v2744_v19 = vrot.slane %v2743_v10, 4  ;;  %v2829_v2 = vadd.f32 %v2828_v5, %v2827_v15 }
 0x3b1   : > { %v2913_v26 = vadd.f32 %v2912_v17, %v2911_v8 }
 0x3b2   : > { %v3247_v29 = vadd.f32 %v2677_v13, %v2665_v12  ;;  %v2745_v20 = vadd.f32 %v2744_v19, %v2743_v10  ;;  %v2830_v6 = vrot.slane %v2829_v2, 2 }
 0x3b3   : > { %6424 = vmatpush1.bf16.msra.mxu0 %v7618_v24  ;;  %v2629_v24 = vunpack.c.h.bf16 %v10799_v31  ;;  %v2689_v31 = vunpack.c.h.bf16 %v10822_v1  ;;  %v2996_v1 = vrot.slane %v2995_v58, 4 }
 0x3b4   : > { %6425 = vmatprep.subr.bf16.mxu0 %v7626_v60  ;;  %v3163_v60 = vadd.f32 %v2653_v9, %v2641_v44  ;;  %v3248_v37 = vrot.slane %v3247_v29, 4  ;;  %v2746_v44 = vrot.slane %v2745_v20, 2  ;;  %v2831_v10 = vadd.f32 %v2830_v6, %v2829_v2 }
 0x3b5   : > { %v3079_v40 = vadd.f32 %v2629_v24, %v2617_v16  ;;  %v3331_v3 = vadd.f32 %v2701_v61, %v2689_v31  ;;  %v2997_v21 = vadd.f32 %v2996_v1, %v2995_v58  ;;  %v2914_v31 = vrot.slane %v2913_v26, 2 }
 0x3b6   : > { %v3164_v32 = vrot.slane %v3163_v60, 4  ;;  %v3249_v12 = vadd.f32 %v3248_v37, %v3247_v29  ;;  %v2747_v19 = vadd.f32 %v2746_v44, %v2745_v20  ;;  %v2832_v1 = vrot.slane %v2831_v10, 1  ;;  %v7648_v20 = vld [vmem:[#allocation5 + $0x5f0] ss:$8 sps:$4 sm:$0xff]  }
 0x3b7   : > { %6426 = vmatpush1.bf16.msra.mxu0 %v7624_v28  ;;  %v3080_v28 = vrot.slane %v3079_v40, 4  ;;  %v3332_v18 = vrot.slane %v3331_v3, 4  ;;  %v2998_v46 = vrot.slane %v2997_v21, 2  ;;  %v2915_v17 = vadd.f32 %v2914_v31, %v2913_v26  ;;  %v10855_v31 = vld [vmem:[%s8123_s9 + $0x160] sm:$0xff] }
 0x3b8   : > { %6427 = vmatprep.subr.bf16.mxu0 %v7632_v62  ;;  %v3165_v9 = vadd.f32 %v3164_v32, %v3163_v60  ;;  %v3250_v15 = vrot.slane %v3249_v12, 2  ;;  %v2748_v58 = vrot.slane %v2747_v19, 1  ;;  %12889 = vst [vmem:[#allocation45_spill] sm:$0xff] %v10855_v31 }
 0x3b9   : > { %v3081_v62 = vadd.f32 %v3080_v28, %v3079_v40  ;;  %v3333_v13 = vadd.f32 %v3332_v18, %v3331_v3  ;;  %v2999_v8 = vadd.f32 %v2998_v46, %v2997_v21  ;;  %v2916_v16 = vrot.slane %v2915_v17, 1  ;;  %v10858_v46 = vld [vmem:[%s8123_s9 + $0x2b0] sm:$0xff] }
 0x3ba   : > { %v3166_v7 = vrot.slane %v3165_v9, 2  ;;  %v3251_v29 = vadd.f32 %v3250_v15, %v3249_v12  ;;  %v2749_v2 = vadd.f32 %v2748_v58, %v2747_v19  ;;  %v2833_v28 = vadd.f32 %v2832_v1, %v2831_v10  ;;  %12890 = vst [vmem:[#allocation46_spill] sm:$0xff] %v10858_v46  ;;  %v10876_v19 = vld [vmem:[%s8123_s9 + $0x430] sm:$0xff] }
 0x3bb   : > { %6428 = vmatpush1.bf16.msra.mxu0 %v7630_v36  ;;  %v3082_v61 = vrot.slane %v3081_v62, 2  ;;  %v7642_v36 = vld [vmem:[#allocation5 + $0x5e0] ss:$8 sps:$4 sm:$0xff]   ;;  %v3334_v5 = vrot.slane %v3333_v13, 2  ;;  %v3000_v24 = vrot.slane %v2999_v8, 1  ;;  %12892 = vst [vmem:[#allocation48_spill] sm:$0xff] %v10876_v19 }
 0x3bc   : > { %6429 = vmatprep.subr.bf16.mxu0 %v7638_v25  ;;  %v7650_v25 = vld [vmem:[#allocation5 + $0x5f4] ss:$8 sps:$4 sm:$0xff]   ;;  %v3167_v32 = vadd.f32 %v3166_v7, %v3165_v9  ;;  %v3252_v37 = vrot.slane %v3251_v29, 1  ;;  %v10849_v12 = vadd.f32 %v2749_v2, %v10745_v33 }
 0x3bd   : > { %v3083_v40 = vadd.f32 %v3082_v61, %v3081_v62  ;;  %v3335_v3 = vadd.f32 %v3334_v5, %v3333_v13  ;;  %v3001_v26 = vadd.f32 %v3000_v24, %v2999_v8  ;;  %v10846_v9 = vld [vmem:[%s8123_s9 + $0x130] sm:$0xff]  ;;  %v10852_v13 = vadd.f32 %v2833_v28, %v10748_v51  ;;  %v10873_v51 = vld [vmem:[%s8123_s9 + $0x2e0] sm:$0xff] }
 0x3be   : > { %12888 = vst [vmem:[#allocation44_spill] sm:$0xff] %v10846_v9  ;;  %v3253_v44 = vadd.f32 %v3252_v37, %v3251_v29  ;;  %12891 = vst [vmem:[#allocation47_spill] sm:$0xff] %v10873_v51  ;;  %v3580_v15 = vunpack.c.h.bf16 %v10846_v9  ;;  %v10893_v5 = vld [vmem:[%s8123_s9 + $0x5e0] sm:$0xff]  ;;  %v3604_v8 = vunpack.c.h.bf16 %v10858_v46  ;;  %v3616_v1 = vunpack.c.h.bf16 %v10873_v51  ;;  %v10916_v24 = vld [vmem:[%s8123_s9 + $0xa30] sm:$0xff] }
 0x3bf   : > { %6430 = vmatpush1.bf16.msra.mxu0 %v7636_v4  ;;  %v3084_v60 = vrot.slane %v3083_v40, 1  ;;  %v3168_v4 = vrot.slane %v3167_v32, 1  ;;  %v3336_v18 = vrot.slane %v3335_v3, 1  ;;  %v10864_v7 = vadd.f32 %v3001_v26, %v10760_v11  ;;  %v10885_v11 = vld [vmem:[%s8123_s9 + $0x460] sm:$0xff]  ;;  %12895 = vst [vmem:[#allocation51_spill] sm:$0xff] %v10893_v5  ;;  %12900 = vst [vmem:[#allocation56_spill] sm:$0xff] %v10916_v24 }
 0x3c0   : > { %6431 = vmatprep.subr.bf16.mxu0 %v7644_v45  ;;  %v2917_v45 = vadd.f32 %v2916_v16, %v2915_v17  ;;  %v10879_v10 = vadd.f32 %v3253_v44, %v10775_v53  ;;  %12893 = vst [vmem:[#allocation49_spill] sm:$0xff] %v10885_v11  ;;  %v10913_v16 = vld [vmem:[%s8123_s9 + $0x8e0] sm:$0xff]  ;;  %v10926_v37 = vld [vmem:[%s8123_s9 + $0xbb0] sm:$0xff]  ;;  %v3724_v26 = vunpack.c.h.bf16 %v10916_v24  ;;  %v3886_v29 = vadd.f32 %v3616_v1, %v3604_v8 }
 0x3c1   : > { %v3085_v21 = vadd.f32 %v3084_v60, %v3083_v40  ;;  %v3169_v62 = vadd.f32 %v3168_v4, %v3167_v32  ;;  %v3337_v6 = vadd.f32 %v3336_v18, %v3335_v3  ;;  %v10903_v40 = vld [vmem:[%s8123_s9 + $0x760] sm:$0xff]  ;;  %v10906_v32 = vld [vmem:[%s8123_s9 + $0x8b0] sm:$0xff]  ;;  %v3628_v3 = vunpack.c.h.bf16 %v10876_v19  ;;  %12899 = vst [vmem:[#allocation55_spill] sm:$0xff] %v10913_v16  ;;  %12902 = vst [vmem:[#allocation58_spill] sm:$0xff] %v10926_v37 }
 0x3c2   : > { %v10861_v61 = vadd.f32 %v2917_v45, %v10757_v23  ;;  %12897 = vst [vmem:[#allocation53_spill] sm:$0xff] %v10903_v40  ;;  %12898 = vst [vmem:[#allocation54_spill] sm:$0xff] %v10906_v32  ;;  %v3640_v4 = vunpack.c.h.bf16 %v10885_v11  ;;  %v10923_v28 = vld [vmem:[%s8123_s9 + $0xa60] sm:$0xff]  ;;  %v3664_v45 = vunpack.c.h.bf16 %v10893_v5  ;;  %v3700_v60 = vunpack.c.h.bf16 %v10906_v32 }
 0x3c3   : > { %6432 = vmatpush1.bf16.msra.mxu0 %v7642_v36  ;;  %v10867_v36 = vadd.f32 %v3085_v21, %v10763_v14  ;;  %v10870_v33 = vadd.f32 %v3169_v62, %v10766_v49  ;;  %v10882_v23 = vadd.f32 %v3337_v6, %v10778_v43  ;;  %v10888_v14 = vld [vmem:[%s8123_s9 + $0x5b0] sm:$0xff]  ;;  %v3592_v43 = vunpack.c.h.bf16 %v10855_v31  ;;  %12901 = vst [vmem:[#allocation57_spill] sm:$0xff] %v10923_v28  ;;  %v10933_v62 = vld [vmem:[%s8123_s9 + $0xbe0] sm:$0xff] }
 0x3c4   : > { %6433 = vmatprep.subr.bf16.mxu0 %v7650_v25  ;;  %12894 = vst [vmem:[#allocation50_spill] sm:$0xff] %v10888_v14  ;;  %v10896_v25 = vld [vmem:[%s8123_s9 + $0x730] sm:$0xff]  ;;  %v3652_v2 = vunpack.c.h.bf16 %v10888_v14  ;;  %12903 = vst [vmem:[#allocation59_spill] sm:$0xff] %v10933_v62  ;;  %v3688_v6 = vunpack.c.h.bf16 %v10903_v40  ;;  %v3712_v18 = vunpack.c.h.bf16 %v10913_v16  ;;  %v3736_v53 = vunpack.c.h.bf16 %v10923_v28 }
 0x3c5   : > { %12896 = vst [vmem:[#allocation52_spill] sm:$0xff] %v10896_v25  ;;  %v3676_v21 = vunpack.c.h.bf16 %v10896_v25  ;;  %v3748_v49 = vunpack.c.h.bf16 %v10926_v37  ;;  %v3760_v32 = vunpack.c.h.bf16 %v10933_v62  ;;  %v3802_v40 = vadd.f32 %v3592_v43, %v3580_v15 }
 0x3c6   : > { %v3970_v25 = vadd.f32 %v3640_v4, %v3628_v3  ;;  %v4054_v16 = vadd.f32 %v3664_v45, %v3652_v2  ;;  %v4222_v58 = vadd.f32 %v3712_v18, %v3700_v60  ;;  %v3887_v24 = vrot.slane %v3886_v29, 4 }
 0x3c7   : > { %6434 = vmatpush1.bf16.msra.mxu0 %v7648_v20  ;;  %v4138_v5 = vadd.f32 %v3688_v6, %v3676_v21  ;;  %v3803_v14 = vrot.slane %v3802_v40, 4  ;;  %v4306_v11 = vadd.f32 %v3736_v53, %v3724_v26  ;;  %v4390_v17 = vadd.f32 %v3760_v32, %v3748_v49 }
 0x3c8   : > { %v3971_v19 = vrot.slane %v3970_v25, 4  ;;  %v4055_v28 = vrot.slane %v4054_v16, 4  ;;  %v4223_v44 = vrot.slane %v4222_v58, 4  ;;  %v3888_v37 = vadd.f32 %v3887_v24, %v3886_v29 }
 0x3c9   : > { %v4139_v51 = vrot.slane %v4138_v5, 4  ;;  %v3804_v46 = vadd.f32 %v3803_v14, %v3802_v40  ;;  %v4307_v31 = vrot.slane %v4306_v11, 4  ;;  %v4391_v20 = vrot.slane %v4390_v17, 4 }
 0x3ca   : > { %v3972_v9 = vadd.f32 %v3971_v19, %v3970_v25  ;;  %v4056_v62 = vadd.f32 %v4055_v28, %v4054_v16  ;;  %v4224_v43 = vadd.f32 %v4223_v44, %v4222_v58  ;;  %v3889_v1 = vrot.slane %v3888_v37, 2 }
 0x3cb   : > { %v4140_v15 = vadd.f32 %v4139_v51, %v4138_v5  ;;  %v3805_v8 = vrot.slane %v3804_v46, 2  ;;  %v4308_v3 = vadd.f32 %v4307_v31, %v4306_v11  ;;  %v4392_v60 = vadd.f32 %v4391_v20, %v4390_v17 }
 0x3cc   : > { %v3973_v4 = vrot.slane %v3972_v9, 2  ;;  %v4057_v2 = vrot.slane %v4056_v62, 2  ;;  %v4225_v49 = vrot.slane %v4224_v43, 2  ;;  %v3890_v18 = vadd.f32 %v3889_v1, %v3888_v37 }
 0x3cd   : > { %v4141_v53 = vrot.slane %v4140_v15, 2  ;;  %v3806_v32 = vadd.f32 %v3805_v8, %v3804_v46  ;;  %v4309_v45 = vrot.slane %v4308_v3, 2  ;;  %v4393_v26 = vrot.slane %v4392_v60, 2 }
 0x3ce   : > { %v3974_v14 = vadd.f32 %v3973_v4, %v3972_v9  ;;  %v4058_v40 = vadd.f32 %v4057_v2, %v4056_v62  ;;  %v4226_v24 = vadd.f32 %v4225_v49, %v4224_v43  ;;  %v3891_v25 = vrot.slane %v3890_v18, 1 }
 0x3cf   : > { %v4142_v29 = vadd.f32 %v4141_v53, %v4140_v15  ;;  %v3807_v19 = vrot.slane %v3806_v32, 1  ;;  %v4310_v51 = vadd.f32 %v4309_v45, %v4308_v3  ;;  %v4394_v5 = vadd.f32 %v4393_v26, %v4392_v60 }
 0x3d0   : > { %v3975_v58 = vrot.slane %v3974_v14, 1  ;;  %v4059_v16 = vrot.slane %v4058_v40, 1  ;;  %v4227_v11 = vrot.slane %v4226_v24, 1  ;;  %v3892_v20 = vadd.f32 %v3891_v25, %v3890_v18  ;;  %v10961_v25 = vld [vmem:[%s8123_s9 + $0x58] sm:$0xff] }
 0x3d1   : > { %v4143_v31 = vrot.slane %v4142_v29, 1  ;;  %v3808_v17 = vadd.f32 %v3807_v19, %v3806_v32  ;;  %v4311_v28 = vrot.slane %v4310_v51, 1  ;;  %v4395_v21 = vrot.slane %v4394_v5, 1  ;;  %12905 = vst [vmem:[#allocation61_spill] sm:$0xff] %v10961_v25 }
 0x3d2   : > { %v3976_v46 = vadd.f32 %v3975_v58, %v3974_v14  ;;  %v4060_v37 = vadd.f32 %v4059_v16, %v4058_v40  ;;  %v4228_v6 = vadd.f32 %v4227_v11, %v4226_v24  ;;  %v4456_v43 = vadd.f32 %v3892_v20, %v10852_v13  ;;  %v10958_v40 = vld [vmem:[%s8123_s9 + $0x28] sm:$0xff]  ;;  %v10967_v11 = vld [vmem:[%s8123_s9 + $0x1d8] sm:$0xff] }
 0x3d3   : > { %v4144_v44 = vadd.f32 %v4143_v31, %v4142_v29  ;;  %v4312_v9 = vadd.f32 %v4311_v28, %v4310_v51  ;;  %v4396_v62 = vadd.f32 %v4395_v21, %v4394_v5  ;;  %v4444_v15 = vadd.f32 %v3808_v17, %v10849_v12  ;;  %12904 = vst [vmem:[#allocation60_spill] sm:$0xff] %v10958_v40  ;;  %v10964_v31 = vld [vmem:[%s8123_s9 + $0x1a8] sm:$0xff] }
 0x3d4   : > { %v4468_v8 = vadd.f32 %v3976_v46, %v10861_v61  ;;  %v4480_v1 = vadd.f32 %v4060_v37, %v10864_v7  ;;  %v4504_v60 = vadd.f32 %v4228_v6, %v10870_v33  ;;  %v4552_v49 = vmul.f32 0.015625, %v4456_v43  ;;  %12906 = vst [vmem:[#allocation62_spill] sm:$0xff] %v10964_v31  ;;  %12907 = vst [vmem:[#allocation63_spill] sm:$0xff] %v10967_v11  ;;  %v10971_v21 = vld [vmem:[%s8123_s9 + $0x328] sm:$0xff] }
 0x3d5   : > { %v4492_v3 = vadd.f32 %v4144_v44, %v10867_v36  ;;  %v4516_v4 = vadd.f32 %v4312_v9, %v10879_v10  ;;  %v4528_v2 = vadd.f32 %v4396_v62, %v10882_v23  ;;  %v4540_v53 = vmul.f32 0.015625, %v4444_v15  ;;  %12908 = vst [vmem:[#allocation64_spill] sm:$0xff] %v10971_v21  ;;  %v10976_v44 = vld [vmem:[%s8123_s9 + $0x358] sm:$0xff]  ;;  %v10979_v6 = vld [vmem:[%s8123_s9 + $0x4a8] sm:$0xff] }
 0x3d6   : > { %v4564_v32 = vmul.f32 0.015625, %v4468_v8  ;;  %v4576_v18 = vmul.f32 0.015625, %v4480_v1  ;;  %v4600_v13 = vmul.f32 0.015625, %v4504_v60  ;;  %v4648_v7 = vpack.c.bf16 %v4552_v49, %v4552_v49  ;;  %12909 = vst [vmem:[#allocation65_spill] sm:$0xff] %v10976_v44  ;;  %12910 = vst [vmem:[#allocation66_spill] sm:$0xff] %v10979_v6  ;;  %v10986_v8 = vld [vmem:[%s8123_s9 + $0x4d8] sm:$0xff] }
 0x3d7   : > { %v4588_v12 = vmul.f32 0.015625, %v4492_v3  ;;  %v4612_v45 = vmul.f32 0.015625, %v4516_v4  ;;  %v4624_v61 = vmul.f32 0.015625, %v4528_v2  ;;  %v4636_v26 = vpack.c.bf16 %v4540_v53, %v4540_v53  ;;  %12911 = vst [vmem:[#allocation67_spill] sm:$0xff] %v10986_v8  ;;  %v10993_v2 = vld [vmem:[%s8123_s9 + $0x628] sm:$0xff]  ;;  %v10996_v53 = vld [vmem:[%s8123_s9 + $0x658] sm:$0xff] }
 0x3d8   : > { %v4660_v36 = vpack.c.bf16 %v4564_v32, %v4564_v32  ;;  %v4672_v33 = vpack.c.bf16 %v4576_v18, %v4576_v18  ;;  %v4696_v10 = vpack.c.bf16 %v4600_v13, %v4600_v13  ;;  %v5044_v19 = vunpack.c.l.b16 %v4648_v7  ;;  %12912 = vst [vmem:[#allocation68_spill] sm:$0xff] %v10993_v2  ;;  %12913 = vst [vmem:[#allocation69_spill] sm:$0xff] %v10996_v53  ;;  %v11003_v13 = vld [vmem:[%s8123_s9 + $0x7a8] sm:$0xff] }
 0x3d9   : > { %v4684_v14 = vpack.c.bf16 %v4588_v12, %v4588_v12  ;;  %v4708_v23 = vpack.c.bf16 %v4612_v45, %v4612_v45  ;;  %v4720_v29 = vpack.c.bf16 %v4624_v61, %v4624_v61  ;;  %v5032_v24 = vunpack.c.l.b16 %v4636_v26  ;;  %12914 = vst [vmem:[#allocation70_spill] sm:$0xff] %v11003_v13 }
 0x3da   : > { %v5056_v51 = vunpack.c.l.b16 %v4660_v36  ;;  %v5068_v5 = vunpack.c.l.b16 %v4672_v33  ;;  %v5092_v16 = vunpack.c.l.b16 %v4696_v10  ;;  %v409_v9 = vunpack.c.h.bf16 %v10958_v40  ;;  %v11010_v36 = vld [vmem:[%s8123_s9 + $0x7d8] sm:$0xff]  ;;  %v11013_v33 = vld [vmem:[%s8123_s9 + $0x928] sm:$0xff] }
 0x3db   : > { %v5080_v58 = vunpack.c.l.b16 %v4684_v14  ;;  %v5104_v17 = vunpack.c.l.b16 %v4708_v23  ;;  %v5116_v20 = vunpack.c.l.b16 %v4720_v29  ;;  %v5165_v28 = vsel %vm5123_vm0, %v5044_v19, %v5032_v24  ;;  %12915 = vst [vmem:[#allocation71_spill] sm:$0xff] %v11010_v36  ;;  %12916 = vst [vmem:[#allocation72_spill] sm:$0xff] %v11013_v33  ;;  %v11020_v24 = vld [vmem:[%s8123_s9 + $0x958] sm:$0xff]  ;;  %v11023_v19 = vld [vmem:[%s8123_s9 + $0xaa8] sm:$0xff] }
 0x3dc   : > { %v5166_v37 = vsel %vm5125_vm1, %v5056_v51, %v5165_v28  ;;  %v421_v15 = vunpack.c.h.bf16 %v10961_v25  ;;  %v433_v3 = vunpack.c.h.bf16 %v10964_v31  ;;  %v445_v49 = vunpack.c.h.bf16 %v10967_v11  ;;  %12917 = vst [vmem:[#allocation73_spill] sm:$0xff] %v11020_v24  ;;  %12918 = vst [vmem:[#allocation74_spill] sm:$0xff] %v11023_v19 }
 0x3dd   : > { %v5167_v43 = vsel %vm5127_vm2, %v5068_v5, %v5166_v37  ;;  %v457_v18 = vunpack.c.h.bf16 %v10971_v21  ;;  %v469_v61 = vunpack.c.h.bf16 %v10976_v44  ;;  %v481_v14 = vunpack.c.h.bf16 %v10979_v6 }
 0x3de   : > { %v5168_v4 = vsel %vm5129_vm3, %v5080_v58, %v5167_v43  ;;  %v493_v23 = vunpack.c.h.bf16 %v10986_v8  ;;  %v505_v5 = vunpack.c.h.bf16 %v10993_v2  ;;  %v517_v28 = vunpack.c.h.bf16 %v10996_v53 }
 0x3df   : > { %v5169_v12 = vsel %vm5131_vm4, %v5092_v16, %v5168_v4  ;;  %v529_v43 = vunpack.c.h.bf16 %v11003_v13  ;;  %v541_v4 = vunpack.c.h.bf16 %v11010_v36  ;;  %v577_v10 = vunpack.c.h.bf16 %v11023_v19 }
 0x3e0   : > { %v5170_v7 = vsel %vm5133_vm5, %v5104_v17, %v5169_v12  ;;  %v11029_v17 = vld [vmem:[%s8123_s9 + $0xad8] sm:$0xff]  ;;  %v751_v45 = vadd.f32 %v445_v49, %v433_v3  ;;  %v835_v32 = vadd.f32 %v469_v61, %v457_v18  ;;  %v919_v60 = vadd.f32 %v493_v23, %v481_v14 }
 0x3e1   : > { %v5171_v29 = vsel %vm5135_vm6, %v5116_v20, %v5170_v7  ;;  %12919 = vst [vmem:[#allocation75_spill] sm:$0xff] %v11029_v17  ;;  %v553_v7 = vunpack.c.h.bf16 %v11013_v33  ;;  %v589_v26 = vunpack.c.h.bf16 %v11029_v17  ;;  %v667_v20 = vadd.f32 %v421_v15, %v409_v9 }
 0x3e2   : > { %v5219_v16 = vpack.c.b16 %v5171_v29, %v5171_v29  ;;  %v565_v29 = vunpack.c.h.bf16 %v11020_v24  ;;  %v1003_v12 = vadd.f32 %v517_v28, %v505_v5  ;;  %v1087_v1 = vadd.f32 %v541_v4, %v529_v43  ;;  %v11052_v4 = vld [vmem:[%s8123_s9 + $0xb8] sm:$0xff] }
 0x3e3   : > { %v668_v62 = vrot.slane %v667_v20, 4  ;;  %v1255_v58 = vadd.f32 %v589_v26, %v577_v10  ;;  %v836_v33 = vrot.slane %v835_v32, 4  ;;  %v920_v24 = vrot.slane %v919_v60, 4  ;;  %12921 = vst [vmem:[#allocation77_spill] sm:$0xff] %v11052_v4 }
 0x3e4   : > { %6312 = vmatprep.mubr.bf16.mxu1 %v5219_v16  ;;  %v752_v16 = vrot.slane %v751_v45, 4  ;;  %v1171_v46 = vadd.f32 %v565_v29, %v553_v7  ;;  %v1004_v36 = vrot.slane %v1003_v12, 4  ;;  %v1088_v51 = vrot.slane %v1087_v1, 4 }
 0x3e5   : > { %v669_v13 = vadd.f32 %v668_v62, %v667_v20  ;;  %v1256_v37 = vrot.slane %v1255_v58, 4  ;;  %v837_v2 = vadd.f32 %v836_v33, %v835_v32  ;;  %v921_v17 = vadd.f32 %v920_v24, %v919_v60 }
 0x3e6   : > { %v753_v19 = vadd.f32 %v752_v16, %v751_v45  ;;  %v1172_v53 = vrot.slane %v1171_v46, 4  ;;  %v1005_v9 = vadd.f32 %v1004_v36, %v1003_v12  ;;  %v1089_v15 = vadd.f32 %v1088_v51, %v1087_v1  ;;  %v11055_v12 = vld [vmem:[%s8123_s9 + $0x208] sm:$0xff] }
 0x3e7   : > { %v670_v3 = vrot.slane %v669_v13, 2  ;;  %v1257_v61 = vadd.f32 %v1256_v37, %v1255_v58  ;;  %v838_v14 = vrot.slane %v837_v2, 2  ;;  %v922_v23 = vrot.slane %v921_v17, 2  ;;  %12922 = vst [vmem:[#allocation78_spill] sm:$0xff] %v11055_v12 }
 0x3e8   : > { %v754_v49 = vrot.slane %v753_v19, 2  ;;  %v1173_v18 = vadd.f32 %v1172_v53, %v1171_v46  ;;  %v1006_v5 = vrot.slane %v1005_v9, 2  ;;  %v1090_v26 = vrot.slane %v1089_v15, 2 }
 0x3e9   : > { %v671_v10 = vadd.f32 %v670_v3, %v669_v13  ;;  %v1258_v62 = vrot.slane %v1257_v61, 2  ;;  %v839_v45 = vadd.f32 %v838_v14, %v837_v2  ;;  %v923_v20 = vadd.f32 %v922_v23, %v921_v17  ;;  %v11069_v3 = vld [vmem:[%s8123_s9 + $0x388] sm:$0xff] }
 0x3ea   : > { %v755_v28 = vadd.f32 %v754_v49, %v753_v19  ;;  %v1174_v43 = vrot.slane %v1173_v18, 2  ;;  %v1007_v32 = vadd.f32 %v1006_v5, %v1005_v9  ;;  %v1091_v60 = vadd.f32 %v1090_v26, %v1089_v15  ;;  %v11045_v19 = vld [vmem:[%s8123_s9 + $0x88] sm:$0xff]  ;;  %v11066_v15 = vld [vmem:[%s8123_s9 + $0x238] sm:$0xff]  ;;  %12924 = vst [vmem:[#allocation80_spill] sm:$0xff] %v11069_v3 }
 0x3eb   : > { %v672_v1 = vrot.slane %v671_v10, 1  ;;  %v1259_v46 = vadd.f32 %v1258_v62, %v1257_v61  ;;  %v840_v53 = vrot.slane %v839_v45, 1  ;;  %v924_v24 = vrot.slane %v923_v20, 1  ;;  %12920 = vst [vmem:[#allocation76_spill] sm:$0xff] %v11045_v19  ;;  %12923 = vst [vmem:[#allocation79_spill] sm:$0xff] %v11066_v15  ;;  %v11076_v61 = vld [vmem:[%s8123_s9 + $0x3b8] sm:$0xff] }
 0x3ec   : > { %v756_v36 = vrot.slane %v755_v28, 1  ;;  %v1175_v33 = vadd.f32 %v1174_v43, %v1173_v18  ;;  %v1008_v51 = vrot.slane %v1007_v32, 1  ;;  %v1092_v13 = vrot.slane %v1091_v60, 1  ;;  %12925 = vst [vmem:[#allocation81_spill] sm:$0xff] %v11076_v61  ;;  %v11079_v14 = vld [vmem:[%s8123_s9 + $0x508] sm:$0xff]  ;;  %v11084_v26 = vld [vmem:[%s8123_s9 + $0x538] sm:$0xff] }
 0x3ed   : > { %v11047_v2 = vadd.f32 %v672_v1, %v671_v10  ;;  %v1260_v37 = vrot.slane %v1259_v46, 1  ;;  %v11057_v7 = vadd.f32 %v840_v53, %v839_v45  ;;  %v11059_v29 = vadd.f32 %v924_v24, %v923_v20  ;;  %12926 = vst [vmem:[#allocation82_spill] sm:$0xff] %v11079_v14  ;;  %12927 = vst [vmem:[#allocation83_spill] sm:$0xff] %v11084_v26  ;;  %v11087_v10 = vld [vmem:[%s8123_s9 + $0x688] sm:$0xff]  ;;  %v11094_v20 = vld [vmem:[%s8123_s9 + $0x6b8] sm:$0xff] }
 0x3ee   : > { %v11049_v58 = vadd.f32 %v756_v36, %v755_v28  ;;  %v1176_v17 = vrot.slane %v1175_v33, 1  ;;  %v11061_v16 = vadd.f32 %v1008_v51, %v1007_v32  ;;  %v11063_v9 = vadd.f32 %v1092_v13, %v1091_v60  ;;  %12928 = vst [vmem:[#allocation84_spill] sm:$0xff] %v11087_v10  ;;  %12929 = vst [vmem:[#allocation85_spill] sm:$0xff] %v11094_v20  ;;  %v11097_v32 = vld [vmem:[%s8123_s9 + $0x808] sm:$0xff] }
 0x3ef   : > { %v11073_v18 = vadd.f32 %v1260_v37, %v1259_v46  ;;  %v1468_v5 = vunpack.c.h.bf16 %v11045_v19  ;;  %v1480_v43 = vunpack.c.h.bf16 %v11052_v4  ;;  %v1492_v45 = vunpack.c.h.bf16 %v11055_v12  ;;  %12930 = vst [vmem:[#allocation86_spill] sm:$0xff] %v11097_v32  ;;  %v11104_v46 = vld [vmem:[%s8123_s9 + $0x838] sm:$0xff]  ;;  %v11107_v53 = vld [vmem:[%s8123_s9 + $0x988] sm:$0xff] }
 0x3f0   : > { %v11071_v49 = vadd.f32 %v1176_v17, %v1175_v33  ;;  %v1504_v1 = vunpack.c.h.bf16 %v11066_v15  ;;  %v1516_v33 = vunpack.c.h.bf16 %v11069_v3  ;;  %12931 = vst [vmem:[#allocation87_spill] sm:$0xff] %v11104_v46  ;;  %12932 = vst [vmem:[#allocation88_spill] sm:$0xff] %v11107_v53  ;;  %v1528_v51 = vunpack.c.h.bf16 %v11076_v61  ;;  %v11114_v37 = vld [vmem:[%s8123_s9 + $0x9b8] sm:$0xff]  ;;  %v11117_v60 = vld [vmem:[%s8123_s9 + $0xb08] sm:$0xff] }
 0x3f1   : > { %v1540_v17 = vunpack.c.h.bf16 %v11079_v14  ;;  %12933 = vst [vmem:[#allocation89_spill] sm:$0xff] %v11114_v37  ;;  %12934 = vst [vmem:[#allocation90_spill] sm:$0xff] %v11117_v60  ;;  %v1552_v62 = vunpack.c.h.bf16 %v11084_v26  ;;  %v1564_v23 = vunpack.c.h.bf16 %v11087_v10  ;;  %v11124_v3 = vld [vmem:[%s8123_s9 + $0xb38] sm:$0xff]  ;;  %v1576_v13 = vunpack.c.h.bf16 %v11094_v20 }
 0x3f2   : > { %12935 = vst [vmem:[#allocation91_spill] sm:$0xff] %v11124_v3  ;;  %v1588_v61 = vunpack.c.h.bf16 %v11097_v32  ;;  %v1600_v36 = vunpack.c.h.bf16 %v11104_v46  ;;  %v1612_v28 = vunpack.c.h.bf16 %v11107_v53  ;;  %v1624_v12 = vunpack.c.h.bf16 %v11114_v37 }
 0x3f3   : > { %v1636_v20 = vunpack.c.h.bf16 %v11117_v60  ;;  %v1648_v32 = vunpack.c.h.bf16 %v11124_v3  ;;  %v1726_v4 = vadd.f32 %v1480_v43, %v1468_v5  ;;  %v1810_v15 = vadd.f32 %v1504_v1, %v1492_v45 }
 0x3f4   : > { %v1894_v19 = vadd.f32 %v1528_v51, %v1516_v33  ;;  %v1978_v46 = vadd.f32 %v1552_v62, %v1540_v17  ;;  %v2062_v8 = vadd.f32 %v1576_v13, %v1564_v23  ;;  %v2146_v26 = vadd.f32 %v1600_v36, %v1588_v61  ;;  %v11141_v17 = vld [vmem:[%s8123_s9 + $0xe8] sm:$0xff] }
 0x3f5   : > { %v1727_v6 = vrot.slane %v1726_v4, 4  ;;  %v1811_v53 = vrot.slane %v1810_v15, 4  ;;  %v2230_v44 = vadd.f32 %v1624_v12, %v1612_v28  ;;  %v2314_v10 = vadd.f32 %v1648_v32, %v1636_v20  ;;  %12936 = vst [vmem:[#allocation92_spill] sm:$0xff] %v11141_v17 }
 0x3f6   : > { %v1895_v21 = vrot.slane %v1894_v19, 4  ;;  %v1979_v37 = vrot.slane %v1978_v46, 4  ;;  %v2063_v11 = vrot.slane %v2062_v8, 4  ;;  %v2147_v24 = vrot.slane %v2146_v26, 4 }
 0x3f7   : > { %v1728_v31 = vadd.f32 %v1727_v6, %v1726_v4  ;;  %v1812_v60 = vadd.f32 %v1811_v53, %v1810_v15  ;;  %v2231_v25 = vrot.slane %v2230_v44, 4  ;;  %v2315_v14 = vrot.slane %v2314_v10, 4 }
 0x3f8   : > { %v1896_v40 = vadd.f32 %v1895_v21, %v1894_v19  ;;  %v1980_v3 = vadd.f32 %v1979_v37, %v1978_v46  ;;  %v2064_v5 = vadd.f32 %v2063_v11, %v2062_v8  ;;  %v2148_v43 = vadd.f32 %v2147_v24, %v2146_v26 }
 0x3f9   : > { %v1729_v45 = vrot.slane %v1728_v31, 2  ;;  %v1813_v62 = vrot.slane %v1812_v60, 2  ;;  %v2232_v23 = vadd.f32 %v2231_v25, %v2230_v44  ;;  %v2316_v61 = vadd.f32 %v2315_v14, %v2314_v10 }
 0x3fa   : > { %v1897_v1 = vrot.slane %v1896_v40, 2  ;;  %v1981_v36 = vrot.slane %v1980_v3, 2  ;;  %v2065_v12 = vrot.slane %v2064_v5, 2  ;;  %v2149_v28 = vrot.slane %v2148_v43, 2 }
 0x3fb   : > { %v1730_v20 = vadd.f32 %v1729_v45, %v1728_v31  ;;  %v1814_v32 = vadd.f32 %v1813_v62, %v1812_v60  ;;  %v2233_v33 = vrot.slane %v2232_v23, 2  ;;  %v2317_v51 = vrot.slane %v2316_v61, 2  ;;  %v11150_v62 = vld [vmem:[%s8123_s9 + $0x118] sm:$0xff] }
 0x3fc   : > { %v1898_v6 = vadd.f32 %v1897_v1, %v1896_v40  ;;  %v1982_v4 = vadd.f32 %v1981_v36, %v1980_v3  ;;  %v2066_v15 = vadd.f32 %v2065_v12, %v2064_v5  ;;  %v2150_v53 = vadd.f32 %v2149_v28, %v2148_v43  ;;  %12937 = vst [vmem:[#allocation93_spill] sm:$0xff] %v11150_v62  ;;  %v11171_v12 = vld [vmem:[%s8123_s9 + $0x3e8] sm:$0xff] }
 0x3fd   : > { %v1731_v21 = vrot.slane %v1730_v20, 1  ;;  %v1815_v11 = vrot.slane %v1814_v32, 1  ;;  %v2234_v8 = vadd.f32 %v2233_v33, %v2232_v23  ;;  %v2318_v19 = vadd.f32 %v2317_v51, %v2316_v61  ;;  %v11153_v23 = vld [vmem:[%s8123_s9 + $0x268] sm:$0xff]  ;;  %12940 = vst [vmem:[#allocation96_spill] sm:$0xff] %v11171_v12 }
 0x3fe   : > { %v1899_v26 = vrot.slane %v1898_v6, 1  ;;  %v1983_v25 = vrot.slane %v1982_v4, 1  ;;  %v2067_v44 = vrot.slane %v2066_v15, 1  ;;  %v2151_v14 = vrot.slane %v2150_v53, 1  ;;  %12938 = vst [vmem:[#allocation94_spill] sm:$0xff] %v11153_v23  ;;  %v11191_v33 = vld [vmem:[%s8123_s9 + $0x6e8] sm:$0xff] }
 0x3ff   : > { %v1732_v10 = vadd.f32 %v1731_v21, %v1730_v20  ;;  %v1816_v31 = vadd.f32 %v1815_v11, %v1814_v32  ;;  %v2235_v60 = vrot.slane %v2234_v8, 1  ;;  %v2319_v46 = vrot.slane %v2318_v19, 1  ;;  %v11188_v32 = vld [vmem:[%s8123_s9 + $0x598] sm:$0xff]  ;;  %12944 = vst [vmem:[#allocation100_spill] sm:$0xff] %v11191_v33 }
 0x400   : > { %v1900_v40 = vadd.f32 %v1899_v26, %v1898_v6  ;;  %v1984_v3 = vadd.f32 %v1983_v25, %v1982_v4  ;;  %v2068_v24 = vadd.f32 %v2067_v44, %v2066_v15  ;;  %v2152_v13 = vadd.f32 %v2151_v14, %v2150_v53  ;;  %12943 = vst [vmem:[#allocation99_spill] sm:$0xff] %v11188_v32  ;;  %v11198_v4 = vld [vmem:[%s8123_s9 + $0x718] sm:$0xff]  ;;  %v11201_v15 = vld [vmem:[%s8123_s9 + $0x868] sm:$0xff] }
 0x401   : > { %v2236_v37 = vadd.f32 %v2235_v60, %v2234_v8  ;;  %v2320_v5 = vadd.f32 %v2319_v46, %v2318_v19  ;;  %v11144_v43 = vadd.f32 %v1732_v10, %v11047_v2  ;;  %v11147_v45 = vadd.f32 %v1816_v31, %v11049_v58  ;;  %v11168_v58 = vld [vmem:[%s8123_s9 + $0x298] sm:$0xff]  ;;  %12945 = vst [vmem:[#allocation101_spill] sm:$0xff] %v11198_v4  ;;  %v11211_v26 = vld [vmem:[%s8123_s9 + $0x9e8] sm:$0xff] }
 0x402   : > { %v11156_v61 = vadd.f32 %v1900_v40, %v11057_v7  ;;  %v11159_v1 = vadd.f32 %v1984_v3, %v11059_v29  ;;  %v11162_v36 = vadd.f32 %v2068_v24, %v11061_v16  ;;  %v11165_v2 = vadd.f32 %v2152_v13, %v11063_v9  ;;  %12939 = vst [vmem:[#allocation95_spill] sm:$0xff] %v11168_v58  ;;  %v11180_v29 = vld [vmem:[%s8123_s9 + $0x418] sm:$0xff]  ;;  %v11183_v16 = vld [vmem:[%s8123_s9 + $0x568] sm:$0xff] }
 0x403   : > { %v11174_v28 = vadd.f32 %v2236_v37, %v11071_v49  ;;  %v11177_v7 = vadd.f32 %v2320_v5, %v11073_v18  ;;  %12941 = vst [vmem:[#allocation97_spill] sm:$0xff] %v11180_v29  ;;  %12942 = vst [vmem:[#allocation98_spill] sm:$0xff] %v11183_v16  ;;  %v2527_v20 = vunpack.c.h.bf16 %v11141_v17  ;;  %v2539_v18 = vunpack.c.h.bf16 %v11150_v62  ;;  %v11208_v19 = vld [vmem:[%s8123_s9 + $0x898] sm:$0xff]  ;;  %v11221_v60 = vld [vmem:[%s8123_s9 + $0xb68] sm:$0xff] }
 0x404   : > { %v2551_v6 = vunpack.c.h.bf16 %v11153_v23  ;;  %12946 = vst [vmem:[#allocation102_spill] sm:$0xff] %v11201_v15  ;;  %v2563_v21 = vunpack.c.h.bf16 %v11168_v58  ;;  %v2575_v8 = vunpack.c.h.bf16 %v11171_v12  ;;  %12947 = vst [vmem:[#allocation103_spill] sm:$0xff] %v11208_v19  ;;  %v2587_v44 = vunpack.c.h.bf16 %v11180_v29  ;;  %v11218_v31 = vld [vmem:[%s8123_s9 + $0xa18] sm:$0xff] }
 0x405   : > { %12948 = vst [vmem:[#allocation104_spill] sm:$0xff] %v11211_v26  ;;  %v2599_v10 = vunpack.c.h.bf16 %v11183_v16  ;;  %12949 = vst [vmem:[#allocation105_spill] sm:$0xff] %v11218_v31  ;;  %v2611_v40 = vunpack.c.h.bf16 %v11188_v32  ;;  %v2623_v24 = vunpack.c.h.bf16 %v11191_v33  ;;  %v11228_v13 = vld [vmem:[%s8123_s9 + $0xb98] sm:$0xff]  ;;  %v2635_v5 = vunpack.c.h.bf16 %v11198_v4 }
 0x406   : > { %12950 = vst [vmem:[#allocation106_spill] sm:$0xff] %v11221_v60  ;;  %12951 = vst [vmem:[#allocation107_spill] sm:$0xff] %v11228_v13  ;;  %v2647_v25 = vunpack.c.h.bf16 %v11201_v15  ;;  %v2659_v46 = vunpack.c.h.bf16 %v11208_v19  ;;  %v2671_v3 = vunpack.c.h.bf16 %v11211_v26  ;;  %v2683_v49 = vunpack.c.h.bf16 %v11218_v31 }
 0x407   : > { %v2695_v9 = vunpack.c.h.bf16 %v11221_v60  ;;  %v2707_v15 = vunpack.c.h.bf16 %v11228_v13  ;;  %v2785_v4 = vadd.f32 %v2539_v18, %v2527_v20  ;;  %v2869_v11 = vadd.f32 %v2563_v21, %v2551_v6 }
 0x408   : > { %v2953_v33 = vadd.f32 %v2587_v44, %v2575_v8  ;;  %v3037_v19 = vadd.f32 %v2611_v40, %v2599_v10  ;;  %v3121_v32 = vadd.f32 %v2635_v5, %v2623_v24  ;;  %v3205_v53 = vadd.f32 %v2659_v46, %v2647_v25 }
 0x409   : > { %v2786_v16 = vrot.slane %v2785_v4, 4  ;;  %v2870_v26 = vrot.slane %v2869_v11, 4  ;;  %v3289_v29 = vadd.f32 %v2683_v49, %v2671_v3  ;;  %v3373_v51 = vadd.f32 %v2707_v15, %v2695_v9 }
 0x40a   : > { %v2954_v12 = vrot.slane %v2953_v33, 4  ;;  %v3038_v31 = vrot.slane %v3037_v19, 4  ;;  %v3122_v58 = vrot.slane %v3121_v32, 4  ;;  %v3206_v37 = vrot.slane %v3205_v53, 4 }
 0x40b   : > { %v2787_v23 = vadd.f32 %v2786_v16, %v2785_v4  ;;  %v2871_v60 = vadd.f32 %v2870_v26, %v2869_v11  ;;  %v3290_v62 = vrot.slane %v3289_v29, 4  ;;  %v3374_v14 = vrot.slane %v3373_v51, 4 }
 0x40c   : > { %v2955_v17 = vadd.f32 %v2954_v12, %v2953_v33  ;;  %v3039_v13 = vadd.f32 %v3038_v31, %v3037_v19  ;;  %v3123_v20 = vadd.f32 %v3122_v58, %v3121_v32  ;;  %v3207_v18 = vadd.f32 %v3206_v37, %v3205_v53  ;;  %v11245_v37 = vld [vmem:[%s8123_s9 + $0x148] sm:$0xff] }
 0x40d   : > { %v2788_v6 = vrot.slane %v2787_v23, 2  ;;  %v2872_v21 = vrot.slane %v2871_v60, 2  ;;  %v3291_v8 = vadd.f32 %v3290_v62, %v3289_v29  ;;  %v3375_v25 = vadd.f32 %v3374_v14, %v3373_v51  ;;  %12952 = vst [vmem:[#allocation108_spill] sm:$0xff] %v11245_v37 }
 0x40e   : > { %v2956_v44 = vrot.slane %v2955_v17, 2  ;;  %v3040_v10 = vrot.slane %v3039_v13, 2  ;;  %v3124_v49 = vrot.slane %v3123_v20, 2  ;;  %v3208_v9 = vrot.slane %v3207_v18, 2 }
 0x40f   : > { %v2789_v15 = vadd.f32 %v2788_v6, %v2787_v23  ;;  %v2873_v46 = vadd.f32 %v2872_v21, %v2871_v60  ;;  %v3292_v40 = vrot.slane %v3291_v8, 2  ;;  %v3376_v3 = vrot.slane %v3375_v25, 2  ;;  %v11254_v21 = vld [vmem:[%s8123_s9 + $0x178] sm:$0xff] }
 0x410   : > { %v2957_v16 = vadd.f32 %v2956_v44, %v2955_v17  ;;  %v3041_v4 = vadd.f32 %v3040_v10, %v3039_v13  ;;  %v3125_v11 = vadd.f32 %v3124_v49, %v3123_v20  ;;  %v3209_v26 = vadd.f32 %v3208_v9, %v3207_v18  ;;  %12953 = vst [vmem:[#allocation109_spill] sm:$0xff] %v11254_v21  ;;  %v11275_v49 = vld [vmem:[%s8123_s9 + $0x448] sm:$0xff] }
 0x411   : > { %v2790_v12 = vrot.slane %v2789_v15, 1  ;;  %v2874_v58 = vrot.slane %v2873_v46, 1  ;;  %v3293_v32 = vadd.f32 %v3292_v40, %v3291_v8  ;;  %v3377_v33 = vadd.f32 %v3376_v3, %v3375_v25  ;;  %v11257_v8 = vld [vmem:[%s8123_s9 + $0x2c8] sm:$0xff]  ;;  %12956 = vst [vmem:[#allocation112_spill] sm:$0xff] %v11275_v49 }
 0x412   : > { %v2958_v53 = vrot.slane %v2957_v16, 1  ;;  %v3042_v62 = vrot.slane %v3041_v4, 1  ;;  %v3126_v29 = vrot.slane %v3125_v11, 1  ;;  %v3210_v51 = vrot.slane %v3209_v26, 1  ;;  %12954 = vst [vmem:[#allocation110_spill] sm:$0xff] %v11257_v8  ;;  %v11295_v40 = vld [vmem:[%s8123_s9 + $0x748] sm:$0xff] }
 0x413   : > { %v2791_v19 = vadd.f32 %v2790_v12, %v2789_v15  ;;  %v2875_v23 = vadd.f32 %v2874_v58, %v2873_v46  ;;  %v3294_v14 = vrot.slane %v3293_v32, 1  ;;  %v3378_v31 = vrot.slane %v3377_v33, 1  ;;  %v11292_v46 = vld [vmem:[%s8123_s9 + $0x5f8] sm:$0xff]  ;;  %12960 = vst [vmem:[#allocation116_spill] sm:$0xff] %v11295_v40 }
 0x414   : > { %v2959_v17 = vadd.f32 %v2958_v53, %v2957_v16  ;;  %v3043_v60 = vadd.f32 %v3042_v62, %v3041_v4  ;;  %v3127_v24 = vadd.f32 %v3126_v29, %v3125_v11  ;;  %v3211_v13 = vadd.f32 %v3210_v51, %v3209_v26  ;;  %12959 = vst [vmem:[#allocation115_spill] sm:$0xff] %v11292_v46  ;;  %v11302_v4 = vld [vmem:[%s8123_s9 + $0x778] sm:$0xff]  ;;  %v11305_v11 = vld [vmem:[%s8123_s9 + $0x8c8] sm:$0xff] }
 0x415   : > { %v3295_v5 = vadd.f32 %v3294_v14, %v3293_v32  ;;  %v3379_v20 = vadd.f32 %v3378_v31, %v3377_v33  ;;  %v11248_v18 = vadd.f32 %v2791_v19, %v11144_v43  ;;  %v11251_v6 = vadd.f32 %v2875_v23, %v11147_v45  ;;  %v11272_v45 = vld [vmem:[%s8123_s9 + $0x2f8] sm:$0xff]  ;;  %12961 = vst [vmem:[#allocation117_spill] sm:$0xff] %v11302_v4  ;;  %v11315_v53 = vld [vmem:[%s8123_s9 + $0xa48] sm:$0xff] }
 0x416   : > { %v11260_v25 = vadd.f32 %v2959_v17, %v11156_v61  ;;  %v11263_v44 = vadd.f32 %v3043_v60, %v11159_v1  ;;  %v11266_v10 = vadd.f32 %v3127_v24, %v11162_v36  ;;  %v11269_v43 = vadd.f32 %v3211_v13, %v11165_v2  ;;  %12955 = vst [vmem:[#allocation111_spill] sm:$0xff] %v11272_v45  ;;  %v11284_v1 = vld [vmem:[%s8123_s9 + $0x478] sm:$0xff]  ;;  %v11287_v36 = vld [vmem:[%s8123_s9 + $0x5c8] sm:$0xff] }
 0x417   : > { %v11278_v9 = vadd.f32 %v3295_v5, %v11174_v28  ;;  %v11281_v61 = vadd.f32 %v3379_v20, %v11177_v7  ;;  %12957 = vst [vmem:[#allocation113_spill] sm:$0xff] %v11284_v1  ;;  %12958 = vst [vmem:[#allocation114_spill] sm:$0xff] %v11287_v36  ;;  %v3586_v15 = vunpack.c.h.bf16 %v11245_v37  ;;  %v3598_v7 = vunpack.c.h.bf16 %v11254_v21  ;;  %v11312_v33 = vld [vmem:[%s8123_s9 + $0x8f8] sm:$0xff]  ;;  %v11325_v14 = vld [vmem:[%s8123_s9 + $0xbc8] sm:$0xff] }
 0x418   : > { %v3610_v16 = vunpack.c.h.bf16 %v11257_v8  ;;  %12962 = vst [vmem:[#allocation118_spill] sm:$0xff] %v11305_v11  ;;  %v3622_v12 = vunpack.c.h.bf16 %v11272_v45  ;;  %v3634_v32 = vunpack.c.h.bf16 %v11275_v49  ;;  %12963 = vst [vmem:[#allocation119_spill] sm:$0xff] %v11312_v33  ;;  %v3646_v29 = vunpack.c.h.bf16 %v11284_v1  ;;  %v11322_v23 = vld [vmem:[%s8123_s9 + $0xa78] sm:$0xff] }
 0x419   : > { %12964 = vst [vmem:[#allocation120_spill] sm:$0xff] %v11315_v53  ;;  %v3658_v19 = vunpack.c.h.bf16 %v11287_v36  ;;  %12965 = vst [vmem:[#allocation121_spill] sm:$0xff] %v11322_v23  ;;  %v3670_v17 = vunpack.c.h.bf16 %v11292_v46  ;;  %v3682_v24 = vunpack.c.h.bf16 %v11295_v40  ;;  %v11332_v13 = vld [vmem:[%s8123_s9 + $0xbf8] sm:$0xff]  ;;  %v3694_v20 = vunpack.c.h.bf16 %v11302_v4 }
 0x41a   : > { %12966 = vst [vmem:[#allocation122_spill] sm:$0xff] %v11325_v14  ;;  %12967 = vst [vmem:[#allocation123_spill] sm:$0xff] %v11332_v13  ;;  %v3706_v62 = vunpack.c.h.bf16 %v11305_v11  ;;  %v3718_v31 = vunpack.c.h.bf16 %v11312_v33  ;;  %v3730_v60 = vunpack.c.h.bf16 %v11315_v53  ;;  %v3742_v28 = vunpack.c.h.bf16 %v11322_v23 }
 0x41b   : > { %v3754_v2 = vunpack.c.h.bf16 %v11325_v14  ;;  %v3766_v11 = vunpack.c.h.bf16 %v11332_v13  ;;  %v3844_v4 = vadd.f32 %v3598_v7, %v3586_v15  ;;  %v3928_v58 = vadd.f32 %v3622_v12, %v3610_v16 }
 0x41c   : > { %v4012_v40 = vadd.f32 %v3646_v29, %v3634_v32  ;;  %v4096_v33 = vadd.f32 %v3670_v17, %v3658_v19  ;;  %v4180_v46 = vadd.f32 %v3694_v20, %v3682_v24  ;;  %v4264_v26 = vadd.f32 %v3718_v31, %v3706_v62 }
 0x41d   : > { %v3845_v36 = vrot.slane %v3844_v4, 4  ;;  %v3929_v53 = vrot.slane %v3928_v58, 4  ;;  %v4348_v1 = vadd.f32 %v3742_v28, %v3730_v60  ;;  %v4432_v3 = vadd.f32 %v3766_v11, %v3754_v2 }
 0x41e   : > { %v4013_v49 = vrot.slane %v4012_v40, 4  ;;  %v4097_v23 = vrot.slane %v4096_v33, 4  ;;  %v4181_v45 = vrot.slane %v4180_v46, 4  ;;  %v4265_v5 = vrot.slane %v4264_v26, 4 }
 0x41f   : > { %v3846_v8 = vadd.f32 %v3845_v36, %v3844_v4  ;;  %v3930_v14 = vadd.f32 %v3929_v53, %v3928_v58  ;;  %v4349_v21 = vrot.slane %v4348_v1, 4  ;;  %v4433_v51 = vrot.slane %v4432_v3, 4 }
 0x420   : > { %v4014_v37 = vadd.f32 %v4013_v49, %v4012_v40  ;;  %v4098_v13 = vadd.f32 %v4097_v23, %v4096_v33  ;;  %v4182_v15 = vadd.f32 %v4181_v45, %v4180_v46  ;;  %v4266_v7 = vadd.f32 %v4265_v5, %v4264_v26 }
 0x421   : > { %v3847_v16 = vrot.slane %v3846_v8, 2  ;;  %v3931_v12 = vrot.slane %v3930_v14, 2  ;;  %v4350_v32 = vadd.f32 %v4349_v21, %v4348_v1  ;;  %v4434_v62 = vadd.f32 %v4433_v51, %v4432_v3 }
 0x422   : > { %v4015_v29 = vrot.slane %v4014_v37, 2  ;;  %v4099_v19 = vrot.slane %v4098_v13, 2  ;;  %v4183_v28 = vrot.slane %v4182_v15, 2  ;;  %v4267_v2 = vrot.slane %v4266_v7, 2 }
 0x423   : > { %v3848_v11 = vadd.f32 %v3847_v16, %v3846_v8  ;;  %v3932_v31 = vadd.f32 %v3931_v12, %v3930_v14  ;;  %v4351_v17 = vrot.slane %v4350_v32, 2  ;;  %v4435_v60 = vrot.slane %v4434_v62, 2 }
 0x424   : > { %v4016_v36 = vadd.f32 %v4015_v29, %v4014_v37  ;;  %v4100_v4 = vadd.f32 %v4099_v19, %v4098_v13  ;;  %v4184_v58 = vadd.f32 %v4183_v28, %v4182_v15  ;;  %v4268_v53 = vadd.f32 %v4267_v2, %v4266_v7 }
 0x425   : > { %v3849_v49 = vrot.slane %v3848_v11, 1  ;;  %v3933_v40 = vrot.slane %v3932_v31, 1  ;;  %v4352_v45 = vadd.f32 %v4351_v17, %v4350_v32  ;;  %v4436_v46 = vadd.f32 %v4435_v60, %v4434_v62 }
 0x426   : > { %v4017_v26 = vrot.slane %v4016_v36, 1  ;;  %v4101_v33 = vrot.slane %v4100_v4, 1  ;;  %v4185_v21 = vrot.slane %v4184_v58, 1  ;;  %v4269_v1 = vrot.slane %v4268_v53, 1 }
 0x427   : > { %v3850_v3 = vadd.f32 %v3849_v49, %v3848_v11  ;;  %v3934_v51 = vadd.f32 %v3933_v40, %v3932_v31  ;;  %v4353_v23 = vrot.slane %v4352_v45, 1  ;;  %v4437_v24 = vrot.slane %v4436_v46, 1 }
 0x428   : > { %v4018_v8 = vadd.f32 %v4017_v26, %v4016_v36  ;;  %v4102_v14 = vadd.f32 %v4101_v33, %v4100_v4  ;;  %v4186_v5 = vadd.f32 %v4185_v21, %v4184_v58  ;;  %v4270_v20 = vadd.f32 %v4269_v1, %v4268_v53 }
 0x429   : > { %v4354_v37 = vadd.f32 %v4353_v23, %v4352_v45  ;;  %v4438_v13 = vadd.f32 %v4437_v24, %v4436_v46  ;;  %v4450_v15 = vadd.f32 %v3850_v3, %v11248_v18  ;;  %v4462_v7 = vadd.f32 %v3934_v51, %v11251_v6 }
 0x42a   : > { %v4474_v16 = vadd.f32 %v4018_v8, %v11260_v25  ;;  %v4486_v12 = vadd.f32 %v4102_v14, %v11263_v44  ;;  %v4498_v32 = vadd.f32 %v4186_v5, %v11266_v10  ;;  %v4510_v62 = vadd.f32 %v4270_v20, %v11269_v43 }
 0x42b   : > { %v4522_v29 = vadd.f32 %v4354_v37, %v11278_v9  ;;  %v4534_v19 = vadd.f32 %v4438_v13, %v11281_v61  ;;  %v4546_v28 = vmul.f32 0.015625, %v4450_v15  ;;  %v4558_v2 = vmul.f32 0.015625, %v4462_v7 }
 0x42c   : > { %v4570_v11 = vmul.f32 0.015625, %v4474_v16  ;;  %v4582_v31 = vmul.f32 0.015625, %v4486_v12  ;;  %v4594_v17 = vmul.f32 0.015625, %v4498_v32  ;;  %v4606_v18 = vmul.f32 0.015625, %v4510_v62 }
 0x42d   : > { %v4618_v60 = vmul.f32 0.015625, %v4522_v29  ;;  %v4630_v6 = vmul.f32 0.015625, %v4534_v19  ;;  %v4642_v36 = vpack.c.bf16 %v4546_v28, %v4546_v28  ;;  %v4654_v25 = vpack.c.bf16 %v4558_v2, %v4558_v2 }
 0x42e   : > { %v4666_v4 = vpack.c.bf16 %v4570_v11, %v4570_v11  ;;  %v4678_v44 = vpack.c.bf16 %v4582_v31, %v4582_v31  ;;  %v4690_v58 = vpack.c.bf16 %v4594_v17, %v4594_v17  ;;  %v4702_v10 = vpack.c.bf16 %v4606_v18, %v4606_v18 }
 0x42f   : > { %v4714_v53 = vpack.c.bf16 %v4618_v60, %v4618_v60  ;;  %v4726_v43 = vpack.c.bf16 %v4630_v6, %v4630_v6  ;;  %v5038_v49 = vunpack.c.l.b16 %v4642_v36  ;;  %v5050_v9 = vunpack.c.l.b16 %v4654_v25 }
 0x430   : > { %v5062_v40 = vunpack.c.l.b16 %v4666_v4  ;;  %v5074_v61 = vunpack.c.l.b16 %v4678_v44  ;;  %v5086_v45 = vunpack.c.l.b16 %v4690_v58  ;;  %v5098_v46 = vunpack.c.l.b16 %v4702_v10 }
 0x431   : > { %v5110_v26 = vunpack.c.l.b16 %v4714_v53  ;;  %v5122_v33 = vunpack.c.l.b16 %v4726_v43  ;;  %v5207_v21 = vsel %vm5123_vm0, %v5050_v9, %v5038_v49  ;;  %v12968_v1 = vunpack.c.l.bf16 %v10553_v48 }
 0x432   : > { %v12969_v3 = vunpack.c.l.bf16 %v10558_v34  ;;  %v5208_v23 = vsel %vm5125_vm1, %v5062_v40, %v5207_v21  ;;  %v12970_v24 = vunpack.c.l.bf16 %v10563_v41  ;;  %v12971_v8 = vunpack.c.l.bf16 %v10568_v52 }
 0x433   : > { %v12972_v5 = vunpack.c.l.bf16 %v10574_v55  ;;  %v12973_v20 = vunpack.c.l.bf16 %v10579_v30  ;;  %v12974_v13 = vunpack.c.l.bf16 %v10584_v54  ;;  %v12975_v15 = vunpack.c.l.bf16 %v10587_v38 }
 0x434   : > { %v618_v51 = vadd.f32 %v12969_v3, %v12968_v1  ;;  %v702_v14 = vadd.f32 %v12971_v8, %v12970_v24  ;;  %v5209_v34 = vsel %vm5127_vm2, %v5074_v61, %v5208_v23  ;;  %v12976_v16 = vunpack.c.l.bf16 %v10593_v0 }
 0x435   : > { %v786_v37 = vadd.f32 %v12973_v20, %v12972_v5  ;;  %v870_v48 = vadd.f32 %v12975_v15, %v12974_v13  ;;  %v12977_v41 = vunpack.c.l.bf16 %v10599_v57  ;;  %v12978_v52 = vunpack.c.l.bf16 %v10602_v50 }
 0x436   : > { %v619_v7 = vrot.slane %v618_v51, 4  ;;  %v12979_v55 = vunpack.c.l.bf16 %v10607_v27  ;;  %v5210_v30 = vsel %vm5129_vm3, %v5086_v45, %v5209_v34  ;;  %v703_v62 = vrot.slane %v702_v14, 4 }
 0x437   : > { %v954_v12 = vadd.f32 %v12977_v41, %v12976_v16  ;;  %v787_v54 = vrot.slane %v786_v37, 4  ;;  %v871_v29 = vrot.slane %v870_v48, 4  ;;  %v5211_v38 = vsel %vm5131_vm4, %v5098_v46, %v5210_v30  ;;  %v12990_v30 = vld [vmem:[#allocation17_spill] sm:$0xff] }
 0x438   : > { %v1038_v32 = vadd.f32 %v12979_v55, %v12978_v52  ;;  %v620_v19 = vadd.f32 %v619_v7, %v618_v51  ;;  %v5212_v0 = vsel %vm5133_vm5, %v5110_v26, %v5211_v38  ;;  %v704_v11 = vadd.f32 %v703_v62, %v702_v14  ;;  %v12988_v55 = vld [vmem:[#allocation16_spill] sm:$0xff] }
 0x439   : > { %v955_v28 = vrot.slane %v954_v12, 4  ;;  %v788_v57 = vadd.f32 %v787_v54, %v786_v37  ;;  %v872_v31 = vadd.f32 %v871_v29, %v870_v48  ;;  %v5213_v50 = vsel %vm5135_vm6, %v5122_v33, %v5212_v0  ;;  %v12992_v29 = vld [vmem:[#allocation18_spill] sm:$0xff] }
 0x43a   : > { %v1039_v2 = vrot.slane %v1038_v32, 4  ;;  %v621_v17 = vrot.slane %v620_v19, 2  ;;  %v5225_v60 = vpack.c.b16 %v5213_v50, %v5213_v50  ;;  %v705_v6 = vrot.slane %v704_v11, 2  ;;  %v13000_v50 = vld [vmem:[#allocation22_spill] sm:$0xff] }
 0x43b   : > { %v956_v27 = vadd.f32 %v955_v28, %v954_v12  ;;  %v789_v36 = vrot.slane %v788_v57, 2  ;;  %v873_v25 = vrot.slane %v872_v31, 2  ;;  %v12980_v10 = vunpack.c.l.bf16 %v10613_v63 }
 0x43c   : > { %v1040_v18 = vadd.f32 %v1039_v2, %v1038_v32  ;;  %v622_v4 = vadd.f32 %v621_v17, %v620_v19  ;;  %v12981_v53 = vunpack.c.l.bf16 %v10616_v56  ;;  %6435 = vmatprep.mubr.bf16.mxu0 %v5225_v60  ;;  %v706_v49 = vadd.f32 %v705_v6, %v704_v11  ;;  %v12994_v19 = vld [vmem:[#allocation19_spill] sm:$0xff] }
 0x43d   : > { %v957_v44 = vrot.slane %v956_v27, 2  ;;  %v790_v9 = vadd.f32 %v789_v36, %v788_v57  ;;  %v874_v40 = vadd.f32 %v873_v25, %v872_v31  ;;  %v12982_v61 = vunpack.c.l.bf16 %v10622_v39  ;;  %v12998_v57 = vld [vmem:[#allocation21_spill] sm:$0xff]  ;;  %v13002_v17 = vld [vmem:[#allocation23_spill] sm:$0xff] }
 0x43e   : > { %v1041_v58 = vrot.slane %v1040_v18, 2  ;;  %v1122_v43 = vadd.f32 %v12981_v53, %v12980_v10  ;;  %v12983_v45 = vunpack.c.l.bf16 %v10629_v22  ;;  %v623_v26 = vrot.slane %v622_v4, 1 }
 0x43f   : > { %v958_v33 = vadd.f32 %v957_v44, %v956_v27  ;;  %v707_v3 = vrot.slane %v706_v49, 1  ;;  %v791_v51 = vrot.slane %v790_v9, 1  ;;  %v875_v23 = vrot.slane %v874_v40, 1 }
 0x440   : > { %v1206_v46 = vadd.f32 %v12983_v45, %v12982_v61  ;;  %v1042_v21 = vadd.f32 %v1041_v58, %v1040_v18  ;;  %v1123_v1 = vrot.slane %v1122_v43, 4  ;;  %v11395_v24 = vadd.f32 %v623_v26, %v622_v4 }
 0x441   : > { %v959_v56 = vrot.slane %v958_v33, 1  ;;  %v11397_v5 = vadd.f32 %v707_v3, %v706_v49  ;;  %v11399_v20 = vadd.f32 %v791_v51, %v790_v9  ;;  %v11401_v39 = vadd.f32 %v875_v23, %v874_v40 }
 0x442   : > { %v1207_v63 = vrot.slane %v1206_v46, 4  ;;  %v1043_v8 = vrot.slane %v1042_v21, 1  ;;  %v1124_v14 = vadd.f32 %v1123_v1, %v1122_v43  ;;  %v12984_v48 = vunpack.c.l.bf16 %v10646_v59 }
 0x443   : > { %v11403_v37 = vadd.f32 %v959_v56, %v958_v33  ;;  %v12985_v34 = vunpack.c.l.bf16 %v10653_v35  ;;  %v12986_v41 = vunpack.c.l.bf16 %v10656_v42  ;;  %v12987_v12 = vunpack.c.l.bf16 %v10667_v47  ;;  %v12996_v35 = vld [vmem:[#allocation20_spill] sm:$0xff] }
 0x444   : > { %v1208_v22 = vadd.f32 %v1207_v63, %v1206_v46  ;;  %v11405_v13 = vadd.f32 %v1043_v8, %v1042_v21  ;;  %v1125_v15 = vrot.slane %v1124_v14, 2  ;;  %v12989_v32 = vunpack.c.l.bf16 %v12988_v55  ;;  %v13004_v63 = vld [vmem:[#allocation24_spill] sm:$0xff]  ;;  %v13006_v8 = vld [vmem:[#allocation25_spill] sm:$0xff] }
 0x445   : > { %v1677_v7 = vadd.f32 %v12985_v34, %v12984_v48  ;;  %v1761_v52 = vadd.f32 %v12987_v12, %v12986_v41  ;;  %v12991_v62 = vunpack.c.l.bf16 %v12990_v30  ;;  %v12993_v38 = vunpack.c.l.bf16 %v12992_v29  ;;  %v13010_v41 = vld [vmem:[#allocation27_spill] sm:$0xff] }
 0x446   : > { %v1209_v16 = vrot.slane %v1208_v22, 2  ;;  %v12995_v28 = vunpack.c.l.bf16 %v12994_v19  ;;  %v1126_v59 = vadd.f32 %v1125_v15, %v1124_v14  ;;  %v12997_v11 = vunpack.c.l.bf16 %v12996_v35 }
 0x447   : > { %v1845_v54 = vadd.f32 %v12991_v62, %v12989_v32  ;;  %v1678_v0 = vrot.slane %v1677_v7, 4  ;;  %v12999_v31 = vunpack.c.l.bf16 %v12998_v57  ;;  %v13001_v47 = vunpack.c.l.bf16 %v13000_v50 }
 0x448   : > { %v1929_v2 = vadd.f32 %v12995_v28, %v12993_v38  ;;  %v13003_v27 = vunpack.c.l.bf16 %v13002_v17  ;;  %v1210_v60 = vadd.f32 %v1209_v16, %v1208_v22  ;;  %v1762_v6 = vrot.slane %v1761_v52, 4 }
 0x449   : > { %v2013_v42 = vadd.f32 %v12999_v31, %v12997_v11  ;;  %v1846_v36 = vrot.slane %v1845_v54, 4  ;;  %v1127_v4 = vrot.slane %v1126_v59, 1  ;;  %v1679_v44 = vadd.f32 %v1678_v0, %v1677_v7  ;;  %v13008_v7 = vld [vmem:[#allocation26_spill] sm:$0xff] }
 0x44a   : > { %v2097_v18 = vadd.f32 %v13003_v27, %v13001_v47  ;;  %v1930_v25 = vrot.slane %v1929_v2, 4  ;;  %v1211_v53 = vrot.slane %v1210_v60, 1  ;;  %v1763_v43 = vadd.f32 %v1762_v6, %v1761_v52 }
 0x44b   : > { %v2014_v58 = vrot.slane %v2013_v42, 4  ;;  %v1847_v49 = vadd.f32 %v1846_v36, %v1845_v54  ;;  %v11431_v40 = vadd.f32 %v1127_v4, %v1126_v59  ;;  %v1680_v61 = vrot.slane %v1679_v44, 2 }
 0x44c   : > { %v2098_v10 = vrot.slane %v2097_v18, 4  ;;  %v1931_v9 = vadd.f32 %v1930_v25, %v1929_v2  ;;  %v11433_v26 = vadd.f32 %v1211_v53, %v1210_v60  ;;  %v1764_v33 = vrot.slane %v1763_v43, 2 }
 0x44d   : > { %v2015_v45 = vadd.f32 %v2014_v58, %v2013_v42  ;;  %v1848_v21 = vrot.slane %v1847_v49, 2  ;;  %v1681_v3 = vadd.f32 %v1680_v61, %v1679_v44  ;;  %v13005_v56 = vunpack.c.l.bf16 %v13004_v63  ;;  %v13012_v44 = vld [vmem:[#allocation28_spill] sm:$0xff]  ;;  %v13014_v58 = vld [vmem:[#allocation29_spill] sm:$0xff] }
 0x44e   : > { %v2099_v46 = vadd.f32 %v2098_v10, %v2097_v18  ;;  %v1932_v1 = vrot.slane %v1931_v9, 2  ;;  %v13007_v14 = vunpack.c.l.bf16 %v13006_v8  ;;  %v1765_v15 = vadd.f32 %v1764_v33, %v1763_v43  ;;  %v13016_v43 = vld [vmem:[#allocation30_spill] sm:$0xff] }
 0x44f   : > { %v2016_v51 = vrot.slane %v2015_v45, 2  ;;  %v1849_v48 = vadd.f32 %v1848_v21, %v1847_v49  ;;  %v13009_v16 = vunpack.c.l.bf16 %v13008_v7  ;;  %v13011_v12 = vunpack.c.l.bf16 %v13010_v41  ;;  %v13024_v21 = vld [vmem:[#allocation34_spill] sm:$0xff]  ;;  %v13034_v7 = vld [vmem:[#allocation39_spill] sm:$0xff] }
 0x450   : > { %v2100_v23 = vrot.slane %v2099_v46, 2  ;;  %v2181_v22 = vadd.f32 %v13007_v14, %v13005_v56  ;;  %v1933_v34 = vadd.f32 %v1932_v1, %v1931_v9  ;;  %v1682_v55 = vrot.slane %v1681_v3, 1  ;;  %v13028_v56 = vld [vmem:[#allocation36_spill] sm:$0xff]  ;;  %v13030_v14 = vld [vmem:[#allocation37_spill] sm:$0xff] }
 0x451   : > { %v2265_v52 = vadd.f32 %v13011_v12, %v13009_v16  ;;  %v2017_v32 = vadd.f32 %v2016_v51, %v2015_v45  ;;  %v1766_v54 = vrot.slane %v1765_v15, 1  ;;  %v1850_v29 = vrot.slane %v1849_v48, 1 }
 0x452   : > { %v2101_v30 = vadd.f32 %v2100_v23, %v2099_v46  ;;  %v2182_v62 = vrot.slane %v2181_v22, 4  ;;  %v1934_v38 = vrot.slane %v1933_v34, 1  ;;  %v1683_v28 = vadd.f32 %v1682_v55, %v1681_v3  ;;  %v13022_v46 = vld [vmem:[#allocation33_spill] sm:$0xff] }
 0x453   : > { %v2266_v19 = vrot.slane %v2265_v52, 4  ;;  %v2018_v2 = vrot.slane %v2017_v32, 1  ;;  %v1767_v35 = vadd.f32 %v1766_v54, %v1765_v15  ;;  %v1851_v11 = vadd.f32 %v1850_v29, %v1849_v48  ;;  %v13032_v48 = vld [vmem:[#allocation38_spill] sm:$0xff] }
 0x454   : > { %v2102_v59 = vrot.slane %v2101_v30, 1  ;;  %v2183_v0 = vadd.f32 %v2182_v62, %v2181_v22  ;;  %v1935_v57 = vadd.f32 %v1934_v38, %v1933_v34  ;;  %v11444_v17 = vadd.f32 %v1683_v28, %v11395_v24 }
 0x455   : > { %v2267_v31 = vadd.f32 %v2266_v19, %v2265_v52  ;;  %v2019_v42 = vadd.f32 %v2018_v2, %v2017_v32  ;;  %v11447_v18 = vadd.f32 %v1767_v35, %v11397_v5  ;;  %v11450_v60 = vadd.f32 %v1851_v11, %v11399_v20  ;;  %v13018_v20 = vld [vmem:[#allocation31_spill] sm:$0xff] }
 0x456   : > { %v2103_v50 = vadd.f32 %v2102_v59, %v2101_v30  ;;  %v2184_v47 = vrot.slane %v2183_v0, 2  ;;  %v11453_v6 = vadd.f32 %v1935_v57, %v11401_v39  ;;  %v13013_v24 = vunpack.c.l.bf16 %v13012_v44  ;;  %v13020_v39 = vld [vmem:[#allocation32_spill] sm:$0xff] }
 0x457   : > { %v2268_v27 = vrot.slane %v2267_v31, 2  ;;  %v11456_v25 = vadd.f32 %v2019_v42, %v11403_v37  ;;  %v13015_v10 = vunpack.c.l.bf16 %v13014_v58  ;;  %v13017_v49 = vunpack.c.l.bf16 %v13016_v43  ;;  %v13036_v44 = vld [vmem:[#allocation40_spill] sm:$0xff]  ;;  %v13038_v58 = vld [vmem:[#allocation41_spill] sm:$0xff] }
 0x458   : > { %v2185_v36 = vadd.f32 %v2184_v47, %v2183_v0  ;;  %v11459_v4 = vadd.f32 %v2103_v50, %v11405_v13  ;;  %v13019_v9 = vunpack.c.l.bf16 %v13018_v20  ;;  %v13021_v45 = vunpack.c.l.bf16 %v13020_v39  ;;  %v13026_v13 = vld [vmem:[#allocation35_spill] sm:$0xff] }
 0x459   : > { %v2736_v53 = vadd.f32 %v13015_v10, %v13013_v24  ;;  %v2269_v5 = vadd.f32 %v2268_v27, %v2267_v31  ;;  %v13023_v33 = vunpack.c.l.bf16 %v13022_v46  ;;  %v13025_v1 = vunpack.c.l.bf16 %v13024_v21 }
 0x45a   : > { %v2820_v61 = vadd.f32 %v13019_v9, %v13017_v49  ;;  %v13027_v3 = vunpack.c.l.bf16 %v13026_v13  ;;  %v2186_v23 = vrot.slane %v2185_v36, 1  ;;  %v13029_v8 = vunpack.c.l.bf16 %v13028_v56  ;;  %v13040_v49 = vld [vmem:[#allocation42_spill] sm:$0xff]  ;;  %v13042_v9 = vld [vmem:[#allocation43_spill] sm:$0xff] }
 0x45b   : > { %v2904_v37 = vadd.f32 %v13023_v33, %v13021_v45  ;;  %v2737_v63 = vrot.slane %v2736_v53, 4  ;;  %v13031_v22 = vunpack.c.l.bf16 %v13030_v14  ;;  %v13033_v34 = vunpack.c.l.bf16 %v13032_v48 }
 0x45c   : > { %v2988_v51 = vadd.f32 %v13027_v3, %v13025_v1  ;;  %v13035_v16 = vunpack.c.l.bf16 %v13034_v7  ;;  %v2270_v12 = vrot.slane %v2269_v5, 1  ;;  %v2821_v52 = vrot.slane %v2820_v61, 4 }
 0x45d   : > { %v3072_v15 = vadd.f32 %v13031_v22, %v13029_v8  ;;  %v2905_v55 = vrot.slane %v2904_v37, 4  ;;  %v2187_v30 = vadd.f32 %v2186_v23, %v2185_v36  ;;  %v2738_v62 = vadd.f32 %v2737_v63, %v2736_v53 }
 0x45e   : > { %v3156_v41 = vadd.f32 %v13035_v16, %v13033_v34  ;;  %v2989_v32 = vrot.slane %v2988_v51, 4  ;;  %v2271_v38 = vadd.f32 %v2270_v12, %v2269_v5  ;;  %v2822_v19 = vadd.f32 %v2821_v52, %v2820_v61 }
 0x45f   : > { %v3073_v54 = vrot.slane %v3072_v15, 4  ;;  %v2906_v28 = vadd.f32 %v2905_v55, %v2904_v37  ;;  %v11486_v59 = vadd.f32 %v2187_v30, %v11431_v40  ;;  %v2739_v0 = vrot.slane %v2738_v62, 2 }
 0x460   : > { %v3157_v29 = vrot.slane %v3156_v41, 4  ;;  %v2990_v2 = vadd.f32 %v2989_v32, %v2988_v51  ;;  %v11489_v57 = vadd.f32 %v2271_v38, %v11433_v26  ;;  %v2823_v31 = vrot.slane %v2822_v19, 2 }
 0x461   : > { %v3074_v35 = vadd.f32 %v3073_v54, %v3072_v15  ;;  %v2907_v42 = vrot.slane %v2906_v28, 2  ;;  %v2740_v47 = vadd.f32 %v2739_v0, %v2738_v62  ;;  %v13037_v24 = vunpack.c.l.bf16 %v13036_v44  ;;  %v13044_v62 = vld [vmem:[#allocation44_spill] sm:$0xff]  ;;  %v13046_v54 = vld [vmem:[#allocation45_spill] sm:$0xff] }
 0x462   : > { %v3158_v11 = vadd.f32 %v3157_v29, %v3156_v41  ;;  %v2991_v50 = vrot.slane %v2990_v2, 2  ;;  %v13039_v10 = vunpack.c.l.bf16 %v13038_v58  ;;  %v2824_v5 = vadd.f32 %v2823_v31, %v2822_v19  ;;  %v13048_v19 = vld [vmem:[#allocation46_spill] sm:$0xff] }
 0x463   : > { %v3075_v27 = vrot.slane %v3074_v35, 2  ;;  %v2908_v40 = vadd.f32 %v2907_v42, %v2906_v28  ;;  %v13041_v20 = vunpack.c.l.bf16 %v13040_v49  ;;  %v13043_v61 = vunpack.c.l.bf16 %v13042_v9  ;;  %v13056_v42 = vld [vmem:[#allocation50_spill] sm:$0xff]  ;;  %v13066_v49 = vld [vmem:[#allocation55_spill] sm:$0xff] }
 0x464   : > { %v3159_v36 = vrot.slane %v3158_v11, 2  ;;  %v3240_v53 = vadd.f32 %v13039_v10, %v13037_v24  ;;  %v2992_v43 = vadd.f32 %v2991_v50, %v2990_v2  ;;  %v2741_v39 = vrot.slane %v2740_v47, 1  ;;  %v13060_v24 = vld [vmem:[#allocation52_spill] sm:$0xff]  ;;  %v13062_v10 = vld [vmem:[#allocation53_spill] sm:$0xff] }
 0x465   : > { %v3324_v26 = vadd.f32 %v13043_v61, %v13041_v20  ;;  %v3076_v45 = vadd.f32 %v3075_v27, %v3074_v35  ;;  %v2825_v37 = vrot.slane %v2824_v5, 1  ;;  %v2909_v21 = vrot.slane %v2908_v40, 1 }
 0x466   : > { %v3160_v46 = vadd.f32 %v3159_v36, %v3158_v11  ;;  %v3241_v33 = vrot.slane %v3240_v53, 4  ;;  %v2993_v1 = vrot.slane %v2992_v43, 1  ;;  %v2742_v3 = vadd.f32 %v2741_v39, %v2740_v47  ;;  %v13054_v11 = vld [vmem:[#allocation49_spill] sm:$0xff] }
 0x467   : > { %v3325_v13 = vrot.slane %v3324_v26, 4  ;;  %v3077_v51 = vrot.slane %v3076_v45, 1  ;;  %v2826_v56 = vadd.f32 %v2825_v37, %v2824_v5  ;;  %v2910_v8 = vadd.f32 %v2909_v21, %v2908_v40  ;;  %v13064_v40 = vld [vmem:[#allocation54_spill] sm:$0xff] }
 0x468   : > { %v3161_v23 = vrot.slane %v3160_v46, 1  ;;  %v3242_v63 = vadd.f32 %v3241_v33, %v3240_v53  ;;  %v2994_v14 = vadd.f32 %v2993_v1, %v2992_v43  ;;  %v11500_v7 = vadd.f32 %v2742_v3, %v11444_v17 }
 0x469   : > { %v3326_v22 = vadd.f32 %v3325_v13, %v3324_v26  ;;  %v3078_v15 = vadd.f32 %v3077_v51, %v3076_v45  ;;  %v11503_v41 = vadd.f32 %v2826_v56, %v11447_v18  ;;  %v11506_v12 = vadd.f32 %v2910_v8, %v11450_v60  ;;  %v13050_v60 = vld [vmem:[#allocation47_spill] sm:$0xff] }
 0x46a   : > { %v3162_v48 = vadd.f32 %v3161_v23, %v3160_v46  ;;  %v3243_v34 = vrot.slane %v3242_v63, 2  ;;  %v11509_v52 = vadd.f32 %v2994_v14, %v11453_v6  ;;  %v13045_v17 = vunpack.c.l.bf16 %v13044_v62  ;;  %v13052_v6 = vld [vmem:[#allocation48_spill] sm:$0xff] }
 0x46b   : > { %v3327_v16 = vrot.slane %v3326_v22, 2  ;;  %v11512_v32 = vadd.f32 %v3078_v15, %v11456_v25  ;;  %v13047_v29 = vunpack.c.l.bf16 %v13046_v54  ;;  %v13049_v28 = vunpack.c.l.bf16 %v13048_v19  ;;  %v13068_v62 = vld [vmem:[#allocation56_spill] sm:$0xff]  ;;  %v13070_v54 = vld [vmem:[#allocation57_spill] sm:$0xff] }
 0x46c   : > { %v3244_v55 = vadd.f32 %v3243_v34, %v3242_v63  ;;  %v11515_v30 = vadd.f32 %v3162_v48, %v11459_v4  ;;  %v13051_v2 = vunpack.c.l.bf16 %v13050_v60  ;;  %v13053_v35 = vunpack.c.l.bf16 %v13052_v6  ;;  %v13058_v4 = vld [vmem:[#allocation51_spill] sm:$0xff] }
 0x46d   : > { %v3795_v38 = vadd.f32 %v13047_v29, %v13045_v17  ;;  %v3328_v18 = vadd.f32 %v3327_v16, %v3326_v22  ;;  %v13055_v31 = vunpack.c.l.bf16 %v13054_v11  ;;  %v13057_v50 = vunpack.c.l.bf16 %v13056_v42 }
 0x46e   : > { %v3879_v0 = vadd.f32 %v13051_v2, %v13049_v28  ;;  %v13059_v47 = vunpack.c.l.bf16 %v13058_v4  ;;  %v3245_v36 = vrot.slane %v3244_v55, 1  ;;  %v13061_v58 = vunpack.c.l.bf16 %v13060_v24  ;;  %v13072_v28 = vld [vmem:[#allocation58_spill] sm:$0xff]  ;;  %v13074_v2 = vld [vmem:[#allocation59_spill] sm:$0xff] }
 0x46f   : > { %v3963_v25 = vadd.f32 %v13055_v31, %v13053_v35  ;;  %v3796_v44 = vrot.slane %v3795_v38, 4  ;;  %v13063_v53 = vunpack.c.l.bf16 %v13062_v10  ;;  %v13065_v43 = vunpack.c.l.bf16 %v13064_v40 }
 0x470   : > { %v4047_v27 = vadd.f32 %v13059_v47, %v13057_v50  ;;  %v13067_v20 = vunpack.c.l.bf16 %v13066_v49  ;;  %v3329_v61 = vrot.slane %v3328_v18, 1  ;;  %v3880_v26 = vrot.slane %v3879_v0, 4 }
 0x471   : > { %v4131_v5 = vadd.f32 %v13063_v53, %v13061_v58  ;;  %v3964_v39 = vrot.slane %v3963_v25, 4  ;;  %v3246_v46 = vadd.f32 %v3245_v36, %v3244_v55  ;;  %v3797_v33 = vadd.f32 %v3796_v44, %v3795_v38 }
 0x472   : > { %v4215_v9 = vadd.f32 %v13067_v20, %v13065_v43  ;;  %v4048_v45 = vrot.slane %v4047_v27, 4  ;;  %v3330_v1 = vadd.f32 %v3329_v61, %v3328_v18  ;;  %v3881_v13 = vadd.f32 %v3880_v26, %v3879_v0 }
 0x473   : > { %v4132_v37 = vrot.slane %v4131_v5, 4  ;;  %v3965_v3 = vadd.f32 %v3964_v39, %v3963_v25  ;;  %v11542_v23 = vadd.f32 %v3246_v46, %v11486_v59  ;;  %v3798_v63 = vrot.slane %v3797_v33, 2 }
 0x474   : > { %v4216_v21 = vrot.slane %v4215_v9, 4  ;;  %v4049_v51 = vadd.f32 %v4048_v45, %v4047_v27  ;;  %v11545_v14 = vadd.f32 %v3330_v1, %v11489_v57  ;;  %v3882_v22 = vrot.slane %v3881_v13, 2 }
 0x475   : > { %v4133_v56 = vadd.f32 %v4132_v37, %v4131_v5  ;;  %v3966_v15 = vrot.slane %v3965_v3, 2  ;;  %v3799_v34 = vadd.f32 %v3798_v63, %v3797_v33  ;;  %v13069_v17 = vunpack.c.l.bf16 %v13068_v62 }
 0x476   : > { %v4217_v8 = vadd.f32 %v4216_v21, %v4215_v9  ;;  %v4050_v48 = vrot.slane %v4049_v51, 2  ;;  %v13071_v29 = vunpack.c.l.bf16 %v13070_v54  ;;  %v3883_v18 = vadd.f32 %v3882_v22, %v3881_v13  ;;  %v13076_v54 = vld [vmem:[#allocation60_spill] sm:$0xff] }
 0x477   : > { %v4134_v16 = vrot.slane %v4133_v56, 2  ;;  %v3967_v59 = vadd.f32 %v3966_v15, %v3965_v3  ;;  %v13073_v60 = vunpack.c.l.bf16 %v13072_v28  ;;  %v13075_v0 = vunpack.c.l.bf16 %v13074_v2 }
 0x478   : > { %v4218_v55 = vrot.slane %v4217_v8, 2  ;;  %v4299_v38 = vadd.f32 %v13071_v29, %v13069_v17  ;;  %v4051_v19 = vadd.f32 %v4050_v48, %v4049_v51  ;;  %v3800_v6 = vrot.slane %v3799_v34, 1 }
 0x479   : > { %v4383_v57 = vadd.f32 %v13075_v0, %v13073_v60  ;;  %v4135_v35 = vadd.f32 %v4134_v16, %v4133_v56  ;;  %v3884_v25 = vrot.slane %v3883_v18, 1  ;;  %v3968_v42 = vrot.slane %v3967_v59, 1  ;;  %v13080_v60 = vld [vmem:[#allocation62_spill] sm:$0xff]  ;;  %v13082_v0 = vld [vmem:[#allocation63_spill] sm:$0xff] }
 0x47a   : > { %v4219_v11 = vadd.f32 %v4218_v55, %v4217_v8  ;;  %v4300_v31 = vrot.slane %v4299_v38, 4  ;;  %v4052_v50 = vrot.slane %v4051_v19, 1  ;;  %v3801_v47 = vadd.f32 %v3800_v6, %v3799_v34 }
 0x47b   : > { %v4384_v4 = vrot.slane %v4383_v57, 4  ;;  %v4136_v27 = vrot.slane %v4135_v35, 1  ;;  %v3885_v24 = vadd.f32 %v3884_v25, %v3883_v18  ;;  %v3969_v58 = vadd.f32 %v3968_v42, %v3967_v59 }
 0x47c   : > { %v4220_v36 = vrot.slane %v4219_v11, 1  ;;  %v4301_v44 = vadd.f32 %v4300_v31, %v4299_v38  ;;  %v4053_v10 = vadd.f32 %v4052_v50, %v4051_v19  ;;  %v4443_v49 = vadd.f32 %v3801_v47, %v11500_v7  ;;  %v13078_v38 = vld [vmem:[#allocation61_spill] sm:$0xff]  ;;  %v13088_v47 = vld [vmem:[#allocation66_spill] sm:$0xff] }
 0x47d   : > { %v4385_v53 = vadd.f32 %v4384_v4, %v4383_v57  ;;  %v4137_v5 = vadd.f32 %v4136_v27, %v4135_v35  ;;  %v4455_v9 = vadd.f32 %v3885_v24, %v11503_v41  ;;  %v4467_v61 = vadd.f32 %v3969_v58, %v11506_v12  ;;  %v13084_v35 = vld [vmem:[#allocation64_spill] sm:$0xff]  ;;  %v13086_v31 = vld [vmem:[#allocation65_spill] sm:$0xff] }
 0x47e   : > { %v4221_v40 = vadd.f32 %v4220_v36, %v4219_v11  ;;  %v4302_v43 = vrot.slane %v4301_v44, 2  ;;  %v4479_v26 = vadd.f32 %v4053_v10, %v11509_v52  ;;  %v4539_v33 = vmul.f32 0.015625, %v4443_v49  ;;  %v13090_v36 = vld [vmem:[#allocation67_spill] sm:$0xff] }
 0x47f   : > { %v4386_v20 = vrot.slane %v4385_v53, 2  ;;  %v4491_v45 = vadd.f32 %v4137_v5, %v11512_v32  ;;  %v4551_v21 = vmul.f32 0.015625, %v4455_v9  ;;  %v4563_v1 = vmul.f32 0.015625, %v4467_v61 }
 0x480   : > { %v4303_v39 = vadd.f32 %v4302_v43, %v4301_v44  ;;  %v4503_v46 = vadd.f32 %v4221_v40, %v11515_v30  ;;  %v4575_v13 = vmul.f32 0.015625, %v4479_v26  ;;  %v4635_v63 = vpack.c.bf16 %v4539_v33, %v4539_v33  ;;  %v13092_v33 = vld [vmem:[#allocation68_spill] sm:$0xff] }
 0x481   : > { %v4387_v37 = vadd.f32 %v4386_v20, %v4385_v53  ;;  %v4587_v51 = vmul.f32 0.015625, %v4491_v45  ;;  %v4647_v41 = vpack.c.bf16 %v4551_v21, %v4551_v21  ;;  %v4659_v8 = vpack.c.bf16 %v4563_v1, %v4563_v1  ;;  %v13094_v21 = vld [vmem:[#allocation69_spill] sm:$0xff] }
 0x482   : > { %v4304_v3 = vrot.slane %v4303_v39, 1  ;;  %v4599_v7 = vmul.f32 0.015625, %v4503_v46  ;;  %v4671_v12 = vpack.c.bf16 %v4575_v13, %v4575_v13  ;;  %v5031_v48 = vunpack.c.l.b16 %v4635_v63  ;;  %v13096_v63 = vld [vmem:[#allocation70_spill] sm:$0xff] }
 0x483   : > { %v4388_v56 = vrot.slane %v4387_v37, 1  ;;  %v4683_v52 = vpack.c.bf16 %v4587_v51, %v4587_v51  ;;  %v5043_v34 = vunpack.c.l.b16 %v4647_v41  ;;  %v5055_v30 = vunpack.c.l.b16 %v4659_v8  ;;  %v13098_v41 = vld [vmem:[#allocation71_spill] sm:$0xff] }
 0x484   : > { %v4305_v22 = vadd.f32 %v4304_v3, %v4303_v39  ;;  %v4695_v15 = vpack.c.bf16 %v4599_v7, %v4599_v7  ;;  %v5067_v16 = vunpack.c.l.b16 %v4671_v12  ;;  %v13077_v29 = vunpack.c.l.bf16 %v13076_v54 }
 0x485   : > { %v4389_v32 = vadd.f32 %v4388_v56, %v4387_v37  ;;  %v5079_v62 = vunpack.c.l.b16 %v4683_v52  ;;  %v13079_v18 = vunpack.c.l.bf16 %v13078_v38  ;;  %v5158_v28 = vsel %vm5123_vm0, %v5043_v34, %v5031_v48 }
 0x486   : > { %v4515_v55 = vadd.f32 %v4305_v22, %v11542_v23  ;;  %v5091_v17 = vunpack.c.l.b16 %v4695_v15  ;;  %v13081_v2 = vunpack.c.l.bf16 %v13080_v60  ;;  %v13083_v57 = vunpack.c.l.bf16 %v13082_v0 }
 0x487   : > { %v660_v59 = vadd.f32 %v13079_v18, %v13077_v29  ;;  %v4527_v19 = vadd.f32 %v4389_v32, %v11545_v14  ;;  %v13085_v11 = vunpack.c.l.bf16 %v13084_v35  ;;  %v13087_v23 = vunpack.c.l.bf16 %v13086_v31  ;;  %v13104_v35 = vld [vmem:[#allocation74_spill] sm:$0xff]  ;;  %v13106_v31 = vld [vmem:[#allocation75_spill] sm:$0xff] }
 0x488   : > { %v744_v6 = vadd.f32 %v13083_v57, %v13081_v2  ;;  %v4611_v42 = vmul.f32 0.015625, %v4515_v55  ;;  %v5159_v50 = vsel %vm5125_vm1, %v5055_v30, %v5158_v28  ;;  %v13089_v27 = vunpack.c.l.bf16 %v13088_v47  ;;  %v13102_v28 = vld [vmem:[#allocation73_spill] sm:$0xff] }
 0x489   : > { %v828_v25 = vadd.f32 %v13087_v23, %v13085_v11  ;;  %v661_v4 = vrot.slane %v660_v59, 4  ;;  %v13091_v14 = vunpack.c.l.bf16 %v13090_v36  ;;  %v4623_v24 = vmul.f32 0.015625, %v4527_v19 }
 0x48a   : > { %v5160_v58 = vsel %vm5127_vm2, %v5067_v16, %v5159_v50  ;;  %v745_v10 = vrot.slane %v744_v6, 4  ;;  %v4707_v5 = vpack.c.bf16 %v4611_v42, %v4611_v42  ;;  %v13093_v37 = vunpack.c.l.bf16 %v13092_v33 }
 0x48b   : > { %v912_v44 = vadd.f32 %v13091_v14, %v13089_v27  ;;  %v829_v53 = vrot.slane %v828_v25, 4  ;;  %v5161_v40 = vsel %vm5129_vm3, %v5079_v62, %v5160_v58  ;;  %v662_v43 = vadd.f32 %v661_v4, %v660_v59  ;;  %v13100_v59 = vld [vmem:[#allocation72_spill] sm:$0xff]  ;;  %v13110_v58 = vld [vmem:[#allocation77_spill] sm:$0xff] }
 0x48c   : > { %v4719_v20 = vpack.c.bf16 %v4623_v24, %v4623_v24  ;;  %v5162_v9 = vsel %vm5131_vm4, %v5091_v17, %v5161_v40  ;;  %v746_v61 = vadd.f32 %v745_v10, %v744_v6  ;;  %v5103_v39 = vunpack.c.l.b16 %v4707_v5 }
 0x48d   : > { %v913_v49 = vrot.slane %v912_v44, 4  ;;  %v830_v26 = vadd.f32 %v829_v53, %v828_v25  ;;  %v663_v45 = vrot.slane %v662_v43, 2  ;;  %v13095_v1 = vunpack.c.l.bf16 %v13094_v21 }
 0x48e   : > { %v5115_v3 = vunpack.c.l.b16 %v4719_v20  ;;  %v747_v51 = vrot.slane %v746_v61, 2  ;;  %v13097_v56 = vunpack.c.l.bf16 %v13096_v63  ;;  %v13099_v8 = vunpack.c.l.bf16 %v13098_v41  ;;  %v13114_v20 = vld [vmem:[#allocation79_spill] sm:$0xff] }
 0x48f   : > { %v914_v46 = vadd.f32 %v913_v49, %v912_v44  ;;  %v996_v13 = vadd.f32 %v13095_v1, %v13093_v37  ;;  %v831_v7 = vrot.slane %v830_v26, 2  ;;  %v5163_v22 = vsel %vm5133_vm5, %v5103_v39, %v5162_v9  ;;  %v13108_v44 = vld [vmem:[#allocation76_spill] sm:$0xff] }
 0x490   : > { %v1080_v12 = vadd.f32 %v13099_v8, %v13097_v56  ;;  %v664_v52 = vadd.f32 %v663_v45, %v662_v43  ;;  %v5164_v32 = vsel %vm5135_vm6, %v5115_v3, %v5163_v22  ;;  %v748_v34 = vadd.f32 %v747_v51, %v746_v61  ;;  %v13112_v43 = vld [vmem:[#allocation78_spill] sm:$0xff]  ;;  %v13118_v45 = vld [vmem:[#allocation81_spill] sm:$0xff]  ;;  %v13122_v51 = vld [vmem:[#allocation83_spill] sm:$0xff] }
 0x491   : > { %v915_v15 = vrot.slane %v914_v46, 2  ;;  %v997_v48 = vrot.slane %v996_v13, 4  ;;  %v832_v30 = vadd.f32 %v831_v7, %v830_v26  ;;  %v5218_v55 = vpack.c.b16 %v5164_v32, %v5164_v32  ;;  %v13116_v26 = vld [vmem:[#allocation80_spill] sm:$0xff] }
 0x492   : > { %v1081_v16 = vrot.slane %v1080_v12, 4  ;;  %v665_v62 = vrot.slane %v664_v52, 1  ;;  %v749_v29 = vrot.slane %v748_v34, 1  ;;  %v13101_v19 = vunpack.c.l.bf16 %v13100_v59 }
 0x493   : > { %v916_v17 = vadd.f32 %v915_v15, %v914_v46  ;;  %v998_v54 = vadd.f32 %v997_v48, %v996_v13  ;;  %v833_v38 = vrot.slane %v832_v30, 1  ;;  %v13103_v60 = vunpack.c.l.bf16 %v13102_v28  ;;  %6313 = vmatmul.mubr.bf16.vlgmr.msra.gmra.mrb[0].mxu1 %v5218_v55  ;;  %v13120_v13 = vld [vmem:[#allocation82_spill] sm:$0xff] }
 0x494   : > { %v1082_v18 = vadd.f32 %v1081_v16, %v1080_v12  ;;  %v11598_v0 = vadd.f32 %v665_v62, %v664_v52  ;;  %v13105_v11 = vunpack.c.l.bf16 %v13104_v35  ;;  %v13107_v23 = vunpack.c.l.bf16 %v13106_v31 }
 0x495   : > { %v1164_v2 = vadd.f32 %v13103_v60, %v13101_v19  ;;  %v917_v57 = vrot.slane %v916_v17, 1  ;;  %v999_v6 = vrot.slane %v998_v54, 2  ;;  %v11604_v42 = vadd.f32 %v749_v29, %v748_v34 }
 0x496   : > { %v1248_v25 = vadd.f32 %v13107_v23, %v13105_v11  ;;  %v11606_v50 = vadd.f32 %v833_v38, %v832_v30  ;;  %v1083_v4 = vrot.slane %v1082_v18, 2  ;;  %v13109_v24 = vunpack.c.l.bf16 %v13108_v44  ;;  %v13126_v38 = vld [vmem:[#allocation85_spill] sm:$0xff] }
 0x497   : > { %v1165_v47 = vrot.slane %v1164_v2, 4  ;;  %v11608_v27 = vadd.f32 %v917_v57, %v916_v17  ;;  %v1000_v36 = vadd.f32 %v999_v6, %v998_v54  ;;  %v13111_v10 = vunpack.c.l.bf16 %v13110_v58  ;;  %v13124_v54 = vld [vmem:[#allocation84_spill] sm:$0xff]  ;;  %v13130_v6 = vld [vmem:[#allocation87_spill] sm:$0xff] }
 0x498   : > { %v1249_v14 = vrot.slane %v1248_v25, 4  ;;  %v1084_v5 = vadd.f32 %v1083_v4, %v1082_v18  ;;  %v13113_v49 = vunpack.c.l.bf16 %v13112_v43  ;;  %v13115_v9 = vunpack.c.l.bf16 %v13114_v20 }
 0x499   : > { %v1719_v53 = vadd.f32 %v13111_v10, %v13109_v24  ;;  %v1166_v40 = vadd.f32 %v1165_v47, %v1164_v2  ;;  %v13117_v39 = vunpack.c.l.bf16 %v13116_v26  ;;  %v13119_v46 = vunpack.c.l.bf16 %v13118_v45  ;;  %v13128_v2 = vld [vmem:[#allocation86_spill] sm:$0xff] }
 0x49a   : > { %v1803_v61 = vadd.f32 %v13115_v9, %v13113_v49  ;;  %v1001_v37 = vrot.slane %v1000_v36, 1  ;;  %v1250_v21 = vadd.f32 %v1249_v14, %v1248_v25  ;;  %v13121_v3 = vunpack.c.l.bf16 %v13120_v13  ;;  %v13132_v49 = vld [vmem:[#allocation88_spill] sm:$0xff]  ;;  %v13134_v9 = vld [vmem:[#allocation89_spill] sm:$0xff] }
 0x49b   : > { %v1887_v33 = vadd.f32 %v13119_v46, %v13117_v39  ;;  %v1720_v1 = vrot.slane %v1719_v53, 4  ;;  %v13123_v7 = vunpack.c.l.bf16 %v13122_v51  ;;  %v1085_v56 = vrot.slane %v1084_v5, 1 }
 0x49c   : > { %v1167_v41 = vrot.slane %v1166_v40, 2  ;;  %v1804_v8 = vrot.slane %v1803_v61, 4  ;;  %v11626_v22 = vadd.f32 %v1001_v37, %v1000_v36  ;;  %v1251_v52 = vrot.slane %v1250_v21, 2 }
 0x49d   : > { %v1971_v63 = vadd.f32 %v13123_v7, %v13121_v3  ;;  %v1888_v12 = vrot.slane %v1887_v33, 4  ;;  %v1721_v15 = vadd.f32 %v1720_v1, %v1719_v53  ;;  %v11628_v32 = vadd.f32 %v1085_v56, %v1084_v5 }
 0x49e   : > { %v1168_v34 = vadd.f32 %v1167_v41, %v1166_v40  ;;  %v1805_v30 = vadd.f32 %v1804_v8, %v1803_v61  ;;  %v1252_v55 = vadd.f32 %v1251_v52, %v1250_v21  ;;  %v13125_v29 = vunpack.c.l.bf16 %v13124_v54  ;;  %v13138_v21 = vld [vmem:[#allocation91_spill] sm:$0xff]  ;;  %v13142_v54 = vld [vmem:[#allocation93_spill] sm:$0xff] }
 0x49f   : > { %v1972_v48 = vrot.slane %v1971_v63, 4  ;;  %v1889_v16 = vadd.f32 %v1888_v12, %v1887_v33  ;;  %v1722_v62 = vrot.slane %v1721_v15, 2  ;;  %v13127_v18 = vunpack.c.l.bf16 %v13126_v38  ;;  %v13136_v33 = vld [vmem:[#allocation90_spill] sm:$0xff] }
 0x4a0   : > { %v1169_v19 = vrot.slane %v1168_v34, 1  ;;  %v1806_v28 = vrot.slane %v1805_v30, 2  ;;  %v13129_v57 = vunpack.c.l.bf16 %v13128_v2  ;;  %v13131_v35 = vunpack.c.l.bf16 %v13130_v6  ;;  %v13148_v2 = vld [vmem:[#allocation96_spill] sm:$0xff] }
 0x4a1   : > { %v1973_v17 = vadd.f32 %v1972_v48, %v1971_v63  ;;  %v2055_v59 = vadd.f32 %v13127_v18, %v13125_v29  ;;  %v1890_v60 = vrot.slane %v1889_v16, 2  ;;  %v1253_v31 = vrot.slane %v1252_v55, 1 }
 0x4a2   : > { %v2139_v11 = vadd.f32 %v13131_v35, %v13129_v57  ;;  %v1723_v23 = vadd.f32 %v1722_v62, %v1721_v15  ;;  %v11638_v47 = vadd.f32 %v1169_v19, %v1168_v34  ;;  %v1807_v36 = vadd.f32 %v1806_v28, %v1805_v30  ;;  %v13140_v62 = vld [vmem:[#allocation92_spill] sm:$0xff]  ;;  %v13146_v28 = vld [vmem:[#allocation95_spill] sm:$0xff]  ;;  %v13150_v57 = vld [vmem:[#allocation97_spill] sm:$0xff] }
 0x4a3   : > { %v1974_v25 = vrot.slane %v1973_v17, 2  ;;  %v2056_v4 = vrot.slane %v2055_v59, 4  ;;  %v1891_v14 = vadd.f32 %v1890_v60, %v1889_v16  ;;  %v11640_v24 = vadd.f32 %v1253_v31, %v1252_v55 }
 0x4a4   : > { %v2140_v44 = vrot.slane %v2139_v11, 4  ;;  %v1724_v58 = vrot.slane %v1723_v23, 1  ;;  %v1808_v5 = vrot.slane %v1807_v36, 1  ;;  %v13133_v20 = vunpack.c.l.bf16 %v13132_v49 }
 0x4a5   : > { %v1975_v10 = vadd.f32 %v1974_v25, %v1973_v17  ;;  %v2057_v53 = vadd.f32 %v2056_v4, %v2055_v59  ;;  %v1892_v40 = vrot.slane %v1891_v14, 1  ;;  %v13135_v61 = vunpack.c.l.bf16 %v13134_v9  ;;  %v13144_v59 = vld [vmem:[#allocation94_spill] sm:$0xff]  ;;  %v13154_v4 = vld [vmem:[#allocation99_spill] sm:$0xff] }
 0x4a6   : > { %v2141_v43 = vadd.f32 %v2140_v44, %v2139_v11  ;;  %v1725_v39 = vadd.f32 %v1724_v58, %v1723_v23  ;;  %v13137_v37 = vunpack.c.l.bf16 %v13136_v33  ;;  %v13139_v1 = vunpack.c.l.bf16 %v13138_v21  ;;  %v13152_v23 = vld [vmem:[#allocation98_spill] sm:$0xff]  ;;  %v13156_v33 = vld [vmem:[#allocation100_spill] sm:$0xff]  ;;  %v13158_v21 = vld [vmem:[#allocation101_spill] sm:$0xff] }
 0x4a7   : > { %v2223_v26 = vadd.f32 %v13135_v61, %v13133_v20  ;;  %v1976_v45 = vrot.slane %v1975_v10, 1  ;;  %v2058_v46 = vrot.slane %v2057_v53, 2  ;;  %v1809_v3 = vadd.f32 %v1808_v5, %v1807_v36 }
 0x4a8   : > { %v2307_v13 = vadd.f32 %v13139_v1, %v13137_v37  ;;  %v1893_v51 = vadd.f32 %v1892_v40, %v1891_v14  ;;  %v2142_v7 = vrot.slane %v2141_v43, 2  ;;  %v11651_v12 = vadd.f32 %v1725_v39, %v11598_v0 }
 0x4a9   : > { %v2224_v63 = vrot.slane %v2223_v26, 4  ;;  %v1977_v56 = vadd.f32 %v1976_v45, %v1975_v10  ;;  %v2059_v41 = vadd.f32 %v2058_v46, %v2057_v53  ;;  %v11654_v48 = vadd.f32 %v1809_v3, %v11604_v42 }
 0x4aa   : > { %v2308_v8 = vrot.slane %v2307_v13, 4  ;;  %v2143_v52 = vadd.f32 %v2142_v7, %v2141_v43  ;;  %v11657_v34 = vadd.f32 %v1893_v51, %v11606_v50  ;;  %v13141_v17 = vunpack.c.l.bf16 %v13140_v62  ;;  %v13160_v7 = vld [vmem:[#allocation102_spill] sm:$0xff] }
 0x4ab   : > { %v2225_v15 = vadd.f32 %v2224_v63, %v2223_v26  ;;  %v2060_v30 = vrot.slane %v2059_v41, 1  ;;  %v11660_v55 = vadd.f32 %v1977_v56, %v11608_v27  ;;  %v13143_v29 = vunpack.c.l.bf16 %v13142_v54  ;;  %v13162_v56 = vld [vmem:[#allocation103_spill] sm:$0xff] }
 0x4ac   : > { %v2309_v16 = vadd.f32 %v2308_v8, %v2307_v13  ;;  %v2144_v0 = vrot.slane %v2143_v52, 1  ;;  %v13145_v19 = vunpack.c.l.bf16 %v13144_v59  ;;  %v13147_v42 = vunpack.c.l.bf16 %v13146_v28 }
 0x4ad   : > { %v2778_v38 = vadd.f32 %v13143_v29, %v13141_v17  ;;  %v2226_v18 = vrot.slane %v2225_v15, 2  ;;  %v13149_v50 = vunpack.c.l.bf16 %v13148_v2  ;;  %v13151_v6 = vunpack.c.l.bf16 %v13150_v57  ;;  %v13166_v2 = vld [vmem:[#allocation105_spill] sm:$0xff] }
 0x4ae   : > { %v2862_v60 = vadd.f32 %v13147_v42, %v13145_v19  ;;  %v2061_v11 = vadd.f32 %v2060_v30, %v2059_v41  ;;  %v2310_v27 = vrot.slane %v2309_v16, 2  ;;  %v13153_v25 = vunpack.c.l.bf16 %v13152_v23  ;;  %v13164_v42 = vld [vmem:[#allocation104_spill] sm:$0xff] }
 0x4af   : > { %v2946_v35 = vadd.f32 %v13151_v6, %v13149_v50  ;;  %v2779_v31 = vrot.slane %v2778_v38, 4  ;;  %v13155_v36 = vunpack.c.l.bf16 %v13154_v4  ;;  %v2145_v44 = vadd.f32 %v2144_v0, %v2143_v52 }
 0x4b0   : > { %v2227_v58 = vadd.f32 %v2226_v18, %v2225_v15  ;;  %v2863_v10 = vrot.slane %v2862_v60, 4  ;;  %v2311_v5 = vadd.f32 %v2310_v27, %v2309_v16  ;;  %v11679_v40 = vadd.f32 %v2061_v11, %v11626_v22  ;;  %v13168_v11 = vld [vmem:[#allocation106_spill] sm:$0xff] }
 0x4b1   : > { %v3030_v14 = vadd.f32 %v13155_v36, %v13153_v25  ;;  %v2947_v53 = vrot.slane %v2946_v35, 4  ;;  %v2780_v43 = vadd.f32 %v2779_v31, %v2778_v38  ;;  %v11682_v9 = vadd.f32 %v2145_v44, %v11628_v32  ;;  %v13170_v31 = vld [vmem:[#allocation107_spill] sm:$0xff] }
 0x4b2   : > { %v2228_v20 = vrot.slane %v2227_v58, 1  ;;  %v2864_v61 = vadd.f32 %v2863_v10, %v2862_v60  ;;  %v2312_v39 = vrot.slane %v2311_v5, 1  ;;  %v13157_v37 = vunpack.c.l.bf16 %v13156_v33  ;;  %v13174_v33 = vld [vmem:[#allocation109_spill] sm:$0xff] }
 0x4b3   : > { %v3031_v49 = vrot.slane %v3030_v14, 4  ;;  %v2948_v26 = vadd.f32 %v2947_v53, %v2946_v35  ;;  %v2781_v45 = vrot.slane %v2780_v43, 2  ;;  %v13159_v1 = vunpack.c.l.bf16 %v13158_v21 }
 0x4b4   : > { %v2229_v3 = vadd.f32 %v2228_v20, %v2227_v58  ;;  %v2865_v51 = vrot.slane %v2864_v61, 2  ;;  %v13161_v63 = vunpack.c.l.bf16 %v13160_v7  ;;  %v13163_v41 = vunpack.c.l.bf16 %v13162_v56  ;;  %v13180_v7 = vld [vmem:[#allocation112_spill] sm:$0xff] }
 0x4b5   : > { %v3032_v46 = vadd.f32 %v3031_v49, %v3030_v14  ;;  %v3114_v13 = vadd.f32 %v13159_v1, %v13157_v37  ;;  %v2949_v22 = vrot.slane %v2948_v26, 2  ;;  %v2313_v32 = vadd.f32 %v2312_v39, %v2311_v5 }
 0x4b6   : > { %v3198_v8 = vadd.f32 %v13163_v41, %v13161_v63  ;;  %v2782_v52 = vadd.f32 %v2781_v45, %v2780_v43  ;;  %v11693_v16 = vadd.f32 %v2229_v3, %v11638_v47  ;;  %v2866_v62 = vadd.f32 %v2865_v51, %v2864_v61  ;;  %v13172_v45 = vld [vmem:[#allocation108_spill] sm:$0xff]  ;;  %v13178_v51 = vld [vmem:[#allocation111_spill] sm:$0xff]  ;;  %v13182_v63 = vld [vmem:[#allocation113_spill] sm:$0xff] }
 0x4b7   : > { %v3033_v15 = vrot.slane %v3032_v46, 2  ;;  %v3115_v30 = vrot.slane %v3114_v13, 4  ;;  %v2950_v17 = vadd.f32 %v2949_v22, %v2948_v26  ;;  %v11696_v29 = vadd.f32 %v2313_v32, %v11640_v24 }
 0x4b8   : > { %v3199_v54 = vrot.slane %v3198_v8, 4  ;;  %v2783_v38 = vrot.slane %v2782_v52, 1  ;;  %v2867_v59 = vrot.slane %v2866_v62, 1  ;;  %v13165_v60 = vunpack.c.l.bf16 %v13164_v42 }
 0x4b9   : > { %v3034_v0 = vadd.f32 %v3033_v15, %v3032_v46  ;;  %v3116_v18 = vadd.f32 %v3115_v30, %v3114_v13  ;;  %v2951_v19 = vrot.slane %v2950_v17, 1  ;;  %v13167_v50 = vunpack.c.l.bf16 %v13166_v2  ;;  %v13176_v13 = vld [vmem:[#allocation110_spill] sm:$0xff]  ;;  %v13186_v30 = vld [vmem:[#allocation115_spill] sm:$0xff] }
 0x4ba   : > { %v3200_v28 = vadd.f32 %v3199_v54, %v3198_v8  ;;  %v2784_v6 = vadd.f32 %v2783_v38, %v2782_v52  ;;  %v13169_v27 = vunpack.c.l.bf16 %v13168_v11  ;;  %v13171_v23 = vunpack.c.l.bf16 %v13170_v31  ;;  %v13184_v52 = vld [vmem:[#allocation114_spill] sm:$0xff]  ;;  %v13188_v11 = vld [vmem:[#allocation116_spill] sm:$0xff]  ;;  %v13190_v31 = vld [vmem:[#allocation117_spill] sm:$0xff] }
 0x4bb   : > { %v3282_v57 = vadd.f32 %v13167_v50, %v13165_v60  ;;  %v3035_v47 = vrot.slane %v3034_v0, 1  ;;  %v3117_v35 = vrot.slane %v3116_v18, 2  ;;  %v2868_v25 = vadd.f32 %v2867_v59, %v2866_v62 }
 0x4bc   : > { %v3366_v24 = vadd.f32 %v13171_v23, %v13169_v27  ;;  %v2952_v4 = vadd.f32 %v2951_v19, %v2950_v17  ;;  %v3201_v36 = vrot.slane %v3200_v28, 2  ;;  %v11707_v53 = vadd.f32 %v2784_v6, %v11651_v12 }
 0x4bd   : > { %v3283_v14 = vrot.slane %v3282_v57, 4  ;;  %v3036_v44 = vadd.f32 %v3035_v47, %v3034_v0  ;;  %v3118_v58 = vadd.f32 %v3117_v35, %v3116_v18  ;;  %v11710_v49 = vadd.f32 %v2868_v25, %v11654_v48 }
 0x4be   : > { %v3367_v10 = vrot.slane %v3366_v24, 4  ;;  %v3202_v5 = vadd.f32 %v3201_v36, %v3200_v28  ;;  %v11713_v20 = vadd.f32 %v2952_v4, %v11657_v34  ;;  %v13173_v46 = vunpack.c.l.bf16 %v13172_v45  ;;  %v13192_v36 = vld [vmem:[#allocation118_spill] sm:$0xff] }
 0x4bf   : > { %v3284_v43 = vadd.f32 %v3283_v14, %v3282_v57  ;;  %v3119_v61 = vrot.slane %v3118_v58, 1  ;;  %v11716_v39 = vadd.f32 %v3036_v44, %v11660_v55  ;;  %v13175_v37 = vunpack.c.l.bf16 %v13174_v33  ;;  %v13194_v44 = vld [vmem:[#allocation119_spill] sm:$0xff] }
 0x4c0   : > { %v3368_v26 = vadd.f32 %v3367_v10, %v3366_v24  ;;  %v3203_v12 = vrot.slane %v3202_v5, 1  ;;  %v13177_v3 = vunpack.c.l.bf16 %v13176_v13  ;;  %v13179_v48 = vunpack.c.l.bf16 %v13178_v51 }
 0x4c1   : > { %v3837_v21 = vadd.f32 %v13175_v37, %v13173_v46  ;;  %v3285_v1 = vrot.slane %v3284_v43, 2  ;;  %v13181_v34 = vunpack.c.l.bf16 %v13180_v7  ;;  %v13183_v56 = vunpack.c.l.bf16 %v13182_v63  ;;  %v13198_v7 = vld [vmem:[#allocation121_spill] sm:$0xff] }
 0x4c2   : > { %v3921_v22 = vadd.f32 %v13179_v48, %v13177_v3  ;;  %v3120_v8 = vadd.f32 %v3119_v61, %v3118_v58  ;;  %v3369_v55 = vrot.slane %v3368_v26, 2  ;;  %v13185_v15 = vunpack.c.l.bf16 %v13184_v52  ;;  %v13196_v48 = vld [vmem:[#allocation120_spill] sm:$0xff] }
 0x4c3   : > { %v4005_v41 = vadd.f32 %v13183_v56, %v13181_v34  ;;  %v3838_v32 = vrot.slane %v3837_v21, 4  ;;  %v13187_v62 = vunpack.c.l.bf16 %v13186_v30  ;;  %v3204_v54 = vadd.f32 %v3203_v12, %v3202_v5 }
 0x4c4   : > { %v3286_v38 = vadd.f32 %v3285_v1, %v3284_v43  ;;  %v3922_v0 = vrot.slane %v3921_v22, 4  ;;  %v3370_v59 = vadd.f32 %v3369_v55, %v3368_v26  ;;  %v11735_v19 = vadd.f32 %v3120_v8, %v11679_v40  ;;  %v13200_v8 = vld [vmem:[#allocation122_spill] sm:$0xff] }
 0x4c5   : > { %v4089_v17 = vadd.f32 %v13187_v62, %v13185_v15  ;;  %v4006_v18 = vrot.slane %v4005_v41, 4  ;;  %v3839_v28 = vadd.f32 %v3838_v32, %v3837_v21  ;;  %v11738_v2 = vadd.f32 %v3204_v54, %v11682_v9  ;;  %v13202_v32 = vld [vmem:[#allocation123_spill] sm:$0xff] }
 0x4c6   : > { %v3287_v60 = vrot.slane %v3286_v38, 1  ;;  %v3923_v50 = vadd.f32 %v3922_v0, %v3921_v22  ;;  %v3371_v6 = vrot.slane %v3370_v59, 1  ;;  %v13189_v27 = vunpack.c.l.bf16 %v13188_v11 }
 0x4c7   : > { %v4090_v42 = vrot.slane %v4089_v17, 4  ;;  %v4007_v57 = vadd.f32 %v4006_v18, %v4005_v41  ;;  %v3840_v47 = vrot.slane %v3839_v28, 2  ;;  %v13191_v23 = vunpack.c.l.bf16 %v13190_v31 }
 0x4c8   : > { %v3288_v25 = vadd.f32 %v3287_v60, %v3286_v38  ;;  %v3924_v4 = vrot.slane %v3923_v50, 2  ;;  %v13193_v14 = vunpack.c.l.bf16 %v13192_v36  ;;  %v13195_v58 = vunpack.c.l.bf16 %v13194_v44  ;;  %v6463_v44 = vld [vmem:[#allocation8 + $0x88] sm:$0xff] }
 0x4c9   : > { %v4091_v35 = vadd.f32 %v4090_v42, %v4089_v17  ;;  %v4173_v24 = vadd.f32 %v13191_v23, %v13189_v27  ;;  %v4008_v40 = vrot.slane %v4007_v57, 2  ;;  %v3372_v9 = vadd.f32 %v3371_v6, %v3370_v59 }
 0x4ca   : > { %v4257_v10 = vadd.f32 %v13195_v58, %v13193_v14  ;;  %v3841_v5 = vadd.f32 %v3840_v47, %v3839_v28  ;;  %v11749_v26 = vadd.f32 %v3288_v25, %v11693_v16  ;;  %v3925_v45 = vadd.f32 %v3924_v4, %v3923_v50 }
 0x4cb   : > { %v4092_v43 = vrot.slane %v4091_v35, 2  ;;  %v4174_v61 = vrot.slane %v4173_v24, 4  ;;  %v4009_v46 = vadd.f32 %v4008_v40, %v4007_v57  ;;  %v11752_v37 = vadd.f32 %v3372_v9, %v11696_v29  ;;  %v6446_v9 = vld [vmem:[#allocation8] sm:$0xff] }
 0x4cc   : > { %v4258_v33 = vrot.slane %v4257_v10, 4  ;;  %v3842_v21 = vrot.slane %v3841_v5, 1  ;;  %v3926_v13 = vrot.slane %v3925_v45, 1  ;;  %v13197_v22 = vunpack.c.l.bf16 %v13196_v48  ;;  %v6449_v48 = vld [vmem:[#allocation8 + $0x18] sm:$0xff] }
 0x4cd   : > { %v4093_v12 = vadd.f32 %v4092_v43, %v4091_v35  ;;  %v4175_v1 = vadd.f32 %v4174_v61, %v4173_v24  ;;  %v4010_v3 = vrot.slane %v4009_v46, 1  ;;  %v13199_v34 = vunpack.c.l.bf16 %v13198_v7 }
 0x4ce   : > { %v4259_v51 = vadd.f32 %v4258_v33, %v4257_v10  ;;  %v3843_v56 = vadd.f32 %v3842_v21, %v3841_v5  ;;  %v13201_v55 = vunpack.c.l.bf16 %v13200_v8  ;;  %v13203_v52 = vunpack.c.l.bf16 %v13202_v32  ;;  %v6447_v5 = vld [vmem:[#allocation8 + $0x8] sm:$0xff]  ;;  %v6464_v33 = vld [vmem:[#allocation8 + $0x90] sm:$0xff]  ;;  %v6465_v21 = vld [vmem:[#allocation8 + $0x98] sm:$0xff] }
 0x4cf   : > { %v4341_v63 = vadd.f32 %v13199_v34, %v13197_v22  ;;  %v4094_v16 = vrot.slane %v4093_v12, 1  ;;  %v4176_v41 = vrot.slane %v4175_v1, 2  ;;  %v3927_v15 = vadd.f32 %v3926_v13, %v3925_v45 }
 0x4d0   : > { %v4425_v29 = vadd.f32 %v13203_v52, %v13201_v55  ;;  %v4011_v30 = vadd.f32 %v4010_v3, %v4009_v46  ;;  %v4260_v62 = vrot.slane %v4259_v51, 2  ;;  %v4449_v18 = vadd.f32 %v3843_v56, %v11707_v53  ;;  %v6467_v56 = vld [vmem:[#allocation8 + $0xa8] sm:$0xff] }
 0x4d1   : > { %v4342_v17 = vrot.slane %v4341_v63, 4  ;;  %v4095_v54 = vadd.f32 %v4094_v16, %v4093_v12  ;;  %v4177_v38 = vadd.f32 %v4176_v41, %v4175_v1  ;;  %v4461_v42 = vadd.f32 %v3927_v15, %v11710_v49  ;;  %v6462_v49 = vld [vmem:[#allocation8 + $0x80] sm:$0xff] }
 0x4d2   : > { %v4426_v0 = vrot.slane %v4425_v29, 4  ;;  %v4261_v59 = vadd.f32 %v4260_v62, %v4259_v51  ;;  %v4473_v60 = vadd.f32 %v4011_v30, %v11713_v20  ;;  %v4545_v47 = vmul.f32 0.015625, %v4449_v18  ;;  %v6448_v51 = vld [vmem:[#allocation8 + $0x10] sm:$0xff] }
 0x4d3   : > { %v4343_v28 = vadd.f32 %v4342_v17, %v4341_v63  ;;  %v4178_v50 = vrot.slane %v4177_v38, 1  ;;  %v4485_v6 = vadd.f32 %v4095_v54, %v11716_v39  ;;  %v4557_v27 = vmul.f32 0.015625, %v4461_v42  ;;  %v6466_v63 = vld [vmem:[#allocation8 + $0xa0] sm:$0xff]  ;;  %v6451_v54 = vld [vmem:[#allocation8 + $0x28] sm:$0xff]  ;;  %v6468_v18 = vld [vmem:[#allocation8 + $0xb0] sm:$0xff] }
 0x4d4   : > { %v4427_v57 = vadd.f32 %v4426_v0, %v4425_v29  ;;  %v4262_v35 = vrot.slane %v4261_v59, 1  ;;  %v4569_v31 = vmul.f32 0.015625, %v4473_v60  ;;  %v4641_v4 = vpack.c.bf16 %v4545_v47, %v4545_v47  ;;  %v6450_v17 = vld [vmem:[#allocation8 + $0x20] sm:$0xff]  ;;  %v6453_v47 = vld [vmem:[#allocation8 + $0x38] sm:$0xff] }
 0x4d5   : > { %v4344_v11 = vrot.slane %v4343_v28, 2  ;;  %v4179_v23 = vadd.f32 %v4178_v50, %v4177_v38  ;;  %v4581_v25 = vmul.f32 0.015625, %v4485_v6  ;;  %v4653_v36 = vpack.c.bf16 %v4557_v27, %v4557_v27  ;;  %v6452_v6 = vld [vmem:[#allocation8 + $0x30] sm:$0xff]  ;;  %v6471_v27 = vld [vmem:[#allocation8 + $0xc8] sm:$0xff] }
 0x4d6   : > { %v4428_v24 = vrot.slane %v4427_v57, 2  ;;  %v4263_v53 = vadd.f32 %v4262_v35, %v4261_v59  ;;  %v4665_v14 = vpack.c.bf16 %v4569_v31, %v4569_v31  ;;  %v5037_v39 = vunpack.c.l.b16 %v4641_v4  ;;  %v6469_v59 = vld [vmem:[#allocation8 + $0xb8] sm:$0xff] }
 0x4d7   : > { %v4345_v40 = vadd.f32 %v4344_v11, %v4343_v28  ;;  %v4497_v58 = vadd.f32 %v4179_v23, %v11735_v19  ;;  %v4677_v10 = vpack.c.bf16 %v4581_v25, %v4581_v25  ;;  %v5049_v45 = vunpack.c.l.b16 %v4653_v36  ;;  %v6470_v11 = vld [vmem:[#allocation8 + $0xc0] sm:$0xff] }
 0x4d8   : > { %v4429_v20 = vadd.f32 %v4428_v24, %v4427_v57  ;;  %v4509_v61 = vadd.f32 %v4263_v53, %v11738_v2  ;;  %v5061_v46 = vunpack.c.l.b16 %v4665_v14  ;;  %v7217_v3 = vpack.c.bf16 %v6463_v44, %v6462_v49  ;;  %v6454_v53 = vld [vmem:[#allocation8 + $0x40] sm:$0xff]  ;;  %v6472_v14 = vld [vmem:[#allocation8 + $0xd0] sm:$0xff]  ;;  %v6473_v49 = vld [vmem:[#allocation8 + $0xd8] sm:$0xff] }
 0x4d9   : > { %v4346_v43 = vrot.slane %v4345_v40, 1  ;;  %v4593_v1 = vmul.f32 0.015625, %v4497_v58  ;;  %v5073_v13 = vunpack.c.l.b16 %v4677_v10  ;;  %v5200_v19 = vsel %vm5123_vm0, %v5049_v45, %v5037_v39  ;;  %v6456_v58 = vld [vmem:[#allocation8 + $0x50] sm:$0xff]  ;;  %v6457_v10 = vld [vmem:[#allocation8 + $0x58] sm:$0xff]  ;;  %v6459_v45 = vld [vmem:[#allocation8 + $0x68] sm:$0xff] }
 0x4da   : > { %v4430_v12 = vrot.slane %v4429_v20, 1  ;;  %v4605_v7 = vmul.f32 0.015625, %v4509_v61  ;;  %v7219_v34 = vpack.c.bf16 %v6447_v5, %v6446_v9  ;;  %v5201_v2 = vsel %vm5125_vm1, %v5061_v46, %v5200_v19  ;;  %7218 = vmatprep.subr.bf16.mxu1 %v7217_v3  ;;  %v6474_v9 = vld [vmem:[#allocation8 + $0xe0] sm:$0xff]  ;;  %v6475_v5 = vld [vmem:[#allocation8 + $0xe8] sm:$0xff] }
 0x4db   : > { %v4347_v22 = vadd.f32 %v4346_v43, %v4345_v40  ;;  %v4689_v41 = vpack.c.bf16 %v4593_v1, %v4593_v1  ;;  %v7221_v8 = vpack.c.bf16 %v6465_v21, %v6464_v33  ;;  %v5202_v52 = vsel %vm5127_vm2, %v5073_v13, %v5201_v2  ;;  %v6455_v40 = vld [vmem:[#allocation8 + $0x48] sm:$0xff]  ;;  %v6458_v61 = vld [vmem:[#allocation8 + $0x60] sm:$0xff]  ;;  %v6476_v33 = vld [vmem:[#allocation8 + $0xf0] sm:$0xff] }
 0x4dc   : > { %v4431_v16 = vadd.f32 %v4430_v12, %v4429_v20  ;;  %v4701_v32 = vpack.c.bf16 %v4605_v7, %v4605_v7  ;;  %7220 = vmatpush3.bf16.msra.mxu1 %v7219_v34  ;;  %v7223_v29 = vpack.c.bf16 %v6449_v48, %v6448_v51  ;;  %v7225_v62 = vpack.c.bf16 %v6467_v56, %v6466_v63  ;;  %v6477_v21 = vld [vmem:[#allocation8 + $0xf8] sm:$0xff]  ;;  %v6460_v1 = vld [vmem:[#allocation8 + $0x70] sm:$0xff] }
 0x4dd   : > { %v4521_v55 = vadd.f32 %v4347_v22, %v11749_v26  ;;  %v5085_v30 = vunpack.c.l.b16 %v4689_v41  ;;  %7222 = vmatprep.subr.bf16.mxu1 %v7221_v8  ;;  %v7227_v50 = vpack.c.bf16 %v6451_v54, %v6450_v17  ;;  %v7231_v24 = vpack.c.bf16 %v6453_v47, %v6452_v6  ;;  %v6461_v13 = vld [vmem:[#allocation8 + $0x78] sm:$0xff] }
 0x4de   : > { %v4533_v15 = vadd.f32 %v4431_v16, %v11752_v37  ;;  %v5097_v0 = vunpack.c.l.b16 %v4701_v32  ;;  %v7229_v37 = vpack.c.bf16 %v6469_v59, %v6468_v18  ;;  %v7233_v4 = vpack.c.bf16 %v6471_v27, %v6470_v11  ;;  %v4919_v56 = vld [vmem:[#allocation7] sm:$0x3] }
 0x4df   : > { %v4617_v38 = vmul.f32 0.015625, %v4521_v55  ;;  %v5203_v42 = vsel %vm5129_vm3, %v5085_v30, %v5202_v52  ;;  %v7235_v44 = vpack.c.bf16 %v6455_v40, %v6454_v53  ;;  %v7237_v20 = vpack.c.bf16 %v6473_v49, %v6472_v14 }
 0x4e0   : > { %v4629_v28 = vmul.f32 0.015625, %v4533_v15  ;;  %v5204_v60 = vsel %vm5131_vm4, %v5097_v0, %v5203_v42  ;;  %7224 = vmatpush3.bf16.msra.mxu1 %v7223_v29  ;;  %v7239_v39 = vpack.c.bf16 %v6457_v10, %v6456_v58  ;;  %v7241_v43 = vpack.c.bf16 %v6475_v5, %v6474_v9  ;;  %v7177_v0 = vld [vmem:[#allocation10] ss:$0 sm:$0xff] }
 0x4e1   : > { %v4713_v26 = vpack.c.bf16 %v4617_v38, %v4617_v38  ;;  %7226 = vmatprep.subr.bf16.mxu1 %v7225_v62  ;;  %v7243_v46 = vpack.c.bf16 %v6459_v45, %v6458_v61  ;;  %v7245_v12 = vpack.c.bf16 %v6477_v21, %v6476_v33  ;;  %v7247_v3 = vpack.c.bf16 %v6461_v13, %v6460_v1 }
 0x4e2   : > { %v4725_v57 = vpack.c.bf16 %v4629_v28, %v4629_v28  ;;  %v4921_v19 = vlaneseq }
 0x4e3   : > { %v5109_v35 = vunpack.c.l.b16 %v4713_v26 }
 0x4e4   : > { %v5121_v31 = vunpack.c.l.b16 %v4725_v57  ;;  %7228 = vmatpush3.bf16.msra.mxu1 %v7227_v50  ;;  %v4922_v34 = vshrl.u32 %v4921_v19, 7 }
 0x4e5   : > { %v5205_v23 = vsel %vm5133_vm5, %v5109_v35, %v5204_v60  ;;  %7230 = vmatprep.subr.bf16.mxu1 %v7229_v37 }
 0x4e6   : > { %v5206_v25 = vsel %vm5135_vm6, %v5121_v31, %v5205_v23  ;;  %v4923_v63 = vsub.s32 0, %v4922_v34  ;;  %v4927_v16 = vsub.s32 1, %v4922_v34 }
 0x4e7   : > { %v5224_v36 = vpack.c.b16 %v5206_v25, %v5206_v25 }
 0x4e8   : > { %7232 = vmatpush3.bf16.msra.mxu1 %v7231_v24  ;;  %v4924_v41 = vrot.slane %v4919_v56, %v4923_v63  ;;  %v4928_v2 = vrot.slane %v4919_v56, %v4927_v16 }
 0x4e9   : > { %6436 = vmatmul.mubr.bf16.vlgmr.msra.gmra.mrb[0].mxu0 %v5224_v36  ;;  %7234 = vmatprep.subr.bf16.mxu1 %v7233_v4 }
 0x4ec   : > { %7236 = vmatpush3.bf16.msra.mxu1 %v7235_v44 }
 0x4ed   : > { %7238 = vmatprep.subr.bf16.mxu1 %v7237_v20 }
 0x4f0   : > { %7240 = vmatpush3.bf16.msra.mxu1 %v7239_v39 }
 0x4f1   : > { %7242 = vmatprep.subr.bf16.mxu1 %v7241_v43 }
 0x4f4   : > { %7244 = vmatpush3.bf16.msra.mxu1 %v7243_v46 }
 0x4f5   : > { %7246 = vmatprep.subr.bf16.mxu1 %v7245_v12 }
 0x4f8   : > { %7248 = vmatpush3.bf16.msra.mxu1 %v7247_v3 }
 0x566   : > { %v6314_v51 = vpop.f32.mrb[0].mxu1 }
 0x567   : > { %v6316_v48 = vpop.f32.mrb[1].mxu1  ;;  %v7249_v8 = vadd.f32 %v6314_v51, %v4924_v41 }
 0x568   : > { %v6318_v22 = vpop.f32.mrb[2].mxu1  ;;  %v7251_v55 = vadd.f32 %v6316_v48, %v4928_v2 }
 0x569   : > { %v6319_v7 = vpop.f32.mrb[3].mxu1 }
 0x5bc   : > { %v6437_v32 = vpop.f32.mrb[0].mxu0 }
 0x5bd   : > { %v7250_v52 = vadd.f32 %v7249_v8, %v6437_v32  ;;  %v6439_v29 = vpop.f32.mrb[1].mxu0 }
 0x5be   : > { %v7252_v15 = vadd.f32 %v7251_v55, %v6439_v29  ;;  %v6441_v30 = vpop.f32.mrb[2].mxu0 }
 0x5bf   : > { %v6442_v62 = vpop.f32.mrb[3].mxu0  ;;  %v6444_v54 = vmax.f32 %v7250_v52, 0.0 }
 0x5c0   : > { %v6445_v17 = vmax.f32 %v7252_v15, 0.0 }
 0x5c2   : > { %6549 = vmatprep.mubr.f32.mxu1 %v6445_v17 }
 0x5c3   : > { %6550 = vmatmul.mubr.f32.vlgmr.msra.gmra.mrb[4].mxu1 %v6444_v54 }
 0x696   : > { %v7214_v38 = vpop.f32.mrb[4].mxu1 }
 0x697   : > { %v7215_v18 = vpop.f32.mrb[5].mxu1 }
 0x698   : > { %v7216_v59 = vadd.f32 %v7215_v18, %v7214_v38 }
 0x69a   : > { %v6552_v28 = vadd.f32 %v7216_v59, %v7177_v0 }
 0x69c   : > { %6555 = vst [vmem:[%s297_s7] sm:$0xff] %v6552_v28 }
 0x69d   : > { %7806 = shalt.err (!%p7803_p12)
}
 0x69e   : > { %s7807_s16 = scalar_lea.hbm %s11782_s17, 128  ;;  %s7811_s28 = scalar_lea.hbm %s11830_s5, 512 }
 0x69f   : > { %p7808_p9 = scmp.ne.s32.totalorder %s11782_s17, %s7807_s16  ;;  %p7812_p6 = scmp.lt.u32.totalorder %s11782_s17, %s11830_s5 }
 0x6a0   : > { %p7813_p4 = scmp.lt.u32.totalorder %s7811_s28, %s7807_s16  ;;  %p7815_p3 = scmp.lt.u32.totalorder %s7807_s16, %s11782_s17 }
 0x6a1   : > { %p7809_p13 = pnand %p7808_p9, %p8067_p0 }
 0x6a2   : > { %p7814_p8 = por %p7813_p4, %p7812_p6 }
 0x6a3   : > { %p7810_p10 = pneg %p7809_p13 }
 0x6a4   : > { %p7816_p5 = por %p7815_p3, %p7814_p8 }
 0x6a6   : > { %p7817_p7 = pnand %p7816_p5, %p7810_p10 }
 0x6a8   : > { %7820 = shalt.err (!%p7817_p7)
}
 0x6a9   : > { %7290 = dma.vmem_to_hbm [thread:$0]  (%p8067_p0), %s11784_s11, 128, %s11782_s17, %s6557_s30  }
 0x6aa PF: > { %p7322_p11 = scmp.ge.s32.totalorder %s7867_s21, 2  ;;  %s6582_s26 = sand.u32 1, %s7855_s18  }
 0x6ab   : > { %p13204_p2 = scmp.ne.s32.totalorder %s12159_s25, 0  ;;  %s6583_s7 = scalar_lea.sflag [#allocation4], %s6582_s26 }
 0x6ad   : > { %p7310_p1 = pnand %p7322_p11, %p13204_p2 }
 0x6af   : > { %7850 = dma.done.wait (!%p7310_p1), %s6583_s7, 128  }
 0x6b0   : > { %7852 = vsyncadd (!%p7310_p1), %s6583_s7, 4294967168  ;;  %p20_p12 = scmp.ge.s32.totalorder %s8057_s14, 6   ;;  %s13205_s18 = smov %s7859_s19 }
 0x6b1   : > { %s13206_s19 = smov %s7863_s20  ;;  %s13207_s20 = smov %s8073_s27 }
 0x6b2   : > { %s13208_s21 = smov %s8057_s14  ;;  %22 = sbr.rel (!%p20_p12) target bundleno = 7 (0x7), region = 105 }
 0x6b9   :  { %6588 = vsyncpa [#allocation3], 1 }
 0x6ba   :  { %6590 = vsyncpa [#allocation3 + $0x1], 1 }
 0x6bb   :  { %6591 = vsyncpa [#allocation6], 1 }
 0x6bc   :  { %6592 = vsyncpa [#allocation9], 1 }
 0x6bd   :  { %6593 = vsyncpa [#allocation4], 1 }
 0x6be   :  { %6595 = vsyncpa [#allocation4 + $0x1], 1 }

</bundles_post_ra>
